<compile_context>
chip_gen: v6e
topology: v6e:2x2x1
jax: 0.10.0
libtpu: 0.0.40
codegen_flags: <defaults>
</compile_context>

<pallas_src>
import functools

import jax
import jax.numpy as jnp
from jax.experimental import pallas as pl
from jax.experimental.pallas import tpu as pltpu

C1 = 256    # conv1 / conv2 output channels
C3 = 80     # conv3 output channels (logical)
C3P = 128   # conv3 output channels padded to a full lane
HIGH = jax.lax.Precision.HIGHEST   # reference only


def _round_up(n, m):
    return ((n + m - 1) // m) * m


def _single_branch_kernel(x_ref, w1_ref, b1_ref, w2_ref, b2_ref, w3_ref, b3_ref, o_ref):
    # x_ref : (Bblk, Wp, 2)   f32   width on sublanes, I/Q pair on the (2-wide) lane axis
    # w1_ref: (3, 256)        f32   [kw, c_out]                 (conv1, C_in == 1)
    # w2_ref: (768, 256)      bf16  [kw*256 + c_in, c_out]      (K-fused conv2)
    # w3_ref: (1536, 128)     bf16  [(kh*3+kw)*256 + c_in, co]  (K-fused conv3, co padded)
    # b*_ref: (1, C)          f32
    # o_ref : (Bblk*P3, 128)  f32   row = local_b * P3 + w
    x = x_ref[...]
    Bblk = x.shape[0]
    Wp = x.shape[1]
    P1 = Wp - 2      # conv1 rows kept per example
    P2 = Wp - 4      # conv2 rows kept per example (multiple of 8)
    P3 = Wp - 12     # conv3 rows kept per example (multiple of 8)

    w1 = w1_ref[...]           # (3, 256)
    b1 = b1_ref[...]           # (1, 256)
    b2 = b2_ref[...]           # (1, 256)
    b3 = b3_ref[...]           # (1, 128)

    # ---- conv1: Conv2d(1, 256, (1, 3)) + ReLU.  C_in == 1 -> VPU broadcast-mul (f32). ----
    rows1 = []
    for h in range(2):
        acc = x[:, 0:P1, h:h + 1] * w1[0][None, None, :]
        acc = acc + x[:, 1:1 + P1, h:h + 1] * w1[1][None, None, :]
        acc = acc + x[:, 2:2 + P1, h:h + 1] * w1[2][None, None, :]
        rows1.append(jnp.maximum(acc + b1[None], 0.0))            # (Bblk, P1, 256) f32

    # ---- conv2: Conv2d(256, 256, (1, 3)) + ReLU.  K-fused im2col -> one MXU matmul/row. ----
    rows2 = []
    for h in range(2):
        lhs = jnp.concatenate(
            [rows1[h][:, kw:kw + P2, :] for kw in range(3)], axis=-1)      # (Bblk, P2, 768)
        lhs = lhs.reshape(Bblk * P2, 3 * C1).astype(jnp.bfloat16)          # aligned merge
        y = jnp.dot(lhs, w2_ref[...], preferred_element_type=jnp.float32)  # (Bblk*P2, 256)
        y = jnp.maximum(y + b2, 0.0)
        rows2.append(y.reshape(Bblk, P2, C1))                              # aligned split

    # ---- conv3: Conv2d(256, 80->128pad, (2, 3)) + ReLU.  6-tap K-fused matmul. ----
    lhs3 = jnp.concatenate(
        [rows2[h][:, kw:kw + P3, :] for h in range(2) for kw in range(3)],
        axis=-1)                                                           # (Bblk, P3, 1536)
    lhs3 = lhs3.reshape(Bblk * P3, 6 * C1).astype(jnp.bfloat16)            # aligned merge
    y3 = jnp.dot(lhs3, w3_ref[...], preferred_element_type=jnp.float32)    # (Bblk*P3, 128)
    o_ref[...] = jnp.maximum(y3 + b3, 0.0)


@functools.partial(jax.jit, static_argnames=("block_b",))
def single_branch_forward(x, w1, b1, w2, b2, w3, b3, *, block_b=8):
    """x: (B, 1, 2, W) float32 (PyTorch NCHW). Weights in PyTorch OIHW layout."""
    B, _, _, W = x.shape
    if W < 7:
        raise ValueError("SingleBranch needs W >= 7 (three valid width-3 convs)")
    W3 = W - 6
    P3 = _round_up(W3, 8)          # conv3 rows kept per example
    P2 = P3 + 8                    # conv2 rows kept (>= W-4, multiple of 8)
    P1 = P2 + 2                    # conv1 rows kept
    Wp = P1 + 2                    # zero-padded input width

    Bblk = block_b
    Bpad = _round_up(B, Bblk)

    # Input prep: drop C_in=1 axis, put W on sublanes / the I-Q pair on lanes, zero-pad.
    xk = jnp.transpose(x[:, 0], (0, 2, 1))                          # (B, W, 2)
    xk = jnp.pad(xk, ((0, Bpad - B), (0, Wp - W), (0, 0)))          # (Bpad, Wp, 2)

    # Weight prep: PyTorch OIHW -> K-fused [taps*C_in, C_out]; MXU operands pre-cast to bf16.
    w1p = jnp.transpose(w1[:, 0, 0, :], (1, 0))                                 # (3, 256) f32
    b1p = b1.reshape(1, C1)
    w2p = jnp.transpose(w2[:, :, 0, :], (2, 1, 0)).reshape(3 * C1, C1)
    w2p = w2p.astype(jnp.bfloat16)                                              # (768, 256)
    b2p = b2.reshape(1, C1)
    w3p = jnp.transpose(w3, (2, 3, 1, 0)).reshape(6 * C1, C3)
    w3p = jnp.pad(w3p, ((0, 0), (0, C3P - C3))).astype(jnp.bfloat16)            # (1536, 128)
    b3p = jnp.pad(b3, ((0, C3P - C3),)).reshape(1, C3P)

    out = pl.pallas_call(
        _single_branch_kernel,
        out_shape=jax.ShapeDtypeStruct((Bpad * P3, C3P), jnp.float32),
        grid_spec=pltpu.PrefetchScalarGridSpec(
            num_scalar_prefetch=0,
            grid=(Bpad // Bblk,),
            in_specs=[
                pl.BlockSpec((Bblk, Wp, 2), lambda i: (i, 0, 0)),
                pl.BlockSpec((3, C1), lambda i: (0, 0)),
                pl.BlockSpec((1, C1), lambda i: (0, 0)),
                pl.BlockSpec((3 * C1, C1), lambda i: (0, 0)),
                pl.BlockSpec((1, C1), lambda i: (0, 0)),
                pl.BlockSpec((6 * C1, C3P), lambda i: (0, 0)),
                pl.BlockSpec((1, C3P), lambda i: (0, 0)),
            ],
            out_specs=pl.BlockSpec((Bblk * P3, C3P), lambda i: (i, 0)),
        ),
        compiler_params=pltpu.CompilerParams(
            dimension_semantics=("parallel",)),
    )(xk, w1p, b1p, w2p, b2p, w3p, b3p)

    # (Bpad*P3, 128) -> valid (B, W3, 80) -> PyTorch channel-major flatten (reshape(B, -1)).
    out = out.reshape(Bpad, P3, C3P)[:B, :W3, :C3]
    return jnp.transpose(out, (0, 2, 1)).reshape(B, -1)


def _ref_forward(x, w1, b1, w2, b2, w3, b3):
    """Pure-JAX reference using lax.conv (NCHW / OIHW); eval-mode dropout == identity."""
    dn = ("NCHW", "OIHW", "NCHW")
    y = jax.lax.conv_general_dilated(x, w1, (1, 1), "VALID",
                                     dimension_numbers=dn, precision=HIGH)
    y = jnp.maximum(y + b1[None, :, None, None], 0.0)
    y = jax.lax.conv_general_dilated(y, w2, (1, 1), "VALID",
                                     dimension_numbers=dn, precision=HIGH)
    y = jnp.maximum(y + b2[None, :, None, None], 0.0)
    y = jax.lax.conv_general_dilated(y, w3, (1, 1), "VALID",
                                     dimension_numbers=dn, precision=HIGH)
    y = jnp.maximum(y + b3[None, :, None, None], 0.0)
    return y.reshape(y.shape[0], -1)


def _xavier_uniform(key, shape):
    # shape = (O, I, kh, kw); PyTorch xavier_uniform fan over the receptive field.
    fan_in = shape[1] * shape[2] * shape[3]
    fan_out = shape[0] * shape[2] * shape[3]
    lim = (6.0 / (fan_in + fan_out)) ** 0.5
    return jax.random.uniform(key, shape, jnp.float32, -lim, lim)


if __name__ == "__main__":
    key = jax.random.PRNGKey(0)
    ks = jax.random.split(key, 7)

    B, W = 12, 16                                   # input: (B, 1, 2, W) I/Q frames
    x = jax.random.normal(ks[0], (B, 1, 2, W), jnp.float32)

    w1 = _xavier_uniform(ks[1], (C1, 1, 1, 3))
    b1 = 0.1 * jax.random.normal(ks[2], (C1,), jnp.float32)
    w2 = _xavier_uniform(ks[3], (C1, C1, 1, 3))
    b2 = 0.1 * jax.random.normal(ks[4], (C1,), jnp.float32)
    w3 = _xavier_uniform(ks[5], (C3, C1, 2, 3))
    b3 = 0.1 * jax.random.normal(ks[6], (C3,), jnp.float32)

    out = single_branch_forward(x, w1, b1, w2, b2, w3, b3)
    out = jax.block_until_ready(out)

    ref = _ref_forward(x, w1, b1, w2, b2, w3, b3)
    assert out.shape == (B, C3 * (W - 6)), out.shape
    max_err = float(jnp.max(jnp.abs(out - ref)))
    assert jnp.allclose(out, ref, atol=1e-2, rtol=1e-2), max_err

    print("KERNEL_OK")
</pallas_src>

<mosaic_0001>
module attributes {stable_mosaic.version = 11 : i64} {
  func.func @_single_branch_kernel(%arg0: i32, %arg1: memref<8x28x2xf32, #tpu.memory_space<vmem>>, %arg2: memref<3x256xf32, #tpu.memory_space<vmem>>, %arg3: memref<1x256xf32, #tpu.memory_space<vmem>>, %arg4: memref<768x256xbf16, #tpu.memory_space<vmem>>, %arg5: memref<1x256xf32, #tpu.memory_space<vmem>>, %arg6: memref<1536x128xbf16, #tpu.memory_space<vmem>>, %arg7: memref<1x128xf32, #tpu.memory_space<vmem>>, %arg8: memref<128x128xf32, #tpu.memory_space<vmem>>) attributes {dimension_semantics = [#tpu.dimension_semantics<parallel>], iteration_bounds = array<i64: 2>, scalar_prefetch = 0 : i64, scratch_operands = 0 : i64, tpu.core_type = #tpu.core_type<tc>, window_params = [{transform_indices = @transform_0, window_bounds = array<i64: 8, 28, 2>}, {pipeline_mode = #tpu.pipeline_mode<synchronous>, transform_indices = @transform_1, window_bounds = array<i64: 3, 256>}, {pipeline_mode = #tpu.pipeline_mode<synchronous>, transform_indices = @transform_2, window_bounds = array<i64: 1, 256>}, {pipeline_mode = #tpu.pipeline_mode<synchronous>, transform_indices = @transform_3, window_bounds = array<i64: 768, 256>}, {pipeline_mode = #tpu.pipeline_mode<synchronous>, transform_indices = @transform_4, window_bounds = array<i64: 1, 256>}, {pipeline_mode = #tpu.pipeline_mode<synchronous>, transform_indices = @transform_5, window_bounds = array<i64: 1536, 128>}, {pipeline_mode = #tpu.pipeline_mode<synchronous>, transform_indices = @transform_6, window_bounds = array<i64: 1, 128>}, {transform_indices = @transform_7, window_bounds = array<i64: 128, 128>}]} {
    %c0 = arith.constant 0 : index
    %c0_0 = arith.constant 0 : index
    %c0_1 = arith.constant 0 : index
    %0 = vector.load %arg1[%c0, %c0_0, %c0_1] : memref<8x28x2xf32, #tpu.memory_space<vmem>>, vector<8x28x2xf32>
    %c0_2 = arith.constant 0 : index
    %c0_3 = arith.constant 0 : index
    %1 = vector.load %arg2[%c0_2, %c0_3] : memref<3x256xf32, #tpu.memory_space<vmem>>, vector<3x256xf32>
    %c0_4 = arith.constant 0 : index
    %c0_5 = arith.constant 0 : index
    %2 = vector.load %arg3[%c0_4, %c0_5] : memref<1x256xf32, #tpu.memory_space<vmem>>, vector<1x256xf32>
    %c0_6 = arith.constant 0 : index
    %c0_7 = arith.constant 0 : index
    %3 = vector.load %arg5[%c0_6, %c0_7] : memref<1x256xf32, #tpu.memory_space<vmem>>, vector<1x256xf32>
    %c0_8 = arith.constant 0 : index
    %c0_9 = arith.constant 0 : index
    %4 = vector.load %arg7[%c0_8, %c0_9] : memref<1x128xf32, #tpu.memory_space<vmem>>, vector<1x128xf32>
    %5 = vector.extract_strided_slice %0 {offsets = [0, 0, 0], sizes = [8, 26, 1], strides = [1, 1, 1]} : vector<8x28x2xf32> to vector<8x26x1xf32>
    %6 = vector.extract_strided_slice %1 {offsets = [0, 0], sizes = [1, 256], strides = [1, 1]} : vector<3x256xf32> to vector<1x256xf32>
    %7 = vector.shape_cast %6 : vector<1x256xf32> to vector<256xf32>
    %8 = vector.shape_cast %7 : vector<256xf32> to vector<1x1x256xf32>
    %9 = vector.broadcast %5 : vector<8x26x1xf32> to vector<8x26x256xf32>
    %10 = vector.broadcast %8 : vector<1x1x256xf32> to vector<8x26x256xf32>
    %11 = arith.mulf %9, %10 : vector<8x26x256xf32>
    %12 = vector.extract_strided_slice %0 {offsets = [0, 1, 0], sizes = [8, 26, 1], strides = [1, 1, 1]} : vector<8x28x2xf32> to vector<8x26x1xf32>
    %13 = vector.extract_strided_slice %1 {offsets = [1, 0], sizes = [1, 256], strides = [1, 1]} : vector<3x256xf32> to vector<1x256xf32>
    %14 = vector.shape_cast %13 : vector<1x256xf32> to vector<256xf32>
    %15 = vector.shape_cast %14 : vector<256xf32> to vector<1x1x256xf32>
    %16 = vector.broadcast %12 : vector<8x26x1xf32> to vector<8x26x256xf32>
    %17 = vector.broadcast %15 : vector<1x1x256xf32> to vector<8x26x256xf32>
    %18 = arith.mulf %16, %17 : vector<8x26x256xf32>
    %19 = arith.addf %11, %18 : vector<8x26x256xf32>
    %20 = vector.extract_strided_slice %0 {offsets = [0, 2, 0], sizes = [8, 26, 1], strides = [1, 1, 1]} : vector<8x28x2xf32> to vector<8x26x1xf32>
    %21 = vector.extract_strided_slice %1 {offsets = [2, 0], sizes = [1, 256], strides = [1, 1]} : vector<3x256xf32> to vector<1x256xf32>
    %22 = vector.shape_cast %21 : vector<1x256xf32> to vector<256xf32>
    %23 = vector.shape_cast %22 : vector<256xf32> to vector<1x1x256xf32>
    %24 = vector.broadcast %20 : vector<8x26x1xf32> to vector<8x26x256xf32>
    %25 = vector.broadcast %23 : vector<1x1x256xf32> to vector<8x26x256xf32>
    %26 = arith.mulf %24, %25 : vector<8x26x256xf32>
    %27 = arith.addf %19, %26 : vector<8x26x256xf32>
    %28 = vector.shape_cast %2 : vector<1x256xf32> to vector<1x1x256xf32>
    %29 = vector.broadcast %28 : vector<1x1x256xf32> to vector<8x26x256xf32>
    %30 = arith.addf %27, %29 : vector<8x26x256xf32>
    %cst = arith.constant 0.000000e+00 : f32
    %31 = vector.broadcast %cst : f32 to vector<8x26x256xf32>
    %32 = arith.maximumf %30, %31 : vector<8x26x256xf32>
    %33 = vector.extract_strided_slice %0 {offsets = [0, 0, 1], sizes = [8, 26, 1], strides = [1, 1, 1]} : vector<8x28x2xf32> to vector<8x26x1xf32>
    %34 = vector.extract_strided_slice %1 {offsets = [0, 0], sizes = [1, 256], strides = [1, 1]} : vector<3x256xf32> to vector<1x256xf32>
    %35 = vector.shape_cast %34 : vector<1x256xf32> to vector<256xf32>
    %36 = vector.shape_cast %35 : vector<256xf32> to vector<1x1x256xf32>
    %37 = vector.broadcast %33 : vector<8x26x1xf32> to vector<8x26x256xf32>
    %38 = vector.broadcast %36 : vector<1x1x256xf32> to vector<8x26x256xf32>
    %39 = arith.mulf %37, %38 : vector<8x26x256xf32>
    %40 = vector.extract_strided_slice %0 {offsets = [0, 1, 1], sizes = [8, 26, 1], strides = [1, 1, 1]} : vector<8x28x2xf32> to vector<8x26x1xf32>
    %41 = vector.extract_strided_slice %1 {offsets = [1, 0], sizes = [1, 256], strides = [1, 1]} : vector<3x256xf32> to vector<1x256xf32>
    %42 = vector.shape_cast %41 : vector<1x256xf32> to vector<256xf32>
    %43 = vector.shape_cast %42 : vector<256xf32> to vector<1x1x256xf32>
    %44 = vector.broadcast %40 : vector<8x26x1xf32> to vector<8x26x256xf32>
    %45 = vector.broadcast %43 : vector<1x1x256xf32> to vector<8x26x256xf32>
    %46 = arith.mulf %44, %45 : vector<8x26x256xf32>
    %47 = arith.addf %39, %46 : vector<8x26x256xf32>
    %48 = vector.extract_strided_slice %0 {offsets = [0, 2, 1], sizes = [8, 26, 1], strides = [1, 1, 1]} : vector<8x28x2xf32> to vector<8x26x1xf32>
    %49 = vector.extract_strided_slice %1 {offsets = [2, 0], sizes = [1, 256], strides = [1, 1]} : vector<3x256xf32> to vector<1x256xf32>
    %50 = vector.shape_cast %49 : vector<1x256xf32> to vector<256xf32>
    %51 = vector.shape_cast %50 : vector<256xf32> to vector<1x1x256xf32>
    %52 = vector.broadcast %48 : vector<8x26x1xf32> to vector<8x26x256xf32>
    %53 = vector.broadcast %51 : vector<1x1x256xf32> to vector<8x26x256xf32>
    %54 = arith.mulf %52, %53 : vector<8x26x256xf32>
    %55 = arith.addf %47, %54 : vector<8x26x256xf32>
    %56 = vector.shape_cast %2 : vector<1x256xf32> to vector<1x1x256xf32>
    %57 = vector.broadcast %56 : vector<1x1x256xf32> to vector<8x26x256xf32>
    %58 = arith.addf %55, %57 : vector<8x26x256xf32>
    %cst_10 = arith.constant 0.000000e+00 : f32
    %59 = vector.broadcast %cst_10 : f32 to vector<8x26x256xf32>
    %60 = arith.maximumf %58, %59 : vector<8x26x256xf32>
    %61 = vector.extract_strided_slice %32 {offsets = [0, 0, 0], sizes = [8, 24, 256], strides = [1, 1, 1]} : vector<8x26x256xf32> to vector<8x24x256xf32>
    %62 = vector.extract_strided_slice %32 {offsets = [0, 1, 0], sizes = [8, 24, 256], strides = [1, 1, 1]} : vector<8x26x256xf32> to vector<8x24x256xf32>
    %63 = vector.extract_strided_slice %32 {offsets = [0, 2, 0], sizes = [8, 24, 256], strides = [1, 1, 1]} : vector<8x26x256xf32> to vector<8x24x256xf32>
    %64 = tpu.concatenate %61, %62, %63 in 2 : vector<8x24x256xf32>, vector<8x24x256xf32>, vector<8x24x256xf32> -> vector<8x24x768xf32>
    %65 = vector.shape_cast %64 : vector<8x24x768xf32> to vector<192x768xf32>
    %66 = arith.truncf %65 : vector<192x768xf32> to vector<192x768xbf16>
    %c0_11 = arith.constant 0 : index
    %c0_12 = arith.constant 0 : index
    %67 = vector.load %arg4[%c0_11, %c0_12] : memref<768x256xbf16, #tpu.memory_space<vmem>>, vector<768x256xbf16>
    %cst_13 = arith.constant dense<0.000000e+00> : vector<192x256xf32>
    %68 = tpu.matmul %66, %67, %cst_13 {dimension_numbers = #tpu.dot_dimension_numbers<[1], [0], [0], [1], [0, 0, 1, 1], [], []>} : vector<192x768xbf16>, vector<768x256xbf16>, vector<192x256xf32> -> vector<192x256xf32>
    %69 = vector.broadcast %3 : vector<1x256xf32> to vector<192x256xf32>
    %70 = arith.addf %68, %69 : vector<192x256xf32>
    %cst_14 = arith.constant 0.000000e+00 : f32
    %71 = vector.broadcast %cst_14 : f32 to vector<192x256xf32>
    %72 = arith.maximumf %70, %71 : vector<192x256xf32>
    %73 = vector.shape_cast %72 : vector<192x256xf32> to vector<8x24x256xf32>
    %74 = vector.extract_strided_slice %60 {offsets = [0, 0, 0], sizes = [8, 24, 256], strides = [1, 1, 1]} : vector<8x26x256xf32> to vector<8x24x256xf32>
    %75 = vector.extract_strided_slice %60 {offsets = [0, 1, 0], sizes = [8, 24, 256], strides = [1, 1, 1]} : vector<8x26x256xf32> to vector<8x24x256xf32>
    %76 = vector.extract_strided_slice %60 {offsets = [0, 2, 0], sizes = [8, 24, 256], strides = [1, 1, 1]} : vector<8x26x256xf32> to vector<8x24x256xf32>
    %77 = tpu.concatenate %74, %75, %76 in 2 : vector<8x24x256xf32>, vector<8x24x256xf32>, vector<8x24x256xf32> -> vector<8x24x768xf32>
    %78 = vector.shape_cast %77 : vector<8x24x768xf32> to vector<192x768xf32>
    %79 = arith.truncf %78 : vector<192x768xf32> to vector<192x768xbf16>
    %c0_15 = arith.constant 0 : index
    %c0_16 = arith.constant 0 : index
    %80 = vector.load %arg4[%c0_15, %c0_16] : memref<768x256xbf16, #tpu.memory_space<vmem>>, vector<768x256xbf16>
    %cst_17 = arith.constant dense<0.000000e+00> : vector<192x256xf32>
    %81 = tpu.matmul %79, %80, %cst_17 {dimension_numbers = #tpu.dot_dimension_numbers<[1], [0], [0], [1], [0, 0, 1, 1], [], []>} : vector<192x768xbf16>, vector<768x256xbf16>, vector<192x256xf32> -> vector<192x256xf32>
    %82 = vector.broadcast %3 : vector<1x256xf32> to vector<192x256xf32>
    %83 = arith.addf %81, %82 : vector<192x256xf32>
    %cst_18 = arith.constant 0.000000e+00 : f32
    %84 = vector.broadcast %cst_18 : f32 to vector<192x256xf32>
    %85 = arith.maximumf %83, %84 : vector<192x256xf32>
    %86 = vector.shape_cast %85 : vector<192x256xf32> to vector<8x24x256xf32>
    %87 = vector.extract_strided_slice %73 {offsets = [0, 0, 0], sizes = [8, 16, 256], strides = [1, 1, 1]} : vector<8x24x256xf32> to vector<8x16x256xf32>
    %88 = vector.extract_strided_slice %73 {offsets = [0, 1, 0], sizes = [8, 16, 256], strides = [1, 1, 1]} : vector<8x24x256xf32> to vector<8x16x256xf32>
    %89 = vector.extract_strided_slice %73 {offsets = [0, 2, 0], sizes = [8, 16, 256], strides = [1, 1, 1]} : vector<8x24x256xf32> to vector<8x16x256xf32>
    %90 = vector.extract_strided_slice %86 {offsets = [0, 0, 0], sizes = [8, 16, 256], strides = [1, 1, 1]} : vector<8x24x256xf32> to vector<8x16x256xf32>
    %91 = vector.extract_strided_slice %86 {offsets = [0, 1, 0], sizes = [8, 16, 256], strides = [1, 1, 1]} : vector<8x24x256xf32> to vector<8x16x256xf32>
    %92 = vector.extract_strided_slice %86 {offsets = [0, 2, 0], sizes = [8, 16, 256], strides = [1, 1, 1]} : vector<8x24x256xf32> to vector<8x16x256xf32>
    %93 = tpu.concatenate %87, %88, %89, %90, %91, %92 in 2 : vector<8x16x256xf32>, vector<8x16x256xf32>, vector<8x16x256xf32>, vector<8x16x256xf32>, vector<8x16x256xf32>, vector<8x16x256xf32> -> vector<8x16x1536xf32>
    %94 = vector.shape_cast %93 : vector<8x16x1536xf32> to vector<128x1536xf32>
    %95 = arith.truncf %94 : vector<128x1536xf32> to vector<128x1536xbf16>
    %c0_19 = arith.constant 0 : index
    %c0_20 = arith.constant 0 : index
    %96 = vector.load %arg6[%c0_19, %c0_20] : memref<1536x128xbf16, #tpu.memory_space<vmem>>, vector<1536x128xbf16>
    %cst_21 = arith.constant dense<0.000000e+00> : vector<128x128xf32>
    %97 = tpu.matmul %95, %96, %cst_21 {dimension_numbers = #tpu.dot_dimension_numbers<[1], [0], [0], [1], [0, 0, 1, 1], [], []>} : vector<128x1536xbf16>, vector<1536x128xbf16>, vector<128x128xf32> -> vector<128x128xf32>
    %98 = vector.broadcast %4 : vector<1x128xf32> to vector<128x128xf32>
    %99 = arith.addf %97, %98 : vector<128x128xf32>
    %cst_22 = arith.constant 0.000000e+00 : f32
    %100 = vector.broadcast %cst_22 : f32 to vector<128x128xf32>
    %101 = arith.maximumf %99, %100 : vector<128x128xf32>
    %c0_23 = arith.constant 0 : index
    %c0_24 = arith.constant 0 : index
    %102 = vector.load %arg8[%c0_23, %c0_24] : memref<128x128xf32, #tpu.memory_space<vmem>>, vector<128x128xf32>
    tpu.vector_store %arg8[%c0_23, %c0_24], %101 {strides = array<i32>} : memref<128x128xf32, #tpu.memory_space<vmem>>, vector<128x128xf32>,
    return
  }
  func.func @transform_0(%arg0: i32) -> (i32, i32, i32) {
    %c0_i32 = arith.constant 0 : i32
    %c0_i32_0 = arith.constant 0 : i32
    %c0_i32_1 = arith.constant 0 : i32
    return %arg0, %c0_i32, %c0_i32_0 : i32, i32, i32
  }
  func.func @transform_1(%arg0: i32) -> (i32, i32) {
    %c0_i32 = arith.constant 0 : i32
    %c0_i32_0 = arith.constant 0 : i32
    %c0_i32_1 = arith.constant 0 : i32
    return %c0_i32, %c0_i32_0 : i32, i32
  }
  func.func @transform_2(%arg0: i32) -> (i32, i32) {
    %c0_i32 = arith.constant 0 : i32
    %c0_i32_0 = arith.constant 0 : i32
    %c0_i32_1 = arith.constant 0 : i32
    return %c0_i32, %c0_i32_0 : i32, i32
  }
  func.func @transform_3(%arg0: i32) -> (i32, i32) {
    %c0_i32 = arith.constant 0 : i32
    %c0_i32_0 = arith.constant 0 : i32
    %c0_i32_1 = arith.constant 0 : i32
    return %c0_i32, %c0_i32_0 : i32, i32
  }
  func.func @transform_4(%arg0: i32) -> (i32, i32) {
    %c0_i32 = arith.constant 0 : i32
    %c0_i32_0 = arith.constant 0 : i32
    %c0_i32_1 = arith.constant 0 : i32
    return %c0_i32, %c0_i32_0 : i32, i32
  }
  func.func @transform_5(%arg0: i32) -> (i32, i32) {
    %c0_i32 = arith.constant 0 : i32
    %c0_i32_0 = arith.constant 0 : i32
    %c0_i32_1 = arith.constant 0 : i32
    return %c0_i32, %c0_i32_0 : i32, i32
  }
  func.func @transform_6(%arg0: i32) -> (i32, i32) {
    %c0_i32 = arith.constant 0 : i32
    %c0_i32_0 = arith.constant 0 : i32
    %c0_i32_1 = arith.constant 0 : i32
    return %c0_i32, %c0_i32_0 : i32, i32
  }
  func.func @transform_7(%arg0: i32) -> (i32, i32) {
    %c0_i32 = arith.constant 0 : i32
    %c0_i32_0 = arith.constant 0 : i32
    return %arg0, %c0_i32 : i32, i32
  }
}

</mosaic_0001>

<bundles_post_ra>
// kernel: single_branch_forward.1
= control target key start
LH: loop header
LB: loop body
LE: loop exit
PB: predicated region body
PF: predicated region fallthrough
CT: control target
= control target key end

     0   :  { %s8120_s24 = smov 0   ;;  %s14772_s0 = inlined_call_operand.vmem [shape: f32[16,28,2], index: 0, kind: input, shape index: {}]   ;;  %s14773_s1 = inlined_call_operand.vmem [shape: f32[3,256], index: 1, kind: input, shape index: {}]   ;;  %s14774_s2 = inlined_call_operand.vmem [shape: f32[1,256], index: 2, kind: input, shape index: {}]   ;;  %s14775_s3 = inlined_call_operand.vmem [shape: bf16[768,256], index: 3, kind: input, shape index: {}]   ;;  %s14776_s4 = inlined_call_operand.vmem [shape: f32[1,256], index: 4, kind: input, shape index: {}]   ;;  %s14777_s5 = inlined_call_operand.vmem [shape: bf16[1536,128], index: 5, kind: input, shape index: {}]   ;;  %s14778_s6 = inlined_call_operand.vmem [shape: f32[1,128], index: 6, kind: input, shape index: {}]   ;;  %s14779_s7 = inlined_call_operand.vmem [shape: f32[256,128], index: 7, kind: output, shape index: {}]  }
   0x1 LB: > { %s7131_s25 = sadd.s32 4294967295, %s8076_s24   ;;  %p7135_p0 = scmp.ge.s32.totalorder %s8076_s24, 1  ;;  %s8076_s24 = sphi %s8120_s24, %s17_s24  }
   0x2   : > { %p239_p1 = scmp.lt.s32.totalorder %s8076_s24, 3 }
   0x4   : > { %p240_p2 = pnand %p7135_p0, %p239_p1 }
   0x6   : > { %243 = sbr.rel (%p240_p2) target bundleno = 1197 (0x4ad), region = 48 }
   0xb   : > { %s7136_s26 = sshll.u32 %s7131_s25, 3  ;;  %v8078_v0 = vmov 0   ;;  %v8133_v1 = vld [vmem:[%s14775_s3 + $0x74] ss:$8 sps:$4 sm:$0xff]   ;;  %v7737_v2 = vld [vmem:[%s14775_s3 + $0x70] ss:$8 sps:$4 sm:$0xff]  }
   0xc   : > { %7732 = vset.pattern.permute.xlu1 %v8078_v0  ;;  %7731 = vset.pattern.permute.xlu0 %v8078_v0  ;;  %p273_p3 = scmp.lt.s32.totalorder %s7136_s26, 15  ;;  %v7738_v3 = vld [vmem:[%s14775_s3 + $0x174] ss:$8 sps:$4 sm:$0xff]   ;;  %v7740_v4 = vld [vmem:[%s14775_s3 + $0x170] ss:$8 sps:$4 sm:$0xff]   ;;  %vm711_vm0 = vcmask 1046528  }
   0xd   : > { %3577 = vmatprep.subr.bf16.mxu0 %v8133_v1  ;;  %v7741_v5 = vld [vmem:[%s14775_s3 + $0x64] ss:$8 sps:$4 sm:$0xff]   ;;  %v7743_v6 = vld [vmem:[%s14775_s3 + $0x60] ss:$8 sps:$4 sm:$0xff]   ;;  %3730 = vmatprep.subr.bf16.mxu1 %v7738_v3  ;;  %v7747_v9 = vld [vmem:[%s14775_s3 + $0x54] ss:$8 sps:$4 sm:$0xff]  }
   0xe   : > { %s16716_s26 = smov (!%p273_p3, %s7136_s26), 15  ;;  %3578 = vmatpush1.bf16.msra.mxu0 %v7737_v2  ;;  %v7744_v7 = vld [vmem:[%s14775_s3 + $0x164] ss:$8 sps:$4 sm:$0xff]   ;;  %3731 = vmatpush1.bf16.msra.mxu1 %v7740_v4  ;;  %v7746_v8 = vld [vmem:[%s14775_s3 + $0x160] ss:$8 sps:$4 sm:$0xff]   ;;  %vm1098_vm1 = vcmask 1045504  }
   0xf   : > { %s7336_s18 = sshll.u32 %s16716_s26, 5  ;;  %3579 = vmatprep.subr.bf16.mxu0 %v7741_v5  ;;  %3732 = vmatprep.subr.bf16.mxu1 %v7744_v7  ;;  %v7749_v14 = vld [vmem:[%s14775_s3 + $0x50] ss:$8 sps:$4 sm:$0xff]   ;;  %v7750_v19 = vld [vmem:[%s14775_s3 + $0x154] ss:$8 sps:$4 sm:$0xff]   ;;  %s7139_s30 = sshll.u32 %s7131_s25, 4 }
  0x10   : > { %s8160_s23 = scalar_lea.vmem %s14772_s0, %s7336_s18  ;;  %v7752_v20 = vld [vmem:[%s14775_s3 + $0x150] ss:$8 sps:$4 sm:$0xff]   ;;  %v7753_v23 = vld [vmem:[%s14775_s3 + $0x44] ss:$8 sps:$4 sm:$0xff]   ;;  %v7755_v24 = vld [vmem:[%s14775_s3 + $0x40] ss:$8 sps:$4 sm:$0xff]  }
  0x11   : > { %v8166_v10 = vld [vmem:[%s8160_s23 + $0x10] sm:$0xff]  ;;  %v8169_v11 = vld [vmem:[%s8160_s23] sm:$0xff]  ;;  %v8174_v12 = vld [vmem:[%s8160_s23 + $0x18] sm:$0xf]  ;;  %p280_p4 = scmp.lt.s32.totalorder %s7139_s30, 31 }
  0x12   : > { %334 = vperm.xlu1 %7732, %v8166_v10   ;;  %324 = vperm.xlu0 %7731, %v8169_v11   ;;  %v8177_v13 = vld [vmem:[%s8160_s23 + $0x8] sm:$0xff]  ;;  %v8188_v16 = vld [vmem:[%s8160_s23 + $0x20] sm:$0xff]  ;;  %v8193_v17 = vld [vmem:[%s8160_s23 + $0x38] sm:$0xf] }
  0x13   : > { %3580 = vmatpush1.bf16.msra.mxu0 %v7743_v6  ;;  %3733 = vmatpush1.bf16.msra.mxu1 %v7746_v8  ;;  %v8185_v15 = vld [vmem:[%s8160_s23 + $0x28] sm:$0xff]  ;;  %v8196_v18 = vld [vmem:[%s8160_s23 + $0x30] sm:$0xff]  ;;  %v8208_v22 = vld [vmem:[%s8160_s23 + $0x40] sm:$0xff]  ;;  %s16718_s30 = smov (!%p280_p4, %s7139_s30), 31 }
  0x14   : > { %3581 = vmatprep.subr.bf16.mxu0 %v7747_v9  ;;  %v8205_v21 = vld [vmem:[%s8160_s23 + $0x48] sm:$0xff]  ;;  %3734 = vmatprep.subr.bf16.mxu1 %v7750_v19  ;;  %v7759_v27 = vld [vmem:[%s14775_s3 + $0x34] ss:$8 sps:$4 sm:$0xff]   ;;  %v7761_v28 = vld [vmem:[%s14775_s3 + $0x30] ss:$8 sps:$4 sm:$0xff]   ;;  %s7140_s25 = sshll.u32 %s16718_s30, 3 }
  0x15   : > { %v7756_v25 = vld [vmem:[%s14775_s3 + $0x144] ss:$8 sps:$4 sm:$0xff]   ;;  %v7758_v26 = vld [vmem:[%s14775_s3 + $0x140] ss:$8 sps:$4 sm:$0xff]   ;;  %v8231_v29 = vld [vmem:[%s8160_s23 + $0x58] sm:$0xf]  ;;  %s14664_s10 = scalar_lea.vmem %s14779_s7, %s7140_s25 }
  0x16   : > { %339 = vperm.xlu1 %7732, %v8174_v12   ;;  %329 = vperm.xlu0 %7731, %v8177_v13   ;;  %v7762_v30 = vld [vmem:[%s14775_s3 + $0x134] ss:$8 sps:$4 sm:$0xff]   ;;  %v7765_v31 = vld [vmem:[%s14775_s3 + $0x24] ss:$8 sps:$4 sm:$0xff]   ;;  %v7764_v33 = vld [vmem:[%s14775_s3 + $0x130] ss:$8 sps:$4 sm:$0xff]  }
  0x17   : > { %3582 = vmatpush1.bf16.msra.mxu0 %v7749_v14  ;;  %3735 = vmatpush1.bf16.msra.mxu1 %v7752_v20  ;;  %v8242_v32 = vld [vmem:[%s8160_s23 + $0x50] sm:$0xff]  ;;  %v7767_v34 = vld [vmem:[%s14775_s3 + $0x20] ss:$8 sps:$4 sm:$0xff]   ;;  %v7768_v35 = vld [vmem:[%s14775_s3 + $0x124] ss:$8 sps:$4 sm:$0xff]  }
  0x18   : > { %3583 = vmatprep.subr.bf16.mxu0 %v7753_v23  ;;  %3736 = vmatprep.subr.bf16.mxu1 %v7756_v25  ;;  %v7771_v36 = vld [vmem:[%s14775_s3 + $0x14] ss:$8 sps:$4 sm:$0xff]   ;;  %v8259_v37 = vld [vmem:[%s8160_s23 + $0x68] sm:$0xff]  ;;  %v8262_v38 = vld [vmem:[%s8160_s23 + $0x60] sm:$0xff] }
  0x19   : > { %v7770_v39 = vld [vmem:[%s14775_s3 + $0x120] ss:$8 sps:$4 sm:$0xff]   ;;  %v7773_v40 = vld [vmem:[%s14775_s3 + $0x10] ss:$8 sps:$4 sm:$0xff]   ;;  %v7774_v41 = vld [vmem:[%s14775_s3 + $0x114] ss:$8 sps:$4 sm:$0xff]  }
  0x1a   : > { %349 = vperm.xlu1 %7732, %v8185_v15   ;;  %344 = vperm.xlu0 %7731, %v8188_v16   ;;  %v7777_v42 = vld [vmem:[%s14775_s3 + $0x4] ss:$8 sps:$4 sm:$0xff]   ;;  %v8279_v43 = vld [vmem:[%s8160_s23 + $0x78] sm:$0xf]  ;;  %v8282_v44 = vld [vmem:[%s8160_s23 + $0x70] sm:$0xff] }
  0x1b   : > { %3584 = vmatpush1.bf16.msra.mxu0 %v7755_v24  ;;  %3737 = vmatpush1.bf16.msra.mxu1 %v7758_v26  ;;  %v7776_v45 = vld [vmem:[%s14775_s3 + $0x110] ss:$8 sps:$4 sm:$0xff]   ;;  %v7779_v46 = vld [vmem:[%s14775_s3] ss:$8 sps:$4 sm:$0xff]   ;;  %v7780_v47 = vld [vmem:[%s14775_s3 + $0x104] ss:$8 sps:$4 sm:$0xff]  }
  0x1c   : > { %3585 = vmatprep.subr.bf16.mxu0 %v7759_v27  ;;  %3738 = vmatprep.subr.bf16.mxu1 %v7762_v30  ;;  %v7783_v48 = vld [vmem:[%s14775_s3 + $0xf4] ss:$8 sps:$4 sm:$0xff]   ;;  %v8299_v49 = vld [vmem:[%s8160_s23 + $0x88] sm:$0xff]  ;;  %v8302_v50 = vld [vmem:[%s8160_s23 + $0x80] sm:$0xff] }
  0x1d   : > { %v7782_v51 = vld [vmem:[%s14775_s3 + $0x100] ss:$8 sps:$4 sm:$0xff]   ;;  %v7785_v52 = vld [vmem:[%s14775_s3 + $0xf0] ss:$8 sps:$4 sm:$0xff]   ;;  %v7786_v53 = vld [vmem:[%s14775_s3 + $0x1f4] ss:$8 sps:$4 sm:$0xff]  }
  0x1e   : > { %359 = vperm.xlu1 %7732, %v8193_v17   ;;  %354 = vperm.xlu0 %7731, %v8196_v18   ;;  %v7789_v54 = vld [vmem:[%s14775_s3 + $0xe4] ss:$8 sps:$4 sm:$0xff]   ;;  %v8319_v55 = vld [vmem:[%s8160_s23 + $0x98] sm:$0xf]  ;;  %v8322_v56 = vld [vmem:[%s8160_s23 + $0x90] sm:$0xff] }
  0x1f   : > { %3586 = vmatpush1.bf16.msra.mxu0 %v7761_v28  ;;  %3739 = vmatpush1.bf16.msra.mxu1 %v7764_v33  ;;  %v7788_v57 = vld [vmem:[%s14775_s3 + $0x1f0] ss:$8 sps:$4 sm:$0xff]   ;;  %v7791_v58 = vld [vmem:[%s14775_s3 + $0xe0] ss:$8 sps:$4 sm:$0xff]   ;;  %v7792_v59 = vld [vmem:[%s14775_s3 + $0x1e4] ss:$8 sps:$4 sm:$0xff]  }
  0x20   : > { %3587 = vmatprep.subr.bf16.mxu0 %v7765_v31  ;;  %3740 = vmatprep.subr.bf16.mxu1 %v7768_v35  ;;  %v7795_v60 = vld [vmem:[%s14775_s3 + $0xd4] ss:$8 sps:$4 sm:$0xff]   ;;  %v8339_v61 = vld [vmem:[%s8160_s23 + $0xa8] sm:$0xff]  ;;  %v8342_v62 = vld [vmem:[%s8160_s23 + $0xa0] sm:$0xff] }
  0x21   : > { %v7794_v63 = vld [vmem:[%s14775_s3 + $0x1e0] ss:$8 sps:$4 sm:$0xff]   ;;  %v7797_v0 = vld [vmem:[%s14775_s3 + $0xd0] ss:$8 sps:$4 sm:$0xff]   ;;  %v7798_v2 = vld [vmem:[%s14775_s3 + $0x1d4] ss:$8 sps:$4 sm:$0xff]  }
  0x22   : > { %369 = vperm.xlu1 %7732, %v8205_v21   ;;  %364 = vperm.xlu0 %7731, %v8208_v22   ;;  %v7801_v3 = vld [vmem:[%s14775_s3 + $0xc4] ss:$8 sps:$4 sm:$0xff]   ;;  %v8359_v4 = vld [vmem:[%s8160_s23 + $0xb8] sm:$0xf]  ;;  %v8362_v5 = vld [vmem:[%s8160_s23 + $0xb0] sm:$0xff] }
  0x23   : > { %3588 = vmatpush1.bf16.msra.mxu0 %v7767_v34  ;;  %3741 = vmatpush1.bf16.msra.mxu1 %v7770_v39  ;;  %v7800_v6 = vld [vmem:[%s14775_s3 + $0x1d0] ss:$8 sps:$4 sm:$0xff]   ;;  %v7803_v7 = vld [vmem:[%s14775_s3 + $0xc0] ss:$8 sps:$4 sm:$0xff]   ;;  %v7804_v8 = vld [vmem:[%s14775_s3 + $0x1c4] ss:$8 sps:$4 sm:$0xff]  }
  0x24   : > { %3589 = vmatprep.subr.bf16.mxu0 %v7771_v36  ;;  %3742 = vmatprep.subr.bf16.mxu1 %v7774_v41  ;;  %v7807_v9 = vld [vmem:[%s14775_s3 + $0xb4] ss:$8 sps:$4 sm:$0xff]   ;;  %v8379_v14 = vld [vmem:[%s8160_s23 + $0xc8] sm:$0xff]  ;;  %v8382_v19 = vld [vmem:[%s8160_s23 + $0xc0] sm:$0xff] }
  0x25   : > { %v7806_v20 = vld [vmem:[%s14775_s3 + $0x1c0] ss:$8 sps:$4 sm:$0xff]   ;;  %v7809_v23 = vld [vmem:[%s14775_s3 + $0xb0] ss:$8 sps:$4 sm:$0xff]   ;;  %v7810_v24 = vld [vmem:[%s14775_s3 + $0x1b4] ss:$8 sps:$4 sm:$0xff]  }
  0x26   : > { %379 = vperm.xlu1 %7732, %v8231_v29   ;;  %374 = vperm.xlu0 %7731, %v8242_v32   ;;  %v8394_v25 = vld [vmem:[%s8160_s23 + $0xd8] sm:$0xf]  ;;  %v8397_v26 = vld [vmem:[%s8160_s23 + $0xd0] sm:$0xff]  ;;  %v7813_v27 = vld [vmem:[%s14775_s3 + $0xa4] ss:$8 sps:$4 sm:$0xff]  }
  0x27   : > { %3590 = vmatpush1.bf16.msra.mxu0 %v7773_v40  ;;  %3743 = vmatpush1.bf16.msra.mxu1 %v7776_v45  ;;  %v7812_v28 = vld [vmem:[%s14775_s3 + $0x1b0] ss:$8 sps:$4 sm:$0xff]   ;;  %v7815_v30 = vld [vmem:[%s14775_s3 + $0xa0] ss:$8 sps:$4 sm:$0xff]   ;;  %v7816_v31 = vld [vmem:[%s14775_s3 + $0x1a4] ss:$8 sps:$4 sm:$0xff]  }
  0x28   : > { %3591 = vmatprep.subr.bf16.mxu0 %v7777_v42  ;;  %3744 = vmatprep.subr.bf16.mxu1 %v7780_v47  ;;  %v7819_v33 = vld [vmem:[%s14775_s3 + $0x94] ss:$8 sps:$4 sm:$0xff]   ;;  %v8417_v34 = vld [vmem:[%s8160_s23 + $0xe8] sm:$0xff]  ;;  %v8420_v35 = vld [vmem:[%s8160_s23 + $0xe0] sm:$0xff] }
  0x29   : > { %v7818_v36 = vld [vmem:[%s14775_s3 + $0x1a0] ss:$8 sps:$4 sm:$0xff]   ;;  %v7821_v39 = vld [vmem:[%s14775_s3 + $0x90] ss:$8 sps:$4 sm:$0xff]   ;;  %v7822_v40 = vld [vmem:[%s14775_s3 + $0x194] ss:$8 sps:$4 sm:$0xff]  }
  0x2a   : > { %389 = vperm.xlu1 %7732, %v8259_v37   ;;  %384 = vperm.xlu0 %7731, %v8262_v38   ;;  %v7825_v41 = vld [vmem:[%s14775_s3 + $0x84] ss:$8 sps:$4 sm:$0xff]   ;;  %v8437_v42 = vld [vmem:[%s8160_s23 + $0xf8] sm:$0xf]  ;;  %v8440_v45 = vld [vmem:[%s8160_s23 + $0xf0] sm:$0xff] }
  0x2b   : > { %3592 = vmatpush1.bf16.msra.mxu0 %v7779_v46  ;;  %3745 = vmatpush1.bf16.msra.mxu1 %v7782_v51  ;;  %v7824_v46 = vld [vmem:[%s14775_s3 + $0x190] ss:$8 sps:$4 sm:$0xff]   ;;  %v7827_v47 = vld [vmem:[%s14775_s3 + $0x80] ss:$8 sps:$4 sm:$0xff]   ;;  %v7833_v51 = vld [vmem:[%s14775_s3 + $0x274] ss:$8 sps:$4 sm:$0xff]  }
  0x2c   : > { %3593 = vmatprep.subr.bf16.mxu0 %v7783_v48  ;;  %3746 = vmatprep.subr.bf16.mxu1 %v7786_v53  ;;  %v7828_v48 = vld [vmem:[%s14775_s3 + $0x184] ss:$8 sps:$4 sm:$0xff]   ;;  %v8079_v53 = vmov 1  }
  0x2e   : > { %399 = vperm.xlu1 %7732, %v8279_v43   ;;  %394 = vperm.xlu0 %7731, %v8282_v44  }
  0x2f   : > { %3594 = vmatpush2.bf16.msra.mxu0 %v7785_v52  ;;  %3747 = vmatpush2.bf16.msra.mxu1 %v7788_v57  ;;  %v7830_v52 = vld [vmem:[%s14775_s3 + $0x180] ss:$8 sps:$4 sm:$0xff]  }
  0x30   : > { %3595 = vmatprep.subr.bf16.mxu0 %v7789_v54  ;;  %3748 = vmatprep.subr.bf16.mxu1 %v7792_v59  ;;  %v483_v54 = vlaneseq }
  0x32   : > { %409 = vperm.xlu1 %7732, %v8299_v49   ;;  %404 = vperm.xlu0 %7731, %v8302_v50  }
  0x33   : > { %3596 = vmatpush2.bf16.msra.mxu0 %v7791_v58  ;;  %3749 = vmatpush2.bf16.msra.mxu1 %v7794_v63  ;;  %v319_v58 = vld [vmem:[%s14774_s2] sm:$0x3] }
  0x34   : > { %3597 = vmatprep.subr.bf16.mxu0 %v7795_v60  ;;  %3750 = vmatprep.subr.bf16.mxu1 %v7798_v2 }
  0x36   : > { %419 = vperm.xlu1 %7732, %v8319_v55   ;;  %414 = vperm.xlu0 %7731, %v8322_v56  }
  0x37   : > { %3598 = vmatpush2.bf16.msra.mxu0 %v7797_v0  ;;  %3751 = vmatpush2.bf16.msra.mxu1 %v7800_v6 }
  0x38   : > { %3599 = vmatprep.subr.bf16.mxu0 %v7801_v3  ;;  %3752 = vmatprep.subr.bf16.mxu1 %v7804_v8 }
  0x3a   : > { %429 = vperm.xlu1 %7732, %v8339_v61   ;;  %424 = vperm.xlu0 %7731, %v8342_v62  }
  0x3b   : > { %3600 = vmatpush2.bf16.msra.mxu0 %v7803_v7  ;;  %3753 = vmatpush2.bf16.msra.mxu1 %v7806_v20 }
  0x3c   : > { %3601 = vmatprep.subr.bf16.mxu0 %v7807_v9  ;;  %3754 = vmatprep.subr.bf16.mxu1 %v7810_v24 }
  0x3e   : > { %439 = vperm.xlu1 %7732, %v8359_v4   ;;  %434 = vperm.xlu0 %7731, %v8362_v5  }
  0x3f   : > { %3602 = vmatpush2.bf16.msra.mxu0 %v7809_v23  ;;  %3755 = vmatpush2.bf16.msra.mxu1 %v7812_v28 }
  0x40   : > { %3603 = vmatprep.subr.bf16.mxu0 %v7813_v27  ;;  %3756 = vmatprep.subr.bf16.mxu1 %v7816_v31 }
  0x42   : > { %449 = vperm.xlu1 %7732, %v8379_v14   ;;  %444 = vperm.xlu0 %7731, %v8382_v19  }
  0x43   : > { %3604 = vmatpush2.bf16.msra.mxu0 %v7815_v30  ;;  %3757 = vmatpush2.bf16.msra.mxu1 %v7818_v36 }
  0x44   : > { %3605 = vmatprep.subr.bf16.mxu0 %v7819_v33  ;;  %3758 = vmatprep.subr.bf16.mxu1 %v7822_v40 }
  0x46   : > { %459 = vperm.xlu1 %7732, %v8394_v25   ;;  %454 = vperm.xlu0 %7731, %v8397_v26  }
  0x47   : > { %3606 = vmatpush2.bf16.msra.mxu0 %v7821_v39  ;;  %3759 = vmatpush2.bf16.msra.mxu1 %v7824_v46 }
  0x48   : > { %3607 = vmatprep.subr.bf16.mxu0 %v7825_v41  ;;  %3760 = vmatprep.subr.bf16.mxu1 %v7828_v48 }
  0x4a   : > { %469 = vperm.xlu1 %7732, %v8417_v34   ;;  %464 = vperm.xlu0 %7731, %v8420_v35  }
  0x4b   : > { %3608 = vmatpush2.bf16.msra.mxu0 %v7827_v47  ;;  %3761 = vmatpush2.bf16.msra.mxu1 %v7830_v52 }
  0x4c   : > { %3883 = vmatprep.subr.bf16.mxu0 %v7833_v51  ;;  %4540 = vmatprep.subr.bf16.mxu1 %v8133_v1 }
  0x4e   : > { %479 = vperm.xlu1 %7732, %v8437_v42   ;;  %474 = vperm.xlu0 %7731, %v8440_v45  }
  0x52   : > { %7734 = vset.pattern.permute.xlu1 %v8079_v53  ;;  %7733 = vset.pattern.permute.xlu0 %v8079_v53 }
  0x53   : > { %1483 = vperm.xlu1 %7734, %v8177_v13   ;;  %1479 = vperm.xlu0 %7733, %v8169_v11   ;;  %v484_v11 = vshrl.u32 %v483_v54, 7 }
  0x55   : > { %v8478_v1 = vsub.s32 0, %v484_v11  ;;  %v571_v13 = vsub.s32 5, %v484_v11 }
  0x57   : > { %1487 = vperm.xlu1 %7734, %v8166_v10   ;;  %1491 = vperm.xlu0 %7733, %v8174_v12   ;;  %15206 = vst [vmem:[#allocation2_spill] sm:$0xff] %v8478_v1  ;;  %v489_v10 = vsub.s32 4, %v484_v11  ;;  %v8490_v12 = vsub.s32 1, %v484_v11  ;;  %v8537_v2 = vrot.slane %v319_v58, %v8478_v1 }
  0x59   : > { %15207 = vst [vmem:[#allocation3_spill] sm:$0xff] %v8490_v12  ;;  %v8540_v3 = vrot.slane %v319_v58, %v8490_v12 }
  0x5b   : > { %1495 = vperm.xlu1 %7734, %v8188_v16   ;;  %1499 = vperm.xlu0 %7733, %v8185_v15   ;;  %v954_v15 = vsub.s32 2, %v484_v11  ;;  %v958_v16 = vsub.s32 6, %v484_v11 }
  0x5f   : > { %1503 = vperm.xlu1 %7734, %v8196_v18   ;;  %1507 = vperm.xlu0 %7733, %v8193_v17   ;;  %v318_v17 = vld [vmem:[%s14773_s1] sm:$0x77] }
  0x63   : > { %1511 = vperm.xlu1 %7734, %v8208_v22   ;;  %1515 = vperm.xlu0 %7733, %v8205_v21   ;;  %v568_v21 = vrot.slane %v318_v17, %v8490_v12  ;;  %v572_v22 = vrot.slane %v318_v17, %v571_v13 }
  0x67   : > { %1519 = vperm.xlu1 %7734, %v8242_v32   ;;  %1523 = vperm.xlu0 %7733, %v8231_v29   ;;  %v955_v29 = vrot.slane %v318_v17, %v954_v15  ;;  %v486_v32 = vrot.slane %v318_v17, %v8478_v1 }
  0x6b   : > { %1527 = vperm.xlu1 %7734, %v8262_v38   ;;  %1531 = vperm.xlu0 %7733, %v8259_v37   ;;  %v959_v37 = vrot.slane %v318_v17, %v958_v16  ;;  %v490_v38 = vrot.slane %v318_v17, %v489_v10 }
  0x6d   : > { %v8516_v57 = vrot.slane %v959_v37, %v954_v15  ;;  %v8522_v59 = vrot.slane %v490_v38, %v8478_v1 }
  0x6f   : > { %1535 = vperm.xlu1 %7734, %v8282_v44   ;;  %1539 = vperm.xlu0 %7733, %v8279_v43   ;;  %v8506_v44 = vrot.slane %v568_v21, %v8490_v12  ;;  %15208 = vst [vmem:[#allocation4_spill] sm:$0xff] %v8522_v59 }
  0x73   : > { %1543 = vperm.xlu1 %7734, %v8302_v50   ;;  %1547 = vperm.xlu0 %7733, %v8299_v49   ;;  %v8509_v49 = vrot.slane %v572_v22, %v8490_v12  ;;  %v8511_v50 = vrot.slane %v955_v29, %v954_v15 }
  0x77   : > { %1551 = vperm.xlu1 %7734, %v8322_v56   ;;  %1555 = vperm.xlu0 %7733, %v8319_v55   ;;  %v8514_v56 = vrot.slane %v486_v32, %v8478_v1 }
  0x7b   : > { %1559 = vperm.xlu1 %7734, %v8342_v62   ;;  %1563 = vperm.xlu0 %7733, %v8339_v61  }
  0x7f   : > { %1567 = vperm.xlu1 %7734, %v8362_v5   ;;  %1571 = vperm.xlu0 %7733, %v8359_v4  }
  0x83   : > { %1575 = vperm.xlu1 %7734, %v8382_v19   ;;  %1579 = vperm.xlu0 %7733, %v8379_v14  }
  0x87   : > { %1583 = vperm.xlu1 %7734, %v8397_v26   ;;  %1587 = vperm.xlu0 %7733, %v8394_v25  }
  0x8b   : > { %1591 = vperm.xlu1 %7734, %v8420_v35   ;;  %1595 = vperm.xlu0 %7733, %v8417_v34  }
  0x8d   : > { %v335_v18 = vpop.permute.xlu1 %334  ;;  %v8503_v43 = vpop.permute.xlu0 %324 }
  0x8e   : > { %v8525_v60 = vmul.f32 %v8506_v44, %v335_v18  ;;  %v8528_v61 = vmul.f32 %v8509_v49, %v335_v18  ;;  %v8532_v63 = vmul.f32 %v8511_v50, %v335_v18  ;;  %v505_v4 = vmul.f32 %v8514_v56, %v335_v18 }
  0x8f   : > { %1599 = vperm.xlu1 %7734, %v8440_v45   ;;  %1603 = vperm.xlu0 %7733, %v8437_v42   ;;  %v8544_v5 = vmul.f32 %v8516_v57, %v335_v18  ;;  %v8553_v8 = vmul.f32 %v8522_v59, %v335_v18  ;;  %v8557_v9 = vmul.f32 %v8506_v44, %v8503_v43 }
  0x90   : > { %v8561_v14 = vmul.f32 %v8509_v49, %v8503_v43  ;;  %v8565_v19 = vmul.f32 %v8511_v50, %v8503_v43  ;;  %v14783_v23 = vrot.slane %v8525_v60, 1  ;;  %v8571_v25 = vmul.f32 %v8514_v56, %v8503_v43 }
  0x91   : > { %v340_v55 = vpop.permute.xlu1 %339  ;;  %v8534_v0 = vpop.permute.xlu0 %329  ;;  %v14782_v27 = vrot.slane %v8532_v63, 2  ;;  %v8576_v28 = vmul.f32 %v8516_v57, %v8503_v43  ;;  %v502_v12 = vmul.f32 %v8522_v59, %v8503_v43  ;;  %v15224_v52 = vrot.slane %v8544_v5, 2 }
  0x92   : > { %v589_v62 = vmul.f32 %v8506_v44, %v340_v55  ;;  %v8547_v6 = vmul.f32 %v8509_v49, %v340_v55  ;;  %v8550_v7 = vmul.f32 %v8511_v50, %v340_v55  ;;  %v8579_v30 = vmul.f32 %v8516_v57, %v340_v55 }
  0x93   : > { %v8583_v31 = vmul.f32 %v8506_v44, %v8534_v0  ;;  %v8590_v36 = vmul.f32 %v8509_v49, %v8534_v0  ;;  %v715_v40 = vrot.slane %v8561_v14, 1  ;;  %v507_v42 = vmul.f32 %v8514_v56, %v340_v55 }
  0x94   : > { %15209 = vst [vmem:[#allocation5_spill] sm:$0xff] %v8550_v7  ;;  %v722_v26 = vrot.slane %v589_v62, 1  ;;  %v14781_v34 = vrot.slane %v8547_v6, 1  ;;  %v14780_v35 = vrot.slane %v8550_v7, 2  ;;  %v508_v46 = vmul.f32 %v8522_v59, %v340_v55 }
  0x95   : > { %v350_v20 = vpop.permute.xlu1 %349  ;;  %v345_v45 = vpop.permute.xlu0 %344  ;;  %v8602_v48 = vmul.f32 %v8511_v50, %v8534_v0  ;;  %v8606_v51 = vmul.f32 %v8516_v57, %v8534_v0  ;;  %v8612_v54 = vmul.f32 %v8514_v56, %v8534_v0  ;;  %v716_v17 = vrot.slane %v8590_v36, 1 }
  0x96   : > { %v723_v47 = vsel %vm711_vm0, %v14783_v23, %v722_v26  ;;  %v8615_v13 = vadd.f32 %v722_v26, %v507_v42  ;;  %v8619_v15 = vadd.f32 %v14781_v34, %v508_v46  ;;  %v8626_v16 = vsel %vm1098_vm1, %v14782_v27, %v14780_v35 }
  0x97   : > { %v8629_v18 = vadd.f32 %v723_v47, %v505_v4  ;;  %v8632_v21 = vmul.f32 %v8506_v44, %v350_v20  ;;  %v8635_v22 = vmul.f32 %v8509_v49, %v350_v20  ;;  %v8638_v29 = vmul.f32 %v8511_v50, %v350_v20 }
  0x98   : > { %v1103_v37 = vrot.slane %v8606_v51, 2  ;;  %v8643_v38 = vmul.f32 %v8516_v57, %v350_v20  ;;  %v511_v58 = vmul.f32 %v8514_v56, %v350_v20  ;;  %v8650_v62 = vmul.f32 %v8522_v59, %v350_v20 }
  0x99   : > { %v360_v10 = vpop.permute.xlu1 %359  ;;  %v8653_v4 = vmul.f32 %v8506_v44, %v345_v45  ;;  %v8656_v14 = vmul.f32 %v8509_v49, %v345_v45  ;;  %v355_v26 = vpop.permute.xlu0 %354  ;;  %v8659_v36 = vmul.f32 %v8514_v56, %v345_v45  ;;  %v8662_v42 = vmul.f32 %v8522_v59, %v345_v45 }
  0x9a   : > { %v8646_v55 = vmul.f32 %v8506_v44, %v360_v10  ;;  %v8665_v46 = vmul.f32 %v8511_v50, %v345_v45  ;;  %v8668_v47 = vmul.f32 %v8509_v49, %v360_v10  ;;  %v8674_v53 = vmul.f32 %v8516_v57, %v345_v45 }
  0x9b   : > { %v8679_v41 = vmul.f32 %v8511_v50, %v360_v10  ;;  %v8682_v32 = vmul.f32 %v8506_v44, %v355_v26  ;;  %v515_v51 = vmul.f32 %v8514_v56, %v360_v10  ;;  %v516_v35 = vmul.f32 %v8522_v59, %v360_v10 }
  0x9c   : > { %15210 = vst [vmem:[#allocation6_spill] sm:$0xff] %v8646_v55  ;;  %v14787_v27 = vrot.slane %v8646_v55, 1  ;;  %v8691_v11 = vmul.f32 %v8516_v57, %v360_v10  ;;  %v8694_v33 = vmul.f32 %v8509_v49, %v355_v26  ;;  %v8698_v23 = vmul.f32 %v8514_v56, %v355_v26 }
  0x9d   : > { %15211 = vst [vmem:[#allocation7_spill] sm:$0xff] %v8679_v41  ;;  %15212 = vst [vmem:[#allocation8_spill] sm:$0xff] %v8682_v32  ;;  %v8701_v39 = vmul.f32 %v8511_v50, %v355_v26  ;;  %v8704_v20 = vmul.f32 %v8516_v57, %v355_v26  ;;  %v370_v45 = vpop.permute.xlu1 %369  ;;  %v8712_v24 = vmul.f32 %v8522_v59, %v355_v26  ;;  %v15216_v7 = vrot.slane %v8528_v61, 1 }
  0x9e   : > { %15213 = vst [vmem:[#allocation9_spill] sm:$0xff] %v8698_v23  ;;  %v8708_v34 = vadd.f32 %v14787_v27, %v515_v51  ;;  %v504_v1 = vmul.f32 %v8522_v59, %v8534_v0  ;;  %v717_v23 = vsel %vm711_vm0, %v715_v40, %v716_v17  ;;  %v15217_v27 = vrot.slane %v8668_v47, 1 }
  0x9f   : > { %15214 = vst [vmem:[#allocation10_spill] sm:$0xff] %v8701_v39  ;;  %v721_v51 = vsel %vm711_vm0, %v716_v17, %v15216_v7  ;;  %v889_v40 = vadd.f32 %v717_v23, %v502_v12  ;;  %v15220_v55 = vrot.slane %v8682_v32, 1  ;;  %v15221_v7 = vrot.slane %v8632_v21, 1  ;;  %v365_v23 = vpop.permute.xlu0 %364 }
  0xa0   : > { %15215 = vst [vmem:[#allocation11_spill] sm:$0xff] %v8708_v34  ;;  %v8725_v10 = vadd.f32 %v15217_v27, %v516_v35  ;;  %v8730_v34 = vmul.f32 %v8514_v56, %v370_v45  ;;  %v891_v41 = vadd.f32 %v721_v51, %v504_v1  ;;  %v8740_v35 = vmul.f32 %v8506_v44, %v370_v45 }
  0xa1   : > { %v733_v27 = vsel %vm711_vm0, %v15221_v7, %v15220_v55  ;;  %v15223_v17 = vrot.slane %v8576_v28, 2  ;;  %v1108_v43 = vsel %vm1098_vm1, %v1103_v37, %v15224_v52  ;;  %v8749_v12 = vmul.f32 %v8509_v49, %v370_v45 }
  0xa2   : > { %15218 = vst [vmem:[#allocation12_spill] sm:$0xff] %v8725_v10  ;;  %15219 = vst [vmem:[#allocation13_spill] sm:$0xff] %v8730_v34  ;;  %v8752_v1 = vmul.f32 %v8511_v50, %v370_v45  ;;  %v1278_v55 = vadd.f32 %v1108_v43, %v891_v41  ;;  %v8755_v7 = vmul.f32 %v8522_v59, %v370_v45  ;;  %v15230_v0 = vrot.slane %v8557_v9, 1 }
  0xa3   : > { %15222 = vst [vmem:[#allocation14_spill] sm:$0xff] %v8740_v35  ;;  %v1104_v26 = vsel %vm1098_vm1, %v15223_v17, %v1103_v37  ;;  %15225 = vst [vmem:[#allocation15_spill] sm:$0xff] %v8749_v12  ;;  %v8758_v28 = vmul.f32 %v8516_v57, %v370_v45  ;;  %v15229_v17 = vrot.slane %v8583_v31, 1  ;;  %v15231_v37 = vrot.slane %v8525_v60, 1 }
  0xa4   : > { %15226 = vst [vmem:[#allocation16_spill] sm:$0xff] %v8752_v1  ;;  %v1276_v51 = vadd.f32 %v1104_v26, %v889_v40  ;;  %15227 = vst [vmem:[#allocation17_spill] sm:$0xff] %v8755_v7  ;;  %v8770_v26 = vadd.f32 %v733_v27, %v511_v58  ;;  %v15233_v41 = vrot.slane %v8701_v39, 2  ;;  %v15234_v43 = vrot.slane %v8638_v29, 2  ;;  %v375_v1 = vpop.permute.xlu0 %374 }
  0xa5   : > { %15228 = vst [vmem:[#allocation18_spill] sm:$0xff] %v8758_v28  ;;  %v714_v52 = vsel %vm711_vm0, %v15230_v0, %v15229_v17  ;;  %v15232_v34 = vmov %v15229_v17  ;;  %v1353_v9 = vadd.f32 %v8540_v3, %v1278_v55  ;;  %v8783_v60 = vmul.f32 %v8514_v56, %v365_v23 }
  0xa6   : > { %v719_v32 = vsel %vm711_vm0, %v15232_v34, %v15231_v37  ;;  %v8777_v45 = vsel %vm1098_vm1, %v15234_v43, %v15233_v41  ;;  %v1351_v40 = vadd.f32 %v8540_v3, %v1276_v51  ;;  %v888_v31 = vadd.f32 %v714_v52, %v8571_v25 }
  0xa7   : > { %15235 = vst [vmem:[#allocation19_spill] sm:$0xff] %v8777_v45  ;;  %15236 = vst [vmem:[#allocation20_spill] sm:$0xff] %v8783_v60  ;;  %v890_v34 = vadd.f32 %v719_v32, %v8612_v54  ;;  %v8791_v37 = vmax.f32 %v1353_v9, 0.0  ;;  %v8795_v55 = vmul.f32 %v8522_v59, %v365_v23  ;;  %v8798_v41 = vmul.f32 %v8506_v44, %v365_v23  ;;  %v380_v54 = vpop.permute.xlu1 %379 }
  0xa8   : > { %v8789_v17 = vmax.f32 %v1351_v40, 0.0  ;;  %v8801_v25 = vmul.f32 %v8509_v49, %v365_v23  ;;  %v8804_v32 = vmul.f32 %v8511_v50, %v365_v23  ;;  %v15242_v43 = vrot.slane %v8602_v48, 2 }
  0xa9   : > { %15238 = vst [vmem:[#allocation22_spill] sm:$0xff] %v8791_v37  ;;  %15239 = vst [vmem:[#allocation23_spill] sm:$0xff] %v8795_v55  ;;  %v15243_v40 = vrot.slane %v8565_v19, 2  ;;  %v15244_v27 = vrot.slane %v8532_v63, 2  ;;  %v8819_v58 = vmul.f32 %v8516_v57, %v365_v23  ;;  %v15246_v28 = vrot.slane %v8547_v6, 1 }
  0xaa   : > { %15237 = vst [vmem:[#allocation21_spill] sm:$0xff] %v8789_v17  ;;  %15240 = vst [vmem:[#allocation24_spill] sm:$0xff] %v8798_v41  ;;  %v2919_v52 = vpack.c.bf16 %v8791_v37, %v8789_v17  ;;  %v15245_v0 = vmov %v15242_v43  ;;  %v15247_v7 = vrot.slane %v8528_v61, 1  ;;  %v8830_v63 = vmul.f32 %v8522_v59, %v380_v54 }
  0xab   : > { %15241 = vst [vmem:[#allocation25_spill] sm:$0xff] %v8801_v25  ;;  %v1101_v9 = vsel %vm1098_vm1, %v15243_v40, %v15242_v43  ;;  %v1106_v51 = vsel %vm1098_vm1, %v15245_v0, %v15244_v27  ;;  %v8827_v43 = vmul.f32 %v8514_v56, %v380_v54  ;;  %v8833_v48 = vmul.f32 %v8506_v44, %v380_v54  ;;  %v390_v10 = vpop.permute.xlu1 %389 }
  0xac   : > { %v1275_v60 = vadd.f32 %v1101_v9, %v888_v31  ;;  %v1277_v35 = vadd.f32 %v1106_v51, %v890_v34  ;;  %v725_v19 = vsel %vm711_vm0, %v15247_v7, %v15246_v28  ;;  %3609 = vmatprep.mubr.bf16.mxu0 %v2919_v52  ;;  %v8837_v0 = vmul.f32 %v8509_v49, %v380_v54  ;;  %v7836_v52 = vld [vmem:[%s14775_s3 + $0x264] ss:$8 sps:$4 sm:$0xff]  }
  0xad   : > { %v893_v23 = vadd.f32 %v725_v19, %v8553_v8  ;;  %v15248_v7 = vrot.slane %v8579_v30, 2  ;;  %v15249_v28 = vrot.slane %v8544_v5, 2  ;;  %v8848_v27 = vmul.f32 %v8506_v44, %v375_v1  ;;  %v7831_v5 = vld [vmem:[%s14775_s3 + $0x270] ss:$8 sps:$4 sm:$0xff]  }
  0xae   : > { %v1350_v6 = vadd.f32 %v8537_v2, %v1275_v60  ;;  %v1352_v61 = vadd.f32 %v8537_v2, %v1277_v35  ;;  %v8851_v8 = vmul.f32 %v8509_v49, %v375_v1  ;;  %v8855_v60 = vmul.f32 %v8511_v50, %v380_v54 }
  0xaf   : > { %v1112_v31 = vsel %vm1098_vm1, %v15249_v28, %v15248_v7  ;;  %15250 = vst [vmem:[#allocation26_spill] sm:$0xff] %v8848_v27  ;;  %v2601_v19 = vrot.slane %v8789_v17, 1  ;;  %v2602_v7 = vrot.slane %v8791_v37, 1  ;;  %v15256_v28 = vrot.slane %v8656_v14, 1  ;;  %v15315_v37 = vld [vmem:[#allocation6_spill] sm:$0xff] }
  0xb0   : > { %15251 = vst [vmem:[#allocation27_spill] sm:$0xff] %v8851_v8  ;;  %v1280_v51 = vadd.f32 %v1112_v31, %v893_v23  ;;  %15252 = vst [vmem:[#allocation28_spill] sm:$0xff] %v8855_v60  ;;  %v8857_v35 = vmax.f32 %v1350_v6, 0.0  ;;  %v8859_v40 = vmax.f32 %v1352_v61, 0.0  ;;  %v15255_v23 = vrot.slane %v8635_v22, 1 }
  0xb1   : > { %v750_v6 = vrot.slane %v8833_v48, 1  ;;  %v752_v61 = vrot.slane %v8837_v0, 1  ;;  %v8875_v34 = vmul.f32 %v8516_v57, %v380_v54  ;;  %v14804_v14 = vrot.slane %v8851_v8, 1 }
  0xb2   : > { %15253 = vst [vmem:[#allocation29_spill] sm:$0xff] %v8857_v35  ;;  %15254 = vst [vmem:[#allocation30_spill] sm:$0xff] %v8859_v40  ;;  %v1355_v9 = vadd.f32 %v8540_v3, %v1280_v51  ;;  %v731_v31 = vsel %vm711_vm0, %v15256_v28, %v15255_v23  ;;  %v2918_v51 = vpack.c.bf16 %v8859_v40, %v8857_v35  ;;  %v15258_v23 = vrot.slane %v8643_v38, 2 }
  0xb3   : > { %v897_v48 = vadd.f32 %v731_v31, %v8662_v42  ;;  %v8889_v54 = vmul.f32 %v8511_v50, %v375_v1  ;;  %v15259_v28 = vrot.slane %v8674_v53, 2  ;;  %v1279_v41 = vadd.f32 %v8626_v16, %v8629_v18  ;;  %v7839_v18 = vld [vmem:[%s14775_s3 + $0x254] ss:$8 sps:$4 sm:$0xff]  }
  0xb4   : > { %v8884_v55 = vmax.f32 %v1355_v9, 0.0  ;;  %3610 = vmatmul.mubr.bf16.vlgmr.msra.gmra.mxu0 %v2918_v51  ;;  %v8899_v9 = vmul.f32 %v8516_v57, %v375_v1  ;;  %v2603_v42 = vsel %vm711_vm0, %v2601_v19, %v2602_v7  ;;  %v7834_v51 = vld [vmem:[%s14775_s3 + $0x260] ss:$8 sps:$4 sm:$0xff]   ;;  %v521_v53 = vmul.f32 %v8514_v56, %v375_v1 }
  0xb5   : > { %v1118_v39 = vsel %vm1098_vm1, %v15259_v28, %v15258_v23  ;;  %3884 = vmatpush1.bf16.msra.mxu0 %v7831_v5  ;;  %v1354_v23 = vadd.f32 %v8537_v2, %v1279_v41  ;;  %v2598_v28 = vrot.slane %v8857_v35, 1  ;;  %v2599_v16 = vrot.slane %v8859_v40, 1  ;;  %v15290_v35 = vld [vmem:[#allocation12_spill] sm:$0xff] }
  0xb6   : > { %15257 = vst [vmem:[#allocation31_spill] sm:$0xff] %v8884_v55  ;;  %v2606_v31 = vrot.slane %v8884_v55, 1  ;;  %v1284_v0 = vadd.f32 %v1118_v39, %v897_v48  ;;  %3885 = vmatprep.subr.bf16.mxu0 %v7836_v52  ;;  %v15260_v5 = vrot.slane %v8848_v27, 1  ;;  %v753_v19 = vsel %vm711_vm0, %v14804_v14, %v752_v61 }
  0xb7   : > { %v522_v52 = vmul.f32 %v8522_v59, %v375_v1  ;;  %v14806_v25 = vrot.slane %v8889_v54, 2  ;;  %v8925_v45 = vmax.f32 %v1354_v23, 0.0  ;;  %v14807_v27 = vrot.slane %v8875_v34, 2 }
  0xb8   : > { %v751_v39 = vsel %vm711_vm0, %v15260_v5, %v750_v6  ;;  %v2607_v41 = vsel %vm711_vm0, %v2602_v7, %v2606_v31  ;;  %v1359_v48 = vadd.f32 %v8540_v3, %v1284_v0  ;;  %v14808_v14 = vrot.slane %v8899_v9, 2  ;;  %v7837_v7 = vld [vmem:[%s14775_s3 + $0x250] ss:$8 sps:$4 sm:$0xff]  }
  0xb9   : > { %v2921_v12 = vpack.c.bf16 %v2607_v41, %v2603_v42  ;;  %15261 = vst [vmem:[#allocation32_spill] sm:$0xff] %v8925_v45  ;;  %3886 = vmatpush1.bf16.msra.mxu0 %v7834_v51  ;;  %v908_v1 = vadd.f32 %v751_v39, %v521_v53  ;;  %v909_v0 = vadd.f32 %v753_v19, %v522_v52  ;;  %v14810_v23 = vrot.slane %v8925_v45, 1  ;;  %v7842_v41 = vld [vmem:[%s14775_s3 + $0x244] ss:$8 sps:$4 sm:$0xff]  }
  0xba   : > { %v8930_v8 = vmax.f32 %v1359_v48, 0.0  ;;  %v2600_v42 = vsel %vm711_vm0, %v2598_v28, %v2599_v16  ;;  %3887 = vmatprep.subr.bf16.mxu0 %v7839_v18  ;;  %v8942_v51 = vadd.f32 %v750_v6, %v8827_v43  ;;  %v8945_v5 = vmul.f32 %v8506_v44, %v390_v10  ;;  %v7840_v6 = vld [vmem:[%s14775_s3 + $0x240] ss:$8 sps:$4 sm:$0xff]  }
  0xbb   : > { %3762 = vmatprep.mubr.bf16.mxu1 %v2921_v12  ;;  %v8950_v53 = vadd.f32 %v752_v61, %v8830_v63  ;;  %v15263_v28 = vrot.slane %v8855_v60, 2  ;;  %v8958_v39 = vmul.f32 %v8509_v49, %v390_v10  ;;  %v2605_v43 = vsel %vm711_vm0, %v2599_v16, %v14810_v23  ;;  %v7854_v23 = vld [vmem:[%s14775_s3 + $0x204] ss:$8 sps:$4 sm:$0xff]  }
  0xbc   : > { %15262 = vst [vmem:[#allocation33_spill] sm:$0xff] %v8930_v8  ;;  %v2925_v12 = vpack.c.bf16 %v8930_v8, %v8884_v55  ;;  %v1140_v63 = vsel %vm1098_vm1, %v14808_v14, %v14807_v27  ;;  %v8970_v61 = vmul.f32 %v8511_v50, %v390_v10  ;;  %v2920_v19 = vpack.c.bf16 %v2605_v43, %v2600_v42  ;;  %v7976_v43 = vld [vmem:[%s14775_s3 + $0x64] ss:$8 sps:$4 sm:$0xff]  }
  0xbd   : > { %v1138_v18 = vsel %vm1098_vm1, %v14806_v25, %v15263_v28  ;;  %3888 = vmatpush1.bf16.msra.mxu0 %v7837_v7  ;;  %v8975_v25 = vadd.f32 %v1140_v63, %v909_v0  ;;  %v8978_v16 = vmul.f32 %v8514_v56, %v390_v10  ;;  %v8984_v27 = vmul.f32 %v8522_v59, %v390_v10  ;;  %v15284_v63 = vld [vmem:[#allocation19_spill] sm:$0xff] }
  0xbe   : > { %3619 = vmatprep.mubr.bf16.mxu0 %v2925_v12  ;;  %v8973_v28 = vadd.f32 %v1138_v18, %v908_v1  ;;  %3889 = vmatprep.subr.bf16.mxu0 %v7842_v41  ;;  %v8988_v7 = vmul.f32 %v8516_v57, %v390_v10  ;;  %v385_v1 = vpop.permute.xlu0 %384  ;;  %v15264_v0 = vrot.slane %v8632_v21, 1  ;;  %v15265_v12 = vrot.slane %v8653_v4, 1  ;;  %v7845_v41 = vld [vmem:[%s14775_s3 + $0x234] ss:$8 sps:$4 sm:$0xff]   ;;  %v7975_v10 = vld [vmem:[%s14775_s3 + $0x70] ss:$8 sps:$4 sm:$0xff]  }
  0xbf   : > { %3763 = vmatmul.mubr.bf16.vlgmr.msra.gmra.mxu1 %v2920_v19  ;;  %v15266_v21 = vrot.slane %v8694_v33, 1  ;;  %v15267_v4 = vrot.slane %v8635_v22, 1  ;;  %v15268_v14 = vrot.slane %v8668_v47, 1  ;;  %v9021_v22 = vmul.f32 %v8506_v44, %v385_v1  ;;  %v7843_v33 = vld [vmem:[%s14775_s3 + $0x230] ss:$8 sps:$4 sm:$0xff]  }
  0xc0   : > { %v728_v18 = vsel %vm711_vm0, %v15265_v12, %v15264_v0  ;;  %4541 = vmatpush1.bf16.msra.mxu1 %v7975_v10  ;;  %v15270_v12 = vrot.slane %v8638_v29, 2  ;;  %v15273_v48 = vrot.slane %v8643_v38, 2  ;;  %v7977_v38 = vld [vmem:[%s14775_s3 + $0x60] ss:$8 sps:$4 sm:$0xff]  }
  0xc1   : > { %v896_v19 = vadd.f32 %v728_v18, %v8659_v36  ;;  %v735_v0 = vsel %vm711_vm0, %v15267_v4, %v15266_v21  ;;  %4542 = vmatprep.subr.bf16.mxu1 %v7976_v43  ;;  %v15269_v10 = vmov %v15266_v21  ;;  %v9024_v21 = vmul.f32 %v8509_v49, %v385_v1  ;;  %3890 = vmatpush1.bf16.msra.mxu0 %v7840_v6 }
  0xc2   : > { %v739_v36 = vsel %vm711_vm0, %v15269_v10, %v15268_v14  ;;  %v899_v18 = vadd.f32 %v735_v0, %v8650_v62  ;;  %v9027_v4 = vmul.f32 %v8511_v50, %v385_v1  ;;  %v15271_v43 = vrot.slane %v8665_v46, 2  ;;  %3891 = vmatprep.subr.bf16.mxu0 %v7845_v41  ;;  %v7848_v46 = vld [vmem:[%s14775_s3 + $0x224] ss:$8 sps:$4 sm:$0xff]  }
  0xc3   : > { %v9038_v62 = vmul.f32 %v8516_v57, %v385_v1  ;;  %v901_v0 = vadd.f32 %v739_v36, %v8712_v24  ;;  %v15272_v10 = vrot.slane %v8704_v20, 2  ;;  %v9062_v36 = vmul.f32 %v8514_v56, %v385_v1 }
  0xc4   : > { %v1115_v47 = vsel %vm1098_vm1, %v15271_v43, %v15270_v12  ;;  %v15274_v12 = vrot.slane %v8691_v11, 2  ;;  %4543 = vmatpush1.bf16.msra.mxu1 %v7977_v38  ;;  %v2615_v6 = vrot.slane %v8930_v8, 1 }
  0xc5   : > { %v1283_v14 = vadd.f32 %v1115_v47, %v896_v19  ;;  %v1122_v29 = vsel %vm1098_vm1, %v15273_v48, %v15272_v10  ;;  %v15275_v43 = vmov %v15272_v10  ;;  %v15276_v48 = vrot.slane %v8579_v30, 2  ;;  %v400_v10 = vpop.permute.xlu1 %399  ;;  %3892 = vmatpush1.bf16.msra.mxu0 %v7843_v33  ;;  %v395_v33 = vpop.permute.xlu0 %394  ;;  %v7980_v30 = vld [vmem:[%s14775_s3 + $0x44] ss:$8 sps:$4 sm:$0xff]  }
  0xc6   : > { %v1126_v19 = vsel %vm1098_vm1, %v15275_v43, %v15274_v12  ;;  %v1286_v24 = vadd.f32 %v1122_v29, %v899_v18  ;;  %v9065_v47 = vmul.f32 %v8522_v59, %v385_v1  ;;  %v7978_v18 = vld [vmem:[%s14775_s3 + $0x54] ss:$8 sps:$4 sm:$0xff]   ;;  %v7846_v1 = vld [vmem:[%s14775_s3 + $0x220] ss:$8 sps:$4 sm:$0xff]   ;;  %3893 = vmatprep.subr.bf16.mxu0 %v7848_v46  ;;  %v9150_v8 = vmul.f32 %v8511_v50, %v400_v10 }
  0xc7   : > { %v1282_v41 = vadd.f32 %v15276_v48, %v8619_v15  ;;  %v1358_v20 = vadd.f32 %v8537_v2, %v1283_v14  ;;  %v1288_v12 = vadd.f32 %v1126_v19, %v901_v0  ;;  %4544 = vmatprep.subr.bf16.mxu1 %v7978_v18  ;;  %v9086_v48 = vmul.f32 %v8514_v56, %v400_v10  ;;  %v7979_v14 = vld [vmem:[%s14775_s3 + $0x50] ss:$8 sps:$4 sm:$0xff]  }
  0xc8   : > { %v1361_v15 = vadd.f32 %v8540_v3, %v1286_v24  ;;  %v9089_v24 = vmul.f32 %v8522_v59, %v400_v10  ;;  %4545 = vmatpush1.bf16.msra.mxu1 %v7979_v14  ;;  %v15282_v29 = vld [vmem:[#allocation5_spill] sm:$0xff]  ;;  %15287 = vst [vmem:[#allocation39_spill] sm:$0xff] %v9150_v8 }
  0xc9   : > { %v9075_v43 = vadd.f32 %v8540_v3, %v1282_v41  ;;  %v9082_v19 = vmax.f32 %v1358_v20, 0.0  ;;  %v1363_v38 = vadd.f32 %v8540_v3, %v1288_v12  ;;  %v9098_v20 = vmul.f32 %v8506_v44, %v400_v10  ;;  %4546 = vmatprep.subr.bf16.mxu1 %v7980_v30  ;;  %3894 = vmatpush1.bf16.msra.mxu0 %v7846_v1  ;;  %v9220_v17 = vpop.permute.xlu0 %404 }
  0xca   : > { %v9091_v41 = vmax.f32 %v1361_v15, 0.0  ;;  %v15283_v0 = vrot.slane %v15282_v29, 2  ;;  %v9120_v29 = vmul.f32 %v8506_v44, %v395_v33  ;;  %v9123_v30 = vmul.f32 %v8509_v49, %v395_v33 }
  0xcb   : > { %15277 = vst [vmem:[#allocation34_spill] sm:$0xff] %v9075_v43  ;;  %15278 = vst [vmem:[#allocation35_spill] sm:$0xff] %v9082_v19  ;;  %v14809_v18 = vmax.f32 %v9075_v43, 0.0  ;;  %v2924_v46 = vpack.c.bf16 %v9082_v19, %v8925_v45  ;;  %v9102_v12 = vmax.f32 %v1363_v38, 0.0  ;;  %v1285_v38 = vadd.f32 %v15284_v63, %v8770_v26  ;;  %v7849_v26 = vld [vmem:[%s14775_s3 + $0x210] ss:$8 sps:$4 sm:$0xff]  }
  0xcc   : > { %15279 = vst [vmem:[#allocation36_spill] sm:$0xff] %v9091_v41  ;;  %15280 = vst [vmem:[#allocation37_spill] sm:$0xff] %v9098_v20  ;;  %v1281_v15 = vadd.f32 %v15283_v0, %v8615_v13  ;;  %v14812_v52 = vrot.slane %v9091_v41, 1  ;;  %v7851_v13 = vld [vmem:[%s14775_s3 + $0x214] ss:$8 sps:$4 sm:$0xff]   ;;  %v9134_v63 = vmul.f32 %v8509_v49, %v400_v10 }
  0xcd   : > { %15281 = vst [vmem:[#allocation38_spill] sm:$0xff] %v9102_v12  ;;  %v2610_v14 = vrot.slane %v14809_v18, 1  ;;  %15285 = vst [vmem:[#allocation5_spill] sm:$0xff] %v9120_v29  ;;  %3620 = vmatmul.mubr.bf16.gmra.mxu0 %v2924_v46  ;;  %v2931_v0 = vpack.c.bf16 %v9102_v12, %v9091_v41  ;;  %v1360_v42 = vadd.f32 %v8537_v2, %v1285_v38  ;;  %v7982_v38 = vld [vmem:[%s14775_s3 + $0x34] ss:$8 sps:$4 sm:$0xff]   ;;  %3895 = vmatprep.subr.bf16.mxu0 %v7851_v13 }
  0xce   : > { %v9128_v18 = vadd.f32 %v8537_v2, %v1281_v15  ;;  %v2617_v46 = vsel %vm711_vm0, %v2615_v6, %v14812_v52  ;;  %v7981_v15 = vld [vmem:[%s14775_s3 + $0x40] ss:$8 sps:$4 sm:$0xff]   ;;  %v9161_v52 = vmul.f32 %v8511_v50, %v395_v33  ;;  %3896 = vmatpush1.bf16.msra.mxu0 %v7849_v26  ;;  %v7857_v26 = vld [vmem:[%s14775_s3 + $0x2f4] ss:$8 sps:$4 sm:$0xff]  }
  0xcf   : > { %v2611_v1 = vsel %vm711_vm0, %v2606_v31, %v2610_v14  ;;  %4547 = vmatpush1.bf16.msra.mxu1 %v7981_v15  ;;  %v9153_v31 = vmul.f32 %v8516_v57, %v400_v10  ;;  %3629 = vmatprep.mubr.bf16.mxu0 %v2931_v0  ;;  %v9163_v43 = vmax.f32 %v1360_v42, 0.0  ;;  %v15291_v10 = vrot.slane %v8691_v11, 2  ;;  %v7852_v42 = vld [vmem:[%s14775_s3 + $0x200] ss:$8 sps:$4 sm:$0xff]   ;;  %v410_v0 = vpop.permute.xlu1 %409 }
  0xd0   : > { %15286 = vst [vmem:[#allocation19_spill] sm:$0xff] %v9128_v18  ;;  %v2927_v14 = vpack.c.bf16 %v2617_v46, %v2611_v1  ;;  %v14817_v6 = vmax.f32 %v9128_v18, 0.0  ;;  %4548 = vmatprep.subr.bf16.mxu1 %v7982_v38  ;;  %15288 = vst [vmem:[#allocation40_spill] sm:$0xff] %v9161_v52  ;;  %v9171_v46 = vmul.f32 %v8516_v57, %v395_v33  ;;  %v2612_v11 = vrot.slane %v9082_v19, 1 }
  0xd1   : > { %15289 = vst [vmem:[#allocation41_spill] sm:$0xff] %v9163_v43  ;;  %v1290_v40 = vadd.f32 %v15291_v10, %v15290_v35  ;;  %v2620_v10 = vrot.slane %v9102_v12, 1  ;;  %3897 = vmatprep.subr.bf16.mxu0 %v7854_v23  ;;  %v9193_v1 = vmul.f32 %v8514_v56, %v395_v33  ;;  %v15294_v35 = vrot.slane %v8925_v45, 1 }
  0xd2   : > { %3772 = vmatprep.mubr.bf16.mxu1 %v2927_v14  ;;  %v2608_v38 = vrot.slane %v14817_v6, 1  ;;  %v7983_v14 = vld [vmem:[%s14775_s3 + $0x30] ss:$8 sps:$4 sm:$0xff]   ;;  %v15295_v15 = vrot.slane %v9163_v43, 1  ;;  %v15297_v18 = vrot.slane %v8945_v5, 1  ;;  %v15299_v23 = vrot.slane %v8958_v39, 1  ;;  %3898 = vmatpush1.bf16.msra.mxu0 %v7852_v42 }
  0xd3   : > { %v9181_v13 = vadd.f32 %v8540_v3, %v1290_v40  ;;  %4549 = vmatpush1.bf16.msra.mxu1 %v7983_v14  ;;  %15293 = vst [vmem:[#allocation42_spill] sm:$0xff] %v9193_v1  ;;  %v9196_v40 = vmul.f32 %v8522_v59, %v395_v33  ;;  %v7984_v14 = vld [vmem:[%s14775_s3 + $0x24] ss:$8 sps:$4 sm:$0xff]   ;;  %v15296_v33 = vrot.slane %v9120_v29, 1  ;;  %3899 = vmatprep.subr.bf16.mxu0 %v7857_v26  ;;  %v15304_v42 = vrot.slane %v9134_v63, 1 }
  0xd4   : > { %4550 = vmatprep.subr.bf16.mxu1 %v7984_v14  ;;  %v2609_v6 = vsel %vm711_vm0, %v15294_v35, %v2608_v38  ;;  %v2614_v12 = vsel %vm711_vm0, %v2612_v11, %v15295_v15  ;;  %v15298_v14 = vrot.slane %v9123_v30, 1  ;;  %v7855_v15 = vld [vmem:[%s14775_s3 + $0x2f0] ss:$8 sps:$4 sm:$0xff]   ;;  %v15300_v11 = vrot.slane %v9098_v20, 1  ;;  %v7986_v26 = vld [vmem:[%s14775_s3 + $0x14] ss:$8 sps:$4 sm:$0xff]  }
  0xd5   : > { %15292 = vst [vmem:[#allocation12_spill] sm:$0xff] %v9181_v13  ;;  %v14826_v19 = vmax.f32 %v9181_v13, 0.0  ;;  %v761_v55 = vsel %vm711_vm0, %v15297_v18, %v15296_v33  ;;  %v2926_v35 = vpack.c.bf16 %v2614_v12, %v2609_v6  ;;  %v9231_v33 = vmul.f32 %v8506_v44, %v410_v0  ;;  %v7985_v6 = vld [vmem:[%s14775_s3 + $0x20] ss:$8 sps:$4 sm:$0xff]  }
  0xd6   : > { %v763_v45 = vsel %vm711_vm0, %v15299_v23, %v15298_v14  ;;  %v9228_v18 = vadd.f32 %v15300_v11, %v9086_v48  ;;  %v15303_v23 = vrot.slane %v9091_v41, 1  ;;  %v7860_v48 = vld [vmem:[%s14775_s3 + $0x2e4] ss:$8 sps:$4 sm:$0xff]   ;;  %v9247_v11 = vadd.f32 %v15304_v42, %v9089_v24  ;;  %3900 = vmatpush2.bf16.msra.mxu0 %v7855_v15 }
  0xd7   : > { %15302 = vst [vmem:[#allocation44_spill] sm:$0xff] %v9231_v33  ;;  %v2624_v12 = vrot.slane %v14826_v19, 1  ;;  %4551 = vmatpush1.bf16.msra.mxu1 %v7985_v6  ;;  %v9251_v38 = vmul.f32 %v8509_v49, %v410_v0  ;;  %v9254_v19 = vmul.f32 %v8511_v50, %v410_v0  ;;  %v9260_v6 = vadd.f32 %v761_v55, %v8978_v16  ;;  %v15330_v15 = vld [vmem:[#allocation7_spill] sm:$0xff] }
  0xd8   : > { %15301 = vst [vmem:[#allocation43_spill] sm:$0xff] %v9228_v18  ;;  %v2621_v14 = vsel %vm711_vm0, %v15303_v23, %v2620_v10  ;;  %15305 = vst [vmem:[#allocation45_spill] sm:$0xff] %v9247_v11  ;;  %3773 = vmatmul.mubr.bf16.gmra.mxu1 %v2926_v35  ;;  %4552 = vmatprep.subr.bf16.mxu1 %v7986_v26  ;;  %v9263_v24 = vadd.f32 %v763_v45, %v8984_v27  ;;  %v15310_v13 = vrot.slane %v9161_v52, 2  ;;  %v9283_v27 = vpop.permute.xlu1 %419 }
  0xd9   : > { %15306 = vst [vmem:[#allocation46_spill] sm:$0xff] %v9251_v38  ;;  %15307 = vst [vmem:[#allocation47_spill] sm:$0xff] %v9254_v19  ;;  %v9266_v42 = vmul.f32 %v8516_v57, %v410_v0  ;;  %v2625_v23 = vsel %vm711_vm0, %v2620_v10, %v2624_v12  ;;  %v15311_v35 = vrot.slane %v8970_v61, 2  ;;  %v15313_v26 = vrot.slane %v9171_v46, 2  ;;  %v15317_v10 = vld [vmem:[#allocation8_spill] sm:$0xff]  ;;  %3901 = vmatprep.subr.bf16.mxu0 %v7860_v48  ;;  %v15332_v19 = vld [vmem:[#allocation10_spill] sm:$0xff] }
  0xda   : > { %15308 = vst [vmem:[#allocation48_spill] sm:$0xff] %v9260_v6  ;;  %v15314_v55 = vrot.slane %v8988_v7, 2  ;;  %v2933_v45 = vpack.c.bf16 %v2625_v23, %v2621_v14  ;;  %v15316_v18 = vrot.slane %v15315_v37, 1  ;;  %v15318_v12 = vrot.slane %v15317_v10, 1  ;;  %v15321_v23 = vld [vmem:[#allocation9_spill] sm:$0xff]  ;;  %v9306_v10 = vpop.permute.xlu0 %414  ;;  %v15334_v48 = vld [vmem:[#allocation23_spill] sm:$0xff] }
  0xdb   : > { %15309 = vst [vmem:[#allocation49_spill] sm:$0xff] %v9266_v42  ;;  %v9274_v41 = vsel %vm1098_vm1, %v15311_v35, %v15310_v13  ;;  %v7858_v13 = vld [vmem:[%s14775_s3 + $0x2e0] ss:$8 sps:$4 sm:$0xff]   ;;  %v9294_v35 = vmul.f32 %v8514_v56, %v410_v0  ;;  %v7987_v37 = vld [vmem:[%s14775_s3 + $0x10] ss:$8 sps:$4 sm:$0xff]   ;;  %v1371_v11 = vadd.f32 %v8540_v3, %v8975_v25 }
  0xdc   : > { %15312 = vst [vmem:[#allocation50_spill] sm:$0xff] %v9274_v41  ;;  %v9281_v16 = vsel %vm1098_vm1, %v15314_v55, %v15313_v26  ;;  %v737_v52 = vsel %vm711_vm0, %v15318_v12, %v15316_v18  ;;  %v9297_v26 = vmul.f32 %v8522_v59, %v410_v0  ;;  %4553 = vmatpush1.bf16.msra.mxu1 %v7987_v37  ;;  %v15322_v12 = vld [vmem:[#allocation15_spill] sm:$0xff]  ;;  %v15335_v42 = vld [vmem:[#allocation17_spill] sm:$0xff]  ;;  %v15338_v38 = vld [vmem:[#allocation18_spill] sm:$0xff] }
  0xdd   : > { %15319 = vst [vmem:[#allocation6_spill] sm:$0xff] %v9294_v35  ;;  %v900_v55 = vadd.f32 %v737_v52, %v15321_v23  ;;  %3782 = vmatprep.mubr.bf16.mxu1 %v2933_v45  ;;  %v15323_v0 = vrot.slane %v15322_v12, 1  ;;  %v15324_v35 = vld [vmem:[#allocation25_spill] sm:$0xff]  ;;  %v15326_v52 = vld [vmem:[#allocation27_spill] sm:$0xff]  ;;  %v9321_v18 = vmul.f32 %v8514_v56, %v9220_v17  ;;  %v9325_v45 = vmul.f32 %v8506_v44, %v9283_v27 }
  0xde   : > { %15320 = vst [vmem:[#allocation8_spill] sm:$0xff] %v9297_v26  ;;  %v15325_v26 = vrot.slane %v15324_v35, 1  ;;  %v15327_v23 = vrot.slane %v15326_v52, 1  ;;  %v15331_v35 = vrot.slane %v15330_v15, 2  ;;  %v7863_v12 = vld [vmem:[%s14775_s3 + $0x2d4] ss:$8 sps:$4 sm:$0xff]   ;;  %v9340_v52 = vmul.f32 %v8509_v49, %v9283_v27  ;;  %3902 = vmatpush2.bf16.msra.mxu0 %v7858_v13 }
  0xdf   : > { %v15328_v33 = vmov %v15323_v0  ;;  %15329 = vst [vmem:[#allocation9_spill] sm:$0xff] %v9321_v18  ;;  %v15339_v8 = vrot.slane %v15338_v38, 2  ;;  %v9382_v38 = vmul.f32 %v8509_v49, %v9220_v17  ;;  %3903 = vmatprep.subr.bf16.mxu0 %v7863_v12 }
  0xe0   : > { %v745_v14 = vsel %vm711_vm0, %v15325_v26, %v15323_v0  ;;  %v749_v37 = vsel %vm711_vm0, %v15328_v33, %v15327_v23  ;;  %v15333_v26 = vrot.slane %v15332_v19, 2  ;;  %v7988_v33 = vld [vmem:[%s14775_s3 + $0x4] ss:$8 sps:$4 sm:$0xff]   ;;  %v15354_v20 = vrot.slane %v9340_v52, 1 }
  0xe1   : > { %4554 = vmatprep.subr.bf16.mxu1 %v7988_v33  ;;  %v905_v18 = vadd.f32 %v745_v14, %v15334_v48  ;;  %v907_v19 = vadd.f32 %v749_v37, %v15335_v42  ;;  %v9353_v33 = vmul.f32 %v8509_v49, %v9306_v10  ;;  %v15341_v42 = vrot.slane %v8899_v9, 2  ;;  %v7989_v48 = vld [vmem:[%s14775_s3] ss:$8 sps:$4 sm:$0xff]  }
  0xe2   : > { %v1124_v0 = vsel %vm1098_vm1, %v15333_v26, %v15331_v35  ;;  %v7861_v35 = vld [vmem:[%s14775_s3 + $0x2d0] ss:$8 sps:$4 sm:$0xff]   ;;  %v9349_v26 = vmul.f32 %v8506_v44, %v9306_v10  ;;  %v15342_v13 = vmov %v15339_v8  ;;  %4555 = vmatpush1.bf16.msra.mxu1 %v7989_v48  ;;  %v9378_v9 = vmul.f32 %v8506_v44, %v9220_v17 }
  0xe3   : > { %v1287_v23 = vadd.f32 %v1124_v0, %v900_v55  ;;  %15337 = vst [vmem:[#allocation25_spill] sm:$0xff] %v9353_v33  ;;  %v15340_v55 = vrot.slane %v8819_v58, 2  ;;  %v1136_v37 = vsel %vm1098_vm1, %v15342_v13, %v15341_v42  ;;  %v9370_v0 = vmul.f32 %v8522_v59, %v9220_v17  ;;  %v15347_v42 = vld [vmem:[#allocation11_spill] sm:$0xff]  ;;  %3904 = vmatpush2.bf16.msra.mxu0 %v7861_v35 }
  0xe4   : > { %15336 = vst [vmem:[#allocation15_spill] sm:$0xff] %v9349_v26  ;;  %v1294_v29 = vadd.f32 %v1136_v37, %v907_v19  ;;  %15344 = vst [vmem:[#allocation7_spill] sm:$0xff] %v9378_v9  ;;  %v15348_v13 = vrot.slane %v15330_v15, 2  ;;  %v14848_v48 = vrot.slane %v9325_v45, 1  ;;  %v15355_v41 = vrot.slane %v9353_v33, 1 }
  0xe5   : > { %v1132_v14 = vsel %vm1098_vm1, %v15340_v55, %v15339_v8  ;;  %15343 = vst [vmem:[#allocation27_spill] sm:$0xff] %v9370_v0  ;;  %v1362_v1 = vadd.f32 %v8537_v2, %v1287_v23  ;;  %v7990_v8 = vld [vmem:[%s14775_s3 + $0xf4] ss:$8 sps:$4 sm:$0xff]   ;;  %v9386_v55 = vmul.f32 %v8511_v50, %v9220_v17  ;;  %v537_v0 = vmul.f32 %v8514_v56, %v9306_v10 }
  0xe6   : > { %v1292_v58 = vadd.f32 %v1132_v14, %v905_v18  ;;  %4556 = vmatprep.subr.bf16.mxu1 %v7990_v8  ;;  %v9390_v18 = vmul.f32 %v8511_v50, %v9283_v27  ;;  %v1369_v14 = vadd.f32 %v8540_v3, %v1294_v29  ;;  %v1289_v37 = vadd.f32 %v15348_v13, %v15347_v42 }
  0xe7   : > { %v9392_v23 = vmax.f32 %v1362_v1, 0.0  ;;  %v7991_v1 = vld [vmem:[%s14775_s3 + $0xf0] ss:$8 sps:$4 sm:$0xff]   ;;  %v9421_v13 = vmul.f32 %v8516_v57, %v9220_v17  ;;  %v9440_v17 = vmul.f32 %v8516_v57, %v9306_v10  ;;  %v538_v8 = vmul.f32 %v8522_v59, %v9306_v10 }
  0xe8   : > { %15345 = vst [vmem:[#allocation10_spill] sm:$0xff] %v9390_v18  ;;  %v1367_v19 = vadd.f32 %v8540_v3, %v1292_v58  ;;  %4557 = vmatpush2.bf16.msra.mxu1 %v7991_v1  ;;  %v9410_v15 = vmax.f32 %v1369_v14, 0.0  ;;  %v9413_v35 = vadd.f32 %v8537_v2, %v1289_v37  ;;  %v7992_v58 = vld [vmem:[%s14775_s3 + $0xe4] ss:$8 sps:$4 sm:$0xff]   ;;  %v7864_v37 = vld [vmem:[%s14775_s3 + $0x2c0] ss:$8 sps:$4 sm:$0xff]  }
  0xe9   : > { %15346 = vst [vmem:[#allocation23_spill] sm:$0xff] %v9392_v23  ;;  %v2930_v29 = vpack.c.bf16 %v9392_v23, %v9163_v43  ;;  %4558 = vmatprep.subr.bf16.mxu1 %v7992_v58  ;;  %v2618_v14 = vrot.slane %v9392_v23, 1  ;;  %v7866_v1 = vld [vmem:[%s14775_s3 + $0x2c4] ss:$8 sps:$4 sm:$0xff]   ;;  %v9436_v58 = vmul.f32 %v8511_v50, %v9306_v10  ;;  %v15353_v23 = vrot.slane %v9349_v26, 1 }
  0xea   : > { %v9408_v12 = vmax.f32 %v1367_v19, 0.0  ;;  %15350 = vst [vmem:[#allocation18_spill] sm:$0xff] %v9410_v15  ;;  %15351 = vst [vmem:[#allocation11_spill] sm:$0xff] %v9413_v35  ;;  %v9425_v19 = vmul.f32 %v8516_v57, %v9283_v27  ;;  %3905 = vmatprep.subr.bf16.mxu0 %v7866_v1  ;;  %v781_v26 = vsel %vm711_vm0, %v15355_v41, %v15354_v20  ;;  %v7994_v1 = vld [vmem:[%s14775_s3 + $0xd4] ss:$8 sps:$4 sm:$0xff]   ;;  %v2630_v41 = vrot.slane %v9410_v15, 1 }
  0xeb   : > { %3630 = vmatmul.mubr.bf16.gmra.mxu0 %v2930_v29  ;;  %v779_v9 = vsel %vm711_vm0, %v15353_v23, %v14848_v48  ;;  %v7993_v29 = vld [vmem:[%s14775_s3 + $0xe0] ss:$8 sps:$4 sm:$0xff]   ;;  %v15356_v23 = vrot.slane %v9163_v43, 1  ;;  %v15357_v48 = vmax.f32 %v9413_v35, 0.0  ;;  %v925_v43 = vadd.f32 %v781_v26, %v538_v8  ;;  %v7995_v10 = vld [vmem:[%s14775_s3 + $0xd0] ss:$8 sps:$4 sm:$0xff]  }
  0xec   : > { %15349 = vst [vmem:[#allocation17_spill] sm:$0xff] %v9408_v12  ;;  %15352 = vst [vmem:[#allocation51_spill] sm:$0xff] %v9425_v19  ;;  %v2937_v42 = vpack.c.bf16 %v9410_v15, %v9408_v12  ;;  %4559 = vmatpush2.bf16.msra.mxu1 %v7993_v29  ;;  %v9474_v29 = vmax.f32 %v1371_v11, 0.0  ;;  %v2629_v33 = vrot.slane %v9408_v12, 1  ;;  %3906 = vmatpush2.bf16.msra.mxu0 %v7864_v37  ;;  %v7996_v26 = vld [vmem:[%s14775_s3 + $0xc4] ss:$8 sps:$4 sm:$0xff]   ;;  %v425_v37 = vpop.permute.xlu0 %424 }
  0xed   : > { %v2619_v25 = vsel %vm711_vm0, %v15356_v23, %v2618_v14  ;;  %v2622_v6 = vrot.slane %v15357_v48, 1  ;;  %4560 = vmatprep.subr.bf16.mxu1 %v7994_v1  ;;  %v924_v20 = vadd.f32 %v779_v9, %v537_v0  ;;  %v14856_v23 = vrot.slane %v9440_v17, 2  ;;  %v430_v48 = vpop.permute.xlu1 %429  ;;  %v15377_v15 = vld [vmem:[#allocation16_spill] sm:$0xff] }
  0xee   : > { %3639 = vmatprep.mubr.bf16.mxu0 %v2937_v42  ;;  %15358 = vst [vmem:[#allocation52_spill] sm:$0xff] %v9474_v29  ;;  %v14855_v42 = vrot.slane %v9436_v58, 2  ;;  %v2631_v1 = vsel %vm711_vm0, %v2629_v33, %v2630_v41  ;;  %v14854_v11 = vrot.slane %v9474_v29, 1  ;;  %v540_v33 = vmul.f32 %v8522_v59, %v9283_v27 }
  0xef   : > { %v2623_v35 = vsel %vm711_vm0, %v2618_v14, %v2622_v6  ;;  %v539_v6 = vmul.f32 %v8514_v56, %v9283_v27  ;;  %v9497_v8 = vmul.f32 %v8506_v44, %v430_v48  ;;  %v15362_v9 = vrot.slane %v9425_v19, 2 }
  0xf0   : > { %v2932_v60 = vpack.c.bf16 %v2623_v35, %v2619_v25  ;;  %4561 = vmatpush2.bf16.msra.mxu1 %v7995_v10  ;;  %v9500_v35 = vmul.f32 %v8509_v49, %v430_v48  ;;  %v2635_v14 = vsel %vm711_vm0, %v2630_v41, %v14854_v11  ;;  %v15359_v25 = vrot.slane %v9325_v45, 1 }
  0xf1   : > { %4562 = vmatprep.subr.bf16.mxu1 %v7996_v26  ;;  %v15361_v26 = vrot.slane %v9390_v18, 2  ;;  %v2939_v0 = vpack.c.bf16 %v2635_v14, %v2631_v1  ;;  %v15363_v41 = vrot.slane %v9340_v52, 1  ;;  %v9537_v1 = vmul.f32 %v8511_v50, %v430_v48  ;;  %v15364_v52 = vld [vmem:[#allocation14_spill] sm:$0xff] }
  0xf2   : > { %3783 = vmatmul.mubr.bf16.gmra.mxu1 %v2932_v60  ;;  %v9507_v10 = vadd.f32 %v15359_v25, %v539_v6  ;;  %v1168_v60 = vsel %vm1098_vm1, %v14856_v23, %v15362_v9  ;;  %v9528_v25 = vmul.f32 %v8514_v56, %v430_v48  ;;  %v9534_v9 = vmul.f32 %v8522_v59, %v430_v48 }
  0xf3   : > { %v1166_v27 = vsel %vm1098_vm1, %v14855_v42, %v15361_v26  ;;  %v9521_v11 = vadd.f32 %v15363_v41, %v540_v33  ;;  %v9525_v6 = vadd.f32 %v1168_v60, %v925_v43  ;;  %v7997_v26 = vld [vmem:[%s14775_s3 + $0xc0] ss:$8 sps:$4 sm:$0xff]   ;;  %3792 = vmatprep.mubr.bf16.mxu1 %v2939_v0  ;;  %v15366_v33 = vld [vmem:[#allocation24_spill] sm:$0xff]  ;;  %v9552_v12 = vmul.f32 %v8516_v57, %v430_v48 }
  0xf4   : > { %15360 = vst [vmem:[#allocation53_spill] sm:$0xff] %v9507_v10  ;;  %v9523_v45 = vadd.f32 %v1166_v27, %v924_v20  ;;  %4563 = vmatpush2.bf16.msra.mxu1 %v7997_v26  ;;  %v15365_v20 = vrot.slane %v15364_v52, 1  ;;  %v15367_v43 = vrot.slane %v15366_v33, 1  ;;  %v15368_v27 = vld [vmem:[#allocation26_spill] sm:$0xff]  ;;  %v9555_v0 = vmul.f32 %v8506_v44, %v425_v37  ;;  %v15372_v52 = vld [vmem:[#allocation20_spill] sm:$0xff] }
  0xf5   : > { %v15369_v60 = vrot.slane %v15368_v27, 1  ;;  %v9561_v33 = vmul.f32 %v8509_v49, %v425_v37  ;;  %v15373_v27 = vld [vmem:[#allocation13_spill] sm:$0xff]  ;;  %v15375_v48 = vrot.slane %v9024_v21, 1  ;;  %v9571_v26 = vmul.f32 %v8511_v50, %v425_v37 }
  0xf6   : > { %v742_v14 = vsel %vm711_vm0, %v15367_v43, %v15365_v20  ;;  %v15370_v41 = vmov %v15365_v20  ;;  %15371 = vst [vmem:[#allocation14_spill] sm:$0xff] %v9555_v0  ;;  %v7998_v20 = vld [vmem:[%s14775_s3 + $0xb4] ss:$8 sps:$4 sm:$0xff]   ;;  %v15378_v18 = vrot.slane %v15377_v15, 2  ;;  %v15380_v19 = vrot.slane %v8889_v54, 2 }
  0xf7   : > { %v747_v42 = vsel %vm711_vm0, %v15370_v41, %v15369_v60  ;;  %4564 = vmatprep.subr.bf16.mxu1 %v7998_v20  ;;  %v904_v43 = vadd.f32 %v742_v14, %v15372_v52  ;;  %v15374_v41 = vrot.slane %v8958_v39, 1  ;;  %15376 = vst [vmem:[#allocation24_spill] sm:$0xff] %v9571_v26  ;;  %v15379_v20 = vrot.slane %v8804_v32, 2  ;;  %v7999_v21 = vld [vmem:[%s14775_s3 + $0xb0] ss:$8 sps:$4 sm:$0xff]  }
  0xf8   : > { %v906_v60 = vadd.f32 %v747_v42, %v15373_v27  ;;  %v15381_v14 = vmov %v15378_v18  ;;  %4565 = vmatpush2.bf16.msra.mxu1 %v7999_v21  ;;  %v9588_v52 = vmul.f32 %v8516_v57, %v425_v37  ;;  %v15383_v54 = vrot.slane %v9038_v62, 2 }
  0xf9   : > { %v759_v23 = vsel %vm711_vm0, %v15375_v48, %v15374_v41  ;;  %v1129_v10 = vsel %vm1098_vm1, %v15379_v20, %v15378_v18  ;;  %v1134_v42 = vsel %vm1098_vm1, %v15381_v14, %v15380_v19  ;;  %v15382_v18 = vrot.slane %v8988_v7, 2  ;;  %v7867_v14 = vld [vmem:[%s14775_s3 + $0x2b0] ss:$8 sps:$4 sm:$0xff]  }
  0xfa   : > { %v913_v39 = vadd.f32 %v759_v23, %v9065_v47  ;;  %v1291_v27 = vadd.f32 %v1129_v10, %v904_v43  ;;  %v1293_v32 = vadd.f32 %v1134_v42, %v906_v60  ;;  %v8000_v47 = vld [vmem:[%s14775_s3 + $0xa4] ss:$8 sps:$4 sm:$0xff]   ;;  %v9601_v41 = vmul.f32 %v8514_v56, %v425_v37  ;;  %v440_v10 = vpop.permute.xlu1 %439  ;;  %v435_v60 = vpop.permute.xlu0 %434  ;;  %v7869_v42 = vld [vmem:[%s14775_s3 + $0x2b4] ss:$8 sps:$4 sm:$0xff]  }
  0xfb   : > { %v1146_v15 = vsel %vm1098_vm1, %v15383_v54, %v15382_v18  ;;  %4566 = vmatprep.subr.bf16.mxu1 %v8000_v47  ;;  %v9604_v7 = vmul.f32 %v8522_v59, %v425_v37  ;;  %v1370_v18 = vadd.f32 %v8537_v2, %v8973_v28  ;;  %v9625_v54 = vmul.f32 %v8506_v44, %v440_v10 }
  0xfc   : > { %15384 = vst [vmem:[#allocation26_spill] sm:$0xff] %v9601_v41  ;;  %v1300_v43 = vadd.f32 %v1146_v15, %v913_v39  ;;  %v1366_v48 = vadd.f32 %v8537_v2, %v1291_v27  ;;  %v1368_v20 = vadd.f32 %v8537_v2, %v1293_v32  ;;  %v8001_v27 = vld [vmem:[%s14775_s3 + $0xa0] ss:$8 sps:$4 sm:$0xff]   ;;  %3907 = vmatprep.subr.bf16.mxu0 %v7869_v42 }
  0xfd   : > { %4567 = vmatpush2.bf16.msra.mxu1 %v8001_v27  ;;  %15385 = vst [vmem:[#allocation20_spill] sm:$0xff] %v9625_v54  ;;  %v9635_v28 = vmul.f32 %v8509_v49, %v440_v10  ;;  %v9638_v27 = vmul.f32 %v8506_v44, %v435_v60  ;;  %v9642_v62 = vmax.f32 %v1370_v18, 0.0  ;;  %3908 = vmatpush2.bf16.msra.mxu0 %v7867_v14  ;;  %v8003_v18 = vld [vmem:[%s14775_s3 + $0x90] ss:$8 sps:$4 sm:$0xff]  }
  0xfe   : > { %v1375_v21 = vadd.f32 %v8540_v3, %v1300_v43  ;;  %v9627_v15 = vmax.f32 %v1366_v48, 0.0  ;;  %v9629_v47 = vmax.f32 %v1368_v20, 0.0  ;;  %v8002_v43 = vld [vmem:[%s14775_s3 + $0x94] ss:$8 sps:$4 sm:$0xff]   ;;  %v9645_v48 = vmul.f32 %v8509_v49, %v435_v60 }
  0xff   : > { %4568 = vmatprep.subr.bf16.mxu1 %v8002_v43  ;;  %15388 = vst [vmem:[#allocation54_spill] sm:$0xff] %v9638_v27  ;;  %15390 = vst [vmem:[#allocation56_spill] sm:$0xff] %v9642_v62  ;;  %v547_v32 = vmul.f32 %v8514_v56, %v440_v10  ;;  %v9653_v39 = vmul.f32 %v8511_v50, %v440_v10  ;;  %v9663_v19 = vmul.f32 %v8511_v50, %v435_v60 }
 0x100   : > { %15386 = vst [vmem:[#allocation13_spill] sm:$0xff] %v9627_v15  ;;  %15387 = vst [vmem:[#allocation16_spill] sm:$0xff] %v9629_v47  ;;  %v9640_v37 = vmax.f32 %v1375_v21, 0.0  ;;  %v2936_v20 = vpack.c.bf16 %v9629_v47, %v9627_v15  ;;  %v2626_v42 = vrot.slane %v9627_v15, 1  ;;  %v2627_v43 = vrot.slane %v9629_v47, 1 }
 0x101   : > { %15391 = vst [vmem:[#allocation57_spill] sm:$0xff] %v9653_v39  ;;  %4569 = vmatpush2.bf16.msra.mxu1 %v8003_v18  ;;  %15392 = vst [vmem:[#allocation58_spill] sm:$0xff] %v9663_v19  ;;  %v15393_v15 = vrot.slane %v8875_v34, 2  ;;  %v14867_v41 = vrot.slane %v9638_v27, 1  ;;  %v9671_v14 = vmul.f32 %v8516_v57, %v435_v60  ;;  %v15394_v18 = vrot.slane %v9642_v62, 1 }
 0x102   : > { %15389 = vst [vmem:[#allocation55_spill] sm:$0xff] %v9640_v37  ;;  %v2943_v21 = vpack.c.bf16 %v9640_v37, %v9474_v29  ;;  %3640 = vmatmul.mubr.bf16.gmra.mxu0 %v2936_v20  ;;  %v2628_v47 = vsel %vm711_vm0, %v2626_v42, %v2627_v43  ;;  %v1302_v0 = vadd.f32 %v9281_v16, %v9263_v24  ;;  %v8004_v20 = vld [vmem:[%s14775_s3 + $0x84] ss:$8 sps:$4 sm:$0xff]   ;;  %v450_v16 = vpop.permute.xlu1 %449  ;;  %v15404_v39 = vrot.slane %v9500_v35, 1 }
 0x103   : > { %v1298_v26 = vadd.f32 %v15393_v15, %v8950_v53  ;;  %v2633_v23 = vsel %vm711_vm0, %v2627_v43, %v15394_v18  ;;  %4570 = vmatprep.subr.bf16.mxu1 %v8004_v20  ;;  %v9688_v43 = vmul.f32 %v8516_v57, %v440_v10  ;;  %v9691_v24 = vmul.f32 %v8514_v56, %v435_v60  ;;  %v8005_v20 = vld [vmem:[%s14775_s3 + $0x80] ss:$8 sps:$4 sm:$0xff]   ;;  %v8006_v53 = vld [vmem:[%s14775_s3 + $0x274] ss:$8 sps:$4 sm:$0xff]  }
 0x104   : > { %3649 = vmatprep.mubr.bf16.mxu0 %v2943_v21  ;;  %v2938_v15 = vpack.c.bf16 %v2633_v23, %v2628_v47  ;;  %v548_v21 = vmul.f32 %v8522_v59, %v440_v10  ;;  %v1377_v18 = vadd.f32 %v8540_v3, %v1302_v0  ;;  %v15397_v0 = vrot.slane %v9625_v54, 1  ;;  %v7872_v23 = vld [vmem:[%s14775_s3 + $0x2a4] ss:$8 sps:$4 sm:$0xff]  }
 0x105   : > { %v9684_v42 = vadd.f32 %v8540_v3, %v1298_v26  ;;  %15396 = vst [vmem:[#allocation60_spill] sm:$0xff] %v9691_v24  ;;  %4571 = vmatpush2.bf16.msra.mxu1 %v8005_v20  ;;  %v9699_v26 = vmul.f32 %v8522_v59, %v435_v60  ;;  %v15399_v20 = vrot.slane %v9497_v8, 1  ;;  %v15401_v47 = vrot.slane %v9635_v28, 1  ;;  %3909 = vmatprep.subr.bf16.mxu0 %v7872_v23 }
 0x106   : > { %3793 = vmatmul.mubr.bf16.gmra.mxu1 %v2938_v15  ;;  %4846 = vmatprep.subr.bf16.mxu1 %v8006_v53  ;;  %v9708_v34 = vadd.f32 %v15397_v0, %v547_v32  ;;  %v9716_v15 = vmax.f32 %v1377_v18, 0.0  ;;  %v15403_v53 = vrot.slane %v9645_v48, 1  ;;  %v9728_v0 = vmul.f32 %v8506_v44, %v450_v16  ;;  %v7870_v18 = vld [vmem:[%s14775_s3 + $0x2a0] ss:$8 sps:$4 sm:$0xff]  }
 0x107   : > { %15395 = vst [vmem:[#allocation59_spill] sm:$0xff] %v9684_v42  ;;  %v789_v60 = vsel %vm711_vm0, %v15399_v20, %v14867_v41  ;;  %v9720_v10 = vadd.f32 %v15401_v47, %v548_v21  ;;  %v15406_v20 = vmax.f32 %v9684_v42, 0.0  ;;  %v9738_v21 = vmul.f32 %v8509_v49, %v450_v16  ;;  %3910 = vmatpush2.bf16.msra.mxu0 %v7870_v18 }
 0x108   : > { %15398 = vst [vmem:[#allocation61_spill] sm:$0xff] %v9708_v34  ;;  %15400 = vst [vmem:[#allocation62_spill] sm:$0xff] %v9716_v15  ;;  %v791_v32 = vsel %vm711_vm0, %v15404_v39, %v15403_v53  ;;  %v9730_v34 = vpop.permute.xlu0 %444  ;;  %v9741_v47 = vmul.f32 %v8511_v50, %v450_v16  ;;  %v2643_v39 = vrot.slane %v9640_v37, 1  ;;  %v9750_v42 = vadd.f32 %v789_v60, %v9528_v25 }
 0x109   : > { %15402 = vst [vmem:[#allocation63_spill] sm:$0xff] %v9720_v10  ;;  %15405 = vst [vmem:[#allocation64_spill] sm:$0xff] %v9728_v0  ;;  %v2638_v41 = vrot.slane %v15406_v20, 1  ;;  %v15409_v24 = vrot.slane %v9663_v19, 2  ;;  %v15410_v27 = vrot.slane %v9537_v1, 2  ;;  %v9760_v37 = vmul.f32 %v8516_v57, %v450_v16 }
 0x10a   : > { %15407 = vst [vmem:[#allocation65_spill] sm:$0xff] %v9741_v47  ;;  %15408 = vst [vmem:[#allocation66_spill] sm:$0xff] %v9750_v42  ;;  %v9763_v53 = vadd.f32 %v791_v32, %v9534_v9  ;;  %v15413_v10 = vrot.slane %v9671_v14, 2  ;;  %v15414_v20 = vrot.slane %v9552_v12, 2  ;;  %v15415_v60 = vrot.slane %v9474_v29, 1 }
 0x10b   : > { %v9757_v54 = vsel %vm1098_vm1, %v15410_v27, %v15409_v24  ;;  %15412 = vst [vmem:[#allocation68_spill] sm:$0xff] %v9760_v37  ;;  %v15416_v27 = vrot.slane %v9716_v15, 1  ;;  %v9782_v9 = vmul.f32 %v8522_v59, %v450_v16  ;;  %v15419_v42 = vrot.slane %v8945_v5, 1 }
 0x10c   : > { %15411 = vst [vmem:[#allocation67_spill] sm:$0xff] %v9757_v54  ;;  %v9770_v25 = vsel %vm1098_vm1, %v15414_v20, %v15413_v10  ;;  %v2639_v19 = vsel %vm711_vm0, %v15415_v60, %v2638_v41  ;;  %v9779_v54 = vmul.f32 %v8514_v56, %v450_v16  ;;  %v15420_v10 = vrot.slane %v9021_v22, 1  ;;  %v455_v22 = vpop.permute.xlu0 %454  ;;  %v15432_v16 = vld [vmem:[#allocation28_spill] sm:$0xff] }
 0x10d   : > { %v2645_v24 = vsel %vm711_vm0, %v2643_v39, %v15416_v27  ;;  %15418 = vst [vmem:[#allocation70_spill] sm:$0xff] %v9782_v9  ;;  %v9792_v39 = vpop.permute.xlu1 %459  ;;  %v9798_v5 = vmul.f32 %v8506_v44, %v9730_v34  ;;  %v9846_v41 = vmul.f32 %v8516_v57, %v9730_v34  ;;  %v554_v0 = vmul.f32 %v8522_v59, %v455_v22 }
 0x10e   : > { %15417 = vst [vmem:[#allocation69_spill] sm:$0xff] %v9779_v54  ;;  %v2945_v32 = vpack.c.bf16 %v2645_v24, %v2639_v19  ;;  %v756_v20 = vsel %vm711_vm0, %v15420_v10, %v15419_v42  ;;  %v15422_v19 = vrot.slane %v8970_v61, 2  ;;  %v15423_v42 = vrot.slane %v9027_v4, 2 }
 0x10f   : > { %v912_v27 = vadd.f32 %v756_v20, %v9062_v36  ;;  %15421 = vst [vmem:[#allocation71_spill] sm:$0xff] %v9798_v5  ;;  %v15424_v24 = vrot.slane %v9134_v63, 1  ;;  %v15425_v10 = vrot.slane %v9123_v30, 1  ;;  %v9812_v20 = vmul.f32 %v8509_v49, %v9730_v34  ;;  %15431 = vst [vmem:[#allocation75_spill] sm:$0xff] %v9846_v41 }
 0x110   : > { %3802 = vmatprep.mubr.bf16.mxu1 %v2945_v32  ;;  %v1143_v18 = vsel %vm1098_vm1, %v15423_v42, %v15422_v19  ;;  %v9816_v32 = vmul.f32 %v8511_v50, %v9730_v34  ;;  %v9821_v4 = vmul.f32 %v8514_v56, %v9730_v34  ;;  %v9825_v30 = vmul.f32 %v8506_v44, %v9792_v39 }
 0x111   : > { %v767_v36 = vsel %vm711_vm0, %v15425_v10, %v15424_v24  ;;  %v1299_v23 = vadd.f32 %v1143_v18, %v912_v27  ;;  %v9829_v63 = vmul.f32 %v8509_v49, %v9792_v39  ;;  %v15428_v19 = vrot.slane %v9153_v31, 2 }
 0x112   : > { %15426 = vst [vmem:[#allocation72_spill] sm:$0xff] %v9816_v32  ;;  %v917_v61 = vadd.f32 %v767_v36, %v9196_v40  ;;  %15427 = vst [vmem:[#allocation73_spill] sm:$0xff] %v9821_v4  ;;  %v15429_v42 = vrot.slane %v9171_v46, 2  ;;  %v9837_v40 = vmul.f32 %v8506_v44, %v455_v22  ;;  %v9840_v18 = vmul.f32 %v8509_v49, %v455_v22 }
 0x113   : > { %v1374_v24 = vadd.f32 %v8537_v2, %v1299_v23  ;;  %v15433_v46 = vrot.slane %v15432_v16, 2  ;;  %v15444_v16 = vrot.slane %v9153_v31, 2  ;;  %v553_v5 = vmul.f32 %v8514_v56, %v455_v22 }
 0x114   : > { %v1154_v27 = vsel %vm1098_vm1, %v15429_v42, %v15428_v19  ;;  %15430 = vst [vmem:[#allocation74_spill] sm:$0xff] %v9837_v40  ;;  %v15434_v19 = vld [vmem:[#allocation48_spill] sm:$0xff]  ;;  %v15435_v42 = vld [vmem:[#allocation50_spill] sm:$0xff]  ;;  %v15446_v37 = vrot.slane %v9840_v18, 1  ;;  %v15447_v47 = vrot.slane %v9642_v62, 1 }
 0x115   : > { %v1304_v10 = vadd.f32 %v1154_v27, %v917_v61  ;;  %v1297_v60 = vadd.f32 %v15433_v46, %v8942_v51  ;;  %v1301_v29 = vadd.f32 %v15435_v42, %v15434_v19  ;;  %v9855_v4 = vmax.f32 %v1374_v24, 0.0  ;;  %v15443_v46 = vld [vmem:[#allocation45_spill] sm:$0xff] }
 0x116   : > { %v806_v61 = vrot.slane %v9825_v30, 1  ;;  %v808_v27 = vrot.slane %v9829_v63, 1  ;;  %v9873_v30 = vmul.f32 %v8511_v50, %v9792_v39  ;;  %v9883_v42 = vmul.f32 %v8511_v50, %v455_v22 }
 0x117   : > { %15436 = vst [vmem:[#allocation28_spill] sm:$0xff] %v9855_v4  ;;  %v1379_v23 = vadd.f32 %v8540_v3, %v1304_v10  ;;  %v9861_v36 = vadd.f32 %v8537_v2, %v1297_v60  ;;  %v1376_v51 = vadd.f32 %v8537_v2, %v1301_v29  ;;  %v2942_v19 = vpack.c.bf16 %v9855_v4, %v9642_v62 }
 0x118   : > { %15439 = vst [vmem:[#allocation76_spill] sm:$0xff] %v9873_v30  ;;  %v9880_v29 = vmul.f32 %v8516_v57, %v9792_v39  ;;  %15442 = vst [vmem:[#allocation79_spill] sm:$0xff] %v9883_v42  ;;  %v1306_v32 = vadd.f32 %v15444_v16, %v15443_v46  ;;  %v9920_v62 = vmul.f32 %v8522_v59, %v9730_v34 }
 0x119   : > { %15437 = vst [vmem:[#allocation48_spill] sm:$0xff] %v9861_v36  ;;  %v9868_v24 = vmax.f32 %v1379_v23, 0.0  ;;  %v14884_v60 = vmax.f32 %v9861_v36, 0.0  ;;  %v9876_v63 = vmax.f32 %v1376_v51, 0.0  ;;  %v9886_v23 = vmul.f32 %v8516_v57, %v455_v22  ;;  %3650 = vmatmul.mubr.bf16.gmra.mxu0 %v2942_v19 }
 0x11a   : > { %15441 = vst [vmem:[#allocation78_spill] sm:$0xff] %v9880_v29  ;;  %v2640_v51 = vrot.slane %v9855_v4, 1  ;;  %v15445_v19 = vrot.slane %v9837_v40, 1  ;;  %v470_v4 = vpop.permute.xlu1 %469  ;;  %v9912_v22 = vadd.f32 %v8540_v3, %v1306_v32  ;;  %v7873_v32 = vld [vmem:[%s14775_s3 + $0x290] ss:$8 sps:$4 sm:$0xff]   ;;  %v556_v34 = vmul.f32 %v8522_v59, %v9792_v39 }
 0x11b   : > { %15438 = vst [vmem:[#allocation50_spill] sm:$0xff] %v9868_v24  ;;  %15440 = vst [vmem:[#allocation77_spill] sm:$0xff] %v9876_v63  ;;  %v2949_v54 = vpack.c.bf16 %v9868_v24, %v9716_v15  ;;  %v2636_v10 = vrot.slane %v14884_v60, 1  ;;  %v809_v60 = vsel %vm711_vm0, %v15446_v37, %v808_v27  ;;  %v15448_v31 = vrot.slane %v9876_v63, 1 }
 0x11c   : > { %v807_v41 = vsel %vm711_vm0, %v15445_v19, %v806_v61  ;;  %15449 = vst [vmem:[#allocation45_spill] sm:$0xff] %v9912_v22  ;;  %v2648_v46 = vrot.slane %v9868_v24, 1  ;;  %v15450_v40 = vrot.slane %v9716_v15, 1  ;;  %v9958_v9 = vmul.f32 %v8516_v57, %v470_v4 }
 0x11d   : > { %3659 = vmatprep.mubr.bf16.mxu0 %v2949_v54  ;;  %v2637_v36 = vsel %vm711_vm0, %v15447_v47, %v2636_v10  ;;  %v2642_v16 = vsel %vm711_vm0, %v2640_v51, %v15448_v31  ;;  %v940_v47 = vadd.f32 %v807_v41, %v553_v5  ;;  %v14891_v51 = vmax.f32 %v9912_v22, 0.0  ;;  %v7875_v31 = vld [vmem:[%s14775_s3 + $0x294] ss:$8 sps:$4 sm:$0xff]  }
 0x11e   : > { %v2944_v54 = vpack.c.bf16 %v2642_v16, %v2637_v36  ;;  %v555_v36 = vmul.f32 %v8514_v56, %v9792_v39  ;;  %v941_v16 = vadd.f32 %v809_v60, %v554_v0  ;;  %v9935_v41 = vmul.f32 %v8506_v44, %v470_v4  ;;  %3911 = vmatprep.subr.bf16.mxu0 %v7875_v31 }
 0x11f   : > { %v9938_v5 = vmul.f32 %v8509_v49, %v470_v4  ;;  %v9941_v10 = vmul.f32 %v8511_v50, %v470_v4  ;;  %v2649_v37 = vsel %vm711_vm0, %v15450_v40, %v2648_v46  ;;  %v2652_v19 = vrot.slane %v14891_v51, 1  ;;  %3912 = vmatpush2.bf16.msra.mxu0 %v7873_v32  ;;  %v15460_v51 = vld [vmem:[#allocation5_spill] sm:$0xff] }
 0x120   : > { %3803 = vmatmul.mubr.bf16.gmra.mxu1 %v2944_v54  ;;  %v9948_v39 = vadd.f32 %v806_v61, %v555_v36  ;;  %v9950_v0 = vadd.f32 %v808_v27, %v556_v34  ;;  %v15453_v60 = vrot.slane %v9873_v30, 2  ;;  %v15454_v54 = vrot.slane %v9883_v42, 2  ;;  %v15458_v36 = vld [vmem:[#allocation37_spill] sm:$0xff] }
 0x121   : > { %v15455_v40 = vrot.slane %v9880_v29, 2  ;;  %v15456_v22 = vrot.slane %v9886_v23, 2  ;;  %v2653_v27 = vsel %vm711_vm0, %v2648_v46, %v2652_v19  ;;  %v15459_v34 = vrot.slane %v15458_v36, 1  ;;  %v15471_v46 = vld [vmem:[#allocation25_spill] sm:$0xff] }
 0x122   : > { %15451 = vst [vmem:[#allocation80_spill] sm:$0xff] %v9948_v39  ;;  %15452 = vst [vmem:[#allocation81_spill] sm:$0xff] %v9950_v0  ;;  %v1194_v24 = vsel %vm1098_vm1, %v15454_v54, %v15453_v60  ;;  %v15461_v15 = vrot.slane %v15460_v51, 1  ;;  %v9976_v32 = vmul.f32 %v8514_v56, %v470_v4  ;;  %v9979_v30 = vmul.f32 %v8522_v59, %v470_v4  ;;  %v465_v39 = vpop.permute.xlu0 %464 }
 0x123   : > { %v1196_v31 = vsel %vm1098_vm1, %v15456_v22, %v15455_v40  ;;  %v9965_v61 = vadd.f32 %v1194_v24, %v940_v47  ;;  %v2951_v22 = vpack.c.bf16 %v2653_v27, %v2649_v37  ;;  %v15463_v47 = vld [vmem:[#allocation42_spill] sm:$0xff]  ;;  %v15470_v37 = vrot.slane %v9382_v38, 1 }
 0x124   : > { %v765_v60 = vsel %vm711_vm0, %v15461_v15, %v15459_v34  ;;  %v9973_v54 = vadd.f32 %v1196_v31, %v941_v16  ;;  %v15464_v16 = vld [vmem:[#allocation39_spill] sm:$0xff]  ;;  %v15466_v31 = vld [vmem:[#allocation40_spill] sm:$0xff]  ;;  %v15468_v34 = vld [vmem:[#allocation46_spill] sm:$0xff]  ;;  %v15472_v24 = vrot.slane %v15471_v46, 1  ;;  %v10011_v38 = vmul.f32 %v8509_v49, %v465_v39 }
 0x125   : > { %15457 = vst [vmem:[#allocation82_spill] sm:$0xff] %v9965_v61  ;;  %v916_v51 = vadd.f32 %v765_v60, %v15463_v47  ;;  %3812 = vmatprep.mubr.bf16.mxu1 %v2951_v22  ;;  %v15465_v40 = vrot.slane %v15464_v16, 2  ;;  %v15467_v36 = vrot.slane %v15466_v31, 2  ;;  %v15469_v29 = vrot.slane %v15468_v34, 1  ;;  %v7876_v22 = vld [vmem:[%s14775_s3 + $0x280] ss:$8 sps:$4 sm:$0xff]  }
 0x126   : > { %15462 = vst [vmem:[#allocation37_spill] sm:$0xff] %v9973_v54  ;;  %v7878_v47 = vld [vmem:[%s14775_s3 + $0x284] ss:$8 sps:$4 sm:$0xff]   ;;  %15475 = vst [vmem:[#allocation42_spill] sm:$0xff] %v10011_v38  ;;  %v15479_v34 = vld [vmem:[#allocation49_spill] sm:$0xff]  ;;  %v15481_v15 = vrot.slane %v9421_v13, 2 }
 0x127   : > { %v1152_v4 = vsel %vm1098_vm1, %v15467_v36, %v15465_v40  ;;  %v773_v27 = vsel %vm711_vm0, %v15470_v37, %v15469_v29  ;;  %v15473_v19 = vmov %v15469_v29  ;;  %v10008_v40 = vmul.f32 %v8506_v44, %v465_v39  ;;  %v15476_v46 = vld [vmem:[#allocation27_spill] sm:$0xff]  ;;  %3913 = vmatprep.subr.bf16.mxu0 %v7878_v47 }
 0x128   : > { %v777_v60 = vsel %vm711_vm0, %v15473_v19, %v15472_v24  ;;  %v1303_v29 = vadd.f32 %v1152_v4, %v916_v51  ;;  %v921_v31 = vadd.f32 %v773_v27, %v15476_v46  ;;  %v10015_v36 = vmul.f32 %v8514_v56, %v465_v39  ;;  %v15478_v24 = vld [vmem:[#allocation8_spill] sm:$0xff]  ;;  %v15482_v61 = vld [vmem:[#allocation43_spill] sm:$0xff]  ;;  %v480_v4 = vpop.permute.xlu1 %479  ;;  %3914 = vmatpush2.bf16.msra.mxu0 %v7876_v22 }
 0x129   : > { %15474 = vst [vmem:[#allocation5_spill] sm:$0xff] %v10008_v40  ;;  %v923_v19 = vadd.f32 %v777_v60, %v15478_v24  ;;  %v15480_v37 = vrot.slane %v15479_v34, 2  ;;  %v15483_v42 = vrot.slane %v15464_v16, 2  ;;  %v10027_v51 = vmul.f32 %v8522_v59, %v465_v39 }
 0x12a   : > { %15477 = vst [vmem:[#allocation39_spill] sm:$0xff] %v10015_v36  ;;  %v1378_v27 = vadd.f32 %v8537_v2, %v1303_v29  ;;  %v15485_v46 = vrot.slane %v9440_v17, 2  ;;  %v8007_v17 = vld [vmem:[%s14775_s3 + $0x174] ss:$8 sps:$4 sm:$0xff]  }
 0x12b   : > { %v1160_v0 = vsel %vm1098_vm1, %v15481_v15, %v15480_v37  ;;  %v1305_v54 = vadd.f32 %v15483_v42, %v15482_v61  ;;  %15484 = vst [vmem:[#allocation40_spill] sm:$0xff] %v10027_v51  ;;  %v15486_v60 = vmov %v15480_v37  ;;  %v10036_v15 = vmul.f32 %v8511_v50, %v465_v39  ;;  %v475_v61 = vpop.permute.xlu0 %474  ;;  %4693 = vmatprep.subr.bf16.mxu0 %v8007_v17 }
 0x12c   : > { %v1164_v24 = vsel %vm1098_vm1, %v15486_v60, %v15485_v46  ;;  %v1308_v13 = vadd.f32 %v1160_v0, %v921_v31  ;;  %v10039_v42 = vmul.f32 %v8516_v57, %v465_v39  ;;  %v10049_v22 = vmax.f32 %v1378_v27, 0.0 }
 0x12d   : > { %15487 = vst [vmem:[#allocation46_spill] sm:$0xff] %v10036_v15  ;;  %v1310_v16 = vadd.f32 %v1164_v24, %v923_v19  ;;  %v10042_v47 = vadd.f32 %v8537_v2, %v1305_v54  ;;  %v10053_v39 = vmul.f32 %v8506_v44, %v480_v4  ;;  %v10056_v19 = vmul.f32 %v8509_v49, %v480_v4 }
 0x12e   : > { %15489 = vst [vmem:[#allocation27_spill] sm:$0xff] %v10049_v22  ;;  %v1383_v31 = vadd.f32 %v8540_v3, %v1308_v13  ;;  %v10061_v37 = vmul.f32 %v8506_v44, %v475_v61  ;;  %v2948_v46 = vpack.c.bf16 %v10049_v22, %v9876_v63  ;;  %v2646_v60 = vrot.slane %v10049_v22, 1 }
 0x12f   : > { %15488 = vst [vmem:[#allocation25_spill] sm:$0xff] %v10042_v47  ;;  %15490 = vst [vmem:[#allocation8_spill] sm:$0xff] %v10053_v39  ;;  %v1385_v54 = vadd.f32 %v8540_v3, %v1310_v16  ;;  %v14899_v34 = vmax.f32 %v10042_v47, 0.0  ;;  %v10069_v24 = vmul.f32 %v8511_v50, %v480_v4  ;;  %v1387_v17 = vadd.f32 %v8540_v3, %v9525_v6 }
 0x130   : > { %15491 = vst [vmem:[#allocation49_spill] sm:$0xff] %v10061_v37  ;;  %v10065_v27 = vmax.f32 %v1383_v31, 0.0  ;;  %v10078_v29 = vmul.f32 %v8509_v49, %v475_v61  ;;  %v10081_v0 = vmul.f32 %v8511_v50, %v475_v61  ;;  %3660 = vmatmul.mubr.bf16.gmra.mxu0 %v2948_v46  ;;  %v15496_v31 = vrot.slane %v9876_v63, 1 }
 0x131   : > { %15493 = vst [vmem:[#allocation83_spill] sm:$0xff] %v10069_v24  ;;  %v10071_v13 = vmax.f32 %v1385_v54, 0.0  ;;  %v2650_v16 = vrot.slane %v14899_v34, 1  ;;  %v10090_v36 = vmax.f32 %v1387_v17, 0.0  ;;  %v10095_v51 = vmul.f32 %v8516_v57, %v480_v4  ;;  %v1484_v17 = vpop.permute.xlu1 %1483 }
 0x132   : > { %15492 = vst [vmem:[#allocation43_spill] sm:$0xff] %v10065_v27  ;;  %15495 = vst [vmem:[#allocation85_spill] sm:$0xff] %v10081_v0  ;;  %v2647_v22 = vsel %vm711_vm0, %v15496_v31, %v2646_v60  ;;  %v2657_v54 = vrot.slane %v10065_v27, 1  ;;  %v14909_v46 = vrot.slane %v10061_v37, 1  ;;  %v10100_v38 = vmul.f32 %v8516_v57, %v475_v61 }
 0x133   : > { %15494 = vst [vmem:[#allocation84_spill] sm:$0xff] %v10071_v13  ;;  %v2955_v47 = vpack.c.bf16 %v10071_v13, %v10065_v27  ;;  %v2651_v34 = vsel %vm711_vm0, %v2646_v60, %v2650_v16  ;;  %15497 = vst [vmem:[#allocation86_spill] sm:$0xff] %v10090_v36  ;;  %v2658_v6 = vrot.slane %v10071_v13, 1  ;;  %v14906_v16 = vrot.slane %v10090_v36, 1 }
 0x134   : > { %15498 = vst [vmem:[#allocation87_spill] sm:$0xff] %v10095_v51  ;;  %v2950_v63 = vpack.c.bf16 %v2651_v34, %v2647_v22  ;;  %15499 = vst [vmem:[#allocation88_spill] sm:$0xff] %v10100_v38  ;;  %v563_v13 = vmul.f32 %v8514_v56, %v480_v4  ;;  %v564_v22 = vmul.f32 %v8522_v59, %v480_v4  ;;  %v15502_v31 = vrot.slane %v10053_v39, 1 }
 0x135   : > { %3669 = vmatprep.mubr.bf16.mxu0 %v2955_v47  ;;  %v2659_v60 = vsel %vm711_vm0, %v2657_v54, %v2658_v6  ;;  %v10110_v34 = vmul.f32 %v8514_v56, %v475_v61  ;;  %v2663_v54 = vsel %vm711_vm0, %v2658_v6, %v14906_v16  ;;  %v10118_v40 = vmul.f32 %v8522_v59, %v475_v61 }
 0x136   : > { %3813 = vmatmul.mubr.bf16.gmra.mxu1 %v2950_v63  ;;  %v15501_v63 = vrot.slane %v9935_v41, 1  ;;  %v2957_v27 = vpack.c.bf16 %v2663_v54, %v2659_v60  ;;  %v15504_v47 = vrot.slane %v10056_v19, 1  ;;  %v15506_v16 = vrot.slane %v10078_v29, 1  ;;  %v15510_v54 = vld [vmem:[#allocation7_spill] sm:$0xff] }
 0x137   : > { %15500 = vst [vmem:[#allocation89_spill] sm:$0xff] %v10110_v34  ;;  %v10127_v34 = vadd.f32 %v15502_v31, %v563_v13  ;;  %v15507_v24 = vrot.slane %v9938_v5, 1  ;;  %v10141_v60 = vmul.f32 %v1484_v17, %v8506_v44  ;;  %v15508_v13 = vld [vmem:[#allocation44_spill] sm:$0xff]  ;;  %v15524_v39 = vrot.slane %v10100_v38, 2 }
 0x138   : > { %v817_v4 = vsel %vm711_vm0, %v15501_v63, %v14909_v46  ;;  %v10131_v15 = vadd.f32 %v15504_v47, %v564_v22  ;;  %3822 = vmatprep.mubr.bf16.mxu1 %v2957_v27  ;;  %v15509_v31 = vrot.slane %v15508_v13, 1  ;;  %v15511_v22 = vrot.slane %v15510_v54, 1  ;;  %v15512_v46 = vld [vmem:[#allocation15_spill] sm:$0xff] }
 0x139   : > { %15503 = vst [vmem:[#allocation90_spill] sm:$0xff] %v10127_v34  ;;  %v819_v63 = vsel %vm711_vm0, %v15507_v24, %v15506_v16  ;;  %v15513_v6 = vrot.slane %v15512_v46, 1  ;;  %v10154_v37 = vadd.f32 %v817_v4, %v9976_v32  ;;  %v15515_v24 = vrot.slane %v10081_v0, 2  ;;  %v15520_v32 = vld [vmem:[#allocation6_spill] sm:$0xff] }
 0x13a   : > { %15505 = vst [vmem:[#allocation91_spill] sm:$0xff] %v10131_v15  ;;  %v770_v47 = vsel %vm711_vm0, %v15511_v22, %v15509_v31  ;;  %v15514_v61 = vmov %v15509_v31  ;;  %v15516_v16 = vrot.slane %v9941_v10, 2  ;;  %v10164_v54 = vmul.f32 %v1484_v17, %v8509_v49  ;;  %v15518_v31 = vld [vmem:[#allocation9_spill] sm:$0xff] }
 0x13b   : > { %v775_v34 = vsel %vm711_vm0, %v15514_v61, %v15513_v6  ;;  %v920_v22 = vadd.f32 %v770_v47, %v15518_v31  ;;  %v10168_v46 = vmul.f32 %v1484_v17, %v8511_v50  ;;  %v10171_v6 = vmul.f32 %v1484_v17, %v8516_v57  ;;  %v15521_v61 = vld [vmem:[#allocation47_spill] sm:$0xff] }
 0x13c   : > { %v10161_v27 = vsel %vm1098_vm1, %v15516_v16, %v15515_v24  ;;  %15517 = vst [vmem:[#allocation44_spill] sm:$0xff] %v10164_v54  ;;  %v922_v4 = vadd.f32 %v775_v34, %v15520_v32  ;;  %v15522_v13 = vrot.slane %v15521_v61, 2  ;;  %v15523_v0 = vrot.slane %v9386_v55, 2 }
 0x13d   : > { %15519 = vst [vmem:[#allocation7_spill] sm:$0xff] %v10171_v6  ;;  %v10180_v16 = vadd.f32 %v819_v63, %v9979_v30  ;;  %v15525_v47 = vrot.slane %v9958_v9, 2  ;;  %v15526_v15 = vrot.slane %v9436_v58, 2  ;;  %v1608_v55 = vmul.f32 %v1484_v17, %v8514_v56  ;;  %v1480_v63 = vpop.permute.xlu0 %1479 }
 0x13e   : > { %v1157_v24 = vsel %vm1098_vm1, %v15523_v0, %v15522_v13  ;;  %v15527_v34 = vmov %v15522_v13  ;;  %v10196_v0 = vmul.f32 %v1484_v17, %v8522_v59  ;;  %v1799_v30 = vrot.slane %v10141_v60, 1 }
 0x13f   : > { %v10187_v31 = vsel %vm1098_vm1, %v15525_v47, %v15524_v39  ;;  %v1162_v32 = vsel %vm1098_vm1, %v15527_v34, %v15526_v15  ;;  %v1307_v51 = vadd.f32 %v1157_v24, %v920_v22  ;;  %v1670_v39 = vmul.f32 %v1480_v63, %v8506_v44  ;;  %v1488_v47 = vpop.permute.xlu1 %1487 }
 0x140   : > { %15528 = vst [vmem:[#allocation15_spill] sm:$0xff] %v10196_v0  ;;  %v1309_v13 = vadd.f32 %v1162_v32, %v922_v4  ;;  %v15529_v61 = vrot.slane %v9500_v35, 1  ;;  %v15530_v15 = vrot.slane %v9561_v33, 1  ;;  %v2167_v24 = vrot.slane %v10168_v46, 2 }
 0x141   : > { %v1382_v58 = vadd.f32 %v8537_v2, %v1307_v51  ;;  %v1606_v34 = vmul.f32 %v1480_v63, %v8514_v56  ;;  %v10213_v32 = vmul.f32 %v1488_v47, %v8506_v44  ;;  %v15533_v35 = vrot.slane %v9552_v12, 2  ;;  %v10281_v54 = vpop.permute.xlu0 %1491 }
 0x142   : > { %v787_v22 = vsel %vm711_vm0, %v15530_v15, %v15529_v61  ;;  %v1384_v60 = vadd.f32 %v8537_v2, %v1309_v13  ;;  %v15534_v33 = vrot.slane %v9588_v52, 2  ;;  %v10223_v61 = vmul.f32 %v1480_v63, %v8522_v59  ;;  %15545 = vst [vmem:[#allocation97_spill] sm:$0xff] %v10281_v54 }
 0x143   : > { %v929_v4 = vadd.f32 %v787_v22, %v9604_v7  ;;  %15531 = vst [vmem:[#allocation9_spill] sm:$0xff] %v10213_v32  ;;  %v10215_v51 = vmax.f32 %v1382_v58, 0.0  ;;  %v1386_v7 = vadd.f32 %v8537_v2, %v9523_v45  ;;  %v1798_v22 = vrot.slane %v1670_v39, 1 }
 0x144   : > { %v1174_v46 = vsel %vm1098_vm1, %v15534_v33, %v15533_v35  ;;  %15535 = vst [vmem:[#allocation47_spill] sm:$0xff] %v10223_v61  ;;  %v10225_v15 = vmax.f32 %v1384_v60, 0.0  ;;  %v2038_v17 = vmul.f32 %v1480_v63, %v8511_v50  ;;  %v10231_v58 = vmul.f32 %v1488_v47, %v8511_v50 }
 0x145   : > { %15532 = vst [vmem:[#allocation6_spill] sm:$0xff] %v10215_v51  ;;  %v1316_v13 = vadd.f32 %v1174_v46, %v929_v4  ;;  %v2654_v12 = vrot.slane %v10215_v51, 1  ;;  %v10237_v33 = vmax.f32 %v1386_v7, 0.0  ;;  %v10241_v4 = vmul.f32 %v1480_v63, %v8509_v49 }
 0x146   : > { %15536 = vst [vmem:[#allocation92_spill] sm:$0xff] %v10225_v15  ;;  %15537 = vst [vmem:[#allocation93_spill] sm:$0xff] %v10231_v58  ;;  %v2954_v52 = vpack.c.bf16 %v10225_v15, %v10215_v51  ;;  %v2655_v60 = vrot.slane %v10225_v15, 1  ;;  %v10244_v45 = vmul.f32 %v1480_v63, %v8516_v57  ;;  %v10247_v39 = vmul.f32 %v1488_v47, %v8514_v56  ;;  %v15541_v15 = vld [vmem:[#allocation51_spill] sm:$0xff] }
 0x147   : > { %v1391_v35 = vadd.f32 %v8540_v3, %v1316_v13  ;;  %15538 = vst [vmem:[#allocation94_spill] sm:$0xff] %v10237_v33  ;;  %v14923_v7 = vrot.slane %v10237_v33, 1  ;;  %v15542_v51 = vrot.slane %v15541_v15, 2  ;;  %v1800_v0 = vsel %vm711_vm0, %v1798_v22, %v1799_v30 }
 0x148   : > { %15539 = vst [vmem:[#allocation95_spill] sm:$0xff] %v10247_v39  ;;  %3670 = vmatmul.mubr.bf16.gmra.mxu0 %v2954_v52  ;;  %v2656_v13 = vsel %vm711_vm0, %v2654_v12, %v2655_v60  ;;  %v2166_v63 = vrot.slane %v2038_v17, 2  ;;  %v10259_v61 = vmul.f32 %v1488_v47, %v8509_v49  ;;  %v1318_v46 = vadd.f32 %v9770_v25, %v9763_v53 }
 0x149   : > { %v10250_v38 = vmax.f32 %v1391_v35, 0.0  ;;  %v1314_v6 = vadd.f32 %v15542_v51, %v9521_v11  ;;  %v2661_v35 = vsel %vm711_vm0, %v2655_v60, %v14923_v7  ;;  %v15544_v51 = vrot.slane %v10213_v32, 1 }
 0x14a   : > { %v2956_v22 = vpack.c.bf16 %v2661_v35, %v2656_v13  ;;  %v1393_v53 = vadd.f32 %v8540_v3, %v1318_v46  ;;  %v1974_v25 = vadd.f32 %v1800_v0, %v1606_v34  ;;  %v10279_v39 = vmul.f32 %v1488_v47, %v8522_v59 }
 0x14b   : > { %15540 = vst [vmem:[#allocation96_spill] sm:$0xff] %v10250_v38  ;;  %v2961_v12 = vpack.c.bf16 %v10250_v38, %v10090_v36  ;;  %v10270_v11 = vadd.f32 %v8540_v3, %v1314_v6  ;;  %v1805_v15 = vsel %vm711_vm0, %v1799_v30, %v15544_v51  ;;  %v2168_v60 = vsel %vm1098_vm1, %v2166_v63, %v2167_v24 }
 0x14c   : > { %v10288_v30 = vmul.f32 %v10281_v54, %v8509_v49  ;;  %3823 = vmatmul.mubr.bf16.gmra.mxu1 %v2956_v22  ;;  %v10290_v0 = vmax.f32 %v1393_v53, 0.0  ;;  %v1976_v34 = vadd.f32 %v1805_v15, %v1608_v55  ;;  %v10293_v46 = vmul.f32 %v1488_v47, %v8516_v57 }
 0x14d   : > { %15543 = vst [vmem:[#allocation51_spill] sm:$0xff] %v10270_v11  ;;  %3679 = vmatprep.mubr.bf16.mxu0 %v2961_v12  ;;  %v14922_v6 = vmax.f32 %v10270_v11, 0.0  ;;  %v15547_v13 = vrot.slane %v10231_v58, 2  ;;  %v10302_v35 = vmul.f32 %v10281_v54, %v8506_v44  ;;  %v10306_v51 = vmul.f32 %v10281_v54, %v8511_v50 }
 0x14e   : > { %15546 = vst [vmem:[#allocation98_spill] sm:$0xff] %v10290_v0  ;;  %v2671_v55 = vrot.slane %v10250_v38, 1  ;;  %v14930_v47 = vrot.slane %v10290_v0, 1  ;;  %v10310_v15 = vadd.f32 %v2168_v60, %v1974_v25  ;;  %v10316_v22 = vmul.f32 %v10281_v54, %v8516_v57  ;;  %v15555_v38 = vld [vmem:[#allocation26_spill] sm:$0xff] }
 0x14f   : > { %v2173_v12 = vsel %vm1098_vm1, %v2167_v24, %v15547_v13  ;;  %v2666_v63 = vrot.slane %v14922_v6, 1  ;;  %15548 = vst [vmem:[#allocation99_spill] sm:$0xff] %v10302_v35  ;;  %15549 = vst [vmem:[#allocation100_spill] sm:$0xff] %v10306_v51  ;;  %v1613_v24 = vmul.f32 %v10281_v54, %v8522_v59  ;;  %v15551_v53 = vrot.slane %v9497_v8, 1  ;;  %v15552_v13 = vld [vmem:[#allocation14_spill] sm:$0xff]  ;;  %v1496_v8 = vpop.permute.xlu1 %1495  ;;  %v15573_v54 = vld [vmem:[#allocation67_spill] sm:$0xff]  ;;  %v1500_v51 = vpop.permute.xlu0 %1499 }
 0x150   : > { %15550 = vst [vmem:[#allocation101_spill] sm:$0xff] %v10316_v22  ;;  %v15553_v6 = vrot.slane %v15552_v13, 1  ;;  %v15554_v7 = vrot.slane %v10090_v36, 1  ;;  %v2673_v60 = vsel %vm711_vm0, %v2671_v55, %v14930_v47  ;;  %v10332_v58 = vadd.f32 %v2173_v12, %v1976_v34 }
 0x151   : > { %v10342_v55 = vmul.f32 %v1496_v8, %v8506_v44  ;;  %v10348_v34 = vmul.f32 %v1496_v8, %v8511_v50  ;;  %v15562_v12 = vrot.slane %v9645_v48, 1  ;;  %v15567_v48 = vrot.slane %v9671_v14, 2 }
 0x152   : > { %v784_v52 = vsel %vm711_vm0, %v15553_v6, %v15551_v53  ;;  %v2667_v25 = vsel %vm711_vm0, %v15554_v7, %v2666_v63  ;;  %v15556_v6 = vrot.slane %v9537_v1, 2  ;;  %v15557_v53 = vld [vmem:[#allocation24_spill] sm:$0xff]  ;;  %v10351_v1 = vmul.f32 %v1496_v8, %v8516_v57 }
 0x153   : > { %v928_v11 = vadd.f32 %v784_v52, %v15555_v38  ;;  %v2963_v13 = vpack.c.bf16 %v2673_v60, %v2667_v25  ;;  %v15558_v17 = vrot.slane %v15557_v53, 2  ;;  %15559 = vst [vmem:[#allocation14_spill] sm:$0xff] %v10342_v55  ;;  %v10345_v52 = vmul.f32 %v1496_v8, %v8509_v49  ;;  %15560 = vst [vmem:[#allocation26_spill] sm:$0xff] %v10348_v34  ;;  %v10458_v32 = vpop.permute.xlu0 %1507 }
 0x154   : > { %v15563_v60 = vrot.slane %v10288_v30, 1  ;;  %v10366_v63 = vmul.f32 %v1496_v8, %v8514_v56  ;;  %15592 = vst [vmem:[#allocation112_spill] sm:$0xff] %v10458_v32 }
 0x155   : > { %v1171_v36 = vsel %vm1098_vm1, %v15558_v17, %v15556_v6  ;;  %3832 = vmatprep.mubr.bf16.mxu1 %v2963_v13  ;;  %v15561_v17 = vrot.slane %v9635_v28, 1  ;;  %v10369_v13 = vmul.f32 %v1496_v8, %v8522_v59  ;;  %v15566_v28 = vrot.slane %v9688_v43, 2 }
 0x156   : > { %v1315_v38 = vadd.f32 %v1171_v36, %v928_v11  ;;  %v10360_v6 = vadd.f32 %v15563_v60, %v1613_v24  ;;  %15565 = vst [vmem:[#allocation102_spill] sm:$0xff] %v10366_v63  ;;  %v15568_v24 = vld [vmem:[#allocation53_spill] sm:$0xff]  ;;  %v10418_v8 = vmul.f32 %v1500_v51, %v8516_v57 }
 0x157   : > { %v795_v25 = vsel %vm711_vm0, %v15562_v12, %v15561_v17  ;;  %v1182_v17 = vsel %vm1098_vm1, %v15567_v48, %v15566_v28  ;;  %v15569_v12 = vld [vmem:[#allocation10_spill] sm:$0xff]  ;;  %v10391_v48 = vmul.f32 %v1500_v51, %v8514_v56 }
 0x158   : > { %15564 = vst [vmem:[#allocation24_spill] sm:$0xff] %v10360_v6  ;;  %v1390_v11 = vadd.f32 %v8537_v2, %v1315_v38  ;;  %v933_v53 = vadd.f32 %v795_v25, %v9699_v26  ;;  %v15570_v60 = vrot.slane %v15569_v12, 2  ;;  %v15572_v25 = vld [vmem:[#allocation66_spill] sm:$0xff]  ;;  %v10404_v12 = vmul.f32 %v1500_v51, %v8509_v49 }
 0x159   : > { %v1317_v47 = vadd.f32 %v15573_v54, %v15572_v25  ;;  %15575 = vst [vmem:[#allocation66_spill] sm:$0xff] %v10391_v48  ;;  %v1504_v25 = vpop.permute.xlu1 %1503  ;;  %v15581_v38 = vrot.slane %v9688_v43, 2  ;;  %v15590_v43 = vrot.slane %v10237_v33, 1 }
 0x15a   : > { %v1313_v7 = vadd.f32 %v15570_v60, %v15568_v24  ;;  %v10380_v36 = vmax.f32 %v1390_v11, 0.0  ;;  %v1320_v26 = vadd.f32 %v1182_v17, %v933_v53  ;;  %v10398_v17 = vmul.f32 %v1500_v51, %v8522_v59 }
 0x15b   : > { %v1392_v54 = vadd.f32 %v8537_v2, %v1317_v47  ;;  %v10401_v24 = vmul.f32 %v1500_v51, %v8506_v44  ;;  %v10408_v60 = vmul.f32 %v1500_v51, %v8511_v50  ;;  %v15580_v47 = vld [vmem:[#allocation63_spill] sm:$0xff]  ;;  %v10421_v48 = vmul.f32 %v1504_v25, %v8514_v56 }
 0x15c   : > { %15571 = vst [vmem:[#allocation53_spill] sm:$0xff] %v10380_v36  ;;  %v10388_v28 = vadd.f32 %v8537_v2, %v1313_v7  ;;  %v2960_v11 = vpack.c.bf16 %v10380_v36, %v10237_v33  ;;  %v1395_v53 = vadd.f32 %v8540_v3, %v1320_v26  ;;  %15576 = vst [vmem:[#allocation67_spill] sm:$0xff] %v10398_v17 }
 0x15d   : > { %15577 = vst [vmem:[#allocation103_spill] sm:$0xff] %v10408_v60  ;;  %v10412_v26 = vmax.f32 %v1392_v54, 0.0  ;;  %v1322_v14 = vadd.f32 %v15581_v38, %v15580_v47  ;;  %15582 = vst [vmem:[#allocation63_spill] sm:$0xff] %v10421_v48  ;;  %v10424_v7 = vmul.f32 %v1504_v25, %v8522_v59  ;;  %v2668_v54 = vrot.slane %v10380_v36, 1  ;;  %v15602_v60 = vld [vmem:[#allocation54_spill] sm:$0xff] }
 0x15e   : > { %15574 = vst [vmem:[#allocation10_spill] sm:$0xff] %v10388_v28  ;;  %3680 = vmatmul.mubr.bf16.gmra.mxu0 %v2960_v11  ;;  %v10410_v6 = vmax.f32 %v1395_v53, 0.0  ;;  %v15584_v17 = vmax.f32 %v10388_v28, 0.0  ;;  %v10436_v51 = vmul.f32 %v1504_v25, %v8506_v44  ;;  %v10439_v47 = vmul.f32 %v1504_v25, %v8509_v49 }
 0x15f   : > { %15579 = vst [vmem:[#allocation105_spill] sm:$0xff] %v10412_v26  ;;  %15583 = vst [vmem:[#allocation106_spill] sm:$0xff] %v10424_v7  ;;  %v10433_v38 = vadd.f32 %v8540_v3, %v1322_v14  ;;  %v10442_v48 = vmul.f32 %v1504_v25, %v8511_v50  ;;  %v10446_v28 = vmul.f32 %v1504_v25, %v8516_v57  ;;  %v15591_v36 = vrot.slane %v10412_v26, 1 }
 0x160   : > { %15578 = vst [vmem:[#allocation104_spill] sm:$0xff] %v10410_v6  ;;  %v2664_v11 = vrot.slane %v15584_v17, 1  ;;  %v2967_v53 = vpack.c.bf16 %v10410_v6, %v10290_v0  ;;  %15586 = vst [vmem:[#allocation108_spill] sm:$0xff] %v10436_v51  ;;  %v2676_v17 = vrot.slane %v10410_v6, 1  ;;  %v15600_v51 = vld [vmem:[#allocation20_spill] sm:$0xff] }
 0x161   : > { %15585 = vst [vmem:[#allocation107_spill] sm:$0xff] %v10433_v38  ;;  %15587 = vst [vmem:[#allocation109_spill] sm:$0xff] %v10439_v47  ;;  %v2670_v7 = vsel %vm711_vm0, %v2668_v54, %v15591_v36  ;;  %v14940_v34 = vmax.f32 %v10433_v38, 0.0  ;;  %v15595_v36 = vrot.slane %v10290_v0, 1 }
 0x162   : > { %15588 = vst [vmem:[#allocation110_spill] sm:$0xff] %v10442_v48  ;;  %15589 = vst [vmem:[#allocation111_spill] sm:$0xff] %v10446_v28  ;;  %3689 = vmatprep.mubr.bf16.mxu0 %v2967_v53  ;;  %v2665_v14 = vsel %vm711_vm0, %v15590_v43, %v2664_v11  ;;  %v10462_v53 = vmul.f32 %v10458_v32, %v8506_v44  ;;  %v10466_v11 = vmul.f32 %v10458_v32, %v8509_v49 }
 0x163   : > { %v2962_v25 = vpack.c.bf16 %v2670_v7, %v2665_v14  ;;  %v2677_v54 = vsel %vm711_vm0, %v15595_v36, %v2676_v17  ;;  %v2680_v43 = vrot.slane %v14940_v34, 1  ;;  %v10477_v7 = vmul.f32 %v10458_v32, %v8511_v50  ;;  %v1512_v34 = vpop.permute.xlu1 %1511 }
 0x164   : > { %15593 = vst [vmem:[#allocation113_spill] sm:$0xff] %v10462_v53  ;;  %15594 = vst [vmem:[#allocation114_spill] sm:$0xff] %v10466_v11  ;;  %v10481_v14 = vmul.f32 %v10458_v32, %v8516_v57  ;;  %v10488_v63 = vmul.f32 %v1512_v34, %v8506_v44  ;;  %v10491_v0 = vmul.f32 %v1512_v34, %v8509_v49  ;;  %v15601_v32 = vrot.slane %v15600_v51, 1 }
 0x165   : > { %15596 = vst [vmem:[#allocation115_spill] sm:$0xff] %v10477_v7  ;;  %3833 = vmatmul.mubr.bf16.gmra.mxu1 %v2962_v25  ;;  %v2681_v6 = vsel %vm711_vm0, %v2676_v17, %v2680_v43  ;;  %v15603_v25 = vrot.slane %v15602_v60, 1  ;;  %v10501_v48 = vmul.f32 %v1512_v34, %v8511_v50  ;;  %v15605_v17 = vld [vmem:[#allocation60_spill] sm:$0xff]  ;;  %v15607_v60 = vld [vmem:[#allocation57_spill] sm:$0xff]  ;;  %v10515_v36 = vmul.f32 %v1512_v34, %v8522_v59 }
 0x166   : > { %15597 = vst [vmem:[#allocation116_spill] sm:$0xff] %v10481_v14  ;;  %15598 = vst [vmem:[#allocation117_spill] sm:$0xff] %v10488_v63  ;;  %v2969_v33 = vpack.c.bf16 %v2681_v6, %v2677_v54  ;;  %v10507_v6 = vmul.f32 %v1512_v34, %v8514_v56  ;;  %v15608_v51 = vrot.slane %v15607_v60, 2  ;;  %v10518_v38 = vmul.f32 %v1512_v34, %v8516_v57  ;;  %v15627_v63 = vld [vmem:[#allocation61_spill] sm:$0xff] }
 0x167   : > { %15599 = vst [vmem:[#allocation118_spill] sm:$0xff] %v10491_v0  ;;  %v793_v55 = vsel %vm711_vm0, %v15603_v25, %v15601_v32  ;;  %15604 = vst [vmem:[#allocation20_spill] sm:$0xff] %v10501_v48  ;;  %v15609_v32 = vld [vmem:[#allocation58_spill] sm:$0xff]  ;;  %v15614_v28 = vrot.slane %v9812_v20, 1  ;;  %v15628_v0 = vrot.slane %v15607_v60, 2 }
 0x168   : > { %v932_v43 = vadd.f32 %v793_v55, %v15605_v17  ;;  %15606 = vst [vmem:[#allocation54_spill] sm:$0xff] %v10507_v6  ;;  %3842 = vmatprep.mubr.bf16.mxu1 %v2969_v33  ;;  %v15610_v54 = vrot.slane %v15609_v32, 2  ;;  %15611 = vst [vmem:[#allocation60_spill] sm:$0xff] %v10515_v36  ;;  %v15613_v17 = vrot.slane %v9738_v21, 1  ;;  %v1516_v32 = vpop.permute.xlu0 %1515  ;;  %v15620_v21 = vld [vmem:[#allocation68_spill] sm:$0xff] }
 0x169   : > { %15612 = vst [vmem:[#allocation57_spill] sm:$0xff] %v10518_v38  ;;  %v10540_v33 = vmul.f32 %v1516_v32, %v8509_v49  ;;  %v15621_v6 = vrot.slane %v15620_v21, 2  ;;  %v1321_v7 = vadd.f32 %v15628_v0, %v15627_v63  ;;  %v15637_v63 = vld [vmem:[#allocation37_spill] sm:$0xff] }
 0x16a   : > { %v1180_v25 = vsel %vm1098_vm1, %v15610_v54, %v15608_v51  ;;  %v801_v47 = vsel %vm711_vm0, %v15614_v28, %v15613_v17  ;;  %v15615_v51 = vrot.slane %v9840_v18, 1  ;;  %v15616_v54 = vmov %v15613_v17  ;;  %v15618_v28 = vld [vmem:[#allocation70_spill] sm:$0xff] }
 0x16b   : > { %v1319_v55 = vadd.f32 %v1180_v25, %v932_v43  ;;  %v937_v34 = vadd.f32 %v801_v47, %v9920_v62  ;;  %v10535_v25 = vmul.f32 %v1516_v32, %v8506_v44  ;;  %v10543_v18 = vmul.f32 %v1516_v32, %v8511_v50 }
 0x16c   : > { %v805_v36 = vsel %vm711_vm0, %v15616_v54, %v15615_v51  ;;  %v15622_v51 = vld [vmem:[#allocation75_spill] sm:$0xff]  ;;  %v15624_v47 = vrot.slane %v9886_v23, 2  ;;  %v15625_v43 = vmov %v15621_v6  ;;  %v10568_v23 = vmul.f32 %v1516_v32, %v8516_v57 }
 0x16d   : > { %15617 = vst [vmem:[#allocation58_spill] sm:$0xff] %v10535_v25  ;;  %v1394_v20 = vadd.f32 %v8537_v2, %v1319_v55  ;;  %v939_v17 = vadd.f32 %v805_v36, %v15618_v28  ;;  %15619 = vst [vmem:[#allocation70_spill] sm:$0xff] %v10543_v18  ;;  %v15623_v54 = vrot.slane %v15622_v51, 2  ;;  %v10562_v51 = vmul.f32 %v1516_v32, %v8514_v56 }
 0x16e   : > { %v1192_v55 = vsel %vm1098_vm1, %v15625_v43, %v15624_v47  ;;  %15631 = vst [vmem:[#allocation119_spill] sm:$0xff] %v10568_v23  ;;  %v1520_v43 = vpop.permute.xlu1 %1519  ;;  %v10575_v0 = vadd.f32 %v8537_v2, %v1321_v7  ;;  %v1403_v53 = vadd.f32 %v8540_v3, %v15637_v63  ;;  %v15651_v23 = vld [vmem:[#allocation64_spill] sm:$0xff] }
 0x16f   : > { %v1188_v62 = vsel %vm1098_vm1, %v15623_v54, %v15621_v6  ;;  %v10555_v48 = vmax.f32 %v1394_v20, 0.0  ;;  %v1326_v28 = vadd.f32 %v1192_v55, %v939_v17  ;;  %15629 = vst [vmem:[#allocation75_spill] sm:$0xff] %v10562_v51  ;;  %v10565_v6 = vmul.f32 %v1516_v32, %v8522_v59 }
 0x170   : > { %v1324_v36 = vadd.f32 %v1188_v62, %v937_v34  ;;  %15632 = vst [vmem:[#allocation120_spill] sm:$0xff] %v10575_v0  ;;  %v10580_v21 = vmul.f32 %v1520_v43, %v8514_v56  ;;  %v14966_v55 = vmax.f32 %v10575_v0, 0.0  ;;  %v10599_v54 = vmul.f32 %v1520_v43, %v8511_v50 }
 0x171   : > { %15626 = vst [vmem:[#allocation68_spill] sm:$0xff] %v10555_v48  ;;  %15630 = vst [vmem:[#allocation61_spill] sm:$0xff] %v10565_v6  ;;  %v2966_v34 = vpack.c.bf16 %v10555_v48, %v10412_v26  ;;  %v1401_v60 = vadd.f32 %v8540_v3, %v1326_v28  ;;  %v2674_v32 = vrot.slane %v10555_v48, 1  ;;  %v10594_v28 = vmul.f32 %v1520_v43, %v8509_v49  ;;  %v10611_v48 = vpop.permute.xlu0 %1523 }
 0x172   : > { %v1399_v20 = vadd.f32 %v8540_v3, %v1324_v36  ;;  %15633 = vst [vmem:[#allocation121_spill] sm:$0xff] %v10580_v21  ;;  %v10591_v36 = vmul.f32 %v1520_v43, %v8506_v44  ;;  %15638 = vst [vmem:[#allocation37_spill] sm:$0xff] %v10599_v54  ;;  %v2678_v7 = vrot.slane %v14966_v55, 1  ;;  %v10609_v17 = vmul.f32 %v1520_v43, %v8516_v57  ;;  %v1528_v6 = vpop.permute.xlu1 %1527 }
 0x173   : > { %3690 = vmatmul.mubr.bf16.gmra.mxu0 %v2966_v34  ;;  %v10586_v47 = vmax.f32 %v1401_v60, 0.0  ;;  %15641 = vst [vmem:[#allocation126_spill] sm:$0xff] %v10611_v48  ;;  %v10613_v21 = vmax.f32 %v1403_v53, 0.0  ;;  %v10619_v51 = vmul.f32 %v10611_v48, %v8506_v44  ;;  %v10627_v55 = vmul.f32 %v10611_v48, %v8511_v50 }
 0x174   : > { %v10584_v62 = vmax.f32 %v1399_v20, 0.0  ;;  %15636 = vst [vmem:[#allocation124_spill] sm:$0xff] %v10591_v36  ;;  %v15639_v20 = vrot.slane %v10412_v26, 1  ;;  %15640 = vst [vmem:[#allocation125_spill] sm:$0xff] %v10609_v17  ;;  %v2679_v53 = vsel %vm711_vm0, %v2674_v32, %v2678_v7  ;;  %v10637_v25 = vmul.f32 %v1520_v43, %v8522_v59  ;;  %v15655_v17 = vld [vmem:[#allocation74_spill] sm:$0xff] }
 0x175   : > { %15635 = vst [vmem:[#allocation123_spill] sm:$0xff] %v10586_v47  ;;  %15642 = vst [vmem:[#allocation127_spill] sm:$0xff] %v10613_v21  ;;  %v2686_v18 = vrot.slane %v10586_v47, 1  ;;  %v14984_v26 = vrot.slane %v10613_v21, 1  ;;  %v10644_v7 = vmul.f32 %v1528_v6, %v8506_v44 }
 0x176   : > { %15634 = vst [vmem:[#allocation122_spill] sm:$0xff] %v10584_v62  ;;  %v2973_v34 = vpack.c.bf16 %v10586_v47, %v10584_v62  ;;  %v2675_v60 = vsel %vm711_vm0, %v15639_v20, %v2674_v32  ;;  %v2685_v63 = vrot.slane %v10584_v62, 1  ;;  %15643 = vst [vmem:[#allocation128_spill] sm:$0xff] %v10619_v51  ;;  %v10623_v20 = vmul.f32 %v10611_v48, %v8509_v49  ;;  %v15660_v32 = vld [vmem:[#allocation73_spill] sm:$0xff] }
 0x177   : > { %15645 = vst [vmem:[#allocation130_spill] sm:$0xff] %v10627_v55  ;;  %v10632_v62 = vmul.f32 %v10611_v48, %v8516_v57  ;;  %v2968_v47 = vpack.c.bf16 %v2679_v53, %v2675_v60  ;;  %15647 = vst [vmem:[#allocation132_spill] sm:$0xff] %v10637_v25  ;;  %v10647_v60 = vmul.f32 %v1528_v6, %v8509_v49  ;;  %v15652_v48 = vrot.slane %v15651_v23, 1  ;;  %v15653_v25 = vld [vmem:[#allocation71_spill] sm:$0xff]  ;;  %v15661_v23 = vld [vmem:[#allocation69_spill] sm:$0xff] }
 0x178   : > { %15644 = vst [vmem:[#allocation129_spill] sm:$0xff] %v10623_v20  ;;  %3699 = vmatprep.mubr.bf16.mxu0 %v2973_v34  ;;  %v2687_v0 = vsel %vm711_vm0, %v2685_v63, %v2686_v18  ;;  %15648 = vst [vmem:[#allocation133_spill] sm:$0xff] %v10644_v7  ;;  %v2691_v43 = vsel %vm711_vm0, %v2686_v18, %v14984_v26  ;;  %v15654_v54 = vrot.slane %v15653_v25, 1  ;;  %v15656_v18 = vrot.slane %v15655_v17, 1  ;;  %v15664_v55 = vld [vmem:[#allocation72_spill] sm:$0xff] }
 0x179   : > { %15646 = vst [vmem:[#allocation131_spill] sm:$0xff] %v10632_v62  ;;  %3843 = vmatmul.mubr.bf16.gmra.mxu1 %v2968_v47  ;;  %15649 = vst [vmem:[#allocation134_spill] sm:$0xff] %v10647_v60  ;;  %v2975_v38 = vpack.c.bf16 %v2691_v43, %v2687_v0  ;;  %v10657_v47 = vmul.f32 %v1528_v6, %v8511_v50  ;;  %v15657_v63 = vmov %v15652_v48  ;;  %v15679_v60 = vrot.slane %v9958_v9, 2 }
 0x17a   : > { %v798_v36 = vsel %vm711_vm0, %v15654_v54, %v15652_v48  ;;  %v803_v53 = vsel %vm711_vm0, %v15657_v63, %v15656_v18  ;;  %v10670_v34 = vmul.f32 %v1528_v6, %v8514_v56  ;;  %v10673_v0 = vmul.f32 %v1528_v6, %v8522_v59  ;;  %v1532_v54 = vpop.permute.xlu0 %1531  ;;  %v15662_v63 = vld [vmem:[#allocation65_spill] sm:$0xff] }
 0x17b   : > { %15650 = vst [vmem:[#allocation135_spill] sm:$0xff] %v10657_v47  ;;  %v10676_v43 = vmul.f32 %v1528_v6, %v8516_v57  ;;  %3852 = vmatprep.mubr.bf16.mxu1 %v2975_v38  ;;  %v936_v25 = vadd.f32 %v798_v36, %v15660_v32  ;;  %v938_v26 = vadd.f32 %v803_v53, %v15661_v23  ;;  %v15663_v18 = vrot.slane %v15662_v63, 2  ;;  %v15667_v6 = vld [vmem:[#allocation79_spill] sm:$0xff] }
 0x17c   : > { %15658 = vst [vmem:[#allocation64_spill] sm:$0xff] %v10670_v34  ;;  %15659 = vst [vmem:[#allocation71_spill] sm:$0xff] %v10673_v0  ;;  %v15665_v34 = vrot.slane %v15664_v55, 2  ;;  %v10688_v62 = vmul.f32 %v1532_v54, %v8506_v44  ;;  %v10691_v38 = vmul.f32 %v1532_v54, %v8509_v49  ;;  %v15668_v36 = vrot.slane %v15667_v6, 2 }
 0x17d   : > { %v15669_v32 = vmov %v15663_v18  ;;  %v10700_v23 = vmul.f32 %v1532_v54, %v8511_v50  ;;  %v10709_v6 = vmul.f32 %v1532_v54, %v8514_v56  ;;  %v10712_v63 = vmul.f32 %v1532_v54, %v8516_v57 }
 0x17e   : > { %v1185_v51 = vsel %vm1098_vm1, %v15665_v34, %v15663_v18  ;;  %15666 = vst [vmem:[#allocation74_spill] sm:$0xff] %v10688_v62  ;;  %v1190_v48 = vsel %vm1098_vm1, %v15669_v32, %v15668_v36  ;;  %v15671_v34 = vrot.slane %v9938_v5, 1  ;;  %v15672_v18 = vld [vmem:[#allocation42_spill] sm:$0xff]  ;;  %v15676_v5 = vld [vmem:[#allocation40_spill] sm:$0xff] }
 0x17f   : > { %v1323_v17 = vadd.f32 %v1185_v51, %v936_v25  ;;  %15670 = vst [vmem:[#allocation73_spill] sm:$0xff] %v10700_v23  ;;  %v1325_v55 = vadd.f32 %v1190_v48, %v938_v26  ;;  %v15673_v7 = vrot.slane %v15672_v18, 1  ;;  %15674 = vst [vmem:[#allocation69_spill] sm:$0xff] %v10709_v6  ;;  %v10716_v25 = vmul.f32 %v1532_v54, %v8522_v59  ;;  %v15677_v36 = vld [vmem:[#allocation82_spill] sm:$0xff]  ;;  %v1536_v18 = vpop.permute.xlu1 %1535 }
 0x180   : > { %v10738_v32 = vmul.f32 %v1536_v18, %v8514_v56 }
 0x181   : > { %v815_v0 = vsel %vm711_vm0, %v15673_v7, %v15671_v34  ;;  %v1398_v51 = vadd.f32 %v8537_v2, %v1323_v17  ;;  %15675 = vst [vmem:[#allocation65_spill] sm:$0xff] %v10716_v25  ;;  %v1400_v26 = vadd.f32 %v8537_v2, %v1325_v55  ;;  %v1402_v7 = vadd.f32 %v8537_v2, %v15677_v36  ;;  %v10761_v36 = vpop.permute.xlu0 %1539 }
 0x182   : > { %v945_v48 = vadd.f32 %v815_v0, %v15676_v5  ;;  %v15680_v17 = vrot.slane %v10039_v42, 2  ;;  %15683 = vst [vmem:[#allocation40_spill] sm:$0xff] %v10738_v32  ;;  %v10759_v55 = vmul.f32 %v1536_v18, %v8516_v57  ;;  %15688 = vst [vmem:[#allocation139_spill] sm:$0xff] %v10761_v36  ;;  %v15691_v32 = vld [vmem:[#allocation78_spill] sm:$0xff]  ;;  %v10774_v47 = vmul.f32 %v10761_v36, %v8506_v44 }
 0x183   : > { %v10724_v53 = vmax.f32 %v1398_v51, 0.0  ;;  %v10732_v6 = vmax.f32 %v1400_v26, 0.0  ;;  %v10734_v5 = vmax.f32 %v1402_v7, 0.0  ;;  %v10741_v51 = vmul.f32 %v1536_v18, %v8522_v59 }
 0x184   : > { %v1202_v54 = vsel %vm1098_vm1, %v15680_v17, %v15679_v60  ;;  %v10750_v7 = vmul.f32 %v1536_v18, %v8506_v44  ;;  %v10753_v17 = vmul.f32 %v1536_v18, %v8509_v49 }
 0x185   : > { %15678 = vst [vmem:[#allocation72_spill] sm:$0xff] %v10724_v53  ;;  %15681 = vst [vmem:[#allocation79_spill] sm:$0xff] %v10732_v6  ;;  %v1332_v0 = vadd.f32 %v1202_v54, %v945_v48  ;;  %v2682_v9 = vrot.slane %v10724_v53, 1  ;;  %v2972_v42 = vpack.c.bf16 %v10732_v6, %v10724_v53  ;;  %v2683_v26 = vrot.slane %v10732_v6, 1  ;;  %v15690_v53 = vld [vmem:[#allocation81_spill] sm:$0xff] }
 0x186   : > { %15682 = vst [vmem:[#allocation42_spill] sm:$0xff] %v10734_v5  ;;  %15684 = vst [vmem:[#allocation82_spill] sm:$0xff] %v10741_v51  ;;  %v14996_v48 = vrot.slane %v10734_v5, 1  ;;  %v10756_v54 = vmul.f32 %v1536_v18, %v8511_v50  ;;  %v15692_v51 = vrot.slane %v15691_v32, 2  ;;  %v10778_v18 = vmul.f32 %v10761_v36, %v8509_v49 }
 0x187   : > { %v1407_v60 = vadd.f32 %v8540_v3, %v1332_v0  ;;  %15685 = vst [vmem:[#allocation136_spill] sm:$0xff] %v10750_v7  ;;  %15686 = vst [vmem:[#allocation137_spill] sm:$0xff] %v10753_v17  ;;  %3700 = vmatmul.mubr.bf16.gmra.mxu0 %v2972_v42  ;;  %v2684_v34 = vsel %vm711_vm0, %v2682_v9, %v2683_v26  ;;  %v1334_v9 = vadd.f32 %v10187_v31, %v10180_v16  ;;  %v1548_v17 = vpop.permute.xlu0 %1547 }
 0x188   : > { %15687 = vst [vmem:[#allocation138_spill] sm:$0xff] %v10756_v54  ;;  %v2689_v6 = vsel %vm711_vm0, %v2683_v26, %v14996_v48  ;;  %v1330_v25 = vadd.f32 %v15692_v51, %v15690_v53  ;;  %15693 = vst [vmem:[#allocation81_spill] sm:$0xff] %v10774_v47  ;;  %v10784_v26 = vmul.f32 %v10761_v36, %v8511_v50 }
 0x189   : > { %v10763_v0 = vmax.f32 %v1407_v60, 0.0  ;;  %15694 = vst [vmem:[#allocation78_spill] sm:$0xff] %v10778_v18  ;;  %v2974_v42 = vpack.c.bf16 %v2689_v6, %v2684_v34  ;;  %v1544_v60 = vpop.permute.xlu1 %1543  ;;  %v10788_v53 = vmul.f32 %v10761_v36, %v8516_v57  ;;  %v1409_v31 = vadd.f32 %v8540_v3, %v1334_v9 }
 0x18a   : > { %15695 = vst [vmem:[#allocation141_spill] sm:$0xff] %v10784_v26  ;;  %v10793_v51 = vadd.f32 %v8540_v3, %v1330_v25  ;;  %v10800_v48 = vmul.f32 %v1544_v60, %v8506_v44  ;;  %v10803_v36 = vmul.f32 %v1544_v60, %v8509_v49  ;;  %v10806_v23 = vmul.f32 %v1544_v60, %v8511_v50 }
 0x18b   : > { %15689 = vst [vmem:[#allocation140_spill] sm:$0xff] %v10763_v0  ;;  %15696 = vst [vmem:[#allocation142_spill] sm:$0xff] %v10788_v53  ;;  %v2979_v32 = vpack.c.bf16 %v10763_v0, %v10613_v21  ;;  %3853 = vmatmul.mubr.bf16.gmra.mxu1 %v2974_v42  ;;  %v10812_v16 = vmax.f32 %v1409_v31, 0.0  ;;  %v10817_v54 = vmul.f32 %v1544_v60, %v8516_v57  ;;  %v2699_v31 = vrot.slane %v10763_v0, 1 }
 0x18c   : > { %15697 = vst [vmem:[#allocation143_spill] sm:$0xff] %v10793_v51  ;;  %15698 = vst [vmem:[#allocation144_spill] sm:$0xff] %v10800_v48  ;;  %v15010_v25 = vmax.f32 %v10793_v51, 0.0  ;;  %v10822_v62 = vmul.f32 %v1544_v60, %v8514_v56  ;;  %v10825_v34 = vmul.f32 %v1544_v60, %v8522_v59  ;;  %v15704_v51 = vrot.slane %v9935_v41, 1 }
 0x18d   : > { %3709 = vmatprep.mubr.bf16.mxu0 %v2979_v32  ;;  %15699 = vst [vmem:[#allocation145_spill] sm:$0xff] %v10806_v23  ;;  %15700 = vst [vmem:[#allocation146_spill] sm:$0xff] %v10812_v16  ;;  %v15017_v6 = vrot.slane %v10812_v16, 1  ;;  %v10844_v9 = vmul.f32 %v1548_v17, %v8506_v44  ;;  %v10847_v32 = vmul.f32 %v1548_v17, %v8509_v49  ;;  %v1552_v42 = vpop.permute.xlu1 %1551  ;;  %v15715_v23 = vld [vmem:[#allocation46_spill] sm:$0xff]  ;;  %v15719_v41 = vrot.slane %v10078_v29, 1 }
 0x18e   : > { %15701 = vst [vmem:[#allocation147_spill] sm:$0xff] %v10817_v54  ;;  %v2694_v7 = vrot.slane %v15010_v25, 1  ;;  %15702 = vst [vmem:[#allocation148_spill] sm:$0xff] %v10822_v62  ;;  %v15705_v25 = vld [vmem:[#allocation5_spill] sm:$0xff]  ;;  %v15707_v62 = vrot.slane %v10613_v21, 1  ;;  %v15716_v48 = vrot.slane %v15715_v23, 2 }
 0x18f   : > { %15703 = vst [vmem:[#allocation149_spill] sm:$0xff] %v10825_v34  ;;  %v15706_v26 = vrot.slane %v15705_v25, 1  ;;  %v2701_v0 = vsel %vm711_vm0, %v2699_v31, %v15017_v6  ;;  %15708 = vst [vmem:[#allocation5_spill] sm:$0xff] %v10844_v9  ;;  %v10861_v31 = vmul.f32 %v1548_v17, %v8516_v57  ;;  %v15714_v6 = vrot.slane %v9941_v10, 2 }
 0x190   : > { %v2695_v60 = vsel %vm711_vm0, %v15707_v62, %v2694_v7  ;;  %v10855_v62 = vmul.f32 %v1548_v17, %v8522_v59  ;;  %v10858_v7 = vmul.f32 %v1548_v17, %v8511_v50 }
 0x191   : > { %v812_v47 = vsel %vm711_vm0, %v15706_v26, %v15704_v51  ;;  %v2981_v25 = vpack.c.bf16 %v2701_v0, %v2695_v60  ;;  %v10851_v26 = vmul.f32 %v1548_v17, %v8514_v56  ;;  %v15710_v51 = vld [vmem:[#allocation39_spill] sm:$0xff]  ;;  %15713 = vst [vmem:[#allocation152_spill] sm:$0xff] %v10861_v31  ;;  %v1199_v0 = vsel %vm1098_vm1, %v15716_v48, %v15714_v6  ;;  %v15721_v17 = vld [vmem:[#allocation76_spill] sm:$0xff] }
 0x192   : > { %v944_v21 = vadd.f32 %v812_v47, %v15710_v51  ;;  %15711 = vst [vmem:[#allocation39_spill] sm:$0xff] %v10855_v62  ;;  %15712 = vst [vmem:[#allocation151_spill] sm:$0xff] %v10858_v7  ;;  %v10869_v60 = vmul.f32 %v1552_v42, %v8514_v56  ;;  %v15718_v51 = vrot.slane %v10056_v19, 1  ;;  %v15720_v62 = vld [vmem:[#allocation80_spill] sm:$0xff]  ;;  %v15722_v54 = vrot.slane %v15721_v17, 2 }
 0x193   : > { %15709 = vst [vmem:[#allocation150_spill] sm:$0xff] %v10851_v26  ;;  %3862 = vmatprep.mubr.bf16.mxu1 %v2981_v25  ;;  %v10882_v48 = vmul.f32 %v1552_v42, %v8506_v44  ;;  %v10885_v6 = vmul.f32 %v1552_v42, %v8509_v49  ;;  %v10896_v25 = vmul.f32 %v1552_v42, %v8522_v59  ;;  %v15729_v17 = vld [vmem:[#allocation88_spill] sm:$0xff] }
 0x194   : > { %15717 = vst [vmem:[#allocation46_spill] sm:$0xff] %v10869_v60  ;;  %v1331_v47 = vadd.f32 %v1199_v0, %v944_v21  ;;  %v823_v26 = vsel %vm711_vm0, %v15719_v41, %v15718_v51  ;;  %v1329_v34 = vadd.f32 %v15722_v54, %v15720_v62  ;;  %v1333_v21 = vadd.f32 %v10161_v27, %v10154_v37  ;;  %v15727_v0 = vld [vmem:[#allocation87_spill] sm:$0xff]  ;;  %v10908_v37 = vpop.permute.xlu0 %1555 }
 0x195   : > { %15723 = vst [vmem:[#allocation80_spill] sm:$0xff] %v10882_v48  ;;  %v949_v29 = vadd.f32 %v823_v26, %v10118_v40  ;;  %15725 = vst [vmem:[#allocation153_spill] sm:$0xff] %v10896_v25  ;;  %v10899_v62 = vmul.f32 %v1552_v42, %v8511_v50  ;;  %v15728_v51 = vrot.slane %v15727_v0, 2  ;;  %v10916_v25 = vmul.f32 %v1552_v42, %v8516_v57 }
 0x196   : > { %v1406_v19 = vadd.f32 %v8537_v2, %v1331_v47  ;;  %v10892_v41 = vadd.f32 %v8537_v2, %v1329_v34  ;;  %v15730_v47 = vrot.slane %v15729_v17, 2  ;;  %15732 = vst [vmem:[#allocation88_spill] sm:$0xff] %v10908_v37  ;;  %v1408_v34 = vadd.f32 %v8537_v2, %v1333_v21  ;;  %v1560_v21 = vpop.permute.xlu1 %1559 }
 0x197   : > { %15726 = vst [vmem:[#allocation154_spill] sm:$0xff] %v10899_v62  ;;  %15733 = vst [vmem:[#allocation155_spill] sm:$0xff] %v10916_v25  ;;  %v10932_v42 = vmul.f32 %v10908_v37, %v8509_v49  ;;  %v10936_v23 = vmul.f32 %v10908_v37, %v8511_v50  ;;  %v10948_v60 = vmul.f32 %v1560_v21, %v8506_v44  ;;  %v15742_v62 = vld [vmem:[#allocation91_spill] sm:$0xff] }
 0x198   : > { %15724 = vst [vmem:[#allocation76_spill] sm:$0xff] %v10892_v41  ;;  %v1210_v40 = vsel %vm1098_vm1, %v15730_v47, %v15728_v51  ;;  %v10906_v26 = vmax.f32 %v1406_v19, 0.0  ;;  %v15021_v54 = vmax.f32 %v10892_v41, 0.0  ;;  %v10921_v17 = vmax.f32 %v1408_v34, 0.0  ;;  %v1564_v9 = vpop.permute.xlu0 %1563 }
 0x199   : > { %v1336_v27 = vadd.f32 %v1210_v40, %v949_v29  ;;  %v10928_v40 = vmul.f32 %v10908_v37, %v8506_v44  ;;  %15736 = vst [vmem:[#allocation158_spill] sm:$0xff] %v10932_v42  ;;  %15737 = vst [vmem:[#allocation159_spill] sm:$0xff] %v10936_v23  ;;  %v10951_v41 = vmul.f32 %v1560_v21, %v8509_v49  ;;  %v15753_v23 = vld [vmem:[#allocation8_spill] sm:$0xff] }
 0x19a   : > { %15731 = vst [vmem:[#allocation87_spill] sm:$0xff] %v10906_v26  ;;  %v2978_v19 = vpack.c.bf16 %v10906_v26, %v10734_v5  ;;  %15734 = vst [vmem:[#allocation156_spill] sm:$0xff] %v10921_v17  ;;  %v2692_v29 = vrot.slane %v15021_v54, 1  ;;  %v2696_v54 = vrot.slane %v10906_v26, 1  ;;  %v15038_v47 = vrot.slane %v10921_v17, 1 }
 0x19b   : > { %v1411_v51 = vadd.f32 %v8540_v3, %v1336_v27  ;;  %15735 = vst [vmem:[#allocation157_spill] sm:$0xff] %v10928_v40  ;;  %v10940_v27 = vmul.f32 %v10908_v37, %v8516_v57  ;;  %15740 = vst [vmem:[#allocation162_spill] sm:$0xff] %v10948_v60  ;;  %v15744_v37 = vrot.slane %v10734_v5, 1  ;;  %v10965_v48 = vmul.f32 %v1560_v21, %v8511_v50  ;;  %v1568_v5 = vpop.permute.xlu1 %1567 }
 0x19c   : > { %3710 = vmatmul.mubr.bf16.gmra.mxu0 %v2978_v19  ;;  %15741 = vst [vmem:[#allocation163_spill] sm:$0xff] %v10951_v41  ;;  %v15743_v19 = vrot.slane %v15727_v0, 2  ;;  %v2698_v10 = vsel %vm711_vm0, %v2696_v54, %v15038_v47  ;;  %v10968_v31 = vmul.f32 %v1560_v21, %v8516_v57  ;;  %v10986_v47 = vmul.f32 %v1564_v9, %v8506_v44 }
 0x19d   : > { %15738 = vst [vmem:[#allocation160_spill] sm:$0xff] %v10940_v27  ;;  %v10942_v34 = vmax.f32 %v1411_v51, 0.0  ;;  %v2693_v26 = vsel %vm711_vm0, %v15744_v37, %v2692_v29  ;;  %15745 = vst [vmem:[#allocation91_spill] sm:$0xff] %v10965_v48  ;;  %v15752_v54 = vrot.slane %v10812_v16, 1  ;;  %v11006_v29 = vmul.f32 %v1564_v9, %v8514_v56 }
 0x19e   : > { %v1338_v7 = vadd.f32 %v15743_v19, %v15742_v62  ;;  %v2980_v25 = vpack.c.bf16 %v2698_v10, %v2693_v26  ;;  %15746 = vst [vmem:[#allocation164_spill] sm:$0xff] %v10968_v31  ;;  %v10979_v10 = vmul.f32 %v1560_v21, %v8514_v56  ;;  %v10982_v26 = vmul.f32 %v1560_v21, %v8522_v59  ;;  %v15755_v19 = vld [vmem:[#allocation49_spill] sm:$0xff] }
 0x19f   : > { %15739 = vst [vmem:[#allocation161_spill] sm:$0xff] %v10942_v34  ;;  %v2985_v51 = vpack.c.bf16 %v10942_v34, %v10812_v16  ;;  %v2704_v0 = vrot.slane %v10942_v34, 1  ;;  %15750 = vst [vmem:[#allocation168_spill] sm:$0xff] %v10986_v47  ;;  %v15756_v60 = vrot.slane %v15755_v19, 1  ;;  %v11009_v48 = vmul.f32 %v1564_v9, %v8522_v59  ;;  %v15761_v19 = vld [vmem:[#allocation83_spill] sm:$0xff] }
 0x1a0   : > { %v10971_v62 = vadd.f32 %v8540_v3, %v1338_v7  ;;  %3863 = vmatmul.mubr.bf16.gmra.mxu1 %v2980_v25  ;;  %15748 = vst [vmem:[#allocation166_spill] sm:$0xff] %v10979_v10  ;;  %15749 = vst [vmem:[#allocation167_spill] sm:$0xff] %v10982_v26  ;;  %v15754_v10 = vrot.slane %v15753_v23, 1  ;;  %v11012_v25 = vmul.f32 %v1564_v9, %v8511_v50 }
 0x1a1   : > { %3719 = vmatprep.mubr.bf16.mxu0 %v2985_v51  ;;  %v10992_v51 = vmul.f32 %v1564_v9, %v8509_v49  ;;  %v2705_v21 = vsel %vm711_vm0, %v15752_v54, %v2704_v0  ;;  %15757 = vst [vmem:[#allocation8_spill] sm:$0xff] %v11006_v29  ;;  %15758 = vst [vmem:[#allocation49_spill] sm:$0xff] %v11009_v48  ;;  %v15760_v54 = vld [vmem:[#allocation89_spill] sm:$0xff]  ;;  %v11018_v23 = vmul.f32 %v1564_v9, %v8516_v57  ;;  %v15776_v48 = vld [vmem:[#allocation90_spill] sm:$0xff] }
 0x1a2   : > { %15747 = vst [vmem:[#allocation165_spill] sm:$0xff] %v10971_v62  ;;  %v15046_v7 = vmax.f32 %v10971_v62, 0.0  ;;  %v821_v37 = vsel %vm711_vm0, %v15756_v60, %v15754_v10  ;;  %15759 = vst [vmem:[#allocation170_spill] sm:$0xff] %v11012_v25  ;;  %v15762_v60 = vrot.slane %v15761_v19, 2  ;;  %v15763_v10 = vld [vmem:[#allocation85_spill] sm:$0xff]  ;;  %v11027_v27 = vmul.f32 %v1568_v5, %v8514_v56 }
 0x1a3   : > { %15751 = vst [vmem:[#allocation169_spill] sm:$0xff] %v10992_v51  ;;  %v948_v16 = vadd.f32 %v821_v37, %v15760_v54  ;;  %v15764_v40 = vrot.slane %v15763_v10, 2  ;;  %v11029_v54 = vpop.permute.xlu0 %1571  ;;  %v11035_v9 = vmul.f32 %v1568_v5, %v8509_v49  ;;  %v15771_v10 = vld [vmem:[#allocation21_spill] sm:$0xff]  ;;  %v15786_v51 = vld [vmem:[#allocation44_spill] sm:$0xff] }
 0x1a4   : > { %v2708_v34 = vrot.slane %v15046_v7, 1  ;;  %15765 = vst [vmem:[#allocation89_spill] sm:$0xff] %v11027_v27  ;;  %15766 = vst [vmem:[#allocation83_spill] sm:$0xff] %v11029_v54  ;;  %v15772_v47 = vrot.slane %v15771_v10, 2  ;;  %v15777_v27 = vrot.slane %v15761_v19, 2  ;;  %v11068_v10 = vmul.f32 %v1568_v5, %v8522_v59 }
 0x1a5   : > { %v1208_v29 = vsel %vm1098_vm1, %v15764_v40, %v15762_v60  ;;  %15768 = vst [vmem:[#allocation171_spill] sm:$0xff] %v11035_v9  ;;  %v11044_v60 = vmul.f32 %v1568_v5, %v8511_v50  ;;  %v11091_v25 = vmul.f32 %v11029_v54, %v8516_v57  ;;  %v15787_v41 = vrot.slane %v15786_v51, 1  ;;  %v15795_v51 = vld [vmem:[#allocation7_spill] sm:$0xff] }
 0x1a6   : > { %v2709_v7 = vsel %vm711_vm0, %v2704_v0, %v2708_v34  ;;  %v1335_v37 = vadd.f32 %v1208_v29, %v948_v16  ;;  %v11032_v34 = vmul.f32 %v1568_v5, %v8506_v44  ;;  %v15769_v0 = vld [vmem:[#allocation22_spill] sm:$0xff]  ;;  %v11047_v16 = vmul.f32 %v1568_v5, %v8516_v57  ;;  %15780 = vst [vmem:[#allocation172_spill] sm:$0xff] %v11068_v10 }
 0x1a7   : > { %v2987_v31 = vpack.c.bf16 %v2709_v7, %v2705_v21  ;;  %v15770_v62 = vrot.slane %v15769_v0, 2  ;;  %v15773_v7 = vld [vmem:[#allocation31_spill] sm:$0xff]  ;;  %15774 = vst [vmem:[#allocation22_spill] sm:$0xff] %v11044_v60  ;;  %v1337_v26 = vadd.f32 %v15777_v27, %v15776_v48  ;;  %v11074_v27 = vmul.f32 %v11029_v54, %v8511_v50  ;;  %15784 = vst [vmem:[#allocation176_spill] sm:$0xff] %v11091_v25 }
 0x1a8   : > { %15767 = vst [vmem:[#allocation85_spill] sm:$0xff] %v11032_v34  ;;  %v15060_v21 = vrot.slane %v15773_v7, 2  ;;  %15775 = vst [vmem:[#allocation21_spill] sm:$0xff] %v11047_v16  ;;  %v1410_v29 = vadd.f32 %v8537_v2, %v1335_v37  ;;  %v15790_v60 = vmov %v15787_v41  ;;  %v15793_v16 = vld [vmem:[#allocation15_spill] sm:$0xff] }
 0x1a9   : > { %v2763_v40 = vsel %vm1098_vm1, %v15772_v47, %v15770_v62  ;;  %3872 = vmatprep.mubr.bf16.mxu1 %v2987_v31  ;;  %v11056_v47 = vmul.f32 %v11029_v54, %v8506_v44  ;;  %v11060_v31 = vmul.f32 %v11029_v54, %v8509_v49  ;;  %15782 = vst [vmem:[#allocation174_spill] sm:$0xff] %v11074_v27 }
 0x1aa   : > { %v2767_v37 = vsel %vm1098_vm1, %v15770_v62, %v15060_v21  ;;  %v11070_v48 = vmax.f32 %v1410_v29, 0.0  ;;  %v11080_v0 = vadd.f32 %v8537_v2, %v1337_v26  ;;  %v1576_v62 = vpop.permute.xlu1 %1575 }
 0x1ab   : > { %15778 = vst [vmem:[#allocation31_spill] sm:$0xff] %v11056_v47  ;;  %15779 = vst [vmem:[#allocation90_spill] sm:$0xff] %v11060_v31  ;;  %v2923_v19 = vpack.c.bf16 %v2767_v37, %v2763_v40  ;;  %v11096_v29 = vmul.f32 %v1576_v62, %v8506_v44  ;;  %v15789_v37 = vrot.slane %v10259_v61, 1  ;;  %v15792_v47 = vld [vmem:[#allocation47_spill] sm:$0xff] }
 0x1ac   : > { %15781 = vst [vmem:[#allocation173_spill] sm:$0xff] %v11070_v48  ;;  %15783 = vst [vmem:[#allocation175_spill] sm:$0xff] %v11080_v0  ;;  %v2984_v21 = vpack.c.bf16 %v11070_v48, %v10921_v17  ;;  %v2702_v10 = vrot.slane %v11070_v48, 1  ;;  %v15074_v26 = vmax.f32 %v11080_v0, 0.0  ;;  %v15788_v48 = vrot.slane %v10241_v4, 1 }
 0x1ad   : > { %15785 = vst [vmem:[#allocation177_spill] sm:$0xff] %v11096_v29  ;;  %v1807_v54 = vsel %vm711_vm0, %v15790_v60, %v15789_v37  ;;  %v15796_v60 = vrot.slane %v15795_v51, 2  ;;  %v15810_v51 = vld [vmem:[#allocation29_spill] sm:$0xff] }
 0x1ae   : > { %3720 = vmatmul.mubr.bf16.gmra.mxu0 %v2984_v21  ;;  %v1803_v40 = vsel %vm711_vm0, %v15788_v48, %v15787_v41  ;;  %v15791_v21 = vrot.slane %v10921_v17, 1  ;;  %v2706_v27 = vrot.slane %v15074_v26, 1  ;;  %v1977_v4 = vadd.f32 %v1807_v54, %v15793_v16 }
 0x1af   : > { %3915 = vmatprep.mubr.bf16.mxu0 %v2923_v19  ;;  %v1975_v34 = vadd.f32 %v1803_v40, %v15792_v47  ;;  %v11116_v41 = vmul.f32 %v1576_v62, %v8509_v49  ;;  %v11119_v48 = vmul.f32 %v1576_v62, %v8511_v50  ;;  %v15797_v19 = vrot.slane %v10244_v45, 2  ;;  %v1580_v40 = vpop.permute.xlu0 %1579 }
 0x1b0   : > { %v2703_v5 = vsel %vm711_vm0, %v15791_v21, %v2702_v10  ;;  %v15798_v21 = vrot.slane %v10293_v46, 2  ;;  %v15799_v26 = vmov %v15796_v60  ;;  %v2707_v54 = vsel %vm711_vm0, %v2702_v10, %v2706_v27 }
 0x1b1   : > { %15794 = vst [vmem:[#allocation44_spill] sm:$0xff] %v11119_v48  ;;  %v2171_v37 = vsel %vm1098_vm1, %v15797_v19, %v15796_v60  ;;  %v11133_v16 = vmul.f32 %v1576_v62, %v8516_v57  ;;  %v2986_v9 = vpack.c.bf16 %v2707_v54, %v2703_v5  ;;  %v11137_v45 = vmul.f32 %v1576_v62, %v8514_v56  ;;  %v1584_v19 = vpop.permute.xlu1 %1583  ;;  %v15808_v54 = vld [vmem:[#allocation30_spill] sm:$0xff] }
 0x1b2   : > { %v2175_v47 = vsel %vm1098_vm1, %v15799_v26, %v15798_v21  ;;  %v2343_v0 = vadd.f32 %v2171_v37, %v1975_v34  ;;  %v11140_v60 = vmul.f32 %v1576_v62, %v8522_v59  ;;  %v11146_v27 = vmul.f32 %v1580_v40, %v8506_v44  ;;  %v15812_v37 = vld [vmem:[#allocation32_spill] sm:$0xff] }
 0x1b3   : > { %15800 = vst [vmem:[#allocation47_spill] sm:$0xff] %v11133_v16  ;;  %v2345_v17 = vadd.f32 %v2175_v47, %v1977_v4  ;;  %15801 = vst [vmem:[#allocation15_spill] sm:$0xff] %v11137_v45  ;;  %3873 = vmatmul.mubr.bf16.gmra.mxu1 %v2986_v9  ;;  %v11151_v4 = vmul.f32 %v1580_v40, %v8509_v49  ;;  %v11154_v62 = vmul.f32 %v1580_v40, %v8511_v50 }
 0x1b4   : > { %v2407_v26 = vadd.f32 %v2343_v0, %v8540_v3  ;;  %15802 = vst [vmem:[#allocation7_spill] sm:$0xff] %v11146_v27  ;;  %v11162_v21 = vmul.f32 %v1580_v40, %v8516_v57  ;;  %v11165_v9 = vmul.f32 %v1580_v40, %v8514_v56  ;;  %v11168_v47 = vmul.f32 %v1580_v40, %v8522_v59  ;;  %v11185_v40 = vpop.permute.xlu0 %1587 }
 0x1b5   : > { %v2409_v10 = vadd.f32 %v2345_v17, %v8540_v3  ;;  %15803 = vst [vmem:[#allocation178_spill] sm:$0xff] %v11154_v62  ;;  %v15809_v5 = vrot.slane %v15808_v54, 2  ;;  %v15811_v34 = vrot.slane %v15810_v51, 2  ;;  %v11180_v48 = vmul.f32 %v1584_v19, %v8514_v56  ;;  %15815 = vst [vmem:[#allocation32_spill] sm:$0xff] %v11185_v40  ;;  %v15817_v62 = vld [vmem:[#allocation34_spill] sm:$0xff]  ;;  %v15819_v54 = vld [vmem:[#allocation33_spill] sm:$0xff] }
 0x1b6   : > { %v11157_v0 = vmax.f32 %v2407_v26, 0.0  ;;  %15806 = vst [vmem:[#allocation181_spill] sm:$0xff] %v11165_v9  ;;  %15807 = vst [vmem:[#allocation182_spill] sm:$0xff] %v11168_v47  ;;  %v15092_v26 = vrot.slane %v15812_v37, 2  ;;  %v11183_v9 = vmul.f32 %v1584_v19, %v8506_v44  ;;  %v11206_v51 = vmul.f32 %v11185_v40, %v8506_v44 }
 0x1b7   : > { %v11159_v17 = vmax.f32 %v2409_v10, 0.0  ;;  %v2760_v31 = vsel %vm1098_vm1, %v15811_v34, %v15809_v5  ;;  %15813 = vst [vmem:[#allocation30_spill] sm:$0xff] %v11180_v48  ;;  %v11190_v34 = vmul.f32 %v1584_v19, %v8509_v49  ;;  %v11202_v48 = vmul.f32 %v1584_v19, %v8516_v57 }
 0x1b8   : > { %15804 = vst [vmem:[#allocation179_spill] sm:$0xff] %v11157_v0  ;;  %15814 = vst [vmem:[#allocation29_spill] sm:$0xff] %v11183_v9  ;;  %v2765_v45 = vsel %vm1098_vm1, %v15809_v5, %v15092_v26  ;;  %v15818_v27 = vmax.f32 %v15817_v62, 0.0  ;;  %v2775_v16 = vrot.slane %v15819_v54, 2  ;;  %v15820_v5 = vld [vmem:[#allocation36_spill] sm:$0xff]  ;;  %v2408_v26 = vadd.f32 %v10332_v58, %v8537_v2  ;;  %v11252_v9 = vpop.f32.mrf.mxu0 }
 0x1b9   : > { %15805 = vst [vmem:[#allocation180_spill] sm:$0xff] %v11159_v17  ;;  %v4469_v10 = vpack.c.bf16 %v11159_v17, %v11157_v0  ;;  %v11199_v0 = vmul.f32 %v1584_v19, %v8511_v50  ;;  %v2922_v29 = vpack.c.bf16 %v2765_v45, %v2760_v31  ;;  %15816 = vst [vmem:[#allocation183_spill] sm:$0xff] %v11206_v51  ;;  %v15831_v62 = vrot.slane %v10288_v30, 1  ;;  %v1596_v51 = vpop.permute.xlu0 %1595 }
 0x1ba   : > { %v2770_v47 = vrot.slane %v15818_v27, 2  ;;  %v11213_v17 = vmul.f32 %v1584_v19, %v8522_v59  ;;  %v11218_v31 = vmul.f32 %v11185_v40, %v8509_v49  ;;  %v2406_v45 = vadd.f32 %v10310_v15, %v8537_v2  ;;  %15827 = vst [vmem:[#allocation186_spill] sm:$0xff] %v11252_v9 }
 0x1bb   : > { %4572 = vmatprep.mubr.bf16.mxu1 %v4469_v10  ;;  %v15093_v10 = vrot.slane %v15820_v5, 2  ;;  %3916 = vmatmul.mubr.bf16.vlgmr.msra.gmra.mxu0 %v2922_v29  ;;  %v15822_v27 = vrot.slane %v15773_v7, 2  ;;  %v8008_v29 = vld [vmem:[%s14775_s3 + $0x170] ss:$8 sps:$4 sm:$0xff]   ;;  %v11236_v15 = vmul.f32 %v11185_v40, %v8511_v50  ;;  %v11240_v7 = vmul.f32 %v11185_v40, %v8516_v57 }
 0x1bc   : > { %15821 = vst [vmem:[#allocation34_spill] sm:$0xff] %v11213_v17  ;;  %4694 = vmatpush1.bf16.msra.mxu0 %v8008_v29  ;;  %v1592_v17 = vpop.permute.xlu1 %1591  ;;  %v15832_v40 = vrot.slane %v10259_v61, 1  ;;  %v15833_v29 = vrot.slane %v10404_v12, 1  ;;  %v15834_v58 = vrot.slane %v10345_v52, 1  ;;  %v8011_v52 = vld [vmem:[%s14775_s3 + $0x154] ss:$8 sps:$4 sm:$0xff]  }
 0x1bd   : > { %v2771_v54 = vsel %vm1098_vm1, %v15822_v27, %v2770_v47  ;;  %v2777_v19 = vsel %vm1098_vm1, %v2775_v16, %v15093_v10  ;;  %15823 = vst [vmem:[#allocation33_spill] sm:$0xff] %v11236_v15  ;;  %15824 = vst [vmem:[#allocation36_spill] sm:$0xff] %v11240_v7  ;;  %v11242_v27 = vmax.f32 %v2406_v45, 0.0  ;;  %v8009_v16 = vld [vmem:[%s14775_s3 + $0x164] ss:$8 sps:$4 sm:$0xff]   ;;  %v11250_v10 = vmax.f32 %v2408_v26, 0.0  ;;  %v11305_v15 = vpop.f32.mrf.mxu0 }
 0x1be   : > { %v2929_v47 = vpack.c.bf16 %v2777_v19, %v2771_v54  ;;  %4695 = vmatprep.subr.bf16.mxu0 %v8009_v16  ;;  %v11256_v45 = vmul.f32 %v1592_v17, %v8506_v44  ;;  %v11259_v54 = vmul.f32 %v1592_v17, %v8509_v49  ;;  %v11262_v19 = vmul.f32 %v1592_v17, %v8511_v50 }
 0x1bf   : > { %15825 = vst [vmem:[#allocation184_spill] sm:$0xff] %v11242_v27  ;;  %15826 = vst [vmem:[#allocation185_spill] sm:$0xff] %v11250_v10  ;;  %v4468_v16 = vpack.c.bf16 %v11250_v10, %v11242_v27  ;;  %v11267_v26 = vmul.f32 %v1592_v17, %v8516_v57  ;;  %v1817_v9 = vsel %vm711_vm0, %v15834_v58, %v15833_v29  ;;  %v8010_v10 = vld [vmem:[%s14775_s3 + $0x160] ss:$8 sps:$4 sm:$0xff]   ;;  %v15836_v29 = vrot.slane %v10316_v22, 2 }
 0x1c0   : > { %3925 = vmatprep.mubr.bf16.mxu0 %v2929_v47  ;;  %15828 = vst [vmem:[#allocation187_spill] sm:$0xff] %v11256_v45  ;;  %15829 = vst [vmem:[#allocation188_spill] sm:$0xff] %v11262_v19  ;;  %v1811_v47 = vsel %vm711_vm0, %v15832_v40, %v15831_v62  ;;  %4696 = vmatpush1.bf16.msra.mxu0 %v8010_v10  ;;  %v11285_v61 = vmul.f32 %v1592_v17, %v8514_v56  ;;  %v15837_v58 = vrot.slane %v10293_v46, 2  ;;  %v8016_v22 = vld [vmem:[%s14775_s3 + $0x260] ss:$8 sps:$4 sm:$0xff]  }
 0x1c1   : > { %15830 = vst [vmem:[#allocation189_spill] sm:$0xff] %v11267_v26  ;;  %v1979_v40 = vadd.f32 %v1811_v47, %v10279_v39  ;;  %4697 = vmatprep.subr.bf16.mxu0 %v8011_v52  ;;  %4573 = vmatmul.mubr.bf16.vlgmr.msra.gmra.mxu1 %v4468_v16  ;;  %v11292_v62 = vmul.f32 %v1592_v17, %v8522_v59  ;;  %v15838_v30 = vrot.slane %v10418_v8, 2  ;;  %v15839_v39 = vrot.slane %v10351_v1, 2  ;;  %v8012_v17 = vld [vmem:[%s14775_s3 + $0x270] ss:$8 sps:$4 sm:$0xff]   ;;  %v1600_v52 = vpop.permute.xlu1 %1599 }
 0x1c2   : > { %15835 = vst [vmem:[#allocation190_spill] sm:$0xff] %v11285_v61  ;;  %v1983_v10 = vadd.f32 %v1817_v9, %v10369_v13  ;;  %v2179_v27 = vsel %vm1098_vm1, %v15837_v58, %v15836_v29  ;;  %15840 = vst [vmem:[#allocation191_spill] sm:$0xff] %v11305_v15  ;;  %4847 = vmatpush1.bf16.msra.mxu1 %v8012_v17  ;;  %v11313_v16 = vmul.f32 %v1596_v51, %v8506_v44  ;;  %v11349_v9 = vpop.f32.mrf.mxu0  ;;  %v8017_v19 = vld [vmem:[%s14775_s3 + $0x254] ss:$8 sps:$4 sm:$0xff]   ;;  %v8020_v61 = vld [vmem:[%s14775_s3 + $0x250] ss:$8 sps:$4 sm:$0xff]  }
 0x1c3   : > { %v2185_v47 = vsel %vm1098_vm1, %v15839_v39, %v15838_v30  ;;  %v2347_v46 = vadd.f32 %v2179_v27, %v1979_v40  ;;  %v11318_v58 = vmul.f32 %v1596_v51, %v8509_v49  ;;  %v8013_v39 = vld [vmem:[%s14775_s3 + $0x264] ss:$8 sps:$4 sm:$0xff]   ;;  %v11325_v27 = vmul.f32 %v1596_v51, %v8514_v56  ;;  %15845 = vst [vmem:[#allocation196_spill] sm:$0xff] %v11349_v9 }
 0x1c4   : > { %v2351_v29 = vadd.f32 %v2185_v47, %v1983_v10  ;;  %4848 = vmatprep.subr.bf16.mxu1 %v8013_v39  ;;  %v11328_v40 = vmul.f32 %v1596_v51, %v8522_v59  ;;  %v11331_v1 = vmul.f32 %v1596_v51, %v8511_v50  ;;  %v8014_v10 = vld [vmem:[%s14775_s3 + $0x150] ss:$8 sps:$4 sm:$0xff]   ;;  %v11338_v39 = vmul.f32 %v1596_v51, %v8516_v57  ;;  %v8015_v30 = vld [vmem:[%s14775_s3 + $0x144] ss:$8 sps:$4 sm:$0xff]  }
 0x1c5   : > { %v2411_v17 = vadd.f32 %v2347_v46, %v8540_v3  ;;  %15841 = vst [vmem:[#allocation192_spill] sm:$0xff] %v11325_v27  ;;  %4698 = vmatpush1.bf16.msra.mxu0 %v8014_v10  ;;  %v11341_v46 = vmul.f32 %v1600_v52, %v8514_v56  ;;  %v11344_v13 = vmul.f32 %v1600_v52, %v8506_v44  ;;  %v15849_v9 = vld [vmem:[#allocation19_spill] sm:$0xff] }
 0x1c6   : > { %15842 = vst [vmem:[#allocation193_spill] sm:$0xff] %v11328_v40  ;;  %15843 = vst [vmem:[#allocation194_spill] sm:$0xff] %v11331_v1  ;;  %v2415_v47 = vadd.f32 %v2351_v29, %v8540_v3  ;;  %4699 = vmatprep.subr.bf16.mxu0 %v8015_v30  ;;  %v11355_v51 = vmul.f32 %v1600_v52, %v8509_v49  ;;  %v11358_v10 = vmul.f32 %v1600_v52, %v8511_v50  ;;  %v1604_v40 = vpop.permute.xlu0 %1603  ;;  %v15853_v30 = vld [vmem:[#allocation41_spill] sm:$0xff] }
 0x1c7   : > { %15844 = vst [vmem:[#allocation195_spill] sm:$0xff] %v11341_v46  ;;  %v11351_v15 = vmax.f32 %v2411_v17, 0.0  ;;  %4849 = vmatpush1.bf16.msra.mxu1 %v8016_v22  ;;  %v11367_v17 = vmul.f32 %v1600_v52, %v8516_v57  ;;  %v15850_v29 = vmax.f32 %v15849_v9, 0.0  ;;  %v11376_v22 = vmul.f32 %v1600_v52, %v8522_v59  ;;  %v8018_v9 = vld [vmem:[%s14775_s3 + $0x140] ss:$8 sps:$4 sm:$0xff]   ;;  %v15862_v1 = vld [vmem:[#allocation9_spill] sm:$0xff] }
 0x1c8   : > { %15847 = vst [vmem:[#allocation198_spill] sm:$0xff] %v11358_v10  ;;  %v11363_v46 = vmax.f32 %v2415_v47, 0.0  ;;  %4850 = vmatprep.subr.bf16.mxu1 %v8017_v19  ;;  %v15852_v47 = vld [vmem:[#allocation35_spill] sm:$0xff]  ;;  %v8019_v52 = vld [vmem:[%s14775_s3 + $0x134] ss:$8 sps:$4 sm:$0xff]   ;;  %v11401_v19 = vmul.f32 %v1604_v40, %v8506_v44  ;;  %v15858_v44 = vld [vmem:[#allocation38_spill] sm:$0xff] }
 0x1c9   : > { %15846 = vst [vmem:[#allocation197_spill] sm:$0xff] %v11351_v15  ;;  %v2768_v27 = vrot.slane %v15850_v29, 2  ;;  %15851 = vst [vmem:[#allocation19_spill] sm:$0xff] %v11376_v22  ;;  %v2772_v45 = vrot.slane %v15852_v47, 2  ;;  %4700 = vmatpush1.bf16.msra.mxu0 %v8018_v9  ;;  %v11391_v47 = vpop.f32.mrf.mxu0  ;;  %v15855_v9 = vrot.slane %v15812_v37, 2 }
 0x1ca   : > { %15848 = vst [vmem:[#allocation199_spill] sm:$0xff] %v11363_v46  ;;  %v4475_v29 = vpack.c.bf16 %v11363_v46, %v11351_v15  ;;  %4701 = vmatprep.subr.bf16.mxu0 %v8019_v52  ;;  %15854 = vst [vmem:[#allocation35_spill] sm:$0xff] %v11391_v47  ;;  %v15856_v46 = vrot.slane %v15853_v30, 2  ;;  %v11406_v52 = vpop.f32.mrf.mxu1  ;;  %v15859_v47 = vld [vmem:[#allocation12_spill] sm:$0xff] }
 0x1cb   : > { %v2769_v22 = vsel %vm1098_vm1, %v15855_v9, %v2768_v27  ;;  %4851 = vmatpush1.bf16.msra.mxu1 %v8020_v61  ;;  %15857 = vst [vmem:[#allocation41_spill] sm:$0xff] %v11406_v52  ;;  %v1668_v27 = vmul.f32 %v1604_v40, %v8514_v56  ;;  %v11411_v9 = vmul.f32 %v1604_v40, %v8509_v49  ;;  %v15860_v10 = vmax.f32 %v15859_v47, 0.0  ;;  %v8022_v49 = vld [vmem:[%s14775_s3 + $0x130] ss:$8 sps:$4 sm:$0xff]   ;;  %v15865_v47 = vld [vmem:[#allocation14_spill] sm:$0xff] }
 0x1cc   : > { %v2774_v7 = vsel %vm1098_vm1, %v2772_v45, %v15856_v46  ;;  %4582 = vmatprep.mubr.bf16.mxu1 %v4475_v29  ;;  %v1906_v45 = vrot.slane %v11401_v19, 1  ;;  %v2780_v46 = vrot.slane %v15858_v44, 2  ;;  %v15861_v61 = vrot.slane %v10302_v35, 1 }
 0x1cd   : > { %v2928_v37 = vpack.c.bf16 %v2774_v7, %v2769_v22  ;;  %v2784_v15 = vrot.slane %v15860_v10, 2  ;;  %v15863_v52 = vrot.slane %v15862_v1, 1  ;;  %v8021_v7 = vld [vmem:[%s14775_s3 + $0x244] ss:$8 sps:$4 sm:$0xff]   ;;  %4702 = vmatpush1.bf16.msra.mxu0 %v8022_v49  ;;  %v1669_v22 = vmul.f32 %v1604_v40, %v8522_v59  ;;  %v8026_v59 = vld [vmem:[%s14775_s3 + $0x120] ss:$8 sps:$4 sm:$0xff]  }
 0x1ce   : > { %4852 = vmatprep.subr.bf16.mxu1 %v8021_v7  ;;  %v1908_v10 = vrot.slane %v11411_v9, 1  ;;  %v11431_v19 = vmul.f32 %v1604_v40, %v8511_v50  ;;  %v15864_v1 = vrot.slane %v10401_v24, 1  ;;  %v11441_v7 = vpop.f32.mrf.mxu0  ;;  %v11446_v9 = vmul.f32 %v1604_v40, %v8516_v57 }
 0x1cf   : > { %v1809_v29 = vsel %vm711_vm0, %v15863_v52, %v15861_v61  ;;  %3926 = vmatmul.mubr.bf16.gmra.mxu0 %v2928_v37  ;;  %v15866_v52 = vrot.slane %v15865_v47, 1  ;;  %v8023_v61 = vld [vmem:[%s14775_s3 + $0x124] ss:$8 sps:$4 sm:$0xff]   ;;  %15867 = vst [vmem:[#allocation38_spill] sm:$0xff] %v11441_v7  ;;  %v11443_v37 = vadd.f32 %v1906_v45, %v1668_v27  ;;  %v15869_v50 = vrot.slane %v15820_v5, 2 }
 0x1d0   : > { %4703 = vmatprep.subr.bf16.mxu0 %v8023_v61  ;;  %v2785_v47 = vsel %vm1098_vm1, %v2780_v46, %v2784_v15  ;;  %v15871_v61 = vrot.slane %v11344_v13, 1  ;;  %v15872_v27 = vrot.slane %v11313_v16, 1  ;;  %v11464_v40 = vadd.f32 %v1908_v10, %v1669_v22  ;;  %v8025_v15 = vld [vmem:[%s14775_s3 + $0x234] ss:$8 sps:$4 sm:$0xff]  }
 0x1d1   : > { %v1814_v44 = vsel %vm711_vm0, %v15866_v52, %v15864_v1  ;;  %15868 = vst [vmem:[#allocation12_spill] sm:$0xff] %v11443_v37  ;;  %v2781_v49 = vsel %vm1098_vm1, %v15869_v50, %v2780_v46  ;;  %v8024_v1 = vld [vmem:[%s14775_s3 + $0x240] ss:$8 sps:$4 sm:$0xff]   ;;  %v11455_v52 = vpop.f32.mrf.mxu1  ;;  %v15875_v46 = vrot.slane %v11355_v51, 1  ;;  %4704 = vmatpush1.bf16.msra.mxu0 %v8026_v59 }
 0x1d2   : > { %4853 = vmatpush1.bf16.msra.mxu1 %v8024_v1  ;;  %15870 = vst [vmem:[#allocation9_spill] sm:$0xff] %v11455_v52  ;;  %v11462_v57 = vsel %vm711_vm0, %v15872_v27, %v15871_v61  ;;  %15873 = vst [vmem:[#allocation14_spill] sm:$0xff] %v11464_v40  ;;  %v2935_v5 = vpack.c.bf16 %v2785_v47, %v2781_v49  ;;  %v15874_v50 = vld [vmem:[#allocation95_spill] sm:$0xff]  ;;  %v15876_v1 = vrot.slane %v11318_v58, 1  ;;  %v15877_v52 = vld [vmem:[#allocation102_spill] sm:$0xff] }
 0x1d3   : > { %v1978_v26 = vadd.f32 %v1809_v29, %v15874_v50  ;;  %4854 = vmatprep.subr.bf16.mxu1 %v8025_v15  ;;  %v1982_v61 = vadd.f32 %v1814_v44, %v15877_v52  ;;  %v15878_v27 = vld [vmem:[#allocation100_spill] sm:$0xff]  ;;  %v15880_v40 = vld [vmem:[#allocation93_spill] sm:$0xff]  ;;  %v15882_v47 = vld [vmem:[#allocation103_spill] sm:$0xff] }
 0x1d4   : > { %v11475_v7 = vsel %vm711_vm0, %v15876_v1, %v15875_v46  ;;  %v15879_v22 = vrot.slane %v15878_v27, 2  ;;  %v15881_v49 = vrot.slane %v15880_v40, 2  ;;  %v15883_v50 = vrot.slane %v15882_v47, 2  ;;  %v15884_v37 = vld [vmem:[#allocation26_spill] sm:$0xff]  ;;  %3935 = vmatprep.mubr.bf16.mxu0 %v2935_v5  ;;  %v15886_v52 = vld [vmem:[#allocation109_spill] sm:$0xff]  ;;  %v15892_v46 = vld [vmem:[#allocation67_spill] sm:$0xff] }
 0x1d5   : > { %v15885_v35 = vrot.slane %v15884_v37, 2  ;;  %v15887_v1 = vrot.slane %v15886_v52, 1  ;;  %v15888_v40 = vrot.slane %v10404_v12, 1  ;;  %v8027_v12 = vld [vmem:[%s14775_s3 + $0x230] ss:$8 sps:$4 sm:$0xff]  }
 0x1d6   : > { %v2177_v29 = vsel %vm1098_vm1, %v15881_v49, %v15879_v22  ;;  %v15889_v49 = vrot.slane %v10466_v11, 1  ;;  %4855 = vmatpush1.bf16.msra.mxu1 %v8027_v12  ;;  %v15942_v11 = vld [vmem:[#allocation57_spill] sm:$0xff] }
 0x1d7   : > { %v2182_v15 = vsel %vm1098_vm1, %v15885_v35, %v15883_v50  ;;  %v2346_v44 = vadd.f32 %v2177_v29, %v1978_v26  ;;  %v1821_v22 = vsel %vm711_vm0, %v15888_v40, %v15887_v1  ;;  %v15890_v37 = vmov %v15887_v1  ;;  %v11502_v50 = vpop.f32.mrf.mxu0  ;;  %v15893_v26 = vld [vmem:[#allocation106_spill] sm:$0xff]  ;;  %v11510_v1 = vpop.f32.mrf.mxu1  ;;  %v15895_v40 = vld [vmem:[#allocation111_spill] sm:$0xff] }
 0x1d8   : > { %v1825_v35 = vsel %vm711_vm0, %v15890_v37, %v15889_v49  ;;  %15891 = vst [vmem:[#allocation95_spill] sm:$0xff] %v11502_v50  ;;  %v2350_v27 = vadd.f32 %v2182_v15, %v1982_v61  ;;  %v1985_v5 = vadd.f32 %v1821_v22, %v15892_v46  ;;  %15894 = vst [vmem:[#allocation102_spill] sm:$0xff] %v11510_v1  ;;  %v15896_v49 = vrot.slane %v15895_v40, 2  ;;  %v15900_v22 = vld [vmem:[#allocation23_spill] sm:$0xff] }
 0x1d9   : > { %v1987_v29 = vadd.f32 %v1825_v35, %v15893_v26  ;;  %v2410_v52 = vadd.f32 %v2346_v44, %v8537_v2  ;;  %v15897_v37 = vrot.slane %v10418_v8, 2  ;;  %v15898_v61 = vrot.slane %v10481_v14, 2  ;;  %v8028_v26 = vld [vmem:[%s14775_s3 + $0x224] ss:$8 sps:$4 sm:$0xff]   ;;  %v8029_v44 = vld [vmem:[%s14775_s3 + $0x114] ss:$8 sps:$4 sm:$0xff]  }
 0x1da   : > { %v15899_v15 = vmov %v15896_v49  ;;  %v2778_v35 = vrot.slane %v15900_v22, 2  ;;  %4856 = vmatprep.subr.bf16.mxu1 %v8028_v26  ;;  %4705 = vmatprep.subr.bf16.mxu0 %v8029_v44  ;;  %v15901_v8 = vrot.slane %v11344_v13, 1  ;;  %v2414_v40 = vadd.f32 %v2350_v27, %v8537_v2  ;;  %v15905_v44 = vld [vmem:[#allocation11_spill] sm:$0xff] }
 0x1db   : > { %v2189_v59 = vsel %vm1098_vm1, %v15897_v37, %v15896_v49  ;;  %v2193_v46 = vsel %vm1098_vm1, %v15899_v15, %v15898_v61  ;;  %v8030_v61 = vld [vmem:[%s14775_s3 + $0x110] ss:$8 sps:$4 sm:$0xff]   ;;  %v15902_v15 = vrot.slane %v11355_v51, 1  ;;  %v11544_v26 = vmax.f32 %v2410_v52, 0.0 }
 0x1dc   : > { %v11533_v12 = vsel %vm711_vm0, %v15901_v8, %v1906_v45  ;;  %v2353_v49 = vadd.f32 %v2189_v59, %v1985_v5  ;;  %v2355_v37 = vadd.f32 %v2193_v46, %v1987_v29  ;;  %4706 = vmatpush1.bf16.msra.mxu0 %v8030_v61  ;;  %v15904_v13 = vrot.slane %v15853_v30, 2  ;;  %v8031_v5 = vld [vmem:[%s14775_s3 + $0x104] ss:$8 sps:$4 sm:$0xff]   ;;  %v11554_v29 = vpop.f32.mrf.mxu0  ;;  %v8032_v8 = vld [vmem:[%s14775_s3 + $0x220] ss:$8 sps:$4 sm:$0xff]   ;;  %v11564_v61 = vpop.f32.mrf.mxu1 }
 0x1dd   : > { %v11542_v22 = vsel %vm711_vm0, %v15902_v15, %v1908_v10  ;;  %15903 = vst [vmem:[#allocation93_spill] sm:$0xff] %v11544_v26  ;;  %v15906_v27 = vmax.f32 %v15905_v44, 0.0  ;;  %4707 = vmatprep.subr.bf16.mxu0 %v8031_v5  ;;  %15907 = vst [vmem:[#allocation103_spill] sm:$0xff] %v11554_v29  ;;  %v11556_v51 = vmax.f32 %v2414_v40, 0.0  ;;  %v15909_v46 = vld [vmem:[#allocation18_spill] sm:$0xff]  ;;  %4857 = vmatpush1.bf16.msra.mxu1 %v8032_v8  ;;  %v15911_v44 = vld [vmem:[#allocation17_spill] sm:$0xff] }
 0x1de   : > { %v2779_v45 = vsel %vm1098_vm1, %v15904_v13, %v2778_v35  ;;  %v2417_v10 = vadd.f32 %v2353_v49, %v8540_v3  ;;  %v2419_v52 = vadd.f32 %v2355_v37, %v8540_v3  ;;  %v2790_v30 = vrot.slane %v15909_v46, 2  ;;  %15910 = vst [vmem:[#allocation109_spill] sm:$0xff] %v11564_v61  ;;  %v8033_v49 = vld [vmem:[%s14775_s3 + $0x214] ss:$8 sps:$4 sm:$0xff]  }
 0x1df   : > { %v2782_v59 = vrot.slane %v15906_v27, 2  ;;  %15908 = vst [vmem:[#allocation26_spill] sm:$0xff] %v11556_v51  ;;  %v2789_v40 = vrot.slane %v15911_v44, 2  ;;  %v15912_v27 = vld [vmem:[#allocation52_spill] sm:$0xff]  ;;  %4858 = vmatprep.subr.bf16.mxu1 %v8033_v49  ;;  %v4474_v37 = vpack.c.bf16 %v11556_v51, %v11544_v26  ;;  %v15917_v50 = vrot.slane %v10401_v24, 1  ;;  %v15986_v26 = vld [vmem:[#allocation131_spill] sm:$0xff] }
 0x1e0   : > { %v15123_v5 = vrot.slane %v15912_v27, 2  ;;  %v11575_v46 = vmax.f32 %v2417_v10, 0.0  ;;  %v11577_v8 = vmax.f32 %v2419_v52, 0.0  ;;  %v15915_v49 = vld [vmem:[#allocation108_spill] sm:$0xff]  ;;  %v15918_v52 = vld [vmem:[#allocation113_spill] sm:$0xff] }
 0x1e1   : > { %v2783_v13 = vsel %vm1098_vm1, %v2778_v35, %v2782_v59  ;;  %v8034_v35 = vld [vmem:[%s14775_s3 + $0x100] ss:$8 sps:$4 sm:$0xff]   ;;  %v2791_v59 = vsel %vm1098_vm1, %v2789_v40, %v2790_v30  ;;  %v15916_v15 = vrot.slane %v15915_v49, 1  ;;  %v15919_v61 = vrot.slane %v15918_v52, 1  ;;  %v8035_v40 = vld [vmem:[%s14775_s3 + $0x1f4] ss:$8 sps:$4 sm:$0xff]   ;;  %4583 = vmatmul.mubr.bf16.gmra.mxu1 %v4474_v37  ;;  %v11605_v49 = vpop.f32.mrf.mxu1 }
 0x1e2   : > { %15913 = vst [vmem:[#allocation67_spill] sm:$0xff] %v11575_v46  ;;  %15914 = vst [vmem:[#allocation106_spill] sm:$0xff] %v11577_v8  ;;  %v2934_v29 = vpack.c.bf16 %v2783_v13, %v2779_v45  ;;  %4708 = vmatpush1.bf16.msra.mxu0 %v8034_v35  ;;  %v2795_v44 = vsel %vm1098_vm1, %v2790_v30, %v15123_v5  ;;  %v11599_v35 = vpop.f32.mrf.mxu0  ;;  %v4481_v30 = vpack.c.bf16 %v11577_v8, %v11575_v46  ;;  %v15923_v5 = vld [vmem:[#allocation13_spill] sm:$0xff]  ;;  %v15926_v52 = vld [vmem:[#allocation110_spill] sm:$0xff] }
 0x1e3   : > { %v1819_v10 = vsel %vm711_vm0, %v15917_v50, %v15916_v15  ;;  %v15920_v45 = vmov %v15916_v15  ;;  %4709 = vmatprep.subr.bf16.mxu0 %v8035_v40  ;;  %15921 = vst [vmem:[#allocation111_spill] sm:$0xff] %v11599_v35  ;;  %v2941_v24 = vpack.c.bf16 %v2795_v44, %v2791_v59  ;;  %v15922_v50 = vld [vmem:[#allocation66_spill] sm:$0xff]  ;;  %v2786_v1 = vrot.slane %v15923_v5, 2  ;;  %15924 = vst [vmem:[#allocation23_spill] sm:$0xff] %v11605_v49  ;;  %v15929_v37 = vld [vmem:[#allocation115_spill] sm:$0xff] }
 0x1e4   : > { %v1823_v13 = vsel %vm711_vm0, %v15920_v45, %v15919_v61  ;;  %3936 = vmatmul.mubr.bf16.gmra.mxu0 %v2934_v29  ;;  %v1984_v15 = vadd.f32 %v1819_v10, %v15922_v50  ;;  %v15925_v61 = vld [vmem:[#allocation63_spill] sm:$0xff]  ;;  %v15927_v51 = vrot.slane %v15926_v52, 2  ;;  %v15928_v40 = vrot.slane %v15882_v47, 2  ;;  %v15933_v44 = vld [vmem:[#allocation118_spill] sm:$0xff]  ;;  %4592 = vmatprep.mubr.bf16.mxu1 %v4481_v30 }
 0x1e5   : > { %v1986_v45 = vadd.f32 %v1823_v13, %v15925_v61  ;;  %v15930_v14 = vrot.slane %v15929_v37, 2  ;;  %v15932_v59 = vrot.slane %v10540_v33, 1  ;;  %v15934_v5 = vrot.slane %v15933_v44, 1  ;;  %v8036_v13 = vld [vmem:[%s14775_s3 + $0x210] ss:$8 sps:$4 sm:$0xff]   ;;  %3945 = vmatprep.mubr.bf16.mxu0 %v2941_v24  ;;  %v15940_v49 = vld [vmem:[#allocation119_spill] sm:$0xff] }
 0x1e6   : > { %v2187_v35 = vsel %vm1098_vm1, %v15928_v40, %v15927_v51  ;;  %v15931_v8 = vmov %v15927_v51  ;;  %4859 = vmatpush1.bf16.msra.mxu1 %v8036_v13  ;;  %v15935_v51 = vrot.slane %v10594_v28, 1  ;;  %v15938_v61 = vld [vmem:[#allocation16_spill] sm:$0xff]  ;;  %v15941_v37 = vrot.slane %v15940_v49, 2 }
 0x1e7   : > { %v2191_v29 = vsel %vm1098_vm1, %v15931_v8, %v15930_v14  ;;  %v1831_v10 = vsel %vm711_vm0, %v15934_v5, %v15932_v59  ;;  %v2352_v47 = vadd.f32 %v2187_v35, %v1984_v15  ;;  %v15936_v52 = vmov %v15932_v59  ;;  %v15937_v8 = vld [vmem:[#allocation60_spill] sm:$0xff]  ;;  %v15939_v59 = vld [vmem:[#allocation61_spill] sm:$0xff] }
 0x1e8   : > { %v1835_v14 = vsel %vm711_vm0, %v15936_v52, %v15935_v51  ;;  %v1991_v50 = vadd.f32 %v1831_v10, %v15937_v8  ;;  %v2787_v40 = vrot.slane %v15938_v61, 2  ;;  %v2354_v44 = vadd.f32 %v2191_v29, %v1986_v45  ;;  %v15944_v35 = vld [vmem:[#allocation125_spill] sm:$0xff]  ;;  %v8037_v10 = vld [vmem:[%s14775_s3 + $0x204] ss:$8 sps:$4 sm:$0xff]   ;;  %v11647_v45 = vpop.f32.mrf.mxu0  ;;  %v15948_v52 = vld [vmem:[#allocation56_spill] sm:$0xff] }
 0x1e9   : > { %v1993_v5 = vadd.f32 %v1835_v14, %v15939_v59  ;;  %v15943_v13 = vrot.slane %v15942_v11, 2  ;;  %v15945_v24 = vrot.slane %v15944_v35, 2  ;;  %v15946_v15 = vmov %v15941_v37  ;;  %4860 = vmatprep.subr.bf16.mxu1 %v8037_v10  ;;  %15947 = vst [vmem:[#allocation11_spill] sm:$0xff] %v11647_v45  ;;  %v8038_v49 = vld [vmem:[%s14775_s3 + $0x1f0] ss:$8 sps:$4 sm:$0xff]   ;;  %v11655_v14 = vpop.f32.mrf.mxu1  ;;  %v15950_v59 = vld [vmem:[#allocation59_spill] sm:$0xff] }
 0x1ea   : > { %v2416_v29 = vadd.f32 %v2352_v47, %v8537_v2  ;;  %v2788_v11 = vsel %vm1098_vm1, %v2786_v1, %v2787_v40  ;;  %4710 = vmatpush2.bf16.msra.mxu0 %v8038_v49  ;;  %15949 = vst [vmem:[#allocation18_spill] sm:$0xff] %v11655_v14  ;;  %v2418_v8 = vadd.f32 %v2354_v44, %v8537_v2  ;;  %v8039_v1 = vld [vmem:[%s14775_s3 + $0x200] ss:$8 sps:$4 sm:$0xff]  }
 0x1eb   : > { %v2199_v30 = vsel %vm1098_vm1, %v15943_v13, %v15941_v37  ;;  %v2203_v33 = vsel %vm1098_vm1, %v15946_v15, %v15945_v24  ;;  %v2792_v37 = vrot.slane %v15948_v52, 2  ;;  %v15951_v13 = vmax.f32 %v15950_v59, 0.0  ;;  %v15952_v15 = vld [vmem:[#allocation55_spill] sm:$0xff]  ;;  %4861 = vmatpush1.bf16.msra.mxu1 %v8039_v1  ;;  %v8041_v52 = vld [vmem:[%s14775_s3 + $0x2f4] ss:$8 sps:$4 sm:$0xff]   ;;  %v11681_v1 = vpop.f32.mrf.mxu0 }
 0x1ec   : > { %v2359_v51 = vadd.f32 %v2199_v30, %v1991_v50  ;;  %v2361_v61 = vadd.f32 %v2203_v33, %v1993_v5  ;;  %v2803_v47 = vrot.slane %v15952_v15, 2  ;;  %v8040_v50 = vld [vmem:[%s14775_s3 + $0x1e4] ss:$8 sps:$4 sm:$0xff]   ;;  %v11667_v30 = vmax.f32 %v2416_v29, 0.0  ;;  %4862 = vmatprep.subr.bf16.mxu1 %v8041_v52  ;;  %15957 = vst [vmem:[#allocation108_spill] sm:$0xff] %v11681_v1  ;;  %v15960_v52 = vld [vmem:[#allocation117_spill] sm:$0xff] }
 0x1ed   : > { %v2798_v24 = vrot.slane %v15951_v13, 2  ;;  %4711 = vmatprep.subr.bf16.mxu0 %v8040_v50  ;;  %v2793_v5 = vsel %vm1098_vm1, %v2787_v40, %v2792_v37  ;;  %v15954_v33 = vld [vmem:[#allocation62_spill] sm:$0xff]  ;;  %v11675_v49 = vmax.f32 %v2418_v8, 0.0  ;;  %v15956_v15 = vrot.slane %v15912_v27, 2  ;;  %v15971_v1 = vld [vmem:[#allocation20_spill] sm:$0xff] }
 0x1ee   : > { %15953 = vst [vmem:[#allocation17_spill] sm:$0xff] %v11667_v30  ;;  %v2423_v44 = vadd.f32 %v2359_v51, %v8540_v3  ;;  %v15130_v10 = vrot.slane %v15954_v33, 2  ;;  %v2425_v59 = vadd.f32 %v2361_v61, %v8540_v3  ;;  %v2940_v13 = vpack.c.bf16 %v2793_v5, %v2788_v11  ;;  %v15958_v50 = vld [vmem:[#allocation58_spill] sm:$0xff]  ;;  %v15962_v61 = vld [vmem:[#allocation124_spill] sm:$0xff]  ;;  %v11701_v5 = vpop.f32.mrf.mxu1 }
 0x1ef   : > { %15955 = vst [vmem:[#allocation52_spill] sm:$0xff] %v11675_v49  ;;  %v2799_v29 = vsel %vm1098_vm1, %v15956_v15, %v2798_v24  ;;  %v15959_v45 = vrot.slane %v15958_v50, 1  ;;  %v15961_v8 = vrot.slane %v15960_v52, 1  ;;  %v15963_v11 = vrot.slane %v15962_v61, 1  ;;  %15965 = vst [vmem:[#allocation66_spill] sm:$0xff] %v11701_v5  ;;  %v15967_v52 = vld [vmem:[#allocation54_spill] sm:$0xff] }
 0x1f0   : > { %v11683_v51 = vmax.f32 %v2423_v44, 0.0  ;;  %v2805_v40 = vsel %vm1098_vm1, %v2803_v47, %v15130_v10  ;;  %v8042_v44 = vld [vmem:[%s14775_s3 + $0x1e0] ss:$8 sps:$4 sm:$0xff]   ;;  %v4480_v47 = vpack.c.bf16 %v11675_v49, %v11667_v30  ;;  %v11705_v15 = vmax.f32 %v2425_v59, 0.0  ;;  %3946 = vmatmul.mubr.bf16.gmra.mxu0 %v2940_v13  ;;  %v8043_v50 = vld [vmem:[%s14775_s3 + $0x2f0] ss:$8 sps:$4 sm:$0xff]  }
 0x1f1   : > { %v1828_v14 = vsel %vm711_vm0, %v15961_v8, %v15959_v45  ;;  %v15964_v27 = vmov %v15959_v45  ;;  %4712 = vmatpush2.bf16.msra.mxu0 %v8042_v44  ;;  %v2947_v45 = vpack.c.bf16 %v2805_v40, %v2799_v29  ;;  %4863 = vmatpush2.bf16.msra.mxu1 %v8043_v50  ;;  %v15969_v10 = vld [vmem:[#allocation70_spill] sm:$0xff]  ;;  %v15972_v5 = vrot.slane %v15971_v1, 2  ;;  %v15973_v49 = vld [vmem:[#allocation37_spill] sm:$0xff] }
 0x1f2   : > { %v1833_v24 = vsel %vm711_vm0, %v15964_v27, %v15963_v11  ;;  %15966 = vst [vmem:[#allocation13_spill] sm:$0xff] %v11705_v15  ;;  %v1990_v8 = vadd.f32 %v1828_v14, %v15967_v52  ;;  %v15968_v11 = vld [vmem:[#allocation75_spill] sm:$0xff]  ;;  %v15970_v44 = vrot.slane %v15969_v10, 2  ;;  %v15974_v59 = vrot.slane %v15973_v49, 2  ;;  %4593 = vmatmul.mubr.bf16.gmra.mxu1 %v4480_v47  ;;  %v15979_v50 = vld [vmem:[#allocation134_spill] sm:$0xff] }
 0x1f3   : > { %v1992_v27 = vadd.f32 %v1833_v24, %v15968_v11  ;;  %v15976_v14 = vrot.slane %v10623_v20, 1  ;;  %v15977_v40 = vrot.slane %v10594_v28, 1  ;;  %v8044_v24 = vld [vmem:[%s14775_s3 + $0x2e4] ss:$8 sps:$4 sm:$0xff]   ;;  %v4487_v1 = vpack.c.bf16 %v11705_v15, %v11683_v51  ;;  %3955 = vmatprep.mubr.bf16.mxu0 %v2947_v45  ;;  %v15981_v28 = vld [vmem:[#allocation48_spill] sm:$0xff] }
 0x1f4   : > { %v2196_v46 = vsel %vm1098_vm1, %v15972_v5, %v15970_v44  ;;  %v15975_v13 = vmov %v15970_v44  ;;  %4864 = vmatprep.subr.bf16.mxu1 %v8044_v24  ;;  %v15978_v10 = vrot.slane %v10691_v38, 1  ;;  %v15980_v11 = vrot.slane %v15979_v50, 1  ;;  %v15984_v20 = vld [vmem:[#allocation132_spill] sm:$0xff]  ;;  %v15985_v47 = vld [vmem:[#allocation71_spill] sm:$0xff] }
 0x1f5   : > { %v2201_v29 = vsel %vm1098_vm1, %v15975_v13, %v15974_v59  ;;  %v1839_v52 = vsel %vm711_vm0, %v15977_v40, %v15976_v14  ;;  %v2358_v5 = vadd.f32 %v2196_v46, %v1990_v8  ;;  %v15982_v59 = vmax.f32 %v15981_v28, 0.0  ;;  %v11739_v14 = vpop.f32.mrf.mxu0  ;;  %v8045_v8 = vld [vmem:[%s14775_s3 + $0x1d4] ss:$8 sps:$4 sm:$0xff]   ;;  %4602 = vmatprep.mubr.bf16.mxu1 %v4487_v1 }
 0x1f6   : > { %v1845_v44 = vsel %vm711_vm0, %v15980_v11, %v15978_v10  ;;  %15983 = vst [vmem:[#allocation63_spill] sm:$0xff] %v11739_v14  ;;  %v2360_v40 = vadd.f32 %v2201_v29, %v1992_v27  ;;  %v1995_v24 = vadd.f32 %v1839_v52, %v15984_v20  ;;  %v15987_v15 = vrot.slane %v15986_v26, 2  ;;  %4713 = vmatprep.subr.bf16.mxu0 %v8045_v8  ;;  %v11751_v10 = vpop.f32.mrf.mxu1  ;;  %v15992_v50 = vld [vmem:[#allocation28_spill] sm:$0xff]  ;;  %v8046_v11 = vld [vmem:[%s14775_s3 + $0x2e0] ss:$8 sps:$4 sm:$0xff]   ;;  %v15995_v8 = vld [vmem:[#allocation45_spill] sm:$0xff] }
 0x1f7   : > { %v2796_v13 = vrot.slane %v15982_v59, 2  ;;  %v1999_v30 = vadd.f32 %v1845_v44, %v15985_v47  ;;  %v15988_v46 = vrot.slane %v15944_v35, 2  ;;  %15989 = vst [vmem:[#allocation110_spill] sm:$0xff] %v11751_v10  ;;  %v2422_v27 = vadd.f32 %v2358_v5, %v8537_v2  ;;  %4865 = vmatpush2.bf16.msra.mxu1 %v8046_v11  ;;  %v15993_v5 = vld [vmem:[#allocation77_spill] sm:$0xff]  ;;  %v15994_v47 = vld [vmem:[#allocation50_spill] sm:$0xff] }
 0x1f8   : > { %v15990_v20 = vrot.slane %v10712_v63, 2  ;;  %v15991_v29 = vrot.slane %v10676_v43, 2  ;;  %v2424_v44 = vadd.f32 %v2360_v40, %v8537_v2  ;;  %v2801_v59 = vrot.slane %v15993_v5, 2  ;;  %v8047_v43 = vld [vmem:[%s14775_s3 + $0x1d0] ss:$8 sps:$4 sm:$0xff]  }
 0x1f9   : > { %v2207_v45 = vsel %vm1098_vm1, %v15988_v46, %v15987_v15  ;;  %v2797_v35 = vsel %vm1098_vm1, %v2792_v37, %v2796_v13  ;;  %v2800_v15 = vrot.slane %v15992_v50, 2  ;;  %4714 = vmatpush2.bf16.msra.mxu0 %v8047_v43  ;;  %v8048_v37 = vld [vmem:[%s14775_s3 + $0x2d4] ss:$8 sps:$4 sm:$0xff]   ;;  %v11772_v13 = vmax.f32 %v2422_v27, 0.0  ;;  %v11785_v50 = vpop.f32.mrf.mxu0 }
 0x1fa   : > { %v2213_v52 = vsel %vm1098_vm1, %v15991_v29, %v15990_v20  ;;  %v2363_v1 = vadd.f32 %v2207_v45, %v1995_v24  ;;  %4866 = vmatprep.subr.bf16.mxu1 %v8048_v37  ;;  %v2808_v46 = vrot.slane %v15994_v47, 2  ;;  %v15996_v40 = vmax.f32 %v15995_v8, 0.0  ;;  %16000 = vst [vmem:[#allocation118_spill] sm:$0xff] %v11785_v50  ;;  %v11792_v37 = vpop.f32.mrf.mxu1 }
 0x1fb   : > { %v2367_v28 = vadd.f32 %v2213_v52, %v1999_v30  ;;  %v15997_v30 = vld [vmem:[#allocation128_spill] sm:$0xff]  ;;  %v15999_v20 = vrot.slane %v15962_v61, 1  ;;  %v8049_v52 = vld [vmem:[%s14775_s3 + $0x1c4] ss:$8 sps:$4 sm:$0xff]   ;;  %v11787_v27 = vmax.f32 %v2424_v44, 0.0  ;;  %v2802_v43 = vsel %vm1098_vm1, %v2800_v15, %v2801_v59  ;;  %16001 = vst [vmem:[#allocation60_spill] sm:$0xff] %v11792_v37  ;;  %v11830_v10 = vpop.f32.mrf.mxu0 }
 0x1fc   : > { %v2812_v24 = vrot.slane %v15996_v40, 2  ;;  %v15998_v45 = vrot.slane %v15997_v30, 1  ;;  %4715 = vmatprep.subr.bf16.mxu0 %v8049_v52  ;;  %v2427_v11 = vadd.f32 %v2363_v1, %v8540_v3  ;;  %v2946_v61 = vpack.c.bf16 %v2802_v43, %v2797_v35  ;;  %v16005_v52 = vld [vmem:[#allocation133_spill] sm:$0xff]  ;;  %v16015_v37 = vld [vmem:[#allocation135_spill] sm:$0xff]  ;;  %16017 = vst [vmem:[#allocation61_spill] sm:$0xff] %v11830_v10 }
 0x1fd   : > { %v2431_v5 = vadd.f32 %v2367_v28, %v8540_v3  ;;  %v16002_v47 = vrot.slane %v15954_v33, 2  ;;  %v16006_v44 = vrot.slane %v16005_v52, 1  ;;  %v8050_v1 = vld [vmem:[%s14775_s3 + $0x2d0] ss:$8 sps:$4 sm:$0xff]   ;;  %v4486_v35 = vpack.c.bf16 %v11787_v27, %v11772_v13 }
 0x1fe   : > { %v1837_v29 = vsel %vm711_vm0, %v15999_v20, %v15998_v45  ;;  %v2813_v40 = vsel %vm1098_vm1, %v2808_v46, %v2812_v24  ;;  %v16003_v45 = vld [vmem:[#allocation74_spill] sm:$0xff]  ;;  %4867 = vmatpush2.bf16.msra.mxu1 %v8050_v1  ;;  %v11808_v15 = vmax.f32 %v2427_v11, 0.0  ;;  %3956 = vmatmul.mubr.bf16.gmra.mxu0 %v2946_v61  ;;  %v16008_v43 = vld [vmem:[#allocation121_spill] sm:$0xff] }
 0x1ff   : > { %v2809_v8 = vsel %vm1098_vm1, %v16002_v47, %v2808_v46  ;;  %v16004_v20 = vrot.slane %v16003_v45, 1  ;;  %v11810_v33 = vmax.f32 %v2431_v5, 0.0  ;;  %v8051_v46 = vld [vmem:[%s14775_s3 + $0x1c0] ss:$8 sps:$4 sm:$0xff]   ;;  %v8052_v24 = vld [vmem:[%s14775_s3 + $0x2c4] ss:$8 sps:$4 sm:$0xff]   ;;  %v1994_v47 = vadd.f32 %v1837_v29, %v16008_v43  ;;  %4603 = vmatmul.mubr.bf16.gmra.mxu1 %v4486_v35 }
 0x200   : > { %v2953_v28 = vpack.c.bf16 %v2813_v40, %v2809_v8  ;;  %4716 = vmatpush2.bf16.msra.mxu0 %v8051_v46  ;;  %4868 = vmatprep.subr.bf16.mxu1 %v8052_v24  ;;  %v16010_v11 = vld [vmem:[#allocation130_spill] sm:$0xff]  ;;  %v16012_v5 = vrot.slane %v15973_v49, 2  ;;  %v16013_v40 = vld [vmem:[#allocation73_spill] sm:$0xff]  ;;  %v16016_v46 = vrot.slane %v16015_v37, 2  ;;  %v16020_v24 = vrot.slane %v10691_v38, 1 }
 0x201   : > { %v1842_v50 = vsel %vm711_vm0, %v16006_v44, %v16004_v20  ;;  %16007 = vst [vmem:[#allocation16_spill] sm:$0xff] %v11810_v33  ;;  %v16009_v20 = vld [vmem:[#allocation64_spill] sm:$0xff]  ;;  %v16011_v44 = vrot.slane %v16010_v11, 2  ;;  %v16014_v1 = vrot.slane %v16013_v40, 2  ;;  %v4493_v29 = vpack.c.bf16 %v11810_v33, %v11808_v15  ;;  %v16025_v10 = vld [vmem:[#allocation65_spill] sm:$0xff]  ;;  %v16026_v11 = vld [vmem:[#allocation82_spill] sm:$0xff] }
 0x202   : > { %v1998_v52 = vadd.f32 %v1842_v50, %v16009_v20  ;;  %3965 = vmatprep.mubr.bf16.mxu0 %v2953_v28  ;;  %v16018_v50 = vld [vmem:[#allocation137_spill] sm:$0xff]  ;;  %v16021_v43 = vrot.slane %v10778_v18, 1  ;;  %v8053_v38 = vld [vmem:[%s14775_s3 + $0x2c0] ss:$8 sps:$4 sm:$0xff]  }
 0x203   : > { %v2205_v8 = vsel %vm1098_vm1, %v16012_v5, %v16011_v44  ;;  %v2210_v14 = vsel %vm1098_vm1, %v16016_v46, %v16014_v1  ;;  %v16019_v61 = vrot.slane %v16018_v50, 1  ;;  %v16023_v44 = vld [vmem:[#allocation27_spill] sm:$0xff]  ;;  %v11845_v1 = vpop.f32.mrf.mxu1  ;;  %4869 = vmatpush2.bf16.msra.mxu1 %v8053_v38  ;;  %4612 = vmatprep.mubr.bf16.mxu1 %v4493_v29  ;;  %v16027_v50 = vrot.slane %v10759_v55, 2  ;;  %v8054_v29 = vld [vmem:[%s14775_s3 + $0x1b4] ss:$8 sps:$4 sm:$0xff]  }
 0x204   : > { %v2806_v5 = vrot.slane %v16023_v44, 2  ;;  %16024 = vst [vmem:[#allocation119_spill] sm:$0xff] %v11845_v1  ;;  %v2362_v35 = vadd.f32 %v2205_v8, %v1994_v47  ;;  %v2366_v46 = vadd.f32 %v2210_v14, %v1998_v52  ;;  %v16031_v52 = vld [vmem:[#allocation25_spill] sm:$0xff]  ;;  %4717 = vmatprep.subr.bf16.mxu0 %v8054_v29  ;;  %v16034_v38 = vld [vmem:[#allocation43_spill] sm:$0xff] }
 0x205   : > { %v1849_v49 = vsel %vm711_vm0, %v16020_v24, %v16019_v61  ;;  %v16022_v20 = vmov %v16019_v61  ;;  %v16028_v61 = vrot.slane %v10712_v63, 2  ;;  %v16030_v14 = vmov %v16027_v50  ;;  %v8055_v55 = vld [vmem:[%s14775_s3 + $0x1b0] ss:$8 sps:$4 sm:$0xff]  }
 0x206   : > { %v1853_v37 = vsel %vm711_vm0, %v16022_v20, %v16021_v43  ;;  %v2001_v28 = vadd.f32 %v1849_v49, %v16025_v10  ;;  %v16029_v43 = vrot.slane %v10788_v53, 2  ;;  %v2807_v47 = vsel %vm1098_vm1, %v2801_v59, %v2806_v5  ;;  %4718 = vmatpush2.bf16.msra.mxu0 %v8055_v55  ;;  %v11873_v59 = vpop.f32.mrf.mxu0  ;;  %v16096_v53 = vld [vmem:[#allocation150_spill] sm:$0xff] }
 0x207   : > { %v2003_v33 = vadd.f32 %v1853_v37, %v16026_v11  ;;  %v2217_v24 = vsel %vm1098_vm1, %v16028_v61, %v16027_v50  ;;  %v16032_v11 = vmax.f32 %v16031_v52, 0.0  ;;  %v2426_v63 = vadd.f32 %v2362_v35, %v8537_v2  ;;  %16033 = vst [vmem:[#allocation57_spill] sm:$0xff] %v11873_v59  ;;  %v16035_v61 = vld [vmem:[#allocation84_spill] sm:$0xff] }
 0x208   : > { %v2221_v10 = vsel %vm1098_vm1, %v16030_v14, %v16029_v43  ;;  %v2430_v49 = vadd.f32 %v2366_v46, %v8537_v2  ;;  %v2369_v20 = vadd.f32 %v2217_v24, %v2001_v28  ;;  %v2817_v50 = vrot.slane %v16034_v38, 2  ;;  %v16036_v14 = vld [vmem:[#allocation86_spill] sm:$0xff]  ;;  %v8056_v35 = vld [vmem:[%s14775_s3 + $0x2b4] ss:$8 sps:$4 sm:$0xff]   ;;  %v11885_v46 = vpop.f32.mrf.mxu1 }
 0x209   : > { %v2810_v8 = vrot.slane %v16032_v11, 2  ;;  %v2371_v37 = vadd.f32 %v2221_v10, %v2003_v33  ;;  %v2818_v43 = vrot.slane %v16035_v61, 2  ;;  %v15144_v52 = vrot.slane %v16036_v14, 2  ;;  %4870 = vmatprep.subr.bf16.mxu1 %v8056_v35  ;;  %v8057_v33 = vld [vmem:[%s14775_s3 + $0x1a4] ss:$8 sps:$4 sm:$0xff]   ;;  %16037 = vst [vmem:[#allocation125_spill] sm:$0xff] %v11885_v46 }
 0x20a   : > { %4719 = vmatprep.subr.bf16.mxu0 %v8057_v33  ;;  %v11887_v28 = vmax.f32 %v2426_v63, 0.0  ;;  %v2433_v24 = vadd.f32 %v2369_v20, %v8540_v3  ;;  %v8058_v11 = vld [vmem:[%s14775_s3 + $0x2b0] ss:$8 sps:$4 sm:$0xff]   ;;  %v11935_v1 = vpop.f32.mrf.mxu1 }
 0x20b   : > { %v2811_v44 = vsel %vm1098_vm1, %v2806_v5, %v2810_v8  ;;  %v11889_v5 = vmax.f32 %v2430_v49, 0.0  ;;  %v2435_v10 = vadd.f32 %v2371_v37, %v8540_v3  ;;  %4871 = vmatpush2.bf16.msra.mxu1 %v8058_v11  ;;  %v2819_v29 = vsel %vm1098_vm1, %v2817_v50, %v2818_v43  ;;  %v16039_v63 = vld [vmem:[#allocation136_spill] sm:$0xff]  ;;  %v8059_v37 = vld [vmem:[%s14775_s3 + $0x2a4] ss:$8 sps:$4 sm:$0xff]   ;;  %v16044_v35 = vld [vmem:[#allocation81_spill] sm:$0xff]  ;;  %16054 = vst [vmem:[#allocation62_spill] sm:$0xff] %v11935_v1 }
 0x20c   : > { %v2952_v8 = vpack.c.bf16 %v2811_v44, %v2807_v47  ;;  %v2823_v55 = vsel %vm1098_vm1, %v2818_v43, %v15144_v52  ;;  %v16040_v38 = vrot.slane %v16039_v63, 1  ;;  %v16041_v49 = vrot.slane %v16003_v45, 1  ;;  %4872 = vmatprep.subr.bf16.mxu1 %v8059_v37  ;;  %v8060_v43 = vld [vmem:[%s14775_s3 + $0x1a0] ss:$8 sps:$4 sm:$0xff]   ;;  %v11917_v45 = vpop.f32.mrf.mxu0  ;;  %v16051_v52 = vld [vmem:[#allocation141_spill] sm:$0xff] }
 0x20d   : > { %16038 = vst [vmem:[#allocation56_spill] sm:$0xff] %v11889_v5  ;;  %v4492_v47 = vpack.c.bf16 %v11889_v5, %v11887_v28  ;;  %v11910_v44 = vmax.f32 %v2433_v24, 0.0  ;;  %v11912_v50 = vmax.f32 %v2435_v10, 0.0  ;;  %v2959_v61 = vpack.c.bf16 %v2823_v55, %v2819_v29  ;;  %4720 = vmatpush2.bf16.msra.mxu0 %v8060_v43  ;;  %16043 = vst [vmem:[#allocation55_spill] sm:$0xff] %v11917_v45  ;;  %v16048_v37 = vld [vmem:[#allocation138_spill] sm:$0xff]  ;;  %v16061_v1 = vld [vmem:[#allocation149_spill] sm:$0xff] }
 0x20e   : > { %v1847_v20 = vsel %vm711_vm0, %v16041_v49, %v16040_v38  ;;  %3966 = vmatmul.mubr.bf16.gmra.mxu0 %v2952_v8  ;;  %v16045_v33 = vrot.slane %v16044_v35, 1  ;;  %v16046_v11 = vmov %v16040_v38  ;;  %v16047_v49 = vld [vmem:[#allocation69_spill] sm:$0xff]  ;;  %v16049_v10 = vrot.slane %v16048_v37, 2 }
 0x20f   : > { %16042 = vst [vmem:[#allocation59_spill] sm:$0xff] %v11912_v50  ;;  %v2000_v24 = vadd.f32 %v1847_v20, %v16047_v49  ;;  %v16050_v29 = vrot.slane %v16013_v40, 2  ;;  %v16052_v46 = vrot.slane %v16051_v52, 2  ;;  %4613 = vmatmul.mubr.bf16.gmra.mxu1 %v4492_v47  ;;  %v4499_v63 = vpack.c.bf16 %v11912_v50, %v11910_v44  ;;  %3975 = vmatprep.mubr.bf16.mxu0 %v2959_v61  ;;  %v16055_v20 = vld [vmem:[#allocation40_spill] sm:$0xff]  ;;  %v16091_v52 = vld [vmem:[#allocation145_spill] sm:$0xff] }
 0x210   : > { %v1851_v38 = vsel %vm711_vm0, %v16046_v11, %v16045_v33  ;;  %v16053_v43 = vmov %v16049_v10  ;;  %v16056_v11 = vrot.slane %v10847_v32, 1  ;;  %v16057_v40 = vrot.slane %v10803_v36, 1  ;;  %v16062_v61 = vld [vmem:[#allocation152_spill] sm:$0xff]  ;;  %v8061_v36 = vld [vmem:[%s14775_s3 + $0x2a0] ss:$8 sps:$4 sm:$0xff]  }
 0x211   : > { %v2215_v55 = vsel %vm1098_vm1, %v16050_v29, %v16049_v10  ;;  %v2219_v8 = vsel %vm1098_vm1, %v16053_v43, %v16052_v46  ;;  %v2002_v33 = vadd.f32 %v1851_v38, %v16055_v20  ;;  %v16058_v10 = vld [vmem:[#allocation6_spill] sm:$0xff]  ;;  %v16059_v46 = vrot.slane %v10885_v6, 1  ;;  %v16064_v38 = vld [vmem:[#allocation147_spill] sm:$0xff]  ;;  %4873 = vmatpush2.bf16.msra.mxu1 %v8061_v36  ;;  %4622 = vmatprep.mubr.bf16.mxu1 %v4499_v63 }
 0x212   : > { %v1859_v49 = vsel %vm711_vm0, %v16057_v40, %v16056_v11  ;;  %v2814_v29 = vrot.slane %v16058_v10, 2  ;;  %v2368_v37 = vadd.f32 %v2215_v55, %v2000_v24  ;;  %v16060_v43 = vmov %v16056_v11  ;;  %v16066_v55 = vld [vmem:[#allocation39_spill] sm:$0xff] }
 0x213   : > { %v1863_v47 = vsel %vm711_vm0, %v16060_v43, %v16059_v46  ;;  %v2007_v45 = vadd.f32 %v1859_v49, %v16061_v1  ;;  %v16063_v59 = vrot.slane %v16062_v61, 2  ;;  %v16065_v20 = vrot.slane %v16064_v38, 2  ;;  %v16067_v32 = vld [vmem:[#allocation155_spill] sm:$0xff]  ;;  %v16070_v49 = vld [vmem:[#allocation92_spill] sm:$0xff]  ;;  %v11970_v43 = vpop.f32.mrf.mxu0 }
 0x214   : > { %v2370_v24 = vadd.f32 %v2219_v8, %v2002_v33  ;;  %v2009_v11 = vadd.f32 %v1863_v47, %v16066_v55  ;;  %v16068_v40 = vrot.slane %v16067_v32, 2  ;;  %v2815_v46 = vrot.slane %v16070_v49, 2  ;;  %16071 = vst [vmem:[#allocation58_spill] sm:$0xff] %v11970_v43  ;;  %v16072_v33 = vld [vmem:[#allocation94_spill] sm:$0xff]  ;;  %v16073_v38 = vld [vmem:[#allocation51_spill] sm:$0xff] }
 0x215   : > { %v2227_v50 = vsel %vm1098_vm1, %v16065_v20, %v16063_v59  ;;  %v16069_v10 = vmov %v16063_v59  ;;  %v8062_v59 = vld [vmem:[%s14775_s3 + $0x194] ss:$8 sps:$4 sm:$0xff]   ;;  %v2432_v63 = vadd.f32 %v2368_v37, %v8537_v2  ;;  %v15147_v47 = vrot.slane %v16072_v33, 2  ;;  %v8063_v61 = vld [vmem:[%s14775_s3 + $0x190] ss:$8 sps:$4 sm:$0xff]  }
 0x216   : > { %v2231_v1 = vsel %vm1098_vm1, %v16069_v10, %v16068_v40  ;;  %4721 = vmatprep.subr.bf16.mxu0 %v8062_v59  ;;  %v2375_v8 = vadd.f32 %v2227_v50, %v2007_v45  ;;  %v16074_v20 = vmax.f32 %v16073_v38, 0.0  ;;  %v8064_v55 = vld [vmem:[%s14775_s3 + $0x294] ss:$8 sps:$4 sm:$0xff]   ;;  %v11982_v40 = vpop.f32.mrf.mxu1  ;;  %v2434_v37 = vadd.f32 %v2370_v24, %v8537_v2  ;;  %v8065_v59 = vld [vmem:[%s14775_s3 + $0x184] ss:$8 sps:$4 sm:$0xff]  }
 0x217   : > { %4722 = vmatpush2.bf16.msra.mxu0 %v8063_v61  ;;  %4874 = vmatprep.subr.bf16.mxu1 %v8064_v55  ;;  %16075 = vst [vmem:[#allocation117_spill] sm:$0xff] %v11982_v40  ;;  %v2377_v50 = vadd.f32 %v2231_v1, %v2009_v11  ;;  %v2816_v45 = vsel %vm1098_vm1, %v2814_v29, %v2815_v46  ;;  %v16076_v10 = vld [vmem:[#allocation96_spill] sm:$0xff]  ;;  %v11990_v38 = vmax.f32 %v2432_v63, 0.0  ;;  %v16077_v24 = vrot.slane %v16036_v14, 2  ;;  %v12009_v14 = vpop.f32.mrf.mxu0 }
 0x218   : > { %v2826_v36 = vrot.slane %v16074_v20, 2  ;;  %v2831_v49 = vrot.slane %v16076_v10, 2  ;;  %4723 = vmatprep.subr.bf16.mxu0 %v8065_v59  ;;  %v2439_v20 = vadd.f32 %v2375_v8, %v8540_v3  ;;  %v2821_v61 = vsel %vm1098_vm1, %v2815_v46, %v15147_v47  ;;  %v8066_v29 = vld [vmem:[%s14775_s3 + $0x290] ss:$8 sps:$4 sm:$0xff]   ;;  %v16079_v10 = vld [vmem:[#allocation98_spill] sm:$0xff]  ;;  %16080 = vst [vmem:[#allocation54_spill] sm:$0xff] %v12009_v14 }
 0x219   : > { %4875 = vmatpush2.bf16.msra.mxu1 %v8066_v29  ;;  %v12002_v1 = vmax.f32 %v2434_v37, 0.0  ;;  %v2441_v63 = vadd.f32 %v2377_v50, %v8540_v3  ;;  %v2958_v55 = vpack.c.bf16 %v2821_v61, %v2816_v45  ;;  %v2832_v8 = vrot.slane %v16079_v10, 2  ;;  %v8067_v46 = vld [vmem:[%s14775_s3 + $0x284] ss:$8 sps:$4 sm:$0xff]   ;;  %v16082_v59 = vld [vmem:[#allocation5_spill] sm:$0xff]  ;;  %v16084_v47 = vld [vmem:[#allocation144_spill] sm:$0xff] }
 0x21a   : > { %v2827_v11 = vsel %vm1098_vm1, %v16077_v24, %v2826_v36  ;;  %4876 = vmatprep.subr.bf16.mxu1 %v8067_v46  ;;  %v12011_v36 = vmax.f32 %v2439_v20, 0.0  ;;  %v16083_v24 = vrot.slane %v16082_v59, 1  ;;  %v16085_v29 = vrot.slane %v16084_v47, 1  ;;  %v16086_v40 = vld [vmem:[#allocation80_spill] sm:$0xff]  ;;  %v16089_v10 = vld [vmem:[#allocation151_spill] sm:$0xff]  ;;  %v12031_v47 = vpop.f32.mrf.mxu1 }
 0x21b   : > { %16078 = vst [vmem:[#allocation124_spill] sm:$0xff] %v12002_v1  ;;  %v16087_v50 = vrot.slane %v16086_v40, 1  ;;  %v16090_v43 = vrot.slane %v16089_v10, 2  ;;  %v16092_v46 = vrot.slane %v16091_v52, 2  ;;  %v8068_v20 = vld [vmem:[%s14775_s3 + $0x180] ss:$8 sps:$4 sm:$0xff]   ;;  %3976 = vmatmul.mubr.bf16.gmra.mxu0 %v2958_v55  ;;  %v2833_v59 = vsel %vm1098_vm1, %v2831_v49, %v2832_v8 }
 0x21c   : > { %16081 = vst [vmem:[#allocation75_spill] sm:$0xff] %v12011_v36  ;;  %v1856_v37 = vsel %vm711_vm0, %v16085_v29, %v16083_v24  ;;  %v16088_v45 = vmov %v16083_v24  ;;  %4724 = vmatpush2.bf16.msra.mxu0 %v8068_v20  ;;  %16093 = vst [vmem:[#allocation70_spill] sm:$0xff] %v12031_v47  ;;  %v4498_v24 = vpack.c.bf16 %v12002_v1, %v11990_v38  ;;  %v12035_v29 = vmax.f32 %v2441_v63, 0.0  ;;  %v8069_v49 = vld [vmem:[%s14775_s3 + $0x280] ss:$8 sps:$4 sm:$0xff]   ;;  %v16102_v55 = vld [vmem:[#allocation169_spill] sm:$0xff] }
 0x21d   : > { %v1861_v61 = vsel %vm711_vm0, %v16088_v45, %v16087_v50  ;;  %v2224_v14 = vsel %vm1098_vm1, %v16092_v46, %v16090_v43  ;;  %v16095_v50 = vld [vmem:[#allocation148_spill] sm:$0xff]  ;;  %v2965_v52 = vpack.c.bf16 %v2833_v59, %v2827_v11  ;;  %v16097_v46 = vld [vmem:[#allocation154_spill] sm:$0xff]  ;;  %v16099_v18 = vrot.slane %v16089_v10, 2  ;;  %4877 = vmatpush2.bf16.msra.mxu1 %v8069_v49  ;;  %v16106_v10 = vld [vmem:[#allocation153_spill] sm:$0xff]  ;;  %v12061_v59 = vpop.f32.mrf.mxu0 }
 0x21e   : > { %16094 = vst [vmem:[#allocation20_spill] sm:$0xff] %v12035_v29  ;;  %v2006_v45 = vadd.f32 %v1856_v37, %v16095_v50  ;;  %v2008_v43 = vadd.f32 %v1861_v61, %v16096_v53  ;;  %v16098_v5 = vrot.slane %v16097_v46, 2  ;;  %v16100_v47 = vrot.slane %v10932_v42, 1  ;;  %4623 = vmatmul.mubr.bf16.gmra.mxu1 %v4498_v24  ;;  %v16104_v61 = vld [vmem:[#allocation163_spill] sm:$0xff]  ;;  %16107 = vst [vmem:[#allocation37_spill] sm:$0xff] %v12061_v59  ;;  %v16109_v49 = vld [vmem:[#allocation160_spill] sm:$0xff] }
 0x21f   : > { %v16101_v1 = vrot.slane %v10885_v6, 1  ;;  %v4505_v53 = vpack.c.bf16 %v12035_v29, %v12011_v36  ;;  %v16103_v37 = vrot.slane %v16102_v55, 1  ;;  %3985 = vmatprep.mubr.bf16.mxu0 %v2965_v52  ;;  %v16110_v24 = vrot.slane %v16109_v49, 2  ;;  %v16113_v36 = vld [vmem:[#allocation164_spill] sm:$0xff] }
 0x220   : > { %v2229_v20 = vsel %vm1098_vm1, %v16099_v18, %v16098_v5  ;;  %v2374_v11 = vadd.f32 %v2224_v14, %v2006_v45  ;;  %v16105_v18 = vrot.slane %v16104_v61, 1  ;;  %v16111_v42 = vrot.slane %v16067_v32, 2  ;;  %v16120_v49 = vld [vmem:[#allocation104_spill] sm:$0xff] }
 0x221   : > { %v1867_v63 = vsel %vm711_vm0, %v16101_v1, %v16100_v47  ;;  %v2376_v1 = vadd.f32 %v2229_v20, %v2008_v43  ;;  %v16108_v47 = vld [vmem:[#allocation167_spill] sm:$0xff]  ;;  %v16112_v45 = vrot.slane %v11018_v23, 2  ;;  %v16114_v61 = vrot.slane %v16113_v36, 2  ;;  %4632 = vmatprep.mubr.bf16.mxu1 %v4505_v53  ;;  %v16116_v20 = vld [vmem:[#allocation10_spill] sm:$0xff] }
 0x222   : > { %v1873_v5 = vsel %vm711_vm0, %v16105_v18, %v16103_v37  ;;  %v2011_v6 = vadd.f32 %v1867_v63, %v16106_v10  ;;  %v2235_v14 = vsel %vm1098_vm1, %v16111_v42, %v16110_v24  ;;  %v12074_v18 = vpop.f32.mrf.mxu1  ;;  %v2438_v52 = vadd.f32 %v2374_v11, %v8537_v2  ;;  %v16118_v10 = vld [vmem:[#allocation53_spill] sm:$0xff] }
 0x223   : > { %v2015_v50 = vadd.f32 %v1873_v5, %v16108_v47  ;;  %v2241_v37 = vsel %vm1098_vm1, %v16114_v61, %v16112_v45  ;;  %16115 = vst [vmem:[#allocation134_spill] sm:$0xff] %v12074_v18  ;;  %v16117_v63 = vmax.f32 %v16116_v20, 0.0  ;;  %v2828_v47 = vrot.slane %v16118_v10, 2  ;;  %v16119_v24 = vld [vmem:[#allocation105_spill] sm:$0xff]  ;;  %v12091_v20 = vpop.f32.mrf.mxu0 }
 0x224   : > { %v2379_v43 = vadd.f32 %v2235_v14, %v2011_v6  ;;  %v2440_v32 = vadd.f32 %v2376_v1, %v8537_v2  ;;  %v2829_v59 = vrot.slane %v16119_v24, 2  ;;  %v2836_v36 = vrot.slane %v16120_v49, 2  ;;  %v16123_v6 = vld [vmem:[#allocation107_spill] sm:$0xff]  ;;  %16125 = vst [vmem:[#allocation132_spill] sm:$0xff] %v12091_v20 }
 0x225   : > { %v2824_v5 = vrot.slane %v16117_v63, 2  ;;  %v2383_v42 = vadd.f32 %v2241_v37, %v2015_v50  ;;  %v12083_v29 = vmax.f32 %v2438_v52, 0.0  ;;  %v16122_v53 = vrot.slane %v16072_v33, 2  ;;  %v12098_v37 = vpop.f32.mrf.mxu1 }
 0x226   : > { %v2443_v45 = vadd.f32 %v2379_v43, %v8540_v3  ;;  %v16124_v14 = vmax.f32 %v16123_v6, 0.0  ;;  %v12093_v63 = vmax.f32 %v2440_v32, 0.0  ;;  %v2830_v50 = vsel %vm1098_vm1, %v2828_v47, %v2829_v59  ;;  %16127 = vst [vmem:[#allocation131_spill] sm:$0xff] %v12098_v37 }
 0x227   : > { %16121 = vst [vmem:[#allocation48_spill] sm:$0xff] %v12083_v29  ;;  %v2825_v11 = vsel %vm1098_vm1, %v16122_v53, %v2824_v5  ;;  %v2447_v1 = vadd.f32 %v2383_v42, %v8540_v3  ;;  %v2837_v49 = vsel %vm1098_vm1, %v2832_v8, %v2836_v36  ;;  %v16128_v5 = vld [vmem:[#allocation157_spill] sm:$0xff]  ;;  %v16130_v24 = vrot.slane %v16086_v40, 1  ;;  %v16132_v8 = vld [vmem:[#allocation168_spill] sm:$0xff]  ;;  %v16138_v40 = vld [vmem:[#allocation159_spill] sm:$0xff] }
 0x228   : > { %v2840_v61 = vrot.slane %v16124_v14, 2  ;;  %16126 = vst [vmem:[#allocation71_spill] sm:$0xff] %v12093_v63  ;;  %v12100_v52 = vmax.f32 %v2443_v45, 0.0  ;;  %v2964_v33 = vpack.c.bf16 %v2830_v50, %v2825_v11  ;;  %v16129_v10 = vrot.slane %v16128_v5, 1  ;;  %v16134_v14 = vld [vmem:[#allocation162_spill] sm:$0xff] }
 0x229   : > { %v4504_v42 = vpack.c.bf16 %v12093_v63, %v12083_v29  ;;  %v12110_v53 = vmax.f32 %v2447_v1, 0.0  ;;  %v16133_v6 = vrot.slane %v16132_v8, 1  ;;  %v16135_v45 = vrot.slane %v16134_v14, 1  ;;  %v16137_v50 = vld [vmem:[#allocation166_spill] sm:$0xff]  ;;  %v12129_v14 = vpop.f32.mrf.mxu0 }
 0x22a   : > { %v2841_v43 = vsel %vm1098_vm1, %v2836_v36, %v2840_v61  ;;  %v1865_v32 = vsel %vm711_vm0, %v16130_v24, %v16129_v10  ;;  %3986 = vmatmul.mubr.bf16.gmra.mxu0 %v2964_v33  ;;  %v16136_v36 = vld [vmem:[#allocation46_spill] sm:$0xff]  ;;  %v16139_v37 = vrot.slane %v16138_v40, 2  ;;  %v16140_v10 = vrot.slane %v16097_v46, 2  ;;  %16145 = vst [vmem:[#allocation77_spill] sm:$0xff] %v12129_v14  ;;  %v16155_v14 = vld [vmem:[#allocation172_spill] sm:$0xff] }
 0x22b   : > { %16131 = vst [vmem:[#allocation28_spill] sm:$0xff] %v12110_v53  ;;  %v2971_v47 = vpack.c.bf16 %v2841_v43, %v2837_v49  ;;  %v1870_v11 = vsel %vm711_vm0, %v16135_v45, %v16133_v6  ;;  %v2010_v61 = vadd.f32 %v1865_v32, %v16136_v36  ;;  %v16141_v1 = vld [vmem:[#allocation170_spill] sm:$0xff]  ;;  %v16143_v49 = vld [vmem:[#allocation91_spill] sm:$0xff]  ;;  %4633 = vmatmul.mubr.bf16.gmra.mxu1 %v4504_v42  ;;  %v16148_v45 = vrot.slane %v16102_v55, 1  ;;  %v7879_v42 = vld [vmem:[%s14777_s5 + $0x78] sm:$0xff]  }
 0x22c   : > { %v2014_v20 = vadd.f32 %v1870_v11, %v16137_v50  ;;  %v2233_v24 = vsel %vm1098_vm1, %v16140_v10, %v16139_v37  ;;  %v16142_v18 = vrot.slane %v16141_v1, 2  ;;  %v16144_v43 = vrot.slane %v16143_v49, 2  ;;  %v16146_v32 = vld [vmem:[#allocation171_spill] sm:$0xff]  ;;  %v16149_v37 = vld [vmem:[#allocation90_spill] sm:$0xff]  ;;  %v12144_v49 = vpop.f32.mrf.mxu1  ;;  %v7881_v55 = vld [vmem:[%s14777_s5 + $0xf8] sm:$0xff]   ;;  %7337 = vmatprep.subr.bf16.mxu0 %v7879_v42 }
 0x22d   : > { %v4511_v33 = vpack.c.bf16 %v12110_v53, %v12100_v52  ;;  %3995 = vmatprep.mubr.bf16.mxu0 %v2971_v47  ;;  %v16147_v6 = vrot.slane %v16146_v32, 1  ;;  %v16150_v11 = vrot.slane %v16149_v37, 1  ;;  %16153 = vst [vmem:[#allocation50_spill] sm:$0xff] %v12144_v49  ;;  %v2378_v47 = vadd.f32 %v2233_v24, %v2010_v61  ;;  %7401 = vmatprep.subr.bf16.mxu1 %v7881_v55 }
 0x22e   : > { %v2238_v29 = vsel %vm1098_vm1, %v16144_v43, %v16142_v18  ;;  %v16152_v18 = vld [vmem:[#allocation68_spill] sm:$0xff]  ;;  %v16159_v53 = vrot.slane %v11091_v25, 2  ;;  %v16219_v25 = vrot.slane %v11199_v0, 2 }
 0x22f   : > { %v1877_v46 = vsel %vm711_vm0, %v16148_v45, %v16147_v6  ;;  %v16151_v36 = vmov %v16147_v6  ;;  %v2834_v10 = vrot.slane %v16152_v18, 2  ;;  %v2382_v43 = vadd.f32 %v2238_v29, %v2014_v20  ;;  %v16154_v6 = vld [vmem:[#allocation49_spill] sm:$0xff]  ;;  %4642 = vmatprep.mubr.bf16.mxu1 %v4511_v33  ;;  %v16161_v29 = vld [vmem:[#allocation120_spill] sm:$0xff] }
 0x230   : > { %v1881_v50 = vsel %vm711_vm0, %v16151_v36, %v16150_v11  ;;  %v2017_v45 = vadd.f32 %v1877_v46, %v16154_v6  ;;  %v16156_v11 = vld [vmem:[#allocation21_spill] sm:$0xff]  ;;  %v16158_v18 = vrot.slane %v11018_v23, 2  ;;  %v16162_v20 = vmax.f32 %v16161_v29, 0.0  ;;  %v12175_v29 = vpop.f32.mrf.mxu1 }
 0x231   : > { %v2019_v32 = vadd.f32 %v1881_v50, %v16155_v14  ;;  %v16157_v36 = vrot.slane %v16156_v11, 2  ;;  %v2835_v61 = vsel %vm1098_vm1, %v2829_v59, %v2834_v10  ;;  %v2442_v14 = vadd.f32 %v2378_v47, %v8537_v2  ;;  %v12169_v50 = vpop.f32.mrf.mxu0  ;;  %v16164_v11 = vld [vmem:[#allocation122_spill] sm:$0xff]  ;;  %v16166_v59 = vld [vmem:[#allocation127_spill] sm:$0xff]  ;;  %16167 = vst [vmem:[#allocation128_spill] sm:$0xff] %v12175_v29 }
 0x232   : > { %v2838_v24 = vrot.slane %v16162_v20, 2  ;;  %v2446_v33 = vadd.f32 %v2382_v43, %v8537_v2  ;;  %16163 = vst [vmem:[#allocation45_spill] sm:$0xff] %v12169_v50  ;;  %v16170_v20 = vrot.slane %v16132_v8, 1  ;;  %v16176_v8 = vld [vmem:[#allocation8_spill] sm:$0xff] }
 0x233   : > { %v2245_v49 = vsel %vm1098_vm1, %v16158_v18, %v16157_v36  ;;  %v16160_v37 = vmov %v16157_v36  ;;  %v2845_v36 = vrot.slane %v16164_v11, 2  ;;  %v2850_v18 = vrot.slane %v16166_v59, 2  ;;  %v16177_v59 = vld [vmem:[#allocation22_spill] sm:$0xff] }
 0x234   : > { %v2249_v63 = vsel %vm1098_vm1, %v16160_v37, %v16159_v53  ;;  %v2385_v46 = vadd.f32 %v2245_v49, %v2017_v45  ;;  %v2839_v6 = vsel %vm1098_vm1, %v2834_v10, %v2838_v24  ;;  %v16165_v53 = vld [vmem:[#allocation123_spill] sm:$0xff]  ;;  %v12177_v42 = vmax.f32 %v2442_v14, 0.0  ;;  %v16168_v45 = vld [vmem:[#allocation85_spill] sm:$0xff] }
 0x235   : > { %v2387_v23 = vadd.f32 %v2249_v63, %v2019_v32  ;;  %v2846_v37 = vrot.slane %v16165_v53, 2  ;;  %v12179_v47 = vmax.f32 %v2446_v33, 0.0  ;;  %v2970_v43 = vpack.c.bf16 %v2839_v6, %v2835_v61  ;;  %v16173_v61 = vld [vmem:[#allocation31_spill] sm:$0xff] }
 0x236   : > { %v2449_v49 = vadd.f32 %v2385_v46, %v8540_v3  ;;  %v16169_v32 = vrot.slane %v16168_v45, 1  ;;  %v16174_v6 = vrot.slane %v16173_v61, 1 }
 0x237   : > { %v2451_v63 = vadd.f32 %v2387_v23, %v8540_v3  ;;  %v2847_v55 = vsel %vm1098_vm1, %v2845_v36, %v2846_v37  ;;  %v2851_v10 = vsel %vm1098_vm1, %v2846_v37, %v2850_v18  ;;  %v4510_v14 = vpack.c.bf16 %v12179_v47, %v12177_v42  ;;  %v12196_v23 = vpop.f32.mrf.mxu0  ;;  %3996 = vmatmul.mubr.bf16.gmra.mxu0 %v2970_v43 }
 0x238   : > { %v1875_v24 = vsel %vm711_vm0, %v16170_v20, %v16169_v32  ;;  %v12192_v33 = vmax.f32 %v2449_v49, 0.0  ;;  %v2977_v46 = vpack.c.bf16 %v2851_v10, %v2847_v55  ;;  %16172 = vst [vmem:[#allocation133_spill] sm:$0xff] %v12196_v23  ;;  %v16175_v36 = vmov %v16169_v32  ;;  %v12214_v10 = vpop.f32.mrf.mxu1 }
 0x239   : > { %v12194_v11 = vmax.f32 %v2451_v63, 0.0  ;;  %v1879_v53 = vsel %vm711_vm0, %v16175_v36, %v16174_v6  ;;  %v2016_v37 = vadd.f32 %v1875_v24, %v16176_v8  ;;  %v16178_v32 = vrot.slane %v16177_v59, 2  ;;  %v16180_v63 = vld [vmem:[#allocation174_spill] sm:$0xff]  ;;  %16183 = vst [vmem:[#allocation121_spill] sm:$0xff] %v12214_v10  ;;  %4643 = vmatmul.mubr.bf16.gmra.mxu1 %v4510_v14  ;;  %v16184_v24 = vld [vmem:[#allocation89_spill] sm:$0xff] }
 0x23a   : > { %v16179_v20 = vrot.slane %v16141_v1, 2  ;;  %v16181_v50 = vrot.slane %v16180_v63, 2  ;;  %4005 = vmatprep.mubr.bf16.mxu0 %v2977_v46  ;;  %v2018_v6 = vadd.f32 %v1879_v53, %v16184_v24  ;;  %v16185_v36 = vrot.slane %v11151_v4, 1  ;;  %v16191_v53 = vld [vmem:[#allocation47_spill] sm:$0xff] }
 0x23b   : > { %16171 = vst [vmem:[#allocation74_spill] sm:$0xff] %v12194_v11  ;;  %v16182_v55 = vmov %v16178_v32  ;;  %v4517_v45 = vpack.c.bf16 %v12194_v11, %v12192_v33  ;;  %v16186_v1 = vrot.slane %v11116_v41, 1  ;;  %v16190_v46 = vrot.slane %v11162_v21, 2 }
 0x23c   : > { %v2243_v49 = vsel %vm1098_vm1, %v16179_v20, %v16178_v32  ;;  %v2247_v43 = vsel %vm1098_vm1, %v16182_v55, %v16181_v50  ;;  %v16187_v32 = vld [vmem:[#allocation72_spill] sm:$0xff]  ;;  %v16188_v50 = vrot.slane %v11190_v34, 1  ;;  %v16189_v55 = vmov %v16185_v36 }
 0x23d   : > { %v1887_v8 = vsel %vm711_vm0, %v16186_v1, %v16185_v36  ;;  %v2842_v20 = vrot.slane %v16187_v32, 2  ;;  %v2384_v59 = vadd.f32 %v2243_v49, %v2016_v37  ;;  %v16192_v24 = vrot.slane %v16191_v53, 2  ;;  %4652 = vmatprep.mubr.bf16.mxu1 %v4517_v45  ;;  %v16193_v36 = vld [vmem:[#allocation182_spill] sm:$0xff]  ;;  %v16196_v32 = vld [vmem:[#allocation79_spill] sm:$0xff] }
 0x23e   : > { %v1891_v14 = vsel %vm711_vm0, %v16189_v55, %v16188_v50  ;;  %v2023_v23 = vadd.f32 %v1887_v8, %v11140_v60  ;;  %v2386_v41 = vadd.f32 %v2247_v43, %v2018_v6  ;;  %v16194_v37 = vrot.slane %v11202_v48, 2  ;;  %v12243_v55 = vpop.f32.mrf.mxu0  ;;  %v16198_v53 = vld [vmem:[#allocation42_spill] sm:$0xff]  ;;  %v12249_v6 = vpop.f32.mrf.mxu1 }
 0x23f   : > { %v2255_v10 = vsel %vm1098_vm1, %v16192_v24, %v16190_v46  ;;  %v2025_v1 = vadd.f32 %v1891_v14, %v16193_v36  ;;  %v16195_v49 = vmov %v16190_v46  ;;  %v2843_v50 = vrot.slane %v16196_v32, 2  ;;  %16197 = vst [vmem:[#allocation64_spill] sm:$0xff] %v12243_v55  ;;  %v16199_v46 = vld [vmem:[#allocation143_spill] sm:$0xff]  ;;  %16201 = vst [vmem:[#allocation73_spill] sm:$0xff] %v12249_v6  ;;  %v16202_v36 = vld [vmem:[#allocation140_spill] sm:$0xff] }
 0x240   : > { %v2259_v4 = vsel %vm1098_vm1, %v16195_v49, %v16194_v37  ;;  %v2448_v60 = vadd.f32 %v2384_v59, %v8537_v2  ;;  %v2391_v8 = vadd.f32 %v2255_v10, %v2023_v23  ;;  %v2848_v29 = vrot.slane %v16198_v53, 2 }
 0x241   : > { %v16200_v45 = vmax.f32 %v16199_v46, 0.0  ;;  %v2450_v14 = vadd.f32 %v2386_v41, %v8537_v2  ;;  %v2393_v24 = vadd.f32 %v2259_v4, %v2025_v1  ;;  %v2844_v21 = vsel %vm1098_vm1, %v2842_v20, %v2843_v50  ;;  %v12263_v1 = vpop.f32.mrf.mxu0  ;;  %v16205_v4 = vld [vmem:[#allocation7_spill] sm:$0xff] }
 0x242   : > { %v2859_v37 = vrot.slane %v16202_v36, 2  ;;  %v12254_v49 = vmax.f32 %v2448_v60, 0.0  ;;  %v2455_v32 = vadd.f32 %v2391_v8, %v8540_v3  ;;  %v2849_v23 = vsel %vm1098_vm1, %v2843_v50, %v2848_v29  ;;  %16204 = vst [vmem:[#allocation135_spill] sm:$0xff] %v12263_v1  ;;  %v16207_v36 = vld [vmem:[#allocation177_spill] sm:$0xff] }
 0x243   : > { %v2854_v43 = vrot.slane %v16200_v45, 2  ;;  %v12259_v59 = vmax.f32 %v2450_v14, 0.0  ;;  %v2457_v53 = vadd.f32 %v2393_v24, %v8540_v3  ;;  %v2976_v46 = vpack.c.bf16 %v2849_v23, %v2844_v21  ;;  %v16203_v45 = vld [vmem:[#allocation146_spill] sm:$0xff]  ;;  %v16209_v50 = vld [vmem:[#allocation29_spill] sm:$0xff]  ;;  %v16214_v21 = vld [vmem:[#allocation44_spill] sm:$0xff] }
 0x244   : > { %v2860_v41 = vrot.slane %v16203_v45, 2  ;;  %v12265_v20 = vmax.f32 %v2455_v32, 0.0  ;;  %v16206_v60 = vrot.slane %v16205_v4, 1  ;;  %v16208_v55 = vrot.slane %v16207_v36, 1  ;;  %v16212_v14 = vld [vmem:[#allocation178_spill] sm:$0xff]  ;;  %v12282_v32 = vpop.f32.mrf.mxu1 }
 0x245   : > { %v2855_v10 = vsel %vm1098_vm1, %v2850_v18, %v2854_v43  ;;  %v16210_v6 = vrot.slane %v16209_v50, 1  ;;  %v16213_v24 = vrot.slane %v16212_v14, 2  ;;  %v16215_v23 = vrot.slane %v16214_v21, 2  ;;  %16216 = vst [vmem:[#allocation137_spill] sm:$0xff] %v12282_v32  ;;  %4006 = vmatmul.mubr.bf16.gmra.mxu0 %v2976_v46  ;;  %v16225_v14 = vld [vmem:[#allocation34_spill] sm:$0xff] }
 0x246   : > { %v1884_v8 = vsel %vm711_vm0, %v16208_v55, %v16206_v60  ;;  %v16211_v18 = vmov %v16206_v60  ;;  %v4516_v1 = vpack.c.bf16 %v12259_v59, %v12254_v49  ;;  %v12286_v36 = vmax.f32 %v2457_v53, 0.0  ;;  %v16217_v60 = vld [vmem:[#allocation15_spill] sm:$0xff] }
 0x247   : > { %v1889_v43 = vsel %vm711_vm0, %v16211_v18, %v16210_v6  ;;  %v2252_v45 = vsel %vm1098_vm1, %v16215_v23, %v16213_v24  ;;  %v2861_v55 = vsel %vm1098_vm1, %v2859_v37, %v2860_v41  ;;  %v2022_v4 = vadd.f32 %v1884_v8, %v16217_v60  ;;  %v16218_v6 = vld [vmem:[#allocation181_spill] sm:$0xff] }
 0x248   : > { %v2983_v11 = vpack.c.bf16 %v2861_v55, %v2855_v10  ;;  %v2024_v18 = vadd.f32 %v1889_v43, %v16218_v6  ;;  %v16220_v21 = vmov %v16213_v24  ;;  %v16221_v23 = vrot.slane %v11218_v31, 1  ;;  %4653 = vmatmul.mubr.bf16.gmra.mxu1 %v4516_v1 }
 0x249   : > { %v2257_v24 = vsel %vm1098_vm1, %v16220_v21, %v16219_v25  ;;  %v16222_v32 = vrot.slane %v11190_v34, 1  ;;  %v4523_v37 = vpack.c.bf16 %v12286_v36, %v12265_v20  ;;  %v2390_v46 = vadd.f32 %v2252_v45, %v2022_v4  ;;  %v12309_v25 = vpop.f32.mrf.mxu0  ;;  %v16231_v4 = vld [vmem:[#allocation189_spill] sm:$0xff] }
 0x24a   : > { %v16223_v10 = vrot.slane %v11318_v58, 1  ;;  %v16224_v8 = vrot.slane %v11259_v54, 1  ;;  %16226 = vst [vmem:[#allocation27_spill] sm:$0xff] %v12309_v25  ;;  %4015 = vmatprep.mubr.bf16.mxu0 %v2983_v11  ;;  %v2392_v60 = vadd.f32 %v2257_v24, %v2024_v18  ;;  %v16229_v6 = vrot.slane %v11202_v48, 2  ;;  %v16234_v24 = vld [vmem:[#allocation76_spill] sm:$0xff] }
 0x24b   : > { %v1895_v53 = vsel %vm711_vm0, %v16222_v32, %v16221_v23  ;;  %v16227_v32 = vld [vmem:[#allocation36_spill] sm:$0xff]  ;;  %v16230_v58 = vrot.slane %v11338_v39, 2  ;;  %v16232_v54 = vrot.slane %v16231_v4, 2  ;;  %v12322_v23 = vpop.f32.mrf.mxu1  ;;  %4662 = vmatprep.mubr.bf16.mxu1 %v4523_v37  ;;  %v2454_v11 = vadd.f32 %v2390_v46, %v8537_v2  ;;  %v16239_v46 = vld [vmem:[#allocation165_spill] sm:$0xff] }
 0x24c   : > { %v1901_v43 = vsel %vm711_vm0, %v16224_v8, %v16223_v10  ;;  %v2027_v55 = vadd.f32 %v1895_v53, %v16225_v14  ;;  %v16228_v1 = vrot.slane %v16227_v32, 2  ;;  %16233 = vst [vmem:[#allocation65_spill] sm:$0xff] %v12322_v23  ;;  %v16236_v10 = vld [vmem:[#allocation87_spill] sm:$0xff]  ;;  %v2456_v48 = vadd.f32 %v2392_v60, %v8537_v2  ;;  %v16237_v14 = vld [vmem:[#allocation156_spill] sm:$0xff]  ;;  %v16298_v23 = vld [vmem:[#allocation93_spill] sm:$0xff] }
 0x24d   : > { %v2031_v34 = vadd.f32 %v1901_v43, %v11292_v62  ;;  %v2269_v21 = vsel %vm1098_vm1, %v16232_v54, %v16230_v58  ;;  %v16235_v62 = vmax.f32 %v16234_v24, 0.0  ;;  %v2856_v8 = vrot.slane %v16236_v10, 2  ;;  %v12337_v54 = vpop.f32.mrf.mxu0 }
 0x24e   : > { %v2263_v45 = vsel %vm1098_vm1, %v16229_v6, %v16228_v1  ;;  %v2857_v1 = vrot.slane %v16237_v14, 2  ;;  %v16238_v6 = vld [vmem:[#allocation161_spill] sm:$0xff]  ;;  %v12331_v25 = vmax.f32 %v2454_v11, 0.0  ;;  %16241 = vst [vmem:[#allocation82_spill] sm:$0xff] %v12337_v54  ;;  %v12339_v24 = vmax.f32 %v2456_v48, 0.0 }
 0x24f   : > { %v2395_v18 = vadd.f32 %v2263_v45, %v2027_v55  ;;  %v2852_v53 = vrot.slane %v16235_v62, 2  ;;  %v2399_v43 = vadd.f32 %v2269_v21, %v2031_v34  ;;  %v2864_v4 = vrot.slane %v16238_v6, 2  ;;  %v12344_v62 = vpop.f32.mrf.mxu1 }
 0x250   : > { %v16240_v55 = vmax.f32 %v16239_v46, 0.0  ;;  %16242 = vst [vmem:[#allocation25_spill] sm:$0xff] %v12339_v24  ;;  %v2858_v34 = vsel %vm1098_vm1, %v2856_v8, %v2857_v1  ;;  %16243 = vst [vmem:[#allocation43_spill] sm:$0xff] %v12344_v62  ;;  %v16246_v14 = vrot.slane %v16209_v50, 1  ;;  %v16249_v46 = vld [vmem:[#allocation187_spill] sm:$0xff]  ;;  %v16253_v50 = vld [vmem:[#allocation33_spill] sm:$0xff] }
 0x251   : > { %v2459_v58 = vadd.f32 %v2395_v18, %v8540_v3  ;;  %v2853_v37 = vsel %vm1098_vm1, %v2848_v29, %v2852_v53  ;;  %v2463_v60 = vadd.f32 %v2399_v43, %v8540_v3  ;;  %v2865_v21 = vsel %vm1098_vm1, %v2860_v41, %v2864_v4  ;;  %v16244_v53 = vld [vmem:[#allocation183_spill] sm:$0xff] }
 0x252   : > { %v2868_v45 = vrot.slane %v16240_v55, 2  ;;  %v2982_v18 = vpack.c.bf16 %v2858_v34, %v2853_v37  ;;  %v16245_v10 = vrot.slane %v16244_v53, 1  ;;  %v4522_v43 = vpack.c.bf16 %v12339_v24, %v12331_v25 }
 0x253   : > { %v12346_v11 = vmax.f32 %v2459_v58, 0.0  ;;  %v12356_v6 = vmax.f32 %v2463_v60, 0.0  ;;  %v16248_v41 = vrot.slane %v11313_v16, 1  ;;  %v16250_v58 = vrot.slane %v16249_v46, 1  ;;  %v16256_v60 = vld [vmem:[#allocation194_spill] sm:$0xff]  ;;  %v12375_v46 = vpop.f32.mrf.mxu0 }
 0x254   : > { %v2869_v29 = vsel %vm1098_vm1, %v2864_v4, %v2868_v45  ;;  %v1893_v48 = vsel %vm711_vm0, %v16246_v14, %v16245_v10  ;;  %4016 = vmatmul.mubr.bf16.gmra.mxu0 %v2982_v18  ;;  %v16251_v4 = vld [vmem:[#allocation30_spill] sm:$0xff]  ;;  %v16254_v54 = vrot.slane %v16253_v50, 2  ;;  %v16255_v10 = vrot.slane %v11199_v0, 2  ;;  %16260 = vst [vmem:[#allocation86_spill] sm:$0xff] %v12375_v46  ;;  %4663 = vmatmul.mubr.bf16.gmra.mxu1 %v4522_v43 }
 0x255   : > { %16247 = vst [vmem:[#allocation84_spill] sm:$0xff] %v12356_v6  ;;  %v2989_v8 = vpack.c.bf16 %v2869_v29, %v2865_v21  ;;  %v1898_v37 = vsel %vm711_vm0, %v16250_v58, %v16248_v41  ;;  %v2026_v55 = vadd.f32 %v1893_v48, %v16251_v4  ;;  %v16252_v45 = vld [vmem:[#allocation190_spill] sm:$0xff]  ;;  %v16257_v62 = vrot.slane %v16256_v60, 2  ;;  %v16258_v21 = vld [vmem:[#allocation188_spill] sm:$0xff]  ;;  %v16261_v48 = vld [vmem:[#allocation193_spill] sm:$0xff]  ;;  %v12384_v4 = vpop.f32.mrf.mxu1 }
 0x256   : > { %v2030_v34 = vadd.f32 %v1898_v37, %v16252_v45  ;;  %v2261_v14 = vsel %vm1098_vm1, %v16255_v10, %v16254_v54  ;;  %v16259_v29 = vrot.slane %v16258_v21, 2  ;;  %v4529_v18 = vpack.c.bf16 %v12356_v6, %v12346_v11  ;;  %v16262_v58 = vld [vmem:[#allocation19_spill] sm:$0xff]  ;;  %v16263_v54 = vld [vmem:[#allocation173_spill] sm:$0xff]  ;;  %16264 = vst [vmem:[#allocation136_spill] sm:$0xff] %v12384_v4  ;;  %v12403_v4 = vpop.f32.mrf.mxu0 }
 0x257   : > { %4025 = vmatprep.mubr.bf16.mxu0 %v2989_v8  ;;  %v2033_v41 = vadd.f32 %v11475_v7, %v16261_v48  ;;  %v2035_v0 = vadd.f32 %v11542_v22, %v16262_v58  ;;  %v2862_v37 = vrot.slane %v16263_v54, 2  ;;  %v2394_v45 = vadd.f32 %v2261_v14, %v2026_v55  ;;  %v16269_v54 = vld [vmem:[#allocation175_spill] sm:$0xff]  ;;  %16273 = vst [vmem:[#allocation81_spill] sm:$0xff] %v12403_v4 }
 0x258   : > { %v2266_v16 = vsel %vm1098_vm1, %v16259_v29, %v16257_v62  ;;  %v16265_v62 = vrot.slane %v11367_v17, 2  ;;  %v16266_v43 = vrot.slane %v11338_v39, 2  ;;  %v16267_v8 = vrot.slane %v11446_v9, 2  ;;  %4672 = vmatprep.mubr.bf16.mxu1 %v4529_v18 }
 0x259   : > { %v2398_v10 = vadd.f32 %v2266_v16, %v2030_v34  ;;  %v2863_v58 = vsel %vm1098_vm1, %v2857_v1, %v2862_v37  ;;  %v16270_v55 = vmax.f32 %v16269_v54, 0.0  ;;  %v2458_v14 = vadd.f32 %v2394_v45, %v8537_v2  ;;  %v16271_v16 = vld [vmem:[#allocation179_spill] sm:$0xff]  ;;  %v16274_v1 = vld [vmem:[#allocation197_spill] sm:$0xff] }
 0x25a   : > { %v2273_v21 = vsel %vm1098_vm1, %v16266_v43, %v16265_v62  ;;  %v16268_v29 = vmov %v16265_v62  ;;  %v4151_v62 = vrot.slane %v16271_v16, 1  ;;  %v16272_v43 = vld [vmem:[#allocation180_spill] sm:$0xff] }
 0x25b   : > { %v2277_v7 = vsel %vm1098_vm1, %v16268_v29, %v16267_v8  ;;  %v2401_v22 = vadd.f32 %v2273_v21, %v2033_v41  ;;  %v2866_v34 = vrot.slane %v16270_v55, 2  ;;  %v2462_v39 = vadd.f32 %v2398_v10, %v8537_v2  ;;  %v12409_v21 = vpop.f32.mrf.mxu1 }
 0x25c   : > { %v2403_v48 = vadd.f32 %v2277_v7, %v2035_v0  ;;  %v4152_v46 = vrot.slane %v16272_v43, 1  ;;  %v15168_v0 = vrot.slane %v16274_v1, 1  ;;  %16275 = vst [vmem:[#allocation69_spill] sm:$0xff] %v12409_v21  ;;  %v12411_v8 = vmax.f32 %v2458_v14, 0.0  ;;  %v16281_v14 = vld [vmem:[#allocation195_spill] sm:$0xff]  ;;  %v16295_v21 = vld [vmem:[#allocation4_spill] sm:$0xff] }
 0x25d   : > { %v2465_v17 = vadd.f32 %v2401_v22, %v8540_v3  ;;  %v2867_v41 = vsel %vm1098_vm1, %v2862_v37, %v2866_v34  ;;  %v12413_v45 = vmax.f32 %v2462_v39, 0.0  ;;  %v16280_v37 = vld [vmem:[#allocation192_spill] sm:$0xff]  ;;  %v16282_v39 = vld [vmem:[#allocation198_spill] sm:$0xff] }
 0x25e   : > { %v2467_v18 = vadd.f32 %v2403_v48, %v8540_v3  ;;  %16276 = vst [vmem:[#allocation138_spill] sm:$0xff] %v12411_v8  ;;  %v2988_v10 = vpack.c.bf16 %v2867_v41, %v2863_v58  ;;  %v4153_v29 = vsel %vm711_vm0, %v4151_v62, %v4152_v46  ;;  %v4157_v22 = vsel %vm711_vm0, %v4152_v46, %v15168_v0  ;;  %v12434_v41 = vpop.f32.mrf.mxu0 }
 0x25f   : > { %16277 = vst [vmem:[#allocation40_spill] sm:$0xff] %v12413_v45  ;;  %v12416_v7 = vmax.f32 %v2465_v17, 0.0  ;;  %v2032_v48 = vadd.f32 %v11462_v57, %v16280_v37  ;;  %v4528_v55 = vpack.c.bf16 %v12413_v45, %v12411_v8  ;;  %v4471_v34 = vpack.c.bf16 %v4157_v22, %v4153_v29  ;;  %16285 = vst [vmem:[#allocation152_spill] sm:$0xff] %v12434_v41  ;;  %v12444_v22 = vpop.f32.mrf.mxu1  ;;  %v16290_v41 = vld [vmem:[#allocation184_spill] sm:$0xff] }
 0x260   : > { %v12418_v54 = vmax.f32 %v2467_v18, 0.0  ;;  %4026 = vmatmul.mubr.bf16.gmra.mxu0 %v2988_v10  ;;  %v2034_v58 = vadd.f32 %v11533_v12, %v16281_v14  ;;  %v16283_v62 = vrot.slane %v16282_v39, 2  ;;  %v16284_v17 = vrot.slane %v16256_v60, 2  ;;  %16288 = vst [vmem:[#allocation147_spill] sm:$0xff] %v12444_v22  ;;  %v16289_v60 = vld [vmem:[#allocation97_spill] sm:$0xff] }
 0x261   : > { %16278 = vst [vmem:[#allocation6_spill] sm:$0xff] %v12416_v7  ;;  %v16286_v57 = vrot.slane %v11431_v19, 2  ;;  %v4311_v12 = vrot.slane %v16271_v16, 2  ;;  %v1612_v14 = vmul.f32 %v16289_v60, %v8514_v56  ;;  %4673 = vmatmul.mubr.bf16.gmra.mxu1 %v4528_v55  ;;  %4725 = vmatprep.mubr.bf16.mxu0 %v4471_v34  ;;  %v4316_v0 = vrot.slane %v16274_v1, 2  ;;  %v16292_v16 = vld [vmem:[#allocation24_spill] sm:$0xff] }
 0x262   : > { %16279 = vst [vmem:[#allocation149_spill] sm:$0xff] %v12418_v54  ;;  %v2271_v18 = vsel %vm1098_vm1, %v16284_v17, %v16283_v62  ;;  %v4535_v46 = vpack.c.bf16 %v12418_v54, %v12416_v7  ;;  %v16287_v37 = vmov %v16283_v62  ;;  %v4312_v17 = vrot.slane %v16272_v43, 2  ;;  %v16296_v60 = vld [vmem:[#allocation112_spill] sm:$0xff]  ;;  %v16305_v7 = vld [vmem:[#allocation114_spill] sm:$0xff] }
 0x263   : > { %v2275_v10 = vsel %vm1098_vm1, %v16287_v37, %v16286_v57  ;;  %v2400_v29 = vadd.f32 %v2271_v18, %v2032_v48  ;;  %v4148_v57 = vrot.slane %v16290_v41, 1  ;;  %v16291_v48 = vld [vmem:[#allocation185_spill] sm:$0xff]  ;;  %v1621_v55 = vmul.f32 %v16296_v60, %v16295_v21 }
 0x264   : > { %v2402_v62 = vadd.f32 %v2275_v10, %v2034_v58  ;;  %4682 = vmatprep.mubr.bf16.mxu1 %v4535_v46  ;;  %v4149_v18 = vrot.slane %v16291_v48, 1  ;;  %v16293_v37 = vld [vmem:[#allocation101_spill] sm:$0xff]  ;;  %v4313_v43 = vsel %vm1098_vm1, %v4311_v12, %v4312_v17  ;;  %v12460_v58 = vpop.f32.mrf.mxu0  ;;  %v4317_v10 = vsel %vm1098_vm1, %v4312_v17, %v4316_v0  ;;  %v7883_v17 = vld [vmem:[%s14777_s5 + $0x70] sm:$0xff]  }
 0x265   : > { %v2464_v39 = vadd.f32 %v2400_v29, %v8537_v2  ;;  %v16294_v4 = vrot.slane %v16293_v37, 2  ;;  %16297 = vst [vmem:[#allocation39_spill] sm:$0xff] %v12460_v58  ;;  %v16299_v54 = vrot.slane %v16298_v23, 1  ;;  %v16301_v58 = vld [vmem:[#allocation199_spill] sm:$0xff]  ;;  %v16306_v32 = vrot.slane %v16305_v7, 1 }
 0x266   : > { %v2466_v34 = vadd.f32 %v2402_v62, %v8537_v2  ;;  %v4150_v29 = vsel %vm711_vm0, %v4148_v57, %v4149_v18  ;;  %v7880_v62 = vld [vmem:[%s14777_s5 + $0x38] sm:$0xff]   ;;  %v4165_v45 = vrot.slane %v16301_v58, 1  ;;  %v16302_v57 = vld [vmem:[#allocation99_spill] sm:$0xff]  ;;  %v4473_v24 = vpack.c.bf16 %v4317_v10, %v4313_v43 }
 0x267   : > { %v2349_v22 = vadd.f32 %v16294_v4, %v16292_v16  ;;  %v12462_v46 = vmax.f32 %v2464_v39, 0.0  ;;  %v4155_v37 = vsel %vm711_vm0, %v4149_v18, %v16299_v54  ;;  %v12469_v4 = vpop.f32.mrf.mxu1  ;;  %v16303_v6 = vrot.slane %v16302_v57, 1  ;;  %v16304_v18 = vld [vmem:[#allocation67_spill] sm:$0xff] }
 0x268   : > { %16300 = vst [vmem:[#allocation155_spill] sm:$0xff] %v12469_v4  ;;  %v12474_v16 = vmax.f32 %v2466_v34, 0.0  ;;  %v4470_v12 = vpack.c.bf16 %v4155_v37, %v4150_v29  ;;  %v15181_v4 = vrot.slane %v16304_v18, 1  ;;  %v1989_v8 = vadd.f32 %v16306_v32, %v1621_v55  ;;  %v12489_v37 = vpop.f32.mrf.mxu0  ;;  %v7884_v32 = vld [vmem:[%s14777_s5 + $0x30] sm:$0xff]  }
 0x269   : > { %v2413_v39 = vadd.f32 %v2349_v22, %v8540_v3  ;;  %v1980_v54 = vadd.f32 %v16303_v6, %v1612_v14  ;;  %v15182_v34 = vrot.slane %v16298_v23, 2  ;;  %16307 = vst [vmem:[#allocation92_spill] sm:$0xff] %v12489_v37  ;;  %v4308_v6 = vrot.slane %v16290_v41, 2  ;;  %v12496_v7 = vpop.f32.mrf.mxu1 }
 0x26a   : > { %v4534_v29 = vpack.c.bf16 %v12474_v16, %v12462_v46  ;;  %4726 = vmatmul.mubr.bf16.vlgmr.msra.gmra.mxu0 %v4470_v12  ;;  %v4167_v57 = vsel %vm711_vm0, %v4165_v45, %v15181_v4  ;;  %v4309_v14 = vrot.slane %v16291_v48, 2  ;;  %16308 = vst [vmem:[#allocation94_spill] sm:$0xff] %v12496_v7  ;;  %v4325_v43 = vrot.slane %v16301_v58, 2  ;;  %v7885_v45 = vld [vmem:[%s14777_s5 + $0x68] sm:$0xff]  }
 0x26b   : > { %v2477_v22 = vmax.f32 %v2413_v39, 0.0  ;;  %7338 = vmatpush3.bf16.msra.mxu0 %v7880_v62  ;;  %v1620_v41 = vmul.f32 %v16296_v60, %v8514_v56  ;;  %v16309_v48 = vrot.slane %v16274_v1, 1  ;;  %v12511_v39 = vpop.f32.mrf.mxu0  ;;  %v7886_v1 = vld [vmem:[%s14777_s5 + $0x28] sm:$0xff]  }
 0x26c   : > { %4683 = vmatmul.mubr.bf16.gmra.mxu1 %v4534_v29  ;;  %7339 = vmatprep.subr.bf16.mxu0 %v7883_v17  ;;  %16310 = vst [vmem:[#allocation51_spill] sm:$0xff] %v12511_v39  ;;  %v4310_v58 = vsel %vm1098_vm1, %v4308_v6, %v4309_v14  ;;  %v4315_v17 = vsel %vm1098_vm1, %v4309_v14, %v15182_v34  ;;  %v16317_v14 = vld [vmem:[#allocation26_spill] sm:$0xff] }
 0x26d   : > { %v4160_v55 = vrot.slane %v2477_v22, 1  ;;  %v4320_v12 = vrot.slane %v2477_v22, 2  ;;  %4878 = vmatprep.mubr.bf16.mxu1 %v4473_v24  ;;  %v16311_v22 = vld [vmem:[#allocation100_spill] sm:$0xff]  ;;  %v12519_v24 = vpop.f32.mrf.mxu1  ;;  %v12543_v39 = vpop.f32.mrf.mxu0  ;;  %v4322_v37 = vrot.slane %v16317_v14, 2 }
 0x26e   : > { %v16312_v4 = vrot.slane %v16311_v22, 2  ;;  %16313 = vst [vmem:[#allocation96_spill] sm:$0xff] %v12519_v24  ;;  %v16318_v22 = vld [vmem:[#allocation17_spill] sm:$0xff]  ;;  %16322 = vst [vmem:[#allocation98_spill] sm:$0xff] %v12543_v39 }
 0x26f   : > { %v4161_v62 = vsel %vm711_vm0, %v16309_v48, %v4160_v55  ;;  %7340 = vmatpush3.bf16.msra.mxu0 %v7884_v32  ;;  %v4321_v60 = vsel %vm1098_vm1, %v4316_v0, %v4320_v12  ;;  %v16315_v55 = vld [vmem:[#allocation116_spill] sm:$0xff]  ;;  %v4162_v32 = vrot.slane %v16317_v14, 1  ;;  %v7882_v0 = vld [vmem:[%s14777_s5 + $0xb8] sm:$0xff]   ;;  %v12550_v7 = vpop.f32.mrf.mxu1  ;;  %v12570_v24 = vpop.f32.mrf.mxu0 }
 0x270   : > { %v4477_v29 = vpack.c.bf16 %v4167_v57, %v4161_v62  ;;  %v2348_v10 = vadd.f32 %v16312_v4, %v1980_v54  ;;  %v16314_v57 = vrot.slane %v16304_v18, 2  ;;  %v16316_v48 = vrot.slane %v16315_v55, 2  ;;  %7341 = vmatprep.subr.bf16.mxu0 %v7885_v45  ;;  %v7889_v4 = vld [vmem:[%s14777_s5 + $0x60] sm:$0xff]   ;;  %v16319_v12 = vld [vmem:[#allocation113_spill] sm:$0xff]  ;;  %16323 = vst [vmem:[#allocation5_spill] sm:$0xff] %v12550_v7  ;;  %v7888_v14 = vld [vmem:[%s14777_s5 + $0xb0] sm:$0xff]  }
 0x271   : > { %v16321_v55 = vld [vmem:[#allocation106_spill] sm:$0xff]  ;;  %16328 = vst [vmem:[#allocation144_spill] sm:$0xff] %v12570_v24 }
 0x272   : > { %v4327_v6 = vsel %vm1098_vm1, %v4325_v43, %v16314_v57  ;;  %v2357_v62 = vadd.f32 %v16316_v48, %v1989_v8  ;;  %4735 = vmatprep.mubr.bf16.mxu0 %v4477_v29  ;;  %v2412_v54 = vadd.f32 %v2348_v10, %v8537_v2  ;;  %v16320_v43 = vrot.slane %v16319_v12, 1  ;;  %v7887_v10 = vld [vmem:[%s14777_s5 + $0xf0] sm:$0xff]  }
 0x273   : > { %v4472_v8 = vpack.c.bf16 %v4315_v17, %v4310_v58  ;;  %v4170_v48 = vrot.slane %v16321_v55, 1  ;;  %v4479_v29 = vpack.c.bf16 %v4327_v6, %v4321_v60  ;;  %7342 = vmatpush3.bf16.msra.mxu0 %v7886_v1  ;;  %v4330_v17 = vrot.slane %v16321_v55, 2  ;;  %v7892_v60 = vld [vmem:[%s14777_s5 + $0x58] sm:$0xff]  }
 0x274   : > { %v1988_v57 = vadd.f32 %v16320_v43, %v1620_v41  ;;  %v2421_v45 = vadd.f32 %v2357_v62, %v8540_v3  ;;  %v2476_v34 = vmax.f32 %v2412_v54, 0.0  ;;  %v7890_v41 = vld [vmem:[%s14777_s5 + $0x20] sm:$0xff]   ;;  %7343 = vmatprep.subr.bf16.mxu0 %v7889_v4  ;;  %v16324_v62 = vrot.slane %v16318_v22, 1 }
 0x275   : > { %4879 = vmatmul.mubr.bf16.vlgmr.msra.gmra.mxu1 %v4472_v8  ;;  %v16325_v12 = vrot.slane %v16304_v18, 1 }
 0x276   : > { %v2485_v58 = vmax.f32 %v2421_v45, 0.0  ;;  %4888 = vmatprep.mubr.bf16.mxu1 %v4479_v29  ;;  %v4158_v6 = vrot.slane %v2476_v34, 1  ;;  %v4164_v54 = vsel %vm711_vm0, %v4162_v32, %v16324_v62  ;;  %v4318_v1 = vrot.slane %v2476_v34, 2  ;;  %7402 = vmatpush3.bf16.msra.mxu1 %v7882_v0  ;;  %v16326_v45 = vld [vmem:[#allocation115_spill] sm:$0xff]  ;;  %v16329_v32 = vld [vmem:[#allocation126_spill] sm:$0xff] }
 0x277   : > { %v4171_v4 = vsel %vm711_vm0, %v16325_v12, %v4170_v48  ;;  %v16327_v55 = vrot.slane %v16326_v45, 2  ;;  %7403 = vmatprep.subr.bf16.mxu1 %v7887_v10  ;;  %v7891_v34 = vld [vmem:[%s14777_s5 + $0xe8] sm:$0xff]   ;;  %v1628_v0 = vmul.f32 %v16329_v32, %v8514_v56  ;;  %v16330_v62 = vrot.slane %v16298_v23, 1  ;;  %v12586_v10 = vpop.f32.mrf.mxu1  ;;  %7344 = vmatpush3.bf16.msra.mxu0 %v7890_v41 }
 0x278   : > { %v4174_v43 = vrot.slane %v2485_v58, 1  ;;  %v4334_v8 = vrot.slane %v2485_v58, 2  ;;  %v16331_v12 = vrot.slane %v16298_v23, 2  ;;  %7345 = vmatprep.subr.bf16.mxu0 %v7892_v60  ;;  %v1629_v41 = vmul.f32 %v16329_v32, %v16295_v21  ;;  %v16335_v60 = vld [vmem:[#allocation13_spill] sm:$0xff]  ;;  %v7898_v32 = vld [vmem:[%s14777_s5 + $0x10] sm:$0xff]  }
 0x279   : > { %v2356_v29 = vadd.f32 %v16327_v55, %v1988_v57  ;;  %v4159_v39 = vsel %vm711_vm0, %v16330_v62, %v4158_v6  ;;  %v16332_v57 = vrot.slane %v16318_v22, 2  ;;  %v7894_v55 = vld [vmem:[%s14777_s5 + $0x18] sm:$0xff]   ;;  %v16333_v6 = vrot.slane %v16304_v18, 2  ;;  %v7893_v18 = vld [vmem:[%s14777_s5 + $0xa8] sm:$0xff]  }
 0x27a   : > { %v4319_v58 = vsel %vm1098_vm1, %v16331_v12, %v4318_v1  ;;  %v4476_v24 = vpack.c.bf16 %v4164_v54, %v4159_v39  ;;  %v4175_v7 = vsel %vm711_vm0, %v4170_v48, %v4174_v43  ;;  %v4335_v1 = vsel %vm1098_vm1, %v4330_v17, %v4334_v8  ;;  %v16334_v39 = vld [vmem:[#allocation52_spill] sm:$0xff]  ;;  %7404 = vmatpush3.bf16.msra.mxu1 %v7888_v14 }
 0x27b   : > { %v4324_v45 = vsel %vm1098_vm1, %v4322_v37, %v16332_v57  ;;  %v4331_v23 = vsel %vm1098_vm1, %v16333_v6, %v4330_v17  ;;  %v7896_v37 = vld [vmem:[%s14777_s5 + $0x50] sm:$0xff]   ;;  %v4483_v62 = vpack.c.bf16 %v4175_v7, %v4171_v4  ;;  %v2420_v12 = vadd.f32 %v2356_v29, %v8537_v2  ;;  %v12609_v57 = vpop.f32.mrf.mxu0  ;;  %7405 = vmatprep.subr.bf16.mxu1 %v7891_v34  ;;  %v7895_v7 = vld [vmem:[%s14777_s5 + $0xe0] sm:$0xff]   ;;  %v7900_v6 = vld [vmem:[%s14777_s5 + $0x48] sm:$0xff]  }
 0x27c   : > { %v4168_v54 = vrot.slane %v16334_v39, 1  ;;  %4736 = vmatmul.mubr.bf16.gmra.mxu0 %v4476_v24  ;;  %v4478_v48 = vpack.c.bf16 %v4324_v45, %v4319_v58  ;;  %v4179_v17 = vrot.slane %v11683_v51, 1  ;;  %v4180_v43 = vrot.slane %v16335_v60, 1  ;;  %v12615_v24 = vpop.f32.mrf.mxu1 }
 0x27d   : > { %v15183_v8 = vrot.slane %v11808_v15, 1  ;;  %4745 = vmatprep.mubr.bf16.mxu0 %v4483_v62  ;;  %v4485_v14 = vpack.c.bf16 %v4335_v1, %v4331_v23  ;;  %v2484_v4 = vmax.f32 %v2420_v12, 0.0  ;;  %v4328_v29 = vrot.slane %v16334_v39, 2  ;;  %7346 = vmatpush3.bf16.msra.mxu0 %v7894_v55  ;;  %v16336_v23 = vld [vmem:[#allocation129_spill] sm:$0xff] }
 0x27e   : > { %4889 = vmatmul.mubr.bf16.gmra.mxu1 %v4478_v48  ;;  %v4339_v58 = vrot.slane %v11683_v51, 2  ;;  %v4340_v34 = vrot.slane %v16335_v60, 2  ;;  %7347 = vmatprep.subr.bf16.mxu0 %v7896_v37  ;;  %v16337_v1 = vrot.slane %v16336_v23, 1  ;;  %v16338_v55 = vrot.slane %v16318_v22, 1  ;;  %v7897_v51 = vld [vmem:[%s14777_s5 + $0xa0] sm:$0xff]  }
 0x27f   : > { %4898 = vmatprep.mubr.bf16.mxu1 %v4485_v14  ;;  %v4172_v39 = vrot.slane %v2484_v4, 1  ;;  %v4332_v48 = vrot.slane %v2484_v4, 2  ;;  %7406 = vmatpush3.bf16.msra.mxu1 %v7893_v18  ;;  %v16339_v37 = vrot.slane %v15997_v30, 1  ;;  %v4181_v45 = vsel %vm711_vm0, %v4179_v17, %v4180_v43  ;;  %v12640_v14 = vpop.f32.mrf.mxu0  ;;  %v7899_v18 = vld [vmem:[%s14777_s5 + $0xd8] sm:$0xff]   ;;  %v16341_v4 = vld [vmem:[#allocation139_spill] sm:$0xff] }
 0x280   : > { %v1997_v62 = vadd.f32 %v16337_v1, %v1629_v41  ;;  %v4169_v12 = vsel %vm711_vm0, %v16338_v55, %v4168_v54  ;;  %v4185_v41 = vsel %vm711_vm0, %v4180_v43, %v15183_v8  ;;  %16340 = vst [vmem:[#allocation80_spill] sm:$0xff] %v12640_v14  ;;  %7407 = vmatprep.subr.bf16.mxu1 %v7895_v7  ;;  %v16342_v30 = vrot.slane %v16318_v22, 2  ;;  %v12652_v55 = vpop.f32.mrf.mxu1  ;;  %v7902_v43 = vld [vmem:[%s14777_s5 + $0x8] sm:$0xff]  }
 0x281   : > { %v1996_v60 = vadd.f32 %v16339_v37, %v1628_v0  ;;  %v1636_v23 = vmul.f32 %v16341_v4, %v8514_v56  ;;  %v4173_v1 = vsel %vm711_vm0, %v4168_v54, %v4172_v39  ;;  %v4333_v17 = vsel %vm1098_vm1, %v4328_v29, %v4332_v48  ;;  %7348 = vmatpush3.bf16.msra.mxu0 %v7898_v32 }
 0x282   : > { %v4329_v0 = vsel %vm1098_vm1, %v16342_v30, %v4328_v29  ;;  %v4482_v7 = vpack.c.bf16 %v4173_v1, %v4169_v12  ;;  %v4341_v37 = vsel %vm1098_vm1, %v4339_v58, %v4340_v34  ;;  %v16343_v8 = vrot.slane %v11808_v15, 2  ;;  %7349 = vmatprep.subr.bf16.mxu0 %v7900_v6  ;;  %v7904_v29 = vld [vmem:[%s14777_s5 + $0x40] sm:$0xff]   ;;  %v16345_v6 = vld [vmem:[#allocation16_spill] sm:$0xff] }
 0x283   : > { %v4176_v22 = vrot.slane %v11772_v13, 1  ;;  %v4489_v39 = vpack.c.bf16 %v4185_v41, %v4181_v45  ;;  %v4177_v32 = vrot.slane %v11787_v27, 1  ;;  %v15184_v48 = vrot.slane %v11887_v28, 1  ;;  %7408 = vmatpush3.bf16.msra.mxu1 %v7897_v51  ;;  %v12676_v41 = vpop.f32.mrf.mxu0 }
 0x284   : > { %v4345_v54 = vsel %vm1098_vm1, %v4340_v34, %v16343_v8  ;;  %v16344_v12 = vrot.slane %v15986_v26, 2  ;;  %v7901_v8 = vld [vmem:[%s14777_s5 + $0x98] sm:$0xff]   ;;  %v1637_v58 = vmul.f32 %v16341_v4, %v16295_v21  ;;  %4746 = vmatmul.mubr.bf16.gmra.mxu0 %v4482_v7  ;;  %v4484_v34 = vpack.c.bf16 %v4333_v17, %v4329_v0  ;;  %7409 = vmatprep.subr.bf16.mxu1 %v7899_v18  ;;  %v7903_v26 = vld [vmem:[%s14777_s5 + $0xd0] sm:$0xff]   ;;  %v12683_v4 = vpop.f32.mrf.mxu1  ;;  %v7906_v0 = vld [vmem:[%s14777_s5] sm:$0xff]  }
 0x285   : > { %v4193_v30 = vrot.slane %v16345_v6, 1  ;;  %4755 = vmatprep.mubr.bf16.mxu0 %v4489_v39  ;;  %16346 = vst [vmem:[#allocation151_spill] sm:$0xff] %v12683_v4  ;;  %7350 = vmatpush3.bf16.msra.mxu0 %v7902_v43  ;;  %v16347_v17 = vld [vmem:[#allocation130_spill] sm:$0xff]  ;;  %v4178_v45 = vsel %vm711_vm0, %v4176_v22, %v4177_v32  ;;  %v4337_v39 = vrot.slane %v11787_v27, 2  ;;  %v16349_v27 = vrot.slane %v16044_v35, 1 }
 0x286   : > { %v2365_v1 = vadd.f32 %v16344_v12, %v1997_v62  ;;  %v4491_v62 = vpack.c.bf16 %v4345_v54, %v4341_v37  ;;  %v4336_v12 = vrot.slane %v11772_v13, 2  ;;  %v16348_v7 = vrot.slane %v16347_v17, 2  ;;  %4899 = vmatmul.mubr.bf16.gmra.mxu1 %v4484_v34  ;;  %7351 = vmatprep.subr.bf16.mxu0 %v7904_v29  ;;  %v16350_v34 = vld [vmem:[#allocation78_spill] sm:$0xff] }
 0x287   : > { %v4342_v37 = vrot.slane %v11887_v28, 2  ;;  %v4183_v13 = vsel %vm711_vm0, %v4177_v32, %v15184_v48  ;;  %v4353_v54 = vrot.slane %v16345_v6, 2  ;;  %7410 = vmatpush3.bf16.msra.mxu1 %v7901_v8  ;;  %v2004_v22 = vadd.f32 %v16349_v27, %v1636_v23  ;;  %v7907_v8 = vld [vmem:[%s14777_s5 + $0xc8] sm:$0xff]   ;;  %v12715_v27 = vpop.f32.mrf.mxu1 }
 0x288   : > { %v2429_v51 = vadd.f32 %v2365_v1, %v8540_v3  ;;  %v2364_v18 = vadd.f32 %v16348_v7, %v1996_v60  ;;  %4908 = vmatprep.mubr.bf16.mxu1 %v4491_v62  ;;  %v4354_v1 = vrot.slane %v11910_v44, 2  ;;  %v7905_v60 = vld [vmem:[%s14777_s5 + $0x90] sm:$0xff]   ;;  %v16351_v29 = vrot.slane %v16350_v34, 1  ;;  %7411 = vmatprep.subr.bf16.mxu1 %v7903_v26  ;;  %16353 = vst [vmem:[#allocation145_spill] sm:$0xff] %v12715_v27 }
 0x289   : > { %v16352_v17 = vrot.slane %v11910_v44, 1  ;;  %v4338_v7 = vsel %vm1098_vm1, %v4336_v12, %v4337_v39  ;;  %v4343_v35 = vsel %vm1098_vm1, %v4337_v39, %v4342_v37  ;;  %7352 = vmatpush3.bf16.msra.mxu0 %v7906_v0  ;;  %v16354_v26 = vrot.slane %v11808_v15, 1  ;;  %v16356_v12 = vld [vmem:[#allocation56_spill] sm:$0xff] }
 0x28a   : > { %v2493_v43 = vmax.f32 %v2429_v51, 0.0  ;;  %v2005_v62 = vadd.f32 %v16351_v29, %v1637_v58  ;;  %v12708_v51 = vpop.f32.mrf.mxu0  ;;  %v4488_v58 = vpack.c.bf16 %v4183_v13, %v4178_v45  ;;  %v4355_v34 = vsel %vm1098_vm1, %v4353_v54, %v4354_v1  ;;  %v7908_v45 = vld [vmem:[%s14777_s5 + $0x88] sm:$0xff]   ;;  %v16361_v27 = vld [vmem:[#allocation88_spill] sm:$0xff] }
 0x28b   : > { %v4195_v32 = vsel %vm711_vm0, %v4193_v30, %v16352_v17  ;;  %v2428_v30 = vadd.f32 %v2364_v18, %v8537_v2  ;;  %v16355_v17 = vrot.slane %v11808_v15, 2  ;;  %v4190_v14 = vrot.slane %v16356_v12, 1  ;;  %7412 = vmatpush3.bf16.msra.mxu1 %v7905_v60  ;;  %v7909_v15 = vld [vmem:[%s14777_s5 + $0xc0] sm:$0xff]  }
 0x28c   : > { %v4188_v6 = vrot.slane %v2493_v43, 1  ;;  %v4348_v23 = vrot.slane %v2493_v43, 2  ;;  %v4191_v39 = vrot.slane %v11990_v38, 1  ;;  %4756 = vmatmul.mubr.bf16.gmra.mxu0 %v4488_v58  ;;  %v4490_v18 = vpack.c.bf16 %v4343_v35, %v4338_v7  ;;  %v16357_v43 = vld [vmem:[#allocation142_spill] sm:$0xff]  ;;  %7413 = vmatprep.subr.bf16.mxu1 %v7907_v8  ;;  %v12742_v35 = vpop.f32.mrf.mxu1 }
 0x28d   : > { %v2492_v13 = vmax.f32 %v2428_v30, 0.0  ;;  %v16358_v54 = vrot.slane %v16357_v43, 2  ;;  %v1644_v4 = vmul.f32 %v16361_v27, %v8514_v56  ;;  %16363 = vst [vmem:[#allocation148_spill] sm:$0xff] %v12742_v35  ;;  %v1645_v43 = vmul.f32 %v16361_v27, %v16295_v21 }
 0x28e   : > { %v4189_v29 = vsel %vm711_vm0, %v16354_v26, %v4188_v6  ;;  %v4349_v48 = vsel %vm1098_vm1, %v16355_v17, %v4348_v23  ;;  %v12732_v26 = vpop.f32.mrf.mxu0  ;;  %v16359_v23 = vld [vmem:[#allocation141_spill] sm:$0xff]  ;;  %4909 = vmatmul.mubr.bf16.gmra.mxu1 %v4490_v18  ;;  %v16364_v18 = vrot.slane %v11887_v28, 1  ;;  %v16366_v27 = vrot.slane %v11910_v44, 1 }
 0x28f   : > { %v4495_v0 = vpack.c.bf16 %v4195_v32, %v4189_v29  ;;  %v2373_v6 = vadd.f32 %v16358_v54, %v2005_v62  ;;  %v16360_v60 = vrot.slane %v16359_v23, 2  ;;  %v4497_v58 = vpack.c.bf16 %v4355_v34, %v4349_v48  ;;  %v16362_v32 = vld [vmem:[#allocation59_spill] sm:$0xff]  ;;  %7414 = vmatpush3.bf16.msra.mxu1 %v7908_v45 }
 0x290   : > { %v4198_v7 = vrot.slane %v16362_v32, 1  ;;  %v4186_v62 = vrot.slane %v2492_v13, 1  ;;  %v4346_v30 = vrot.slane %v2492_v13, 2  ;;  %v4350_v29 = vrot.slane %v16356_v12, 2  ;;  %v12757_v54 = vpop.f32.mrf.mxu0  ;;  %7415 = vmatprep.subr.bf16.mxu1 %v7909_v15 }
 0x291   : > { %v2372_v17 = vadd.f32 %v16360_v60, %v2004_v22  ;;  %4765 = vmatprep.mubr.bf16.mxu0 %v4495_v0  ;;  %v2437_v8 = vadd.f32 %v2373_v6, %v8540_v3  ;;  %4918 = vmatprep.mubr.bf16.mxu1 %v4497_v58  ;;  %v4192_v22 = vsel %vm711_vm0, %v4190_v14, %v4191_v39  ;;  %v4351_v48 = vrot.slane %v11990_v38, 2  ;;  %v7910_v0 = vld [vmem:[%s14777_s5 + $0x80] sm:$0xff]   ;;  %v12764_v6 = vpop.f32.mrf.mxu1 }
 0x292   : > { %v4358_v34 = vrot.slane %v16362_v32, 2  ;;  %v4187_v13 = vsel %vm711_vm0, %v16364_v18, %v4186_v62  ;;  %16365 = vst [vmem:[#allocation150_spill] sm:$0xff] %v12757_v54  ;;  %v4199_v14 = vsel %vm711_vm0, %v16366_v27, %v4198_v7  ;;  %v4347_v38 = vsel %vm1098_vm1, %v4342_v37, %v4346_v30  ;;  %v16370_v27 = vld [vmem:[#allocation124_spill] sm:$0xff] }
 0x293   : > { %v2501_v12 = vmax.f32 %v2437_v8, 0.0  ;;  %v4352_v45 = vsel %vm1098_vm1, %v4350_v29, %v4351_v48  ;;  %v4494_v23 = vpack.c.bf16 %v4192_v22, %v4187_v13  ;;  %v16367_v32 = vrot.slane %v16128_v5, 1  ;;  %v16368_v8 = vld [vmem:[#allocation158_spill] sm:$0xff]  ;;  %7416 = vmatpush3.bf16.msra.mxu1 %v7910_v0  ;;  %v16371_v22 = vld [vmem:[#allocation20_spill] sm:$0xff]  ;;  %v12776_v13 = vpop.f32.mrf.mxu0 }
 0x294   : > { %v4359_v28 = vsel %vm1098_vm1, %v4354_v1, %v4358_v34  ;;  %v16369_v15 = vrot.slane %v16368_v8, 1  ;;  %v2436_v44 = vadd.f32 %v2372_v17, %v8537_v2  ;;  %v4196_v54 = vrot.slane %v16370_v27, 1  ;;  %v12779_v8 = vpop.f32.mrf.mxu1  ;;  %v16373_v17 = vld [vmem:[#allocation83_spill] sm:$0xff] }
 0x295   : > { %v4202_v60 = vrot.slane %v2501_v12, 1  ;;  %v4362_v58 = vrot.slane %v2501_v12, 2  ;;  %v2012_v62 = vadd.f32 %v16367_v32, %v1644_v4  ;;  %4766 = vmatmul.mubr.bf16.gmra.mxu0 %v4494_v23  ;;  %v4496_v30 = vpack.c.bf16 %v4352_v45, %v4347_v38  ;;  %v16372_v32 = vld [vmem:[#allocation75_spill] sm:$0xff]  ;;  %v16374_v23 = vld [vmem:[#allocation32_spill] sm:$0xff] }
 0x296   : > { %v2013_v18 = vadd.f32 %v16369_v15, %v1645_v43  ;;  %v4208_v1 = vrot.slane %v16371_v22, 1  ;;  %v2500_v12 = vmax.f32 %v2436_v44, 0.0  ;;  %v4207_v43 = vrot.slane %v16372_v32, 1  ;;  %v12795_v44 = vpop.f32.mrf.mxu0 }
 0x297   : > { %v4203_v37 = vsel %vm711_vm0, %v4198_v7, %v4202_v60  ;;  %v4363_v29 = vsel %vm1098_vm1, %v4358_v34, %v4362_v58  ;;  %v1652_v0 = vmul.f32 %v16373_v17, %v8514_v56  ;;  %v1660_v7 = vmul.f32 %v16374_v23, %v8514_v56  ;;  %4919 = vmatmul.mubr.bf16.gmra.mxu1 %v4496_v30 }
 0x298   : > { %v4501_v5 = vpack.c.bf16 %v4203_v37, %v4199_v14  ;;  %v4503_v4 = vpack.c.bf16 %v4363_v29, %v4359_v28  ;;  %v4197_v34 = vsel %vm711_vm0, %v4191_v39, %v4196_v54  ;;  %v4212_v38 = vrot.slane %v12100_v52, 1 }
 0x299   : > { %v4200_v14 = vrot.slane %v2500_v12, 1  ;;  %v4209_v45 = vsel %vm711_vm0, %v4207_v43, %v4208_v1  ;;  %v4356_v60 = vrot.slane %v16370_v27, 2  ;;  %v4360_v28 = vrot.slane %v2500_v12, 2 }
 0x29a   : > { %4775 = vmatprep.mubr.bf16.mxu0 %v4501_v5  ;;  %4928 = vmatprep.mubr.bf16.mxu1 %v4503_v4  ;;  %v4213_v58 = vsel %vm711_vm0, %v4208_v1, %v4212_v38  ;;  %v4367_v15 = vrot.slane %v16372_v32, 2  ;;  %v4368_v56 = vrot.slane %v16371_v22, 2  ;;  %v4372_v39 = vrot.slane %v12100_v52, 2  ;;  %v12802_v4 = vpop.f32.mrf.mxu1 }
 0x29b   : > { %v16375_v37 = vrot.slane %v16173_v61, 1  ;;  %v4201_v29 = vsel %vm711_vm0, %v4196_v54, %v4200_v14  ;;  %v4357_v27 = vsel %vm1098_vm1, %v4351_v48, %v4356_v60  ;;  %v4361_v5 = vsel %vm1098_vm1, %v4356_v60, %v4360_v28 }
 0x29c   : > { %v16376_v1 = vrot.slane %v16244_v53, 1  ;;  %v4500_v32 = vpack.c.bf16 %v4201_v29, %v4197_v34  ;;  %v4369_v22 = vsel %vm1098_vm1, %v4367_v15, %v4368_v56  ;;  %v4373_v43 = vsel %vm1098_vm1, %v4368_v56, %v4372_v39  ;;  %v7911_v53 = vld [vmem:[%s14777_s5 + $0x178] sm:$0xff]   ;;  %v16380_v15 = vld [vmem:[#allocation71_spill] sm:$0xff]  ;;  %v12824_v56 = vpop.f32.mrf.mxu0  ;;  %v16384_v29 = vld [vmem:[#allocation160_spill] sm:$0xff] }
 0x29d   : > { %v2020_v30 = vadd.f32 %v16375_v37, %v1652_v0  ;;  %v16377_v61 = vrot.slane %v16138_v40, 2  ;;  %v1653_v48 = vmul.f32 %v16373_v17, %v16295_v21  ;;  %v1661_v54 = vmul.f32 %v16374_v23, %v16295_v21  ;;  %v16381_v17 = vld [vmem:[#allocation90_spill] sm:$0xff]  ;;  %7465 = vmatprep.subr.bf16.mxu0 %v7911_v53 }
 0x29e   : > { %v2028_v12 = vadd.f32 %v16376_v1, %v1660_v7  ;;  %v4507_v14 = vpack.c.bf16 %v4213_v58, %v4209_v45  ;;  %v16378_v7 = vld [vmem:[#allocation12_spill] sm:$0xff]  ;;  %v16379_v34 = vrot.slane %v11431_v19, 2  ;;  %4776 = vmatmul.mubr.bf16.gmra.mxu0 %v4500_v32  ;;  %v4502_v28 = vpack.c.bf16 %v4361_v5, %v4357_v27  ;;  %v12831_v19 = vpop.f32.mrf.mxu1 }
 0x29f   : > { %v2380_v0 = vadd.f32 %v16377_v61, %v2012_v62  ;;  %v4205_v40 = vrot.slane %v16380_v15, 1  ;;  %v4210_v62 = vrot.slane %v12177_v42, 1  ;;  %v16382_v37 = vrot.slane %v16381_v17, 1  ;;  %v16383_v45 = vld [vmem:[#allocation48_spill] sm:$0xff]  ;;  %16386 = vst [vmem:[#allocation154_spill] sm:$0xff] %v12831_v19  ;;  %v12868_v17 = vpop.f32.mrf.mxu0 }
 0x2a0   : > { %v2404_v60 = vadd.f32 %v16379_v34, %v16378_v7  ;;  %4785 = vmatprep.mubr.bf16.mxu0 %v4507_v14  ;;  %v4509_v23 = vpack.c.bf16 %v4373_v43, %v4369_v22  ;;  %v4204_v58 = vrot.slane %v16383_v45, 1  ;;  %v16385_v1 = vrot.slane %v16384_v29, 2  ;;  %v16390_v22 = vld [vmem:[#allocation14_spill] sm:$0xff]  ;;  %4929 = vmatmul.mubr.bf16.gmra.mxu1 %v4502_v28  ;;  %16392 = vst [vmem:[#allocation169_spill] sm:$0xff] %v12868_v17 }
 0x2a1   : > { %v2021_v21 = vadd.f32 %v16382_v37, %v1653_v48  ;;  %v16387_v27 = vrot.slane %v16180_v63, 2  ;;  %v16388_v32 = vrot.slane %v11218_v31, 1  ;;  %v16389_v48 = vrot.slane %v16253_v50, 2  ;;  %v7913_v63 = vld [vmem:[%s14777_s5 + $0x1f8] sm:$0xff]   ;;  %v320_v31 = vld [vmem:[%s14776_s4] sm:$0x3] }
 0x2a2   : > { %v2381_v61 = vadd.f32 %v16385_v1, %v2013_v18  ;;  %v16391_v43 = vrot.slane %v11446_v9, 2  ;;  %4938 = vmatprep.mubr.bf16.mxu1 %v4509_v23  ;;  %v4206_v18 = vsel %vm711_vm0, %v4204_v58, %v4205_v40  ;;  %v4211_v50 = vsel %vm711_vm0, %v4205_v40, %v4210_v62  ;;  %7529 = vmatprep.subr.bf16.mxu1 %v7913_v63  ;;  %v16393_v23 = vld [vmem:[#allocation28_spill] sm:$0xff]  ;;  %v12873_v1 = vpop.f32.mrf.mxu1  ;;  %v16395_v63 = vld [vmem:[#allocation3_spill] sm:$0xff] }
 0x2a3   : > { %v12835_v5 = vadd.f32 %v16387_v27, %v2020_v30  ;;  %v12839_v7 = vadd.f32 %v16388_v32, %v1661_v54  ;;  %v12843_v14 = vadd.f32 %v16389_v48, %v2028_v12  ;;  %v4222_v30 = vrot.slane %v12192_v33, 1 }
 0x2a4   : > { %v12848_v34 = vadd.f32 %v16391_v43, %v16390_v22  ;;  %v2445_v9 = vadd.f32 %v2381_v61, %v8540_v3  ;;  %v12863_v12 = vadd.f32 %v2404_v60, %v8537_v2  ;;  %v4364_v54 = vrot.slane %v16383_v45, 2  ;;  %v16394_v60 = vld [vmem:[#allocation2_spill] sm:$0xff] }
 0x2a5   : > { %v4365_v53 = vrot.slane %v16380_v15, 2  ;;  %v4370_v28 = vrot.slane %v12177_v42, 2  ;;  %v4221_v58 = vrot.slane %v16393_v23, 1  ;;  %v4381_v40 = vrot.slane %v16393_v23, 2  ;;  %v16404_v42 = vld [vmem:[#allocation9_spill] sm:$0xff] }
 0x2a6   : > { %v2509_v37 = vmax.f32 %v2445_v9, 0.0  ;;  %v4382_v29 = vrot.slane %v12192_v33, 2  ;;  %v12876_v61 = vrot.slane %v320_v31, %v16394_v60  ;;  %v4506_v45 = vpack.c.bf16 %v4211_v50, %v4206_v18  ;;  %v12887_v18 = vpop.f32.mrf.mxu0 }
 0x2a7   : > { %v4366_v15 = vsel %vm1098_vm1, %v4364_v54, %v4365_v53  ;;  %v4371_v27 = vsel %vm1098_vm1, %v4365_v53, %v4370_v28  ;;  %v4223_v48 = vsel %vm711_vm0, %v4221_v58, %v4222_v30  ;;  %v12883_v9 = vrot.slane %v320_v31, %v16395_v63  ;;  %v16396_v31 = vld [vmem:[#allocation176_spill] sm:$0xff] }
 0x2a8   : > { %v4216_v32 = vrot.slane %v2509_v37, 1  ;;  %v4376_v22 = vrot.slane %v2509_v37, 2  ;;  %v4383_v43 = vsel %vm1098_vm1, %v4381_v40, %v4382_v29  ;;  %4786 = vmatmul.mubr.bf16.gmra.mxu0 %v4506_v45  ;;  %v4508_v33 = vpack.c.bf16 %v4371_v27, %v4366_v15  ;;  %v12898_v40 = vpop.f32.mrf.mxu1 }
 0x2a9   : > { %v2444_v23 = vadd.f32 %v2380_v0, %v8537_v2  ;;  %v4219_v60 = vrot.slane %v12254_v49, 1  ;;  %v4218_v53 = vrot.slane %v12179_v47, 1  ;;  %v16397_v37 = vrot.slane %v16396_v31, 2  ;;  %v16398_v0 = vld [vmem:[#allocation186_spill] sm:$0xff] }
 0x2aa   : > { %v4217_v50 = vsel %vm711_vm0, %v4212_v38, %v4216_v32  ;;  %v4377_v54 = vsel %vm1098_vm1, %v4372_v39, %v4376_v22  ;;  %v3612_v45 = vadd.f32 %v16398_v0, %v12876_v61  ;;  %4939 = vmatmul.mubr.bf16.gmra.mxu1 %v4508_v33  ;;  %v16399_v32 = vld [vmem:[#allocation74_spill] sm:$0xff]  ;;  %v4379_v0 = vrot.slane %v12254_v49, 2 }
 0x2ab   : > { %v2389_v58 = vadd.f32 %v16397_v37, %v2021_v21  ;;  %v4513_v15 = vpack.c.bf16 %v4223_v48, %v4217_v50  ;;  %v4515_v27 = vpack.c.bf16 %v4383_v43, %v4377_v54  ;;  %v2508_v63 = vmax.f32 %v2444_v23, 0.0  ;;  %v12908_v48 = vpop.f32.mrf.mxu0  ;;  %v16400_v43 = vld [vmem:[#allocation191_spill] sm:$0xff]  ;;  %v16401_v23 = vld [vmem:[#allocation196_spill] sm:$0xff] }
 0x2ac   : > { %v4220_v52 = vsel %vm711_vm0, %v4218_v53, %v4219_v60  ;;  %v4226_v22 = vrot.slane %v16399_v32, 1  ;;  %v4378_v37 = vrot.slane %v12179_v47, 2  ;;  %v3614_v33 = vadd.f32 %v16400_v43, %v12883_v9  ;;  %v16403_v47 = vld [vmem:[#allocation35_spill] sm:$0xff] }
 0x2ad   : > { %v2453_v39 = vadd.f32 %v2389_v58, %v8540_v3  ;;  %4795 = vmatprep.mubr.bf16.mxu0 %v4513_v15  ;;  %4948 = vmatprep.mubr.bf16.mxu1 %v4515_v27  ;;  %v4214_v21 = vrot.slane %v2508_v63, 1  ;;  %v4374_v31 = vrot.slane %v2508_v63, 2  ;;  %v3616_v50 = vadd.f32 %v16401_v23, %v12876_v61  ;;  %v12915_v58 = vpop.f32.mrf.mxu1  ;;  %v16402_v15 = vld [vmem:[#allocation41_spill] sm:$0xff] }
 0x2ae   : > { %v4386_v53 = vrot.slane %v16399_v32, 2  ;;  %v12918_v27 = vadd.f32 %v16402_v15, %v3612_v45  ;;  %v3618_v63 = vadd.f32 %v16403_v47, %v12883_v9  ;;  %v4380_v43 = vsel %vm1098_vm1, %v4378_v37, %v4379_v0  ;;  %v12931_v47 = vpop.f32.mrf.mxu0 }
 0x2af   : > { %v2517_v54 = vmax.f32 %v2453_v39, 0.0  ;;  %v4215_v49 = vsel %vm711_vm0, %v4210_v62, %v4214_v21  ;;  %v4227_v23 = vsel %vm711_vm0, %v4222_v30, %v4226_v22  ;;  %v4375_v32 = vsel %vm1098_vm1, %v4370_v28, %v4374_v31  ;;  %v16405_v62 = vld [vmem:[#allocation102_spill] sm:$0xff] }
 0x2b0   : > { %v4512_v38 = vpack.c.bf16 %v4220_v52, %v4215_v49  ;;  %v4514_v17 = vpack.c.bf16 %v4380_v43, %v4375_v32  ;;  %v4387_v19 = vsel %vm1098_vm1, %v4382_v29, %v4386_v53  ;;  %v2452_v15 = vadd.f32 %v12835_v5, %v8537_v2  ;;  %v12941_v52 = vpop.f32.mrf.mxu1  ;;  %v16410_v32 = vld [vmem:[#allocation95_spill] sm:$0xff] }
 0x2b1   : > { %v4230_v39 = vrot.slane %v2517_v54, 1  ;;  %v4390_v45 = vrot.slane %v2517_v54, 2  ;;  %v12934_v35 = vadd.f32 %v16404_v42, %v3614_v33  ;;  %v12937_v21 = vadd.f32 %v16405_v62, %v3616_v50  ;;  %16406 = vst [vmem:[#allocation163_spill] sm:$0xff] %v12941_v52  ;;  %v16407_v33 = vld [vmem:[#allocation38_spill] sm:$0xff] }
 0x2b2   : > { %4796 = vmatmul.mubr.bf16.gmra.mxu0 %v4512_v38  ;;  %v4224_v28 = vrot.slane %v12259_v59, 1  ;;  %4949 = vmatmul.mubr.bf16.gmra.mxu1 %v4514_v17  ;;  %v2516_v5 = vmax.f32 %v2452_v15, 0.0  ;;  %v4236_v37 = vrot.slane %v12286_v36, 1  ;;  %v3622_v54 = vadd.f32 %v16407_v33, %v12876_v61  ;;  %v12962_v42 = vpop.f32.mrf.mxu1 }
 0x2b3   : > { %v4231_v30 = vsel %vm711_vm0, %v4226_v22, %v4230_v39  ;;  %v4391_v31 = vsel %vm1098_vm1, %v4386_v53, %v4390_v45  ;;  %v4235_v50 = vrot.slane %v12265_v20, 1  ;;  %v15185_v38 = vrot.slane %v12346_v11, 1  ;;  %v16408_v22 = vld [vmem:[#allocation109_spill] sm:$0xff]  ;;  %v12954_v39 = vpop.f32.mrf.mxu0 }
 0x2b4   : > { %v4519_v29 = vpack.c.bf16 %v4231_v30, %v4227_v23  ;;  %v4521_v49 = vpack.c.bf16 %v4391_v31, %v4387_v19  ;;  %v12950_v43 = vadd.f32 %v16408_v22, %v3618_v63  ;;  %v4225_v23 = vsel %vm711_vm0, %v4219_v60, %v4224_v28  ;;  %16409 = vst [vmem:[#allocation153_spill] sm:$0xff] %v12954_v39 }
 0x2b5   : > { %v4228_v17 = vrot.slane %v2516_v5, 1  ;;  %v4384_v53 = vrot.slane %v12259_v59, 2  ;;  %v3624_v45 = vadd.f32 %v16410_v32, %v12883_v9  ;;  %v4237_v19 = vsel %vm711_vm0, %v4235_v50, %v4236_v37  ;;  %v12985_v32 = vpop.f32.mrf.mxu1 }
 0x2b6   : > { %4805 = vmatprep.mubr.bf16.mxu0 %v4519_v29  ;;  %4958 = vmatprep.mubr.bf16.mxu1 %v4521_v49  ;;  %v4241_v15 = vsel %vm711_vm0, %v4236_v37, %v15185_v38  ;;  %v4388_v63 = vrot.slane %v2516_v5, 2  ;;  %v4395_v59 = vrot.slane %v12265_v20, 2  ;;  %v4396_v30 = vrot.slane %v12286_v36, 2  ;;  %v16411_v29 = vld [vmem:[#allocation23_spill] sm:$0xff] }
 0x2b7   : > { %v4229_v60 = vsel %vm711_vm0, %v4224_v28, %v4228_v17  ;;  %v4385_v62 = vsel %vm1098_vm1, %v4379_v0, %v4384_v53  ;;  %v12969_v31 = vadd.f32 %v16411_v29, %v3622_v54  ;;  %v4400_v50 = vrot.slane %v12346_v11, 2  ;;  %v16412_v5 = vld [vmem:[#allocation103_spill] sm:$0xff]  ;;  %v12978_v17 = vpop.f32.mrf.mxu0 }
 0x2b8   : > { %v4518_v33 = vpack.c.bf16 %v4229_v60, %v4225_v23  ;;  %v4389_v49 = vsel %vm1098_vm1, %v4384_v53, %v4388_v63  ;;  %v12975_v37 = vadd.f32 %v16412_v5, %v12876_v61  ;;  %v4525_v22 = vpack.c.bf16 %v4241_v15, %v4237_v19  ;;  %v16413_v23 = vld [vmem:[#allocation25_spill] sm:$0xff]  ;;  %v16414_v63 = vld [vmem:[#allocation18_spill] sm:$0xff] }
 0x2b9   : > { %v4520_v28 = vpack.c.bf16 %v4389_v49, %v4385_v62  ;;  %v4397_v0 = vsel %vm1098_vm1, %v4395_v59, %v4396_v30  ;;  %v4401_v20 = vsel %vm1098_vm1, %v4396_v30, %v4400_v50  ;;  %v3702_v36 = vadd.f32 %v12676_v41, %v12876_v61  ;;  %v16415_v15 = vld [vmem:[#allocation138_spill] sm:$0xff]  ;;  %v16416_v59 = vld [vmem:[#allocation36_spill] sm:$0xff]  ;;  %v16418_v41 = vld [vmem:[#allocation111_spill] sm:$0xff] }
 0x2ba   : > { %4806 = vmatmul.mubr.bf16.gmra.mxu0 %v4518_v33  ;;  %v4232_v54 = vrot.slane %v12331_v25, 1  ;;  %v4233_v53 = vrot.slane %v16413_v23, 1  ;;  %v12988_v60 = vadd.f32 %v16414_v63, %v3624_v45  ;;  %v4527_v19 = vpack.c.bf16 %v4401_v20, %v4397_v0  ;;  %v16419_v5 = vld [vmem:[#allocation6_spill] sm:$0xff]  ;;  %v16420_v0 = vld [vmem:[#allocation84_spill] sm:$0xff]  ;;  %v13008_v63 = vpop.f32.mrf.mxu0 }
 0x2bb   : > { %4815 = vmatprep.mubr.bf16.mxu0 %v4525_v22  ;;  %4959 = vmatmul.mubr.bf16.gmra.mxu1 %v4520_v28  ;;  %v4238_v62 = vrot.slane %v16415_v15, 1  ;;  %v16417_v30 = vrot.slane %v16416_v59, 2  ;;  %v12996_v33 = vadd.f32 %v16418_v41, %v12883_v9  ;;  %v4250_v38 = vrot.slane %v16419_v5, 1 }
 0x2bc   : > { %v4234_v49 = vsel %vm711_vm0, %v4232_v54, %v4233_v53  ;;  %v3704_v45 = vadd.f32 %v12708_v51, %v12883_v9  ;;  %4968 = vmatprep.mubr.bf16.mxu1 %v4527_v19  ;;  %v4249_v20 = vrot.slane %v16420_v0, 1  ;;  %v4392_v54 = vrot.slane %v12331_v25, 2  ;;  %v13013_v51 = vpop.f32.mrf.mxu1  ;;  %v13026_v52 = vpop.f32.mrf.mxu0 }
 0x2bd   : > { %v2397_v29 = vadd.f32 %v16417_v30, %v12839_v7  ;;  %v4239_v22 = vsel %vm711_vm0, %v4233_v53, %v4238_v62  ;;  %v13006_v7 = vadd.f32 %v12764_v6, %v3702_v36  ;;  %v4393_v30 = vrot.slane %v16413_v23, 2 }
 0x2be   : > { %v4524_v59 = vpack.c.bf16 %v4239_v22, %v4234_v49  ;;  %v4398_v41 = vrot.slane %v16415_v15, 2  ;;  %v3706_v53 = vadd.f32 %v12732_v26, %v12876_v61  ;;  %v4410_v6 = vrot.slane %v16419_v5, 2  ;;  %v16421_v26 = vld [vmem:[#allocation11_spill] sm:$0xff] }
 0x2bf   : > { %v2461_v28 = vadd.f32 %v2397_v29, %v8540_v3  ;;  %v4409_v29 = vrot.slane %v16420_v0, 2  ;;  %v4251_v36 = vsel %vm711_vm0, %v4249_v20, %v4250_v38  ;;  %v4394_v49 = vsel %vm1098_vm1, %v4392_v54, %v4393_v30 }
 0x2c0   : > { %v4399_v25 = vsel %vm1098_vm1, %v4393_v30, %v4398_v41  ;;  %v13023_v23 = vadd.f32 %v12779_v8, %v3704_v45  ;;  %v13030_v0 = vadd.f32 %v16421_v26, %v12876_v61  ;;  %v13033_v5 = vadd.f32 %v12802_v4, %v3706_v53  ;;  %v13039_v45 = vpop.f32.mrf.mxu1 }
 0x2c1   : > { %v2525_v19 = vmax.f32 %v2461_v28, 0.0  ;;  %v4526_v22 = vpack.c.bf16 %v4399_v25, %v4394_v49  ;;  %v4411_v28 = vsel %vm1098_vm1, %v4409_v29, %v4410_v6  ;;  %v3712_v20 = vadd.f32 %v12776_v13, %v12876_v61  ;;  %v16423_v29 = vld [vmem:[#allocation40_spill] sm:$0xff] }
 0x2c2   : > { %4816 = vmatmul.mubr.bf16.gmra.mxu0 %v4524_v59  ;;  %v2460_v8 = vadd.f32 %v12843_v14, %v8537_v2  ;;  %v16422_v54 = vrot.slane %v12346_v11, 1  ;;  %v4246_v59 = vrot.slane %v16423_v29, 1  ;;  %v4247_v4 = vrot.slane %v12462_v46, 1  ;;  %v16424_v14 = vld [vmem:[#allocation149_spill] sm:$0xff] }
 0x2c3   : > { %v4244_v15 = vrot.slane %v2525_v19, 1  ;;  %v4404_v39 = vrot.slane %v2525_v19, 2  ;;  %4969 = vmatmul.mubr.bf16.gmra.mxu1 %v4526_v22  ;;  %v2469_v13 = vadd.f32 %v12848_v34, %v8540_v3  ;;  %v4254_v26 = vrot.slane %v16424_v14, 1 }
 0x2c4   : > { %v2524_v25 = vmax.f32 %v2460_v8, 0.0  ;;  %v4248_v2 = vsel %vm711_vm0, %v4246_v59, %v4247_v4  ;;  %v3714_v11 = vadd.f32 %v12795_v44, %v12883_v9  ;;  %v13057_v8 = vpop.f32.mrf.mxu1  ;;  %v4407_v34 = vrot.slane %v12462_v46, 2 }
 0x2c5   : > { %v4245_v30 = vsel %vm711_vm0, %v16422_v54, %v4244_v15  ;;  %v4405_v19 = vsel %vm1098_vm1, %v4400_v50, %v4404_v39  ;;  %v13054_v15 = vadd.f32 %v12873_v1, %v3712_v20  ;;  %v3923_v39 = vpop.f32.mrf.mxu0  ;;  %v4255_v3 = vsel %vm711_vm0, %v4250_v38, %v4254_v26 }
 0x2c6   : > { %v4531_v53 = vpack.c.bf16 %v4251_v36, %v4245_v30  ;;  %v4533_v49 = vpack.c.bf16 %v4411_v28, %v4405_v19  ;;  %v4242_v50 = vrot.slane %v2524_v25, 1  ;;  %v2533_v36 = vmax.f32 %v2469_v13, 0.0 }
 0x2c7   : > { %v4402_v22 = vrot.slane %v2524_v25, 2  ;;  %v4406_v28 = vrot.slane %v16423_v29, 2  ;;  %v3716_v44 = vadd.f32 %v12824_v56, %v12876_v61  ;;  %v4414_v1 = vrot.slane %v16424_v14, 2  ;;  %v3927_v46 = vpop.f32.mrf.mxu0 }
 0x2c8   : > { %4825 = vmatprep.mubr.bf16.mxu0 %v4531_v53  ;;  %4978 = vmatprep.mubr.bf16.mxu1 %v4533_v49  ;;  %v4243_v20 = vsel %vm711_vm0, %v4238_v62, %v4242_v50  ;;  %v4258_v54 = vrot.slane %v2533_v36, 1  ;;  %v4418_v19 = vrot.slane %v2533_v36, 2  ;;  %v13069_v38 = vadd.f32 %v12898_v40, %v3714_v11  ;;  %v16425_v49 = vld [vmem:[#allocation66_spill] sm:$0xff] }
 0x2c9   : > { %v4403_v30 = vsel %vm1098_vm1, %v4398_v41, %v4402_v22  ;;  %v4530_v59 = vpack.c.bf16 %v4248_v2, %v4243_v20  ;;  %v4408_v29 = vsel %vm1098_vm1, %v4406_v28, %v4407_v34  ;;  %v4415_v53 = vsel %vm1098_vm1, %v4410_v6, %v4414_v1  ;;  %v13077_v41 = vpop.f32.mrf.mxu1  ;;  %v3929_v11 = vpop.f32.mrf.mxu0 }
 0x2ca   : > { %v13073_v56 = vadd.f32 %v16425_v49, %v12975_v37  ;;  %v4259_v25 = vsel %vm711_vm0, %v4254_v26, %v4258_v54  ;;  %v4532_v62 = vpack.c.bf16 %v4408_v29, %v4403_v30  ;;  %v4419_v13 = vsel %vm1098_vm1, %v4414_v1, %v4418_v19  ;;  %v16426_v37 = vld [vmem:[#allocation110_spill] sm:$0xff]  ;;  %v16429_v1 = vld [vmem:[#allocation108_spill] sm:$0xff]  ;;  %v16432_v49 = vld [vmem:[#allocation61_spill] sm:$0xff] }
 0x2cb   : > { %4826 = vmatmul.mubr.bf16.gmra.mxu0 %v4530_v59  ;;  %v4537_v2 = vpack.c.bf16 %v4259_v25, %v4255_v3  ;;  %v4539_v14 = vpack.c.bf16 %v4419_v13, %v4415_v53  ;;  %v13080_v6 = vadd.f32 %v12915_v58, %v3716_v44  ;;  %v3722_v40 = vadd.f32 %v12887_v18, %v12876_v61  ;;  %v3931_v19 = vpop.f32.mrf.mxu0  ;;  %v16433_v25 = vld [vmem:[#allocation57_spill] sm:$0xff] }
 0x2cc   : > { %v13086_v50 = vadd.f32 %v16426_v37, %v12996_v33  ;;  %4979 = vmatmul.mubr.bf16.gmra.mxu1 %v4532_v62  ;;  %v4252_v26 = vrot.slane %v12474_v16, 1  ;;  %v16427_v36 = vmax.f32 %v12863_v12, 0.0  ;;  %v3724_v28 = vadd.f32 %v12908_v48, %v12883_v9 }
 0x2cd   : > { %4835 = vmatprep.mubr.bf16.mxu0 %v4537_v2  ;;  %4988 = vmatprep.mubr.bf16.mxu1 %v4539_v14  ;;  %v13094_v58 = vadd.f32 %v12962_v42, %v3722_v40  ;;  %v4412_v18 = vrot.slane %v12474_v16, 2  ;;  %v3726_v44 = vadd.f32 %v12931_v47, %v12876_v61  ;;  %v3634_v20 = vadd.f32 %v16429_v1, %v12883_v9  ;;  %v13108_v42 = vpop.f32.mrf.mxu1  ;;  %v16430_v16 = vld [vmem:[#allocation63_spill] sm:$0xff]  ;;  %v16440_v1 = vld [vmem:[#allocation62_spill] sm:$0xff] }
 0x2ce   : > { %v4256_v22 = vrot.slane %v16427_v36, 1  ;;  %v16428_v3 = vmov %v16427_v36  ;;  %v4253_v54 = vsel %vm711_vm0, %v4247_v4, %v4252_v26  ;;  %v13106_v30 = vadd.f32 %v12985_v32, %v3724_v28  ;;  %v16431_v4 = vld [vmem:[#allocation118_spill] sm:$0xff]  ;;  %v16434_v40 = vld [vmem:[#allocation55_spill] sm:$0xff] }
 0x2cf   : > { %v4416_v33 = vrot.slane %v16428_v3, 2  ;;  %v3636_v12 = vadd.f32 %v16430_v16, %v12876_v61  ;;  %v4413_v59 = vsel %vm1098_vm1, %v4407_v34, %v4412_v18  ;;  %v13115_v29 = vadd.f32 %v13013_v51, %v3726_v44  ;;  %v13135_v28 = vpop.f32.mrf.mxu1 }
 0x2d0   : > { %v4257_v48 = vsel %vm711_vm0, %v4252_v26, %v4256_v22  ;;  %v3638_v53 = vadd.f32 %v16431_v4, %v12883_v9  ;;  %v3642_v32 = vadd.f32 %v16432_v49, %v12876_v61  ;;  %v3644_v62 = vadd.f32 %v16433_v25, %v12883_v9  ;;  %v16443_v25 = vld [vmem:[#allocation134_spill] sm:$0xff] }
 0x2d1   : > { %v4417_v47 = vsel %vm1098_vm1, %v4412_v18, %v4416_v33  ;;  %v3918_v13 = vadd.f32 %v12978_v17, %v12918_v27  ;;  %v4536_v2 = vpack.c.bf16 %v4257_v48, %v4253_v54  ;;  %v3920_v34 = vadd.f32 %v13008_v63, %v12934_v35  ;;  %v3933_v27 = vpop.f32.mrf.mxu0  ;;  %v16435_v17 = vld [vmem:[#allocation58_spill] sm:$0xff]  ;;  %v13164_v4 = vpop.f32.mrf.mxu1 }
 0x2d2   : > { %v3922_v51 = vadd.f32 %v13026_v52, %v12937_v21  ;;  %v3924_v14 = vadd.f32 %v3923_v39, %v12950_v43  ;;  %v3646_v37 = vadd.f32 %v16434_v40, %v12876_v61  ;;  %v4538_v26 = vpack.c.bf16 %v4417_v47, %v4413_v59  ;;  %v16436_v43 = vld [vmem:[#allocation60_spill] sm:$0xff]  ;;  %v16437_v39 = vld [vmem:[#allocation119_spill] sm:$0xff]  ;;  %v16439_v33 = vld [vmem:[#allocation54_spill] sm:$0xff] }
 0x2d3   : > { %v13132_v36 = vmax.f32 %v3918_v13, 0.0  ;;  %v3928_v22 = vadd.f32 %v3927_v46, %v12969_v31  ;;  %v3648_v18 = vadd.f32 %v16435_v17, %v12883_v9  ;;  %4836 = vmatmul.mubr.bf16.gmra.mxu0 %v4536_v2  ;;  %v13144_v52 = vadd.f32 %v3929_v11, %v12988_v60  ;;  %v16438_v31 = vld [vmem:[#allocation125_spill] sm:$0xff]  ;;  %v3937_v49 = vpop.f32.mrf.mxu0  ;;  %v16444_v13 = vld [vmem:[#allocation131_spill] sm:$0xff] }
 0x2d4   : > { %v13139_v35 = vmax.f32 %v3922_v51, 0.0  ;;  %v13141_v21 = vmax.f32 %v3924_v14, 0.0  ;;  %v3785_v63 = vadd.f32 %v16436_v43, %v13030_v0  ;;  %v3787_v3 = vadd.f32 %v16437_v39, %v3634_v20  ;;  %4989 = vmatmul.mubr.bf16.gmra.mxu1 %v4538_v26  ;;  %v16441_v11 = vld [vmem:[#allocation117_spill] sm:$0xff]  ;;  %v16442_v0 = vld [vmem:[#allocation70_spill] sm:$0xff] }
 0x2d5   : > { %v3789_v46 = vadd.f32 %v16438_v31, %v3636_v12  ;;  %v3652_v44 = vadd.f32 %v16439_v33, %v12876_v61  ;;  %v3791_v54 = vadd.f32 %v16440_v1, %v3638_v53  ;;  %v5207_v48 = vrot.slane %v13132_v36, 2  ;;  %v16446_v14 = vld [vmem:[#allocation50_spill] sm:$0xff]  ;;  %v3939_v17 = vpop.f32.mrf.mxu0  ;;  %v7915_v33 = vld [vmem:[%s14777_s5 + $0x170] sm:$0xff]  }
 0x2d6   : > { %v13154_v16 = vmax.f32 %v3920_v34, 0.0  ;;  %v5208_v60 = vrot.slane %v13139_v35, 2  ;;  %v13158_v59 = vadd.f32 %v16441_v11, %v3642_v32  ;;  %v13161_v47 = vadd.f32 %v16442_v0, %v3644_v62  ;;  %v16445_v62 = vld [vmem:[#allocation37_spill] sm:$0xff] }
 0x2d7   : > { %v4040_v20 = vmax.f32 %v3928_v22, 0.0  ;;  %v4041_v12 = vmax.f32 %v13144_v52, 0.0  ;;  %v13167_v53 = vadd.f32 %v16443_v25, %v3646_v37  ;;  %v13170_v2 = vadd.f32 %v16444_v13, %v3648_v18  ;;  %v13184_v37 = vpop.f32.mrf.mxu1  ;;  %v7912_v18 = vld [vmem:[%s14777_s5 + $0x138] sm:$0xff]  }
 0x2d8   : > { %v13173_v34 = vsel %vm1098_vm1, %v5207_v48, %v5208_v60  ;;  %v5592_v32 = vpack.c.bf16 %v13141_v21, %v13154_v16  ;;  %v13179_v51 = vadd.f32 %v16445_v62, %v12883_v9  ;;  %v13182_v40 = vadd.f32 %v16446_v14, %v3652_v44 }
 0x2d9   : > { %v5101_v26 = vrot.slane %v4040_v20, 1  ;;  %v5213_v22 = vrot.slane %v4040_v20, 2  ;;  %v5096_v52 = vrot.slane %v13139_v35, 1  ;;  %v5591_v43 = vpack.c.bf16 %v13139_v35, %v13132_v36  ;;  %v13200_v11 = vpop.f32.mrf.mxu1  ;;  %v3941_v20 = vpop.f32.mrf.mxu0  ;;  %v16447_v35 = vld [vmem:[#allocation132_spill] sm:$0xff] }
 0x2da   : > { %v5103_v39 = vrot.slane %v4041_v12, 1  ;;  %6493 = vmatprep.mubr.bf16.mxu0 %v5592_v32  ;;  %v3938_v31 = vadd.f32 %v3937_v49, %v3785_v63  ;;  %v3932_v1 = vadd.f32 %v3931_v19, %v13073_v56  ;;  %v3934_v48 = vadd.f32 %v3933_v27, %v13086_v50 }
 0x2db   : > { %v13196_v44 = vsel %vm1098_vm1, %v5208_v60, %v5213_v22  ;;  %v3940_v0 = vadd.f32 %v3939_v17, %v3787_v3  ;;  %v13204_v25 = vadd.f32 %v16447_v35, %v12876_v61  ;;  %v5095_v63 = vrot.slane %v13132_v36, 1  ;;  %6494 = vmatmul.mubr.bf16.vlgmr.msra.gmra.mxu0 %v5591_v43  ;;  %v3943_v3 = vpop.f32.mrf.mxu0  ;;  %v7916_v36 = vld [vmem:[%s14777_s5 + $0x130] sm:$0xff]   ;;  %v13220_v32 = vpop.f32.mrf.mxu1 }
 0x2dc   : > { %v5099_v49 = vrot.slane %v13141_v21, 1  ;;  %v5098_v56 = vrot.slane %v13154_v16, 1  ;;  %v5102_v19 = vsel %vm711_vm0, %v5096_v52, %v5101_v26  ;;  %7466 = vmatpush3.bf16.msra.mxu0 %v7912_v18  ;;  %v13218_v13 = vmax.f32 %v3938_v31, 0.0  ;;  %16448 = vst [vmem:[#allocation167_spill] sm:$0xff] %v13220_v32  ;;  %v7917_v26 = vld [vmem:[%s14777_s5 + $0x168] sm:$0xff]  }
 0x2dd   : > { %v13213_v27 = vmax.f32 %v3940_v0, 0.0  ;;  %v3942_v62 = vadd.f32 %v3941_v20, %v3789_v46  ;;  %v3944_v22 = vadd.f32 %v3943_v3, %v3791_v54  ;;  %7467 = vmatprep.subr.bf16.mxu0 %v7915_v33  ;;  %v5097_v18 = vsel %vm711_vm0, %v5095_v63, %v5096_v52  ;;  %v7914_v52 = vld [vmem:[%s14777_s5 + $0x1b8] sm:$0xff]   ;;  %v13245_v63 = vpop.f32.mrf.mxu1 }
 0x2de   : > { %v5104_v14 = vsel %vm711_vm0, %v5099_v49, %v5103_v39  ;;  %v13228_v43 = vmax.f32 %v3932_v1, 0.0  ;;  %v13230_v0 = vmax.f32 %v3934_v48, 0.0  ;;  %v5593_v31 = vpack.c.bf16 %v5102_v19, %v5097_v18  ;;  %v3947_v39 = vpop.f32.mrf.mxu0  ;;  %16449 = vst [vmem:[#allocation164_spill] sm:$0xff] %v13245_v63 }
 0x2df   : > { %v5215_v35 = vrot.slane %v4041_v12, 2  ;;  %v4046_v60 = vmax.f32 %v3942_v62, 0.0  ;;  %v5100_v46 = vsel %vm711_vm0, %v5098_v56, %v5099_v49  ;;  %v5109_v54 = vrot.slane %v13213_v27, 1  ;;  %v7918_v12 = vld [vmem:[%s14777_s5 + $0x128] sm:$0xff]   ;;  %v7919_v62 = vld [vmem:[%s14777_s5 + $0x1f0] sm:$0xff]   ;;  %v13263_v17 = vpop.f32.mrf.mxu1 }
 0x2e0   : > { %v5594_v33 = vpack.c.bf16 %v5104_v14, %v5100_v46  ;;  %v4047_v20 = vmax.f32 %v3944_v22, 0.0  ;;  %v5604_v3 = vpack.c.bf16 %v13213_v27, %v13230_v0  ;;  %7468 = vmatpush3.bf16.msra.mxu0 %v7916_v36  ;;  %v5218_v1 = vrot.slane %v13218_v13, 2  ;;  %v3949_v19 = vpop.f32.mrf.mxu0  ;;  %v7921_v36 = vld [vmem:[%s14777_s5 + $0x160] sm:$0xff]  }
 0x2e1   : > { %v5603_v48 = vpack.c.bf16 %v13218_v13, %v13228_v43  ;;  %v5111_v49 = vrot.slane %v4046_v60, 1  ;;  %v5223_v56 = vrot.slane %v4046_v60, 2  ;;  %7469 = vmatprep.subr.bf16.mxu0 %v7917_v26  ;;  %v5105_v14 = vrot.slane %v13228_v43, 1 }
 0x2e2   : > { %v5108_v22 = vrot.slane %v13230_v0, 1  ;;  %6590 = vmatprep.mubr.bf16.mxu1 %v5594_v33  ;;  %v5113_v18 = vrot.slane %v4047_v20, 1  ;;  %v3948_v46 = vadd.f32 %v3947_v39, %v13158_v59  ;;  %6501 = vmatprep.mubr.bf16.mxu0 %v5604_v3  ;;  %v5106_v60 = vrot.slane %v13218_v13, 1  ;;  %v3951_v33 = vpop.f32.mrf.mxu0  ;;  %v7920_v3 = vld [vmem:[%s14777_s5 + $0x1b0] sm:$0xff]  }
 0x2e3   : > { %v5221_v26 = vrot.slane %v13213_v27, 2  ;;  %v13261_v50 = vsel %vm1098_vm1, %v5218_v1, %v5223_v56  ;;  %6591 = vmatmul.mubr.bf16.vlgmr.msra.gmra.mxu1 %v5593_v31  ;;  %v3950_v63 = vadd.f32 %v3949_v19, %v13161_v47  ;;  %6502 = vmatmul.mubr.bf16.gmra.mxu0 %v5603_v48  ;;  %v5217_v32 = vrot.slane %v13228_v43, 2  ;;  %v13274_v47 = vpop.f32.mrf.mxu1 }
 0x2e4   : > { %16450 = vst [vmem:[#allocation10_spill] sm:$0xff] %v13261_v50  ;;  %v5220_v59 = vrot.slane %v13230_v0, 2  ;;  %v3952_v39 = vadd.f32 %v3951_v33, %v13167_v53  ;;  %v5110_v27 = vsel %vm711_vm0, %v5108_v22, %v5109_v54  ;;  %7530 = vmatpush3.bf16.msra.mxu1 %v7914_v52  ;;  %7470 = vmatpush3.bf16.msra.mxu0 %v7918_v12  ;;  %v5225_v56 = vrot.slane %v4047_v20, 2  ;;  %v3953_v48 = vpop.f32.mrf.mxu0  ;;  %v7922_v53 = vld [vmem:[%s14777_s5 + $0x120] sm:$0xff]   ;;  %v7923_v0 = vld [vmem:[%s14777_s5 + $0x1e8] sm:$0xff]  }
 0x2e5   : > { %v5112_v31 = vsel %vm711_vm0, %v5106_v60, %v5111_v49  ;;  %v5114_v43 = vsel %vm711_vm0, %v5109_v54, %v5113_v18  ;;  %7531 = vmatprep.subr.bf16.mxu1 %v7919_v62  ;;  %7471 = vmatprep.subr.bf16.mxu0 %v7921_v36  ;;  %v16451_v52 = vrot.slane %v13141_v21, 2  ;;  %v16452_v12 = vrot.slane %v13154_v16, 2  ;;  %v7924_v36 = vld [vmem:[%s14777_s5 + $0x158] sm:$0xff]   ;;  %v13298_v22 = vpop.f32.mrf.mxu1  ;;  %v7925_v21 = vld [vmem:[%s14777_s5 + $0x1a8] sm:$0xff]  }
 0x2e6   : > { %v13290_v49 = vmax.f32 %v3948_v46, 0.0  ;;  %v13292_v54 = vmax.f32 %v3952_v39, 0.0  ;;  %v3954_v19 = vadd.f32 %v3953_v48, %v13170_v2  ;;  %v5606_v62 = vpack.c.bf16 %v5114_v43, %v5110_v27  ;;  %16453 = vst [vmem:[#allocation53_spill] sm:$0xff] %v13298_v22  ;;  %v16455_v2 = vld [vmem:[#allocation128_spill] sm:$0xff]  ;;  %v16456_v48 = vld [vmem:[#allocation77_spill] sm:$0xff] }
 0x2e7   : > { %v13288_v20 = vsel %vm1098_vm1, %v16452_v12, %v16451_v52  ;;  %v13300_v18 = vmax.f32 %v3950_v63, 0.0  ;;  %v5107_v16 = vsel %vm711_vm0, %v5105_v14, %v5106_v60  ;;  %v16454_v33 = vmov %v16451_v52  ;;  %v3957_v14 = vpop.f32.mrf.mxu0  ;;  %v13335_v12 = vpop.f32.mrf.mxu1  ;;  %v7930_v60 = vld [vmem:[%s14777_s5 + $0x110] sm:$0xff]  }
 0x2e8   : > { %v13306_v46 = vsel %vm1098_vm1, %v16454_v33, %v5215_v35  ;;  %v13309_v39 = vsel %vm1098_vm1, %v5220_v59, %v5221_v26  ;;  %v3807_v27 = vadd.f32 %v16455_v2, %v13179_v51  ;;  %v3658_v43 = vadd.f32 %v16456_v48, %v12883_v9  ;;  %6598 = vmatprep.mubr.bf16.mxu1 %v5606_v62  ;;  %v7926_v51 = vld [vmem:[%s14777_s5 + $0x118] sm:$0xff]  }
 0x2e9   : > { %v5228_v52 = vrot.slane %v13292_v54, 2  ;;  %v5605_v63 = vpack.c.bf16 %v5112_v31, %v5107_v16  ;;  %7532 = vmatpush3.bf16.msra.mxu1 %v7920_v3  ;;  %v13319_v35 = vmax.f32 %v3954_v19, 0.0  ;;  %7472 = vmatpush3.bf16.msra.mxu0 %v7922_v53  ;;  %v13327_v59 = vsel %vm1098_vm1, %v5221_v26, %v5225_v56  ;;  %16458 = vst [vmem:[#allocation104_spill] sm:$0xff] %v13335_v12  ;;  %v13356_v33 = vpop.f32.mrf.mxu1 }
 0x2ea   : > { %7533 = vmatprep.subr.bf16.mxu1 %v7923_v0  ;;  %v13332_v3 = vsel %vm1098_vm1, %v5217_v32, %v5218_v1  ;;  %v5227_v31 = vrot.slane %v13290_v49, 2  ;;  %v3958_v53 = vadd.f32 %v3957_v14, %v13182_v40  ;;  %7473 = vmatprep.subr.bf16.mxu0 %v7924_v36  ;;  %v7927_v0 = vld [vmem:[%s14777_s5 + $0x1e0] sm:$0xff]   ;;  %v16459_v32 = vld [vmem:[#allocation45_spill] sm:$0xff]  ;;  %v5230_v56 = vrot.slane %v13300_v18, 2  ;;  %v3959_v40 = vpop.f32.mrf.mxu0  ;;  %v7928_v36 = vld [vmem:[%s14777_s5 + $0x150] sm:$0xff]   ;;  %16460 = vst [vmem:[#allocation107_spill] sm:$0xff] %v13356_v33 }
 0x2eb   : > { %16457 = vst [vmem:[#allocation105_spill] sm:$0xff] %v13332_v3  ;;  %v3662_v1 = vadd.f32 %v16459_v32, %v12876_v61  ;;  %v5231_v19 = vrot.slane %v13319_v35, 2  ;;  %6599 = vmatmul.mubr.bf16.gmra.mxu1 %v5605_v63  ;;  %v5616_v62 = vpack.c.bf16 %v13319_v35, %v13300_v18  ;;  %v5615_v16 = vpack.c.bf16 %v13292_v54, %v13290_v49  ;;  %v7929_v63 = vld [vmem:[%s14777_s5 + $0x1a0] sm:$0xff]   ;;  %v16462_v32 = vld [vmem:[#allocation121_spill] sm:$0xff] }
 0x2ec   : > { %v4052_v2 = vmax.f32 %v3958_v53, 0.0  ;;  %v3960_v48 = vadd.f32 %v3959_v40, %v3807_v27  ;;  %v13362_v14 = vsel %vm1098_vm1, %v5227_v31, %v5228_v52  ;;  %v3809_v13 = vadd.f32 %v16462_v32, %v13204_v25  ;;  %v3961_v26 = vpop.f32.mrf.mxu0  ;;  %v7931_v27 = vld [vmem:[%s14777_s5 + $0x1d8] sm:$0xff]   ;;  %v13376_v40 = vpop.f32.mrf.mxu1 }
 0x2ed   : > { %7534 = vmatpush3.bf16.msra.mxu1 %v7925_v21  ;;  %16461 = vst [vmem:[#allocation157_spill] sm:$0xff] %v13362_v14  ;;  %6509 = vmatprep.mubr.bf16.mxu0 %v5616_v62  ;;  %v13373_v21 = vsel %vm1098_vm1, %v5230_v56, %v5231_v19  ;;  %v16464_v53 = vld [vmem:[#allocation73_spill] sm:$0xff]  ;;  %16465 = vst [vmem:[#allocation162_spill] sm:$0xff] %v13376_v40  ;;  %v5116_v56 = vrot.slane %v13292_v54, 1 }
 0x2ee   : > { %7474 = vmatpush3.bf16.msra.mxu0 %v7926_v51  ;;  %16463 = vst [vmem:[#allocation168_spill] sm:$0xff] %v13373_v21  ;;  %v3811_v31 = vadd.f32 %v16464_v53, %v3658_v43  ;;  %v5121_v3 = vrot.slane %v4052_v2, 1  ;;  %v5233_v25 = vrot.slane %v4052_v2, 2  ;;  %v4053_v32 = vmax.f32 %v3960_v48, 0.0  ;;  %7535 = vmatprep.subr.bf16.mxu1 %v7927_v0  ;;  %v7932_v51 = vld [vmem:[%s14777_s5 + $0x148] sm:$0xff]   ;;  %v16466_v62 = vld [vmem:[#allocation133_spill] sm:$0xff]  ;;  %v3963_v53 = vpop.f32.mrf.mxu0 }
 0x2ef   : > { %6510 = vmatmul.mubr.bf16.gmra.mxu0 %v5615_v16  ;;  %v3664_v50 = vadd.f32 %v16466_v62, %v12883_v9  ;;  %v16467_v33 = vld [vmem:[#allocation137_spill] sm:$0xff]  ;;  %v5119_v43 = vrot.slane %v13319_v35, 1  ;;  %7475 = vmatprep.subr.bf16.mxu0 %v7928_v36  ;;  %v13389_v16 = vpop.f32.mrf.mxu1  ;;  %v3962_v40 = vadd.f32 %v3961_v26, %v3809_v13  ;;  %v5115_v35 = vrot.slane %v13290_v49, 1  ;;  %v7935_v26 = vld [vmem:[%s14777_s5 + $0x1d0] sm:$0xff]   ;;  %v7936_v49 = vld [vmem:[%s14777_s5 + $0x140] sm:$0xff]  }
 0x2f0   : > { %v3815_v12 = vadd.f32 %v16467_v33, %v3662_v1  ;;  %v13387_v2 = vsel %vm1098_vm1, %v5228_v52, %v5233_v25  ;;  %16469 = vst [vmem:[#allocation166_spill] sm:$0xff] %v13389_v16  ;;  %v5123_v0 = vrot.slane %v4053_v32, 1  ;;  %v5235_v48 = vrot.slane %v4053_v32, 2  ;;  %v7933_v62 = vld [vmem:[%s14777_s5 + $0x198] sm:$0xff]   ;;  %v16470_v1 = vld [vmem:[#allocation64_spill] sm:$0xff]  ;;  %v7934_v52 = vld [vmem:[%s14777_s5 + $0x108] sm:$0xff]  }
 0x2f1   : > { %16468 = vst [vmem:[#allocation46_spill] sm:$0xff] %v13387_v2  ;;  %7536 = vmatpush3.bf16.msra.mxu1 %v7929_v63  ;;  %v3666_v54 = vadd.f32 %v16470_v1, %v12876_v61  ;;  %v5118_v36 = vrot.slane %v13300_v18, 1  ;;  %v3964_v33 = vadd.f32 %v3963_v53, %v3811_v31  ;;  %v5122_v13 = vsel %vm711_vm0, %v5116_v56, %v5121_v3  ;;  %v3967_v63 = vpop.f32.mrf.mxu0  ;;  %v16473_v32 = vld [vmem:[#allocation135_spill] sm:$0xff]  ;;  %v13417_v3 = vpop.f32.mrf.mxu1 }
 0x2f2   : > { %7476 = vmatpush3.bf16.msra.mxu0 %v7930_v60  ;;  %7537 = vmatprep.subr.bf16.mxu1 %v7931_v27  ;;  %v5124_v25 = vsel %vm711_vm0, %v5119_v43, %v5123_v0  ;;  %v13410_v18 = vsel %vm1098_vm1, %v5231_v19, %v5235_v48  ;;  %v16472_v27 = vld [vmem:[#allocation65_spill] sm:$0xff]  ;;  %v3668_v53 = vadd.f32 %v16473_v32, %v12883_v9  ;;  %v13420_v0 = vmax.f32 %v3962_v40, 0.0  ;;  %v7937_v48 = vld [vmem:[%s14777_s5 + $0x190] sm:$0xff]   ;;  %v16484_v2 = vld [vmem:[#allocation147_spill] sm:$0xff] }
 0x2f3   : > { %7477 = vmatprep.subr.bf16.mxu0 %v7932_v51  ;;  %16471 = vst [vmem:[#allocation159_spill] sm:$0xff] %v13410_v18  ;;  %v3817_v31 = vadd.f32 %v16472_v27, %v3664_v50  ;;  %v3968_v1 = vadd.f32 %v3967_v63, %v3815_v12  ;;  %v5120_v51 = vsel %vm711_vm0, %v5118_v36, %v5119_v43  ;;  %v3969_v16 = vpop.f32.mrf.mxu0  ;;  %v13428_v27 = vpop.f32.mrf.mxu1  ;;  %v13430_v32 = vmax.f32 %v3964_v33, 0.0  ;;  %v16476_v63 = vld [vmem:[#allocation27_spill] sm:$0xff] }
 0x2f4   : > { %v5618_v22 = vpack.c.bf16 %v5124_v25, %v5120_v51  ;;  %v5117_v19 = vsel %vm711_vm0, %v5115_v35, %v5116_v56  ;;  %16474 = vst [vmem:[#allocation170_spill] sm:$0xff] %v13428_v27  ;;  %v7938_v56 = vld [vmem:[%s14777_s5 + $0x100] sm:$0xff]   ;;  %v16475_v35 = vld [vmem:[#allocation43_spill] sm:$0xff]  ;;  %v3672_v33 = vadd.f32 %v16476_v63, %v12876_v61 }
 0x2f5   : > { %7538 = vmatpush3.bf16.msra.mxu1 %v7933_v62  ;;  %v13432_v12 = vmax.f32 %v3968_v1, 0.0  ;;  %v3970_v40 = vadd.f32 %v3969_v16, %v3817_v31  ;;  %v5617_v43 = vpack.c.bf16 %v5122_v13, %v5117_v19  ;;  %v7939_v62 = vld [vmem:[%s14777_s5 + $0x1c8] sm:$0xff]   ;;  %v3819_v36 = vadd.f32 %v16475_v35, %v3666_v54  ;;  %v3971_v25 = vpop.f32.mrf.mxu0  ;;  %v7943_v16 = vld [vmem:[%s14777_s5 + $0x278] sm:$0xff]   ;;  %v16478_v13 = vld [vmem:[#allocation82_spill] sm:$0xff]  ;;  %v13449_v1 = vpop.f32.mrf.mxu1 }
 0x2f6   : > { %7478 = vmatpush3.bf16.msra.mxu0 %v7934_v52  ;;  %7539 = vmatprep.subr.bf16.mxu1 %v7935_v26  ;;  %v16477_v52 = vld [vmem:[#allocation136_spill] sm:$0xff]  ;;  %v3674_v31 = vadd.f32 %v16478_v13, %v12883_v9  ;;  %16479 = vst [vmem:[#allocation91_spill] sm:$0xff] %v13449_v1  ;;  %v16480_v19 = vld [vmem:[#allocation86_spill] sm:$0xff] }
 0x2f7   : > { %6606 = vmatprep.mubr.bf16.mxu1 %v5618_v22  ;;  %7479 = vmatprep.subr.bf16.mxu0 %v7936_v49  ;;  %v3821_v26 = vadd.f32 %v16477_v52, %v3668_v53  ;;  %v5238_v51 = vrot.slane %v13432_v12, 2  ;;  %v4057_v54 = vmax.f32 %v3970_v40, 0.0  ;;  %v3676_v35 = vadd.f32 %v16480_v19, %v12876_v61  ;;  %v3973_v63 = vpop.f32.mrf.mxu0  ;;  %v7940_v53 = vld [vmem:[%s14777_s5 + $0x188] sm:$0xff]   ;;  %v13459_v13 = vpop.f32.mrf.mxu1 }
 0x2f8   : > { %6607 = vmatmul.mubr.bf16.gmra.mxu1 %v5617_v43  ;;  %v5237_v22 = vrot.slane %v13420_v0, 2  ;;  %v3972_v49 = vadd.f32 %v3971_v25, %v3819_v36  ;;  %v5240_v52 = vrot.slane %v13430_v32, 2  ;;  %16481 = vst [vmem:[#allocation171_spill] sm:$0xff] %v13459_v13  ;;  %v7941_v43 = vld [vmem:[%s14777_s5 + $0x1c0] sm:$0xff]   ;;  %v16482_v36 = vld [vmem:[#allocation69_spill] sm:$0xff]  ;;  %v5627_v25 = vpack.c.bf16 %v13432_v12, %v13420_v0 }
 0x2f9   : > { %7540 = vmatpush3.bf16.msra.mxu1 %v7937_v48  ;;  %v5241_v60 = vrot.slane %v4057_v54, 2  ;;  %v3974_v50 = vadd.f32 %v3973_v63, %v3821_v26  ;;  %v5628_v40 = vpack.c.bf16 %v4057_v54, %v13430_v32  ;;  %v3825_v48 = vadd.f32 %v16482_v36, %v3672_v33  ;;  %v16485_v63 = vld [vmem:[#allocation81_spill] sm:$0xff]  ;;  %v3977_v13 = vpop.f32.mrf.mxu0 }
 0x2fa   : > { %7480 = vmatpush3.bf16.msra.mxu0 %v7938_v56  ;;  %7541 = vmatprep.subr.bf16.mxu1 %v7939_v62  ;;  %v4058_v19 = vmax.f32 %v3972_v49, 0.0  ;;  %v13469_v14 = vsel %vm1098_vm1, %v5237_v22, %v5238_v51  ;;  %v3827_v26 = vadd.f32 %v16484_v2, %v3674_v31  ;;  %v3678_v56 = vadd.f32 %v16485_v63, %v12883_v9  ;;  %v16486_v2 = vld [vmem:[#allocation155_spill] sm:$0xff] }
 0x2fb   : > { %16483 = vst [vmem:[#allocation68_spill] sm:$0xff] %v13469_v14  ;;  %7593 = vmatprep.subr.bf16.mxu0 %v7943_v16  ;;  %v4059_v62 = vmax.f32 %v3974_v50, 0.0  ;;  %6517 = vmatprep.mubr.bf16.mxu0 %v5628_v40  ;;  %v13475_v21 = vsel %vm1098_vm1, %v5240_v52, %v5241_v60  ;;  %v5129_v33 = vrot.slane %v4057_v54, 1  ;;  %v3978_v1 = vadd.f32 %v3977_v13, %v3825_v48  ;;  %v7942_v16 = vld [vmem:[%s14777_s5 + $0x180] sm:$0xff]   ;;  %v13482_v50 = vpop.f32.mrf.mxu1  ;;  %v3979_v52 = vpop.f32.mrf.mxu0  ;;  %v7945_v54 = vld [vmem:[%s14777_s5 + $0x2f8] sm:$0xff]  }
 0x2fc   : > { %v5131_v36 = vrot.slane %v4058_v19, 1  ;;  %v5243_v18 = vrot.slane %v4058_v19, 2  ;;  %6518 = vmatmul.mubr.bf16.gmra.mxu0 %v5627_v25  ;;  %v3829_v31 = vadd.f32 %v16486_v2, %v3676_v35  ;;  %v5126_v22 = vrot.slane %v13432_v12, 1  ;;  %16487 = vst [vmem:[#allocation49_spill] sm:$0xff] %v13482_v50  ;;  %v16490_v50 = vld [vmem:[#allocation94_spill] sm:$0xff] }
 0x2fd   : > { %7542 = vmatpush3.bf16.msra.mxu1 %v7940_v53  ;;  %v5133_v49 = vrot.slane %v4059_v62, 1  ;;  %v5245_v40 = vrot.slane %v4059_v62, 2  ;;  %v16488_v53 = vld [vmem:[#allocation152_spill] sm:$0xff]  ;;  %v5125_v48 = vrot.slane %v13420_v0, 1  ;;  %v5128_v25 = vrot.slane %v13430_v32, 1  ;;  %v13495_v19 = vpop.f32.mrf.mxu1 }
 0x2fe   : > { %7543 = vmatprep.subr.bf16.mxu1 %v7941_v43  ;;  %v3682_v13 = vadd.f32 %v16488_v53, %v12876_v61  ;;  %v13492_v35 = vsel %vm1098_vm1, %v5238_v51, %v5243_v18  ;;  %v5132_v12 = vsel %vm711_vm0, %v5126_v22, %v5131_v36  ;;  %v3980_v63 = vadd.f32 %v3979_v52, %v3827_v26  ;;  %v3981_v43 = vpop.f32.mrf.mxu0  ;;  %v16493_v52 = vld [vmem:[#allocation96_spill] sm:$0xff] }
 0x2ff   : > { %16489 = vst [vmem:[#allocation172_spill] sm:$0xff] %v13492_v35  ;;  %v5134_v62 = vsel %vm711_vm0, %v5129_v33, %v5133_v49  ;;  %v13499_v2 = vsel %vm1098_vm1, %v5241_v60, %v5245_v40  ;;  %v3831_v53 = vadd.f32 %v16490_v50, %v3678_v56  ;;  %v13502_v27 = vmax.f32 %v3978_v1, 0.0  ;;  %v13505_v18 = vpop.f32.mrf.mxu1  ;;  %v16491_v1 = vld [vmem:[#allocation39_spill] sm:$0xff] }
 0x300   : > { %v3982_v0 = vadd.f32 %v3981_v43, %v3829_v31  ;;  %v5130_v32 = vsel %vm711_vm0, %v5128_v25, %v5129_v33  ;;  %v3983_v51 = vpop.f32.mrf.mxu0  ;;  %v5127_v26 = vsel %vm711_vm0, %v5125_v48, %v5126_v22  ;;  %v3684_v56 = vadd.f32 %v16491_v1, %v12883_v9 }
 0x301   : > { %7544 = vmatpush3.bf16.msra.mxu1 %v7942_v16  ;;  %v5630_v36 = vpack.c.bf16 %v5134_v62, %v5130_v32  ;;  %v3984_v33 = vadd.f32 %v3983_v51, %v3831_v53  ;;  %v5629_v16 = vpack.c.bf16 %v5132_v12, %v5127_v26  ;;  %v13516_v50 = vpop.f32.mrf.mxu1  ;;  %v4061_v40 = vmax.f32 %v3980_v63, 0.0  ;;  %v16496_v12 = vld [vmem:[#allocation51_spill] sm:$0xff] }
 0x302   : > { %7657 = vmatprep.subr.bf16.mxu1 %v7945_v54  ;;  %v13514_v31 = vmax.f32 %v3982_v0, 0.0  ;;  %16492 = vst [vmem:[#allocation21_spill] sm:$0xff] %v13516_v50  ;;  %v3835_v22 = vadd.f32 %v16493_v52, %v3682_v13  ;;  %v5247_v48 = vrot.slane %v13502_v27, 2  ;;  %v16494_v54 = vld [vmem:[#allocation92_spill] sm:$0xff]  ;;  %v3987_v32 = vpop.f32.mrf.mxu0  ;;  %v16495_v0 = vld [vmem:[#allocation5_spill] sm:$0xff]  ;;  %v3688_v53 = vadd.f32 %v16496_v12, %v12883_v9 }
 0x303   : > { %6614 = vmatprep.mubr.bf16.mxu1 %v5630_v36  ;;  %v3686_v43 = vadd.f32 %v16494_v54, %v12876_v61  ;;  %v4063_v62 = vmax.f32 %v3984_v33, 0.0  ;;  %v3837_v1 = vadd.f32 %v16495_v0, %v3684_v56  ;;  %v13526_v51 = vpop.f32.mrf.mxu1  ;;  %v16499_v36 = vld [vmem:[#allocation98_spill] sm:$0xff]  ;;  %v16501_v50 = vld [vmem:[#allocation144_spill] sm:$0xff] }
 0x304   : > { %v5248_v25 = vrot.slane %v13514_v31, 2  ;;  %6615 = vmatmul.mubr.bf16.gmra.mxu1 %v5629_v16  ;;  %16497 = vst [vmem:[#allocation120_spill] sm:$0xff] %v13526_v51  ;;  %v3988_v63 = vadd.f32 %v3987_v32, %v3835_v22  ;;  %v3692_v26 = vadd.f32 %v16499_v36, %v12876_v61  ;;  %v5250_v16 = vrot.slane %v4061_v40, 2  ;;  %v3989_v60 = vpop.f32.mrf.mxu0 }
 0x305   : > { %v5251_v52 = vrot.slane %v4063_v62, 2  ;;  %v5640_v54 = vpack.c.bf16 %v4063_v62, %v4061_v40  ;;  %v5639_v33 = vpack.c.bf16 %v13514_v31, %v13502_v27  ;;  %v13535_v56 = vpop.f32.mrf.mxu1  ;;  %v3990_v12 = vadd.f32 %v3989_v60, %v3837_v1 }
 0x306   : > { %v13529_v13 = vsel %vm1098_vm1, %v5247_v48, %v5248_v25  ;;  %16500 = vst [vmem:[#allocation123_spill] sm:$0xff] %v13535_v56  ;;  %v4064_v0 = vmax.f32 %v3988_v63, 0.0  ;;  %v3839_v49 = vadd.f32 %v12586_v10, %v3686_v43  ;;  %v3991_v22 = vpop.f32.mrf.mxu0  ;;  %v3841_v32 = vadd.f32 %v12615_v24, %v3688_v53 }
 0x307   : > { %16498 = vst [vmem:[#allocation122_spill] sm:$0xff] %v13529_v13  ;;  %6525 = vmatprep.mubr.bf16.mxu0 %v5640_v54  ;;  %v13539_v48 = vsel %vm1098_vm1, %v5250_v16, %v5251_v52  ;;  %v13542_v36 = vpop.f32.mrf.mxu1  ;;  %v4065_v51 = vmax.f32 %v3990_v12, 0.0  ;;  %v3694_v56 = vadd.f32 %v16501_v50, %v12883_v9  ;;  %v3845_v60 = vadd.f32 %v12652_v55, %v3692_v26  ;;  %v16504_v26 = vld [vmem:[#allocation80_spill] sm:$0xff] }
 0x308   : > { %v5141_v14 = vrot.slane %v4064_v0, 1  ;;  %v5253_v35 = vrot.slane %v4064_v0, 2  ;;  %6526 = vmatmul.mubr.bf16.gmra.mxu0 %v5639_v33  ;;  %v5136_v10 = vrot.slane %v13514_v31, 1  ;;  %v5139_v43 = vrot.slane %v4063_v62, 1  ;;  %v3993_v1 = vpop.f32.mrf.mxu0 }
 0x309   : > { %v13551_v16 = vpop.f32.mrf.mxu1  ;;  %v5143_v24 = vrot.slane %v4065_v51, 1  ;;  %v5255_v53 = vrot.slane %v4065_v51, 2  ;;  %v3992_v54 = vadd.f32 %v3991_v22, %v3839_v49  ;;  %v3696_v33 = vadd.f32 %v12609_v57, %v12876_v61  ;;  %v16503_v51 = vld [vmem:[#allocation151_spill] sm:$0xff] }
 0x30a   : > { %v13549_v63 = vsel %vm1098_vm1, %v5248_v25, %v5253_v35  ;;  %v5135_v0 = vrot.slane %v13502_v27, 1  ;;  %v5138_v50 = vrot.slane %v4061_v40, 1  ;;  %v3994_v12 = vadd.f32 %v3993_v1, %v3841_v32  ;;  %v3997_v31 = vpop.f32.mrf.mxu0 }
 0x30b   : > { %16502 = vst [vmem:[#allocation127_spill] sm:$0xff] %v13549_v63  ;;  %v5142_v55 = vsel %vm711_vm0, %v5136_v10, %v5141_v14  ;;  %v5144_v62 = vsel %vm711_vm0, %v5139_v43, %v5143_v24  ;;  %v13559_v35 = vsel %vm1098_vm1, %v5251_v52, %v5255_v53  ;;  %v3847_v49 = vadd.f32 %v16503_v51, %v3694_v56  ;;  %v13566_v22 = vpop.f32.mrf.mxu1 }
 0x30c   : > { %v3698_v57 = vadd.f32 %v16504_v26, %v12883_v9  ;;  %16505 = vst [vmem:[#allocation85_spill] sm:$0xff] %v13566_v22  ;;  %v3998_v27 = vadd.f32 %v3997_v31, %v3845_v60  ;;  %v5140_v40 = vsel %vm711_vm0, %v5138_v50, %v5139_v43  ;;  %v4066_v14 = vmax.f32 %v3992_v54, 0.0  ;;  %v3999_v32 = vpop.f32.mrf.mxu0  ;;  %v16506_v26 = vld [vmem:[#allocation145_spill] sm:$0xff]  ;;  %v16507_v60 = vld [vmem:[#allocation148_spill] sm:$0xff] }
 0x30d   : > { %v5642_v1 = vpack.c.bf16 %v5144_v62, %v5140_v40  ;;  %v5137_v24 = vsel %vm711_vm0, %v5135_v0, %v5136_v10  ;;  %v13572_v53 = vpop.f32.mrf.mxu1  ;;  %v4067_v25 = vmax.f32 %v3994_v12, 0.0  ;;  %v4000_v51 = vadd.f32 %v3999_v32, %v3847_v49 }
 0x30e   : > { %v4068_v56 = vmax.f32 %v3998_v27, 0.0  ;;  %v5641_v13 = vpack.c.bf16 %v5142_v55, %v5137_v24  ;;  %v3849_v63 = vadd.f32 %v16506_v26, %v3696_v33  ;;  %v4001_v22 = vpop.f32.mrf.mxu0  ;;  %v3851_v43 = vadd.f32 %v16507_v60, %v3698_v57  ;;  %v16510_v57 = vld [vmem:[#allocation150_spill] sm:$0xff] }
 0x30f   : > { %6622 = vmatprep.mubr.bf16.mxu1 %v5642_v1  ;;  %v13576_v54 = vpop.f32.mrf.mxu1  ;;  %v4069_v31 = vmax.f32 %v4000_v51, 0.0  ;;  %v5257_v10 = vrot.slane %v4066_v14, 2  ;;  %v5260_v40 = vrot.slane %v4067_v25, 2  ;;  %v3708_v24 = vadd.f32 %v16510_v57, %v12883_v9 }
 0x310   : > { %16508 = vst [vmem:[#allocation31_spill] sm:$0xff] %v13576_v54  ;;  %v5258_v50 = vrot.slane %v4068_v56, 2  ;;  %6623 = vmatmul.mubr.bf16.gmra.mxu1 %v5641_v13  ;;  %v4002_v0 = vadd.f32 %v4001_v22, %v3849_v63  ;;  %v4003_v62 = vpop.f32.mrf.mxu0  ;;  %v5146_v27 = vrot.slane %v4068_v56, 1  ;;  %v5651_v33 = vpack.c.bf16 %v4068_v56, %v4066_v14 }
 0x311   : > { %v13578_v52 = vpop.f32.mrf.mxu1  ;;  %v5261_v12 = vrot.slane %v4069_v31, 2  ;;  %v4004_v49 = vadd.f32 %v4003_v62, %v3851_v43  ;;  %v5652_v55 = vpack.c.bf16 %v4069_v31, %v4067_v25  ;;  %v5145_v51 = vrot.slane %v4066_v14, 1 }
 0x312   : > { %16509 = vst [vmem:[#allocation8_spill] sm:$0xff] %v13578_v52  ;;  %v4070_v32 = vmax.f32 %v4002_v0, 0.0  ;;  %v13581_v1 = vsel %vm1098_vm1, %v5257_v10, %v5258_v50  ;;  %v4007_v26 = vpop.f32.mrf.mxu0  ;;  %v5149_v22 = vrot.slane %v4069_v31, 1  ;;  %v5148_v54 = vrot.slane %v4067_v25, 1 }
 0x313   : > { %v4071_v13 = vmax.f32 %v4004_v49, 0.0  ;;  %6533 = vmatprep.mubr.bf16.mxu0 %v5652_v55  ;;  %v13586_v63 = vsel %vm1098_vm1, %v5260_v40, %v5261_v12  ;;  %v4008_v62 = vadd.f32 %v4007_v26, %v13006_v7  ;;  %v13589_v56 = vpop.f32.mrf.mxu1  ;;  %v5147_v40 = vsel %vm711_vm0, %v5145_v51, %v5146_v27 }
 0x314   : > { %v5151_v60 = vrot.slane %v4070_v32, 1  ;;  %v5263_v43 = vrot.slane %v4070_v32, 2  ;;  %6534 = vmatmul.mubr.bf16.gmra.mxu0 %v5651_v33  ;;  %16511 = vst [vmem:[#allocation22_spill] sm:$0xff] %v13589_v56  ;;  %v4009_v52 = vpop.f32.mrf.mxu0 }
 0x315   : > { %v5153_v10 = vrot.slane %v4071_v13, 1  ;;  %v5265_v0 = vrot.slane %v4071_v13, 2  ;;  %v13596_v55 = vpop.f32.mrf.mxu1  ;;  %v4072_v31 = vmax.f32 %v4008_v62, 0.0  ;;  %v16513_v13 = vld [vmem:[#allocation154_spill] sm:$0xff] }
 0x316   : > { %v5152_v14 = vsel %vm711_vm0, %v5146_v27, %v5151_v60  ;;  %v13593_v49 = vsel %vm1098_vm1, %v5258_v50, %v5263_v43  ;;  %16512 = vst [vmem:[#allocation174_spill] sm:$0xff] %v13596_v55  ;;  %v4011_v32 = vpop.f32.mrf.mxu0  ;;  %v3861_v26 = vadd.f32 %v16513_v13, %v3708_v24  ;;  %v5150_v60 = vsel %vm711_vm0, %v5148_v54, %v5149_v22 }
 0x317   : > { %v5154_v7 = vsel %vm711_vm0, %v5149_v22, %v5153_v10  ;;  %v5653_v33 = vpack.c.bf16 %v5152_v14, %v5147_v40  ;;  %v13600_v57 = vsel %vm1098_vm1, %v5261_v12, %v5265_v0  ;;  %v4012_v25 = vadd.f32 %v4011_v32, %v13033_v5  ;;  %v13605_v50 = vpop.f32.mrf.mxu1 }
 0x318   : > { %16514 = vst [vmem:[#allocation89_spill] sm:$0xff] %v13605_v50  ;;  %v4010_v27 = vadd.f32 %v4009_v52, %v13023_v23  ;;  %v4013_v51 = vpop.f32.mrf.mxu0  ;;  %v5654_v43 = vpack.c.bf16 %v5154_v7, %v5150_v60  ;;  %v5155_v14 = vrot.slane %v4072_v31, 1  ;;  %v5267_v5 = vrot.slane %v4072_v31, 2 }
 0x319   : > { %v4074_v12 = vmax.f32 %v4012_v25, 0.0  ;;  %v4014_v0 = vadd.f32 %v4013_v51, %v3861_v26  ;;  %v13612_v24 = vpop.f32.mrf.mxu1  ;;  %v16517_v25 = vld [vmem:[#allocation169_spill] sm:$0xff] }
 0x31a   : > { %16515 = vst [vmem:[#allocation72_spill] sm:$0xff] %v13612_v24  ;;  %6630 = vmatprep.mubr.bf16.mxu1 %v5654_v43  ;;  %v4073_v23 = vmax.f32 %v4010_v27, 0.0  ;;  %v4017_v32 = vpop.f32.mrf.mxu0  ;;  %v3718_v51 = vadd.f32 %v16517_v25, %v12883_v9  ;;  %v16521_v24 = vld [vmem:[#allocation153_spill] sm:$0xff] }
 0x31b   : > { %v5156_v54 = vrot.slane %v4074_v12, 1  ;;  %v5268_v22 = vrot.slane %v4074_v12, 2  ;;  %v5663_v40 = vpack.c.bf16 %v4074_v12, %v4072_v31  ;;  %6631 = vmatmul.mubr.bf16.gmra.mxu1 %v5653_v33  ;;  %v4075_v52 = vmax.f32 %v4014_v0, 0.0  ;;  %v13614_v7 = vpop.f32.mrf.mxu1 }
 0x31c   : > { %16516 = vst [vmem:[#allocation47_spill] sm:$0xff] %v13614_v7  ;;  %v4018_v13 = vadd.f32 %v4017_v32, %v13054_v15  ;;  %v4019_v43 = vpop.f32.mrf.mxu0  ;;  %v16520_v7 = vld [vmem:[#allocation163_spill] sm:$0xff]  ;;  %v3728_v50 = vadd.f32 %v16521_v24, %v12883_v9 }
 0x31d   : > { %v5157_v60 = vsel %vm711_vm0, %v5155_v14, %v5156_v54  ;;  %v13619_v26 = vsel %vm1098_vm1, %v5267_v5, %v5268_v22  ;;  %v5664_v10 = vpack.c.bf16 %v4075_v52, %v4073_v23  ;;  %v13623_v62 = vpop.f32.mrf.mxu1  ;;  %v4020_v33 = vadd.f32 %v4019_v43, %v13069_v38 }
 0x31e   : > { %16518 = vst [vmem:[#allocation182_spill] sm:$0xff] %v13623_v62  ;;  %v4076_v31 = vmax.f32 %v4018_v13, 0.0  ;;  %v5159_v27 = vrot.slane %v4075_v52, 1  ;;  %v4021_v12 = vpop.f32.mrf.mxu0  ;;  %v3871_v25 = vadd.f32 %v16520_v7, %v3718_v51  ;;  %v5158_v62 = vrot.slane %v4073_v23, 1 }
 0x31f   : > { %6541 = vmatprep.mubr.bf16.mxu0 %v5664_v10  ;;  %v13626_v0 = vpop.f32.mrf.mxu1  ;;  %v4077_v32 = vmax.f32 %v4020_v33, 0.0  ;;  %v4022_v5 = vadd.f32 %v4021_v12, %v13080_v6  ;;  %v5271_v13 = vrot.slane %v4075_v52, 2 }
 0x320   : > { %16519 = vst [vmem:[#allocation79_spill] sm:$0xff] %v13626_v0  ;;  %v5161_v15 = vrot.slane %v4076_v31, 1  ;;  %v5273_v14 = vrot.slane %v4076_v31, 2  ;;  %6542 = vmatmul.mubr.bf16.gmra.mxu0 %v5663_v40  ;;  %v4023_v55 = vpop.f32.mrf.mxu0  ;;  %v5270_v0 = vrot.slane %v4073_v23, 2  ;;  %v5160_v7 = vsel %vm711_vm0, %v5158_v62, %v5159_v27 }
 0x321   : > { %v13636_v43 = vpop.f32.mrf.mxu1  ;;  %v5163_v31 = vrot.slane %v4077_v32, 1  ;;  %v5275_v33 = vrot.slane %v4077_v32, 2  ;;  %v4078_v6 = vmax.f32 %v4022_v5, 0.0 }
 0x322   : > { %v5162_v38 = vsel %vm711_vm0, %v5156_v54, %v5161_v15  ;;  %v13634_v10 = vsel %vm1098_vm1, %v5268_v22, %v5273_v14  ;;  %16522 = vst [vmem:[#allocation42_spill] sm:$0xff] %v13636_v43  ;;  %v4027_v40 = vpop.f32.mrf.mxu0  ;;  %v4024_v15 = vadd.f32 %v4023_v55, %v3871_v25  ;;  %v13649_v32 = vsel %vm1098_vm1, %v5270_v0, %v5271_v13 }
 0x323   : > { %v5665_v51 = vpack.c.bf16 %v5162_v38, %v5157_v60  ;;  %v4028_v24 = vadd.f32 %v4027_v40, %v13094_v58  ;;  %v5164_v52 = vsel %vm711_vm0, %v5159_v27, %v5163_v31  ;;  %v13642_v12 = vsel %vm1098_vm1, %v5271_v13, %v5275_v33  ;;  %v13646_v22 = vpop.f32.mrf.mxu1 }
 0x324   : > { %16523 = vst [vmem:[#allocation143_spill] sm:$0xff] %v13646_v22  ;;  %v4029_v14 = vpop.f32.mrf.mxu0  ;;  %v5666_v23 = vpack.c.bf16 %v5164_v52, %v5160_v7  ;;  %v3881_v27 = vadd.f32 %v13039_v45, %v3728_v50  ;;  %v5165_v5 = vrot.slane %v4078_v6, 1  ;;  %v5277_v33 = vrot.slane %v4078_v6, 2 }
 0x325   : > { %v4080_v62 = vmax.f32 %v4028_v24, 0.0  ;;  %v4030_v60 = vadd.f32 %v4029_v14, %v13106_v30  ;;  %v13655_v38 = vpop.f32.mrf.mxu1  ;;  %v13657_v0 = vmax.f32 %v4024_v15, 0.0  ;;  %v16531_v58 = vpack.c.bf16 %v13306_v46, %v13288_v20 }
 0x326   : > { %16524 = vst [vmem:[#allocation140_spill] sm:$0xff] %v13655_v38  ;;  %v4031_v31 = vpop.f32.mrf.mxu0  ;;  %6638 = vmatprep.mubr.bf16.mxu1 %v5666_v23 }
 0x327   : > { %v5166_v55 = vrot.slane %v4080_v62, 1  ;;  %v5278_v25 = vrot.slane %v4080_v62, 2  ;;  %v5675_v40 = vpack.c.bf16 %v4080_v62, %v4078_v6  ;;  %6639 = vmatmul.mubr.bf16.gmra.mxu1 %v5665_v51  ;;  %v13659_v13 = vpop.f32.mrf.mxu1  ;;  %v13661_v30 = vmax.f32 %v4030_v60, 0.0 }
 0x328   : > { %16525 = vst [vmem:[#allocation146_spill] sm:$0xff] %v13659_v13  ;;  %v4032_v7 = vadd.f32 %v4031_v31, %v13115_v29  ;;  %v4033_v24 = vpop.f32.mrf.mxu0 }
 0x329   : > { %v13664_v45 = vadd.f32 %v4033_v24, %v3881_v27  ;;  %v5167_v50 = vsel %vm711_vm0, %v5165_v5, %v5166_v55  ;;  %v13668_v52 = vsel %vm1098_vm1, %v5277_v33, %v5278_v25  ;;  %v13670_v14 = vpop.f32.mrf.mxu1  ;;  %v5676_v15 = vpack.c.bf16 %v13661_v30, %v13657_v0 }
 0x32a   : > { %16526 = vst [vmem:[#allocation7_spill] sm:$0xff] %v13668_v52  ;;  %16527 = vst [vmem:[#allocation177_spill] sm:$0xff] %v13670_v14  ;;  %v4082_v6 = vmax.f32 %v4032_v7, 0.0  ;;  %v4727_v51 = vpop.f32.mrf.mxu0  ;;  %v5169_v23 = vrot.slane %v13661_v30, 1  ;;  %v5168_v5 = vrot.slane %v13657_v0, 1 }
 0x32b   : > { %v15196_v62 = vmax.f32 %v13664_v45, 0.0  ;;  %6549 = vmatprep.mubr.bf16.mxu0 %v5676_v15 }
 0x32c   : > { %v13676_v29 = vpop.f32.mrf.mxu1  ;;  %v5171_v60 = vrot.slane %v4082_v6, 1  ;;  %v5283_v27 = vrot.slane %v4082_v6, 2  ;;  %v4729_v33 = vpop.f32.mrf.mxu0  ;;  %6550 = vmatmul.mubr.bf16.gmra.mxu0 %v5675_v40  ;;  %v4575_v6 = vadd.f32 %v13057_v8, %v12876_v61  ;;  %v5170_v15 = vsel %vm711_vm0, %v5168_v5, %v5169_v23  ;;  %v7944_v8 = vld [vmem:[%s14777_s5 + $0x238] sm:$0xff]  }
 0x32d   : > { %16528 = vst [vmem:[#allocation29_spill] sm:$0xff] %v13676_v29  ;;  %v5173_v31 = vrot.slane %v15196_v62, 1  ;;  %6687 = vmatprep.mubr.bf16.mxu0 %v16531_v58  ;;  %v4579_v58 = vadd.f32 %v13108_v42, %v12876_v61  ;;  %v4585_v42 = vadd.f32 %v13164_v4, %v12876_v61 }
 0x32e   : > { %v5172_v7 = vsel %vm711_vm0, %v5166_v55, %v5171_v60  ;;  %v13683_v24 = vsel %vm1098_vm1, %v5278_v25, %v5283_v27  ;;  %v13685_v54 = vpop.f32.mrf.mxu1  ;;  %v4577_v60 = vadd.f32 %v13077_v41, %v12883_v9  ;;  %v4728_v27 = vadd.f32 %v4727_v51, %v4575_v6  ;;  %v4731_v20 = vpop.f32.mrf.mxu0  ;;  %v7948_v6 = vld [vmem:[%s14777_s5 + $0x230] sm:$0xff]  }
 0x32f   : > { %16529 = vst [vmem:[#allocation178_spill] sm:$0xff] %v13683_v24  ;;  %16530 = vst [vmem:[#allocation44_spill] sm:$0xff] %v13685_v54  ;;  %v5174_v62 = vsel %vm711_vm0, %v5169_v23, %v5173_v31  ;;  %v5677_v29 = vpack.c.bf16 %v5172_v7, %v5167_v50  ;;  %v7947_v23 = vld [vmem:[%s14777_s5 + $0x270] sm:$0xff]   ;;  %v4732_v51 = vadd.f32 %v4731_v20, %v4579_v58  ;;  %v16548_v24 = vld [vmem:[#allocation159_spill] sm:$0xff] }
 0x330   : > { %v13694_v40 = vpop.f32.mrf.mxu1  ;;  %v5678_v55 = vpack.c.bf16 %v5174_v62, %v5170_v15  ;;  %v4730_v50 = vadd.f32 %v4729_v33, %v4577_v60  ;;  %v4733_v5 = vpop.f32.mrf.mxu0  ;;  %v16534_v31 = vpack.c.bf16 %v13196_v44, %v13173_v34  ;;  %v4581_v7 = vadd.f32 %v13135_v28, %v12883_v9  ;;  %v16536_v28 = vld [vmem:[#allocation167_spill] sm:$0xff] }
 0x331   : > { %16532 = vst [vmem:[#allocation15_spill] sm:$0xff] %v13694_v40  ;;  %v4587_v34 = vadd.f32 %v13184_v37, %v12883_v9  ;;  %v4589_v44 = vadd.f32 %v13200_v11, %v12876_v61  ;;  %v4591_v15 = vadd.f32 %v16536_v28, %v12883_v9  ;;  %v13738_v60 = vadd.f32 %v13263_v17, %v12883_v9  ;;  %v16540_v17 = vld [vmem:[#allocation107_spill] sm:$0xff] }
 0x332   : > { %v13700_v46 = vpop.f32.mrf.mxu1  ;;  %6646 = vmatprep.mubr.bf16.mxu1 %v5678_v55  ;;  %v4734_v11 = vadd.f32 %v4733_v5, %v4581_v7  ;;  %v13744_v20 = vadd.f32 %v13274_v47, %v12876_v61  ;;  %v16542_v47 = vld [vmem:[#allocation166_spill] sm:$0xff] }
 0x333   : > { %16533 = vst [vmem:[#allocation181_spill] sm:$0xff] %v13700_v46  ;;  %6647 = vmatmul.mubr.bf16.gmra.mxu1 %v5677_v29  ;;  %v16535_v29 = vpack.c.bf16 %v13327_v59, %v13309_v39  ;;  %v7949_v39 = vld [vmem:[%s14777_s5 + $0x268] sm:$0xff]   ;;  %v16537_v59 = vld [vmem:[#allocation164_spill] sm:$0xff]  ;;  %v13764_v7 = vadd.f32 %v16542_v47, %v12883_v9 }
 0x334   : > { %6688 = vmatmul.mubr.bf16.vlgmr.msra.gmra.mxu0 %v16534_v31  ;;  %v13734_v55 = vadd.f32 %v16537_v59, %v12876_v61  ;;  %v13756_v31 = vadd.f32 %v16540_v17, %v12883_v9  ;;  %v13771_v59 = vadd.f32 %v13417_v3, %v12876_v61 }
 0x335   : > { %v4880_v62 = vpop.f32.mrf.mxu1  ;;  %6695 = vmatprep.mubr.bf16.mxu0 %v16535_v29  ;;  %7594 = vmatpush3.bf16.msra.mxu0 %v7944_v8  ;;  %v16538_v8 = vld [vmem:[#allocation53_spill] sm:$0xff] }
 0x336   : > { %v4881_v41 = vadd.f32 %v4880_v62, %v4728_v27  ;;  %7595 = vmatprep.subr.bf16.mxu0 %v7947_v23  ;;  %v13748_v58 = vadd.f32 %v16538_v8, %v12883_v9 }
 0x337   : > { %v4882_v33 = vpop.f32.mrf.mxu1 }
 0x338   : > { %v4883_v4 = vadd.f32 %v4882_v33, %v4730_v50  ;;  %v13740_v37 = vmax.f32 %v4881_v41, 0.0  ;;  %v16539_v50 = vld [vmem:[#allocation104_spill] sm:$0xff]  ;;  %v16541_v41 = vld [vmem:[#allocation162_spill] sm:$0xff] }
 0x339   : > { %v4884_v27 = vpop.f32.mrf.mxu1  ;;  %v13752_v23 = vadd.f32 %v16539_v50, %v12876_v61  ;;  %v13760_v5 = vadd.f32 %v16541_v41, %v12876_v61  ;;  %7596 = vmatpush3.bf16.msra.mxu0 %v7948_v6  ;;  %v16544_v6 = vld [vmem:[#allocation91_spill] sm:$0xff] }
 0x33a   : > { %v4885_v62 = vadd.f32 %v4884_v27, %v4732_v51  ;;  %v5000_v33 = vmax.f32 %v4883_v4, 0.0  ;;  %v7950_v51 = vld [vmem:[%s14777_s5 + $0x228] sm:$0xff]   ;;  %v16543_v27 = vld [vmem:[#allocation170_spill] sm:$0xff]  ;;  %7597 = vmatprep.subr.bf16.mxu0 %v7949_v39  ;;  %v13782_v41 = vadd.f32 %v16544_v6, %v12876_v61  ;;  %v5367_v47 = vrot.slane %v13740_v37, 1 }
 0x33b   : > { %v4886_v28 = vpop.f32.mrf.mxu1  ;;  %v13775_v8 = vadd.f32 %v16543_v27, %v12883_v9  ;;  %v7953_v4 = vld [vmem:[%s14777_s5 + $0x260] sm:$0xff]   ;;  %v5479_v3 = vrot.slane %v13740_v37, 2 }
 0x33c   : > { %v4737_v29 = vpop.f32.mrf.mxu0  ;;  %v5001_v50 = vmax.f32 %v4885_v62, 0.0  ;;  %v4887_v25 = vadd.f32 %v4886_v28, %v4734_v11  ;;  %v16545_v62 = vld [vmem:[#allocation10_spill] sm:$0xff]  ;;  %v5370_v13 = vrot.slane %v5000_v33, 1  ;;  %v5482_v38 = vrot.slane %v5000_v33, 2  ;;  %v16549_v11 = vld [vmem:[#allocation168_spill] sm:$0xff] }
 0x33d   : > { %v4738_v17 = vadd.f32 %v4737_v29, %v4585_v42  ;;  %v16546_v29 = vld [vmem:[#allocation105_spill] sm:$0xff]  ;;  %v16550_v28 = vpack.c.bf16 %v16548_v24, %v16549_v11  ;;  %7598 = vmatpush3.bf16.msra.mxu0 %v7950_v51 }
 0x33e   : > { %v4739_v46 = vpop.f32.mrf.mxu0  ;;  %v4890_v40 = vpop.f32.mrf.mxu1  ;;  %v5368_v27 = vrot.slane %v5001_v50, 1  ;;  %v5480_v54 = vrot.slane %v5001_v50, 2  ;;  %v5597_v42 = vpack.c.bf16 %v5001_v50, %v13740_v37  ;;  %v16547_v14 = vpack.c.bf16 %v16545_v62, %v16546_v29  ;;  %7599 = vmatprep.subr.bf16.mxu0 %v7953_v4  ;;  %v7951_v29 = vld [vmem:[%s14777_s5 + $0x2f0] sm:$0xff]  }
 0x33f   : > { %v4740_v39 = vadd.f32 %v4739_v46, %v4587_v34  ;;  %v13790_v6 = vmax.f32 %v4887_v25, 0.0  ;;  %v4891_v22 = vadd.f32 %v4890_v40, %v4738_v17  ;;  %v7954_v46 = vld [vmem:[%s14777_s5 + $0x220] sm:$0xff]   ;;  %v7955_v40 = vld [vmem:[%s14777_s5 + $0x258] sm:$0xff]  }
 0x340   : > { %6696 = vmatmul.mubr.bf16.gmra.mxu0 %v16547_v14  ;;  %v4741_v43 = vpop.f32.mrf.mxu0  ;;  %v4892_v52 = vpop.f32.mrf.mxu1  ;;  %v13799_v34 = vsel %vm711_vm0, %v5367_v47, %v5368_v27  ;;  %v13802_v14 = vsel %vm1098_vm1, %v5479_v3, %v5480_v54  ;;  %v7946_v3 = vld [vmem:[%s14777_s5 + $0x2b8] sm:$0xff]  }
 0x341   : > { %6703 = vmatprep.mubr.bf16.mxu0 %v16550_v28  ;;  %16551 = vst [vmem:[#allocation34_spill] sm:$0xff] %v13799_v34  ;;  %16552 = vst [vmem:[#allocation189_spill] sm:$0xff] %v13802_v14  ;;  %v4742_v25 = vadd.f32 %v4741_v43, %v4589_v44  ;;  %v4893_v37 = vadd.f32 %v4892_v52, %v4740_v39  ;;  %v5371_v24 = vrot.slane %v13790_v6, 1  ;;  %v5483_v51 = vrot.slane %v13790_v6, 2  ;;  %v16553_v43 = vld [vmem:[#allocation171_spill] sm:$0xff]  ;;  %v16565_v14 = vld [vmem:[#allocation172_spill] sm:$0xff] }
 0x342   : > { %v5003_v50 = vmax.f32 %v4891_v22, 0.0  ;;  %v4743_v17 = vpop.f32.mrf.mxu0  ;;  %v4894_v62 = vpop.f32.mrf.mxu1  ;;  %v5598_v47 = vpack.c.bf16 %v13790_v6, %v5000_v33  ;;  %v13815_v52 = vadd.f32 %v16553_v43, %v12883_v9  ;;  %7600 = vmatpush3.bf16.msra.mxu0 %v7954_v46  ;;  %v7956_v6 = vld [vmem:[%s14777_s5 + $0x218] sm:$0xff]   ;;  %v7959_v46 = vld [vmem:[%s14777_s5 + $0x250] sm:$0xff]  }
 0x343   : > { %v5004_v44 = vmax.f32 %v4893_v37, 0.0  ;;  %v4744_v4 = vadd.f32 %v4743_v17, %v4591_v15  ;;  %v4895_v39 = vadd.f32 %v4894_v62, %v4742_v25  ;;  %v13824_v43 = vsel %vm711_vm0, %v5370_v13, %v5371_v24  ;;  %v16555_v25 = vld [vmem:[#allocation49_spill] sm:$0xff]  ;;  %7601 = vmatprep.subr.bf16.mxu0 %v7955_v40 }
 0x344   : > { %v5373_v22 = vrot.slane %v5003_v50, 1  ;;  %v5485_v11 = vrot.slane %v5003_v50, 2  ;;  %v4747_v28 = vpop.f32.mrf.mxu0  ;;  %6784 = vmatprep.mubr.bf16.mxu1 %v5598_v47  ;;  %v4896_v33 = vpop.f32.mrf.mxu1  ;;  %v13827_v15 = vsel %vm1098_vm1, %v5482_v38, %v5483_v51  ;;  %v13831_v37 = vadd.f32 %v16555_v25, %v12876_v61  ;;  %v16558_v40 = vld [vmem:[#allocation157_spill] sm:$0xff] }
 0x345   : > { %16554 = vst [vmem:[#allocation76_spill] sm:$0xff] %v13827_v15  ;;  %v5375_v17 = vrot.slane %v5004_v44, 1  ;;  %v5487_v50 = vrot.slane %v5004_v44, 2  ;;  %v4748_v62 = vadd.f32 %v4747_v28, %v13734_v55  ;;  %6785 = vmatmul.mubr.bf16.vlgmr.msra.gmra.mxu1 %v5597_v42  ;;  %v13839_v13 = vadd.f32 %v13495_v19, %v12883_v9  ;;  %v7952_v55 = vld [vmem:[%s14777_s5 + $0x2b0] sm:$0xff]   ;;  %v7967_v15 = vld [vmem:[%s14777_s5 + $0x2d8] sm:$0xff]  }
 0x346   : > { %v13842_v38 = vsel %vm711_vm0, %v5368_v27, %v5373_v22  ;;  %v13845_v47 = vsel %vm1098_vm1, %v5480_v54, %v5485_v11  ;;  %v4897_v25 = vadd.f32 %v4896_v33, %v4744_v4  ;;  %v4749_v44 = vpop.f32.mrf.mxu0  ;;  %v4900_v56 = vpop.f32.mrf.mxu1  ;;  %7658 = vmatpush3.bf16.msra.mxu1 %v7946_v3  ;;  %v13852_v42 = vadd.f32 %v13505_v18, %v12876_v61  ;;  %v16557_v54 = vld [vmem:[#allocation46_spill] sm:$0xff]  ;;  %v7957_v3 = vld [vmem:[%s14777_s5 + $0x2e8] sm:$0xff]  }
 0x347   : > { %16556 = vst [vmem:[#allocation87_spill] sm:$0xff] %v13845_v47  ;;  %v16559_v4 = vpack.c.bf16 %v16557_v54, %v16558_v40  ;;  %7659 = vmatprep.subr.bf16.mxu1 %v7951_v29  ;;  %v13864_v22 = vmax.f32 %v4895_v39, 0.0  ;;  %v4750_v18 = vadd.f32 %v4749_v44, %v13738_v60  ;;  %v4901_v11 = vadd.f32 %v4900_v56, %v4748_v62  ;;  %v7960_v29 = vld [vmem:[%s14777_s5 + $0x210] sm:$0xff]   ;;  %v7961_v56 = vld [vmem:[%s14777_s5 + $0x248] sm:$0xff]   ;;  %v16562_v60 = vld [vmem:[#allocation21_spill] sm:$0xff] }
 0x348   : > { %v4751_v28 = vpop.f32.mrf.mxu0  ;;  %v4902_v33 = vpop.f32.mrf.mxu1  ;;  %v16560_v19 = vpack.c.bf16 %v13499_v2, %v13475_v21  ;;  %7602 = vmatpush3.bf16.msra.mxu0 %v7956_v6  ;;  %v13874_v54 = vsel %vm711_vm0, %v5371_v24, %v5375_v17  ;;  %v13876_v40 = vmax.f32 %v4897_v25, 0.0  ;;  %v13885_v2 = vsel %vm1098_vm1, %v5483_v51, %v5487_v50  ;;  %v16563_v24 = vld [vmem:[#allocation120_spill] sm:$0xff]  ;;  %v7958_v44 = vld [vmem:[%s14777_s5 + $0x2a8] sm:$0xff]  }
 0x349   : > { %6704 = vmatmul.mubr.bf16.gmra.mxu0 %v16559_v4  ;;  %v4752_v39 = vadd.f32 %v4751_v28, %v13744_v20  ;;  %7603 = vmatprep.subr.bf16.mxu0 %v7959_v46  ;;  %16561 = vst [vmem:[#allocation156_spill] sm:$0xff] %v13885_v2  ;;  %v13889_v6 = vadd.f32 %v16562_v60, %v12883_v9  ;;  %v13895_v20 = vmax.f32 %v4901_v11, 0.0  ;;  %v16564_v51 = vld [vmem:[#allocation123_spill] sm:$0xff]  ;;  %v7963_v11 = vld [vmem:[%s14777_s5 + $0x2e0] sm:$0xff]   ;;  %v16566_v47 = vld [vmem:[#allocation68_spill] sm:$0xff] }
 0x34a   : > { %6711 = vmatprep.mubr.bf16.mxu0 %v16560_v19  ;;  %v13893_v17 = vadd.f32 %v16563_v24, %v12876_v61  ;;  %v4903_v62 = vadd.f32 %v4902_v33, %v4750_v18  ;;  %v4753_v46 = vpop.f32.mrf.mxu0  ;;  %v4904_v25 = vpop.f32.mrf.mxu1  ;;  %7660 = vmatpush3.bf16.msra.mxu1 %v7952_v55  ;;  %v13902_v50 = vadd.f32 %v16564_v51, %v12883_v9  ;;  %v5377_v55 = vrot.slane %v13864_v22, 1  ;;  %v7962_v51 = vld [vmem:[%s14777_s5 + $0x208] sm:$0xff]  }
 0x34b   : > { %v4754_v19 = vadd.f32 %v4753_v46, %v13748_v58  ;;  %v4905_v4 = vadd.f32 %v4904_v25, %v4752_v39  ;;  %7661 = vmatprep.subr.bf16.mxu1 %v7957_v3  ;;  %v5378_v28 = vrot.slane %v13895_v20, 1  ;;  %v5609_v33 = vpack.c.bf16 %v13895_v20, %v13864_v22 }
 0x34c   : > { %v13914_v60 = vmax.f32 %v4903_v62, 0.0  ;;  %v4757_v24 = vpop.f32.mrf.mxu0  ;;  %v4906_v58 = vpop.f32.mrf.mxu1  ;;  %7604 = vmatpush3.bf16.msra.mxu0 %v7960_v29  ;;  %v5492_v3 = vrot.slane %v13876_v40, 2  ;;  %v5490_v27 = vrot.slane %v13895_v20, 2  ;;  %v13946_v2 = vadd.f32 %v13542_v36, %v12876_v61 }
 0x34d   : > { %v5009_v39 = vmax.f32 %v4905_v4, 0.0  ;;  %v4758_v46 = vadd.f32 %v4757_v24, %v13752_v23  ;;  %v13918_v25 = vadd.f32 %v4906_v58, %v4754_v19  ;;  %7605 = vmatprep.subr.bf16.mxu0 %v7961_v56  ;;  %v7964_v23 = vld [vmem:[%s14777_s5 + $0x2a0] sm:$0xff]   ;;  %v13934_v19 = vsel %vm711_vm0, %v5377_v55, %v5378_v28 }
 0x34e   : > { %v5493_v62 = vrot.slane %v13914_v60, 2  ;;  %v4759_v18 = vpop.f32.mrf.mxu0  ;;  %v4910_v21 = vpop.f32.mrf.mxu1  ;;  %v5610_v29 = vpack.c.bf16 %v13914_v60, %v13876_v40  ;;  %7662 = vmatpush3.bf16.msra.mxu1 %v7958_v44  ;;  %v7965_v56 = vld [vmem:[%s14777_s5 + $0x240] sm:$0xff]   ;;  %v16567_v44 = vpack.c.bf16 %v16565_v14, %v16566_v47  ;;  %v5489_v47 = vrot.slane %v13864_v22, 2 }
 0x34f   : > { %v5383_v20 = vrot.slane %v5009_v39, 1  ;;  %v5495_v4 = vrot.slane %v5009_v39, 2  ;;  %v5010_v24 = vmax.f32 %v13918_v25, 0.0  ;;  %v4760_v58 = vadd.f32 %v4759_v18, %v13756_v31  ;;  %7663 = vmatprep.subr.bf16.mxu1 %v7963_v11 }
 0x350   : > { %v4911_v55 = vadd.f32 %v4910_v21, %v4758_v46  ;;  %v4761_v34 = vpop.f32.mrf.mxu0  ;;  %6792 = vmatprep.mubr.bf16.mxu1 %v5610_v29  ;;  %v4912_v39 = vpop.f32.mrf.mxu1  ;;  %v16568_v31 = vpack.c.bf16 %v13559_v35, %v13539_v48  ;;  %v13952_v14 = vsel %vm1098_vm1, %v5492_v3, %v5493_v62  ;;  %7606 = vmatpush3.bf16.msra.mxu0 %v7962_v51  ;;  %v7966_v48 = vld [vmem:[%s14777_s5 + $0x200] sm:$0xff]   ;;  %v7968_v46 = vld [vmem:[%s14777_s5 + $0x298] sm:$0xff]   ;;  %v5381_v25 = vrot.slane %v13914_v60, 1  ;;  %v16586_v60 = vld [vmem:[#allocation7_spill] sm:$0xff] }
 0x351   : > { %6712 = vmatmul.mubr.bf16.gmra.mxu0 %v16567_v44  ;;  %v13956_v11 = vsel %vm711_vm0, %v5378_v28, %v5383_v20  ;;  %v13959_v18 = vsel %vm1098_vm1, %v5490_v27, %v5495_v4  ;;  %v5497_v36 = vrot.slane %v5010_v24, 2  ;;  %6793 = vmatmul.mubr.bf16.gmra.mxu1 %v5609_v33  ;;  %v4762_v21 = vadd.f32 %v4761_v34, %v13760_v5  ;;  %v7969_v5 = vld [vmem:[%s14777_s5 + $0x2d0] sm:$0xff]  }
 0x352   : > { %6719 = vmatprep.mubr.bf16.mxu0 %v16568_v31  ;;  %v13966_v35 = vmax.f32 %v4911_v55, 0.0  ;;  %v4913_v22 = vadd.f32 %v4912_v39, %v4760_v58  ;;  %v4763_v3 = vpop.f32.mrf.mxu0  ;;  %v4914_v28 = vpop.f32.mrf.mxu1  ;;  %7664 = vmatpush3.bf16.msra.mxu1 %v7964_v23  ;;  %v13976_v51 = vadd.f32 %v13551_v16, %v12883_v9  ;;  %v13986_v23 = vsel %vm1098_vm1, %v5489_v47, %v5490_v27 }
 0x353   : > { %7607 = vmatprep.subr.bf16.mxu0 %v7965_v56  ;;  %v4764_v29 = vadd.f32 %v4763_v3, %v13764_v7  ;;  %7665 = vmatprep.subr.bf16.mxu1 %v7967_v15  ;;  %v13983_v34 = vsel %vm1098_vm1, %v5493_v62, %v5497_v36  ;;  %v16569_v56 = vld [vmem:[#allocation85_spill] sm:$0xff]  ;;  %v5280_v16 = vrot.slane %v13657_v0, 2  ;;  %v4915_v7 = vadd.f32 %v4914_v28, %v4762_v21  ;;  %v16571_v28 = vld [vmem:[#allocation127_spill] sm:$0xff] }
 0x354   : > { %v13990_v20 = vadd.f32 %v16569_v56, %v12876_v61  ;;  %v13993_v4 = vmax.f32 %v4913_v22, 0.0  ;;  %v4916_v58 = vpop.f32.mrf.mxu1  ;;  %v5281_v44 = vrot.slane %v13661_v30, 2  ;;  %7608 = vmatpush3.bf16.msra.mxu0 %v7966_v48  ;;  %v16570_v39 = vmax.f32 %v13664_v45, 0.0  ;;  %v7970_v30 = vld [vmem:[%s14777_s5 + $0x290] sm:$0xff]  }
 0x355   : > { %v4767_v15 = vpop.f32.mrf.mxu0  ;;  %v4917_v62 = vadd.f32 %v4916_v58, %v4764_v29  ;;  %v5387_v47 = vrot.slane %v13966_v35, 1  ;;  %v5013_v0 = vmax.f32 %v4915_v7, 0.0  ;;  %v5499_v48 = vrot.slane %v13966_v35, 2  ;;  %v16572_v29 = vld [vmem:[#allocation122_spill] sm:$0xff] }
 0x356   : > { %v4768_v55 = vadd.f32 %v4767_v15, %v13771_v59  ;;  %v5285_v31 = vrot.slane %v16570_v39, 2  ;;  %7666 = vmatpush3.bf16.msra.mxu1 %v7968_v46  ;;  %v16573_v56 = vpack.c.bf16 %v16571_v28, %v16572_v29  ;;  %v7971_v46 = vld [vmem:[%s14777_s5 + $0x2c8] sm:$0xff]   ;;  %v5502_v7 = vrot.slane %v13993_v4, 2 }
 0x357   : > { %v4769_v36 = vpop.f32.mrf.mxu0  ;;  %v4920_v22 = vpop.f32.mrf.mxu1  ;;  %v14008_v21 = vmax.f32 %v4917_v62, 0.0  ;;  %7667 = vmatprep.subr.bf16.mxu1 %v7969_v5  ;;  %v5388_v15 = vrot.slane %v5013_v0, 1  ;;  %v5500_v58 = vrot.slane %v5013_v0, 2  ;;  %v5621_v39 = vpack.c.bf16 %v5013_v0, %v13966_v35 }
 0x358   : > { %v4770_v45 = vadd.f32 %v4769_v36, %v13775_v8  ;;  %v4921_v3 = vadd.f32 %v4920_v22, %v4768_v55  ;;  %v16574_v8 = vpack.c.bf16 %v13600_v57, %v13586_v63  ;;  %v7972_v63 = vld [vmem:[%s14777_s5 + $0x288] sm:$0xff]  }
 0x359   : > { %6720 = vmatmul.mubr.bf16.gmra.mxu0 %v16573_v56  ;;  %v4771_v62 = vpop.f32.mrf.mxu0  ;;  %v4922_v59 = vpop.f32.mrf.mxu1  ;;  %v5391_v55 = vrot.slane %v14008_v21, 1  ;;  %v5503_v5 = vrot.slane %v14008_v21, 2  ;;  %v5622_v27 = vpack.c.bf16 %v14008_v21, %v13993_v4  ;;  %v14028_v35 = vsel %vm711_vm0, %v5387_v47, %v5388_v15 }
 0x35a   : > { %6727 = vmatprep.mubr.bf16.mxu0 %v16574_v8  ;;  %v5015_v36 = vmax.f32 %v4921_v3, 0.0  ;;  %v4772_v22 = vadd.f32 %v4771_v62, %v13782_v41  ;;  %v4923_v28 = vadd.f32 %v4922_v59, %v4770_v45  ;;  %7668 = vmatpush3.bf16.msra.mxu1 %v7970_v30  ;;  %v14034_v57 = vsel %vm1098_vm1, %v5499_v48, %v5500_v58  ;;  %v7973_v30 = vld [vmem:[%s14777_s5 + $0x2c0] sm:$0xff]  }
 0x35b   : > { %v4773_v29 = vpop.f32.mrf.mxu0  ;;  %v4924_v56 = vpop.f32.mrf.mxu1  ;;  %7669 = vmatprep.subr.bf16.mxu1 %v7971_v46  ;;  %6800 = vmatprep.mubr.bf16.mxu1 %v5622_v27  ;;  %v14041_v62 = vsel %vm1098_vm1, %v5280_v16, %v5281_v44  ;;  %v14044_v48 = vsel %vm1098_vm1, %v5281_v44, %v5285_v31  ;;  %v14047_v8 = vsel %vm1098_vm1, %v5502_v7, %v5503_v5 }
 0x35c   : > { %v5393_v0 = vrot.slane %v5015_v36, 1  ;;  %v5505_v3 = vrot.slane %v5015_v36, 2  ;;  %v4774_v41 = vadd.f32 %v4773_v29, %v13815_v52  ;;  %v4925_v59 = vadd.f32 %v4924_v56, %v4772_v22  ;;  %6801 = vmatmul.mubr.bf16.gmra.mxu1 %v5621_v39 }
 0x35d   : > { %v5016_v21 = vmax.f32 %v4923_v28, 0.0  ;;  %v4926_v45 = vpop.f32.mrf.mxu1  ;;  %v5390_v52 = vrot.slane %v13993_v4, 1  ;;  %v7974_v4 = vld [vmem:[%s14777_s5 + $0x280] sm:$0xff]  }
 0x35e   : > { %v4777_v47 = vpop.f32.mrf.mxu0  ;;  %v14051_v46 = vsel %vm711_vm0, %v5388_v15, %v5393_v0  ;;  %v14054_v36 = vsel %vm1098_vm1, %v5500_v58, %v5505_v3  ;;  %v4927_v28 = vadd.f32 %v4926_v45, %v4774_v41  ;;  %7670 = vmatpush3.bf16.msra.mxu1 %v7972_v63  ;;  %v5017_v7 = vmax.f32 %v4925_v59, 0.0 }
 0x35f   : > { %v4778_v27 = vadd.f32 %v4777_v47, %v13831_v37  ;;  %v5395_v22 = vrot.slane %v5016_v21, 1  ;;  %v5507_v16 = vrot.slane %v5016_v21, 2  ;;  %v16575_v37 = vpack.c.bf16 %v13593_v49, %v13581_v1  ;;  %7671 = vmatprep.subr.bf16.mxu1 %v7973_v30 }
 0x360   : > { %v4779_v29 = vpop.f32.mrf.mxu0  ;;  %v4930_v44 = vpop.f32.mrf.mxu1  ;;  %v14067_v39 = vsel %vm711_vm0, %v5390_v52, %v5391_v55  ;;  %v14069_v56 = vmax.f32 %v4927_v28, 0.0  ;;  %v16576_v3 = vpack.c.bf16 %v13642_v12, %v13649_v32  ;;  %v14087_v12 = vadd.f32 %v13572_v53, %v12883_v9  ;;  %v16577_v32 = vld [vmem:[#allocation31_spill] sm:$0xff] }
 0x361   : > { %v4780_v15 = vadd.f32 %v4779_v29, %v13839_v13  ;;  %v4931_v58 = vadd.f32 %v4930_v44, %v4778_v27  ;;  %6728 = vmatmul.mubr.bf16.gmra.mxu0 %v16575_v37  ;;  %v14075_v41 = vsel %vm711_vm0, %v5391_v55, %v5395_v22  ;;  %v14078_v13 = vsel %vm1098_vm1, %v5503_v5, %v5507_v16 }
 0x362   : > { %v4781_v0 = vpop.f32.mrf.mxu0  ;;  %v4932_v63 = vpop.f32.mrf.mxu1  ;;  %6735 = vmatprep.mubr.bf16.mxu0 %v16576_v3  ;;  %v14091_v55 = vadd.f32 %v16577_v32, %v12876_v61  ;;  %v5680_v45 = vpack.c.bf16 %v14044_v48, %v14041_v62  ;;  %7672 = vmatpush3.bf16.msra.mxu1 %v7974_v4  ;;  %v5397_v53 = vrot.slane %v5017_v7, 1  ;;  %v5509_v28 = vrot.slane %v5017_v7, 2 }
 0x363   : > { %v5019_v49 = vmax.f32 %v4931_v58, 0.0  ;;  %v4782_v59 = vadd.f32 %v4781_v0, %v13852_v42  ;;  %v4933_v30 = vadd.f32 %v4932_v63, %v4780_v15  ;;  %v5512_v37 = vrot.slane %v14069_v56, 2  ;;  %v16585_v42 = vld [vmem:[#allocation178_spill] sm:$0xff] }
 0x364   : > { %v4783_v5 = vpop.f32.mrf.mxu0  ;;  %v4934_v47 = vpop.f32.mrf.mxu1 }
 0x365   : > { %v5398_v52 = vrot.slane %v5019_v49, 1  ;;  %v5510_v27 = vrot.slane %v5019_v49, 2  ;;  %v5633_v22 = vpack.c.bf16 %v5019_v49, %v5017_v7  ;;  %v14097_v16 = vmax.f32 %v4933_v30, 0.0 }
 0x366   : > { %v4784_v29 = vadd.f32 %v4783_v5, %v13889_v6  ;;  %v4935_v44 = vadd.f32 %v4934_v47, %v4782_v59  ;;  %v4936_v58 = vpop.f32.mrf.mxu1  ;;  %v16578_v59 = vld [vmem:[#allocation8_spill] sm:$0xff]  ;;  %v16579_v5 = vpack.c.bf16 %v13634_v10, %v13619_v26 }
 0x367   : > { %v5513_v62 = vrot.slane %v14097_v16, 2  ;;  %v5634_v4 = vpack.c.bf16 %v14097_v16, %v14069_v56  ;;  %v14108_v7 = vsel %vm711_vm0, %v5397_v53, %v5398_v52  ;;  %v14111_v6 = vsel %vm1098_vm1, %v5509_v28, %v5510_v27 }
 0x368   : > { %v4787_v15 = vpop.f32.mrf.mxu0  ;;  %v5021_v0 = vmax.f32 %v4935_v44, 0.0  ;;  %v14105_v63 = vadd.f32 %v4936_v58, %v4784_v29  ;;  %v14115_v30 = vadd.f32 %v16578_v59, %v12883_v9  ;;  %v16580_v58 = vld [vmem:[#allocation22_spill] sm:$0xff] }
 0x369   : > { %v4788_v48 = vadd.f32 %v4787_v15, %v13893_v17  ;;  %6808 = vmatprep.mubr.bf16.mxu1 %v5634_v4  ;;  %6736 = vmatmul.mubr.bf16.gmra.mxu0 %v16579_v5  ;;  %v14123_v28 = vsel %vm1098_vm1, %v5512_v37, %v5513_v62  ;;  %v16583_v5 = vld [vmem:[#allocation72_spill] sm:$0xff] }
 0x36a   : > { %v4789_v3 = vpop.f32.mrf.mxu0  ;;  %v4940_v49 = vpop.f32.mrf.mxu1  ;;  %v5403_v47 = vrot.slane %v5021_v0, 1  ;;  %v5515_v29 = vrot.slane %v5021_v0, 2  ;;  %v5022_v53 = vmax.f32 %v14105_v63, 0.0  ;;  %6809 = vmatmul.mubr.bf16.gmra.mxu1 %v5633_v22  ;;  %6743 = vmatprep.mubr.bf16.mxu0 %v5680_v45  ;;  %v16582_v0 = vld [vmem:[#allocation89_spill] sm:$0xff] }
 0x36b   : > { %v4790_v17 = vadd.f32 %v4789_v3, %v13902_v50  ;;  %v4941_v32 = vadd.f32 %v4940_v49, %v4788_v48  ;;  %v14127_v50 = vadd.f32 %v16580_v58, %v12876_v61  ;;  %v16581_v48 = vld [vmem:[#allocation174_spill] sm:$0xff]  ;;  %v14136_v3 = vadd.f32 %v16582_v0, %v12876_v61 }
 0x36c   : > { %v4791_v44 = vpop.f32.mrf.mxu0  ;;  %v4942_v15 = vpop.f32.mrf.mxu1  ;;  %v14131_v4 = vadd.f32 %v16581_v48, %v12883_v9  ;;  %v14139_v45 = vsel %vm711_vm0, %v5398_v52, %v5403_v47  ;;  %v14142_v22 = vsel %vm1098_vm1, %v5510_v27, %v5515_v29  ;;  %v5517_v37 = vrot.slane %v5022_v53, 2  ;;  %v16584_v52 = vld [vmem:[#allocation47_spill] sm:$0xff] }
 0x36d   : > { %v4792_v26 = vadd.f32 %v4791_v44, %v13946_v2  ;;  %v4943_v10 = vadd.f32 %v4942_v15, %v4790_v17  ;;  %v14148_v58 = vadd.f32 %v16583_v5, %v12883_v9  ;;  %v5385_v2 = vrot.slane %v5010_v24, 1 }
 0x36e   : > { %v4793_v49 = vpop.f32.mrf.mxu0  ;;  %v4944_v59 = vpop.f32.mrf.mxu1  ;;  %v5023_v17 = vmax.f32 %v4941_v32, 0.0  ;;  %v14155_v47 = vadd.f32 %v16584_v52, %v12876_v61  ;;  %v14160_v48 = vsel %vm1098_vm1, %v5513_v62, %v5517_v37  ;;  %v5380_v0 = vrot.slane %v13876_v40, 1 }
 0x36f   : > { %v4794_v44 = vadd.f32 %v4793_v49, %v13976_v51  ;;  %v4945_v27 = vadd.f32 %v4944_v59, %v4792_v26  ;;  %v14164_v24 = vmax.f32 %v4943_v10, 0.0  ;;  %v16587_v10 = vpack.c.bf16 %v16585_v42, %v16586_v60 }
 0x370   : > { %v4946_v29 = vpop.f32.mrf.mxu1  ;;  %v5407_v62 = vrot.slane %v5023_v17, 1  ;;  %v5519_v37 = vrot.slane %v5023_v17, 2  ;;  %v16588_v26 = vpack.c.bf16 %v13874_v54, %v13824_v43  ;;  %v16589_v43 = vld [vmem:[#allocation182_spill] sm:$0xff] }
 0x371   : > { %v4947_v51 = vadd.f32 %v4946_v29, %v4794_v44  ;;  %v5025_v49 = vmax.f32 %v4945_v27, 0.0  ;;  %6744 = vmatmul.mubr.bf16.gmra.mxu0 %v16587_v10  ;;  %v5386_v44 = vsel %vm711_vm0, %v5381_v25, %v5385_v2  ;;  %v5522_v59 = vrot.slane %v14164_v24, 2 }
 0x372   : > { %v4797_v32 = vpop.f32.mrf.mxu0  ;;  %v4950_v52 = vpop.f32.mrf.mxu1  ;;  %6881 = vmatprep.mubr.bf16.mxu0 %v16588_v26  ;;  %v14190_v54 = vadd.f32 %v16589_v43, %v12883_v9 }
 0x373   : > { %v4798_v5 = vadd.f32 %v4797_v32, %v13990_v20  ;;  %v5026_v1 = vmax.f32 %v4947_v51, 0.0  ;;  %v5408_v27 = vrot.slane %v5025_v49, 1  ;;  %v5520_v29 = vrot.slane %v5025_v49, 2 }
 0x374   : > { %v4799_v40 = vpop.f32.mrf.mxu0  ;;  %v5645_v20 = vpack.c.bf16 %v5025_v49, %v5023_v17  ;;  %v4952_v15 = vpop.f32.mrf.mxu1 }
 0x375   : > { %v4800_v32 = vadd.f32 %v4799_v40, %v14087_v12  ;;  %v5523_v51 = vrot.slane %v5026_v1, 2  ;;  %v4951_v31 = vadd.f32 %v4950_v52, %v4798_v5  ;;  %v5646_v42 = vpack.c.bf16 %v5026_v1, %v14164_v24 }
 0x376   : > { %v4801_v21 = vpop.f32.mrf.mxu0  ;;  %v4954_v10 = vpop.f32.mrf.mxu1  ;;  %v14183_v17 = vsel %vm711_vm0, %v5407_v62, %v5408_v27  ;;  %v14186_v12 = vsel %vm1098_vm1, %v5519_v37, %v5520_v29  ;;  %v5382_v5 = vsel %vm711_vm0, %v5380_v0, %v5381_v25  ;;  %v16590_v37 = vld [vmem:[#allocation79_spill] sm:$0xff]  ;;  %v5410_v0 = vrot.slane %v14164_v24, 1 }
 0x377   : > { %v4802_v60 = vadd.f32 %v4801_v21, %v14091_v55  ;;  %v4953_v2 = vadd.f32 %v4952_v15, %v4800_v32  ;;  %v5027_v49 = vmax.f32 %v4951_v31, 0.0  ;;  %6816 = vmatprep.mubr.bf16.mxu1 %v5646_v42  ;;  %v14194_v52 = vsel %vm1098_vm1, %v5522_v59, %v5523_v51 }
 0x378   : > { %v4803_v26 = vpop.f32.mrf.mxu0  ;;  %v5411_v21 = vrot.slane %v5026_v1, 1  ;;  %v4956_v40 = vpop.f32.mrf.mxu1  ;;  %6817 = vmatmul.mubr.bf16.gmra.mxu1 %v5645_v20  ;;  %v14199_v32 = vadd.f32 %v16590_v37, %v12876_v61  ;;  %v5612_v42 = vpack.c.bf16 %v5386_v44, %v5382_v5  ;;  %v16592_v44 = vld [vmem:[#allocation34_spill] sm:$0xff] }
 0x379   : > { %v5028_v55 = vmax.f32 %v4953_v2, 0.0  ;;  %v4804_v15 = vadd.f32 %v4803_v26, %v14115_v30  ;;  %v4955_v62 = vadd.f32 %v4954_v10, %v4802_v60  ;;  %v5413_v43 = vrot.slane %v5027_v49, 1  ;;  %v16591_v30 = vld [vmem:[#allocation42_spill] sm:$0xff] }
 0x37a   : > { %v5525_v31 = vrot.slane %v5027_v49, 2  ;;  %v4807_v33 = vpop.f32.mrf.mxu0  ;;  %v14205_v60 = vadd.f32 %v16591_v30, %v12883_v9  ;;  %v16593_v24 = vpack.c.bf16 %v13842_v38, %v16592_v44  ;;  %v14218_v37 = vsel %vm711_vm0, %v5410_v0, %v5411_v21  ;;  %v16594_v0 = vld [vmem:[#allocation143_spill] sm:$0xff] }
 0x37b   : > { %v5415_v25 = vrot.slane %v5028_v55, 1  ;;  %v5527_v59 = vrot.slane %v5028_v55, 2  ;;  %v4808_v1 = vadd.f32 %v4807_v33, %v14127_v50  ;;  %v4960_v2 = vpop.f32.mrf.mxu1  ;;  %v14208_v20 = vsel %vm711_vm0, %v5408_v27, %v5413_v43 }
 0x37c   : > { %v14211_v10 = vsel %vm1098_vm1, %v5520_v29, %v5525_v31  ;;  %v4957_v49 = vadd.f32 %v4956_v40, %v4804_v15  ;;  %v4809_v26 = vpop.f32.mrf.mxu0  ;;  %6882 = vmatmul.mubr.bf16.vlgmr.msra.gmra.mxu0 %v16593_v24  ;;  %v5029_v5 = vmax.f32 %v4955_v62, 0.0 }
 0x37d   : > { %v4810_v33 = vadd.f32 %v4809_v26, %v14131_v4  ;;  %v4961_v50 = vadd.f32 %v4960_v2, %v4808_v1  ;;  %v4962_v55 = vpop.f32.mrf.mxu1  ;;  %6889 = vmatprep.mubr.bf16.mxu0 %v5612_v42  ;;  %v14223_v29 = vsel %vm711_vm0, %v5411_v21, %v5415_v25  ;;  %v14228_v38 = vsel %vm1098_vm1, %v5523_v51, %v5527_v59 }
 0x37e   : > { %v14220_v27 = vmax.f32 %v4957_v49, 0.0  ;;  %v4811_v43 = vpop.f32.mrf.mxu0  ;;  %v14235_v1 = vadd.f32 %v16594_v0, %v12876_v61  ;;  %v5405_v21 = vrot.slane %v5022_v53, 1  ;;  %v5417_v44 = vrot.slane %v5029_v5, 1 }
 0x37f   : > { %v5031_v62 = vmax.f32 %v4961_v50, 0.0  ;;  %v4812_v4 = vadd.f32 %v4811_v43, %v14136_v3  ;;  %v4963_v40 = vadd.f32 %v4962_v55, %v4810_v33  ;;  %v4964_v31 = vpop.f32.mrf.mxu1  ;;  %v5529_v24 = vrot.slane %v5029_v5, 2 }
 0x380   : > { %v4813_v25 = vpop.f32.mrf.mxu0  ;;  %v5532_v53 = vrot.slane %v14220_v27, 2 }
 0x381   : > { %v5418_v3 = vrot.slane %v5031_v62, 1  ;;  %v5530_v2 = vrot.slane %v5031_v62, 2  ;;  %v5657_v30 = vpack.c.bf16 %v5031_v62, %v5029_v5  ;;  %v14243_v49 = vmax.f32 %v4963_v40, 0.0  ;;  %v4966_v26 = vpop.f32.mrf.mxu1 }
 0x382   : > { %v4814_v33 = vadd.f32 %v4813_v25, %v14148_v58  ;;  %v4965_v50 = vadd.f32 %v4964_v31, %v4812_v4  ;;  %v4817_v63 = vpop.f32.mrf.mxu0  ;;  %v16595_v5 = vpack.c.bf16 %v13956_v11, %v13934_v19  ;;  %v5401_v25 = vrot.slane %v14097_v16, 1  ;;  %v16599_v16 = vld [vmem:[#allocation146_spill] sm:$0xff] }
 0x383   : > { %v5533_v55 = vrot.slane %v14243_v49, 2  ;;  %v4818_v43 = vadd.f32 %v4817_v63, %v14155_v47  ;;  %v4970_v0 = vpop.f32.mrf.mxu1  ;;  %v5658_v59 = vpack.c.bf16 %v14243_v49, %v14220_v27  ;;  %v14257_v58 = vsel %vm711_vm0, %v5417_v44, %v5418_v3  ;;  %v16597_v47 = vld [vmem:[#allocation140_spill] sm:$0xff] }
 0x384   : > { %v5033_v62 = vmax.f32 %v4965_v50, 0.0  ;;  %v14251_v40 = vadd.f32 %v4966_v26, %v4814_v33  ;;  %v4819_v51 = vpop.f32.mrf.mxu0  ;;  %6890 = vmatmul.mubr.bf16.gmra.mxu0 %v16595_v5  ;;  %v14260_v4 = vsel %vm1098_vm1, %v5529_v24, %v5530_v2  ;;  %v4677_v31 = vadd.f32 %v16597_v47, %v12883_v9 }
 0x385   : > { %16596 = vst [vmem:[#allocation161_spill] sm:$0xff] %v14260_v4  ;;  %v4820_v50 = vadd.f32 %v4819_v51, %v14190_v54  ;;  %v4971_v26 = vadd.f32 %v4970_v0, %v4818_v43  ;;  %6824 = vmatprep.mubr.bf16.mxu1 %v5658_v59  ;;  %v4972_v33 = vpop.f32.mrf.mxu1  ;;  %v16598_v19 = vpack.c.bf16 %v14075_v41, %v14067_v39  ;;  %v16600_v54 = vld [vmem:[#allocation177_spill] sm:$0xff]  ;;  %v5400_v59 = vrot.slane %v14069_v56, 1 }
 0x386   : > { %v5423_v11 = vrot.slane %v5033_v62, 1  ;;  %v5535_v44 = vrot.slane %v5033_v62, 2  ;;  %v5034_v63 = vmax.f32 %v14251_v40, 0.0  ;;  %v4821_v24 = vpop.f32.mrf.mxu0  ;;  %6825 = vmatmul.mubr.bf16.gmra.mxu1 %v5657_v30  ;;  %v14271_v5 = vsel %vm1098_vm1, %v5532_v53, %v5533_v55  ;;  %v16602_v40 = vld [vmem:[#allocation29_spill] sm:$0xff] }
 0x387   : > { %6897 = vmatprep.mubr.bf16.mxu0 %v16598_v19  ;;  %v4679_v47 = vadd.f32 %v16599_v16, %v12876_v61  ;;  %v4681_v51 = vadd.f32 %v16600_v54, %v12883_v9  ;;  %v4822_v39 = vadd.f32 %v4821_v24, %v14199_v32  ;;  %v4974_v41 = vpop.f32.mrf.mxu1  ;;  %v5406_v62 = vsel %vm711_vm0, %v5401_v25, %v5405_v21 }
 0x388   : > { %v14280_v43 = vsel %vm711_vm0, %v5418_v3, %v5423_v11  ;;  %v14283_v0 = vsel %vm1098_vm1, %v5530_v2, %v5535_v44  ;;  %v5537_v30 = vrot.slane %v5034_v63, 2  ;;  %v4823_v53 = vpop.f32.mrf.mxu0  ;;  %v4685_v19 = vadd.f32 %v16602_v40, %v12876_v61  ;;  %v16603_v11 = vld [vmem:[#allocation44_spill] sm:$0xff] }
 0x389   : > { %16601 = vst [vmem:[#allocation165_spill] sm:$0xff] %v14283_v0  ;;  %v5035_v16 = vmax.f32 %v4971_v26, 0.0  ;;  %v4973_v54 = vadd.f32 %v4972_v33, %v4820_v50  ;;  %v4824_v56 = vadd.f32 %v4823_v53, %v14205_v60  ;;  %v4976_v15 = vpop.f32.mrf.mxu1  ;;  %v4975_v32 = vadd.f32 %v4974_v41, %v4822_v39 }
 0x38a   : > { %v5402_v24 = vsel %vm711_vm0, %v5400_v59, %v5401_v25  ;;  %v14293_v2 = vsel %vm1098_vm1, %v5533_v55, %v5537_v30  ;;  %v4687_v21 = vadd.f32 %v16603_v11, %v12883_v9  ;;  %v16604_v25 = vpack.c.bf16 %v14051_v46, %v14028_v35  ;;  %v16605_v35 = vld [vmem:[#allocation15_spill] sm:$0xff] }
 0x38b   : > { %v4827_v40 = vpop.f32.mrf.mxu0  ;;  %v4977_v26 = vadd.f32 %v4976_v15, %v4824_v56  ;;  %v5636_v50 = vpack.c.bf16 %v5406_v62, %v5402_v24  ;;  %v5037_v33 = vmax.f32 %v4975_v32, 0.0  ;;  %v5427_v41 = vrot.slane %v5035_v16, 1 }
 0x38c   : > { %v4828_v60 = vadd.f32 %v4827_v40, %v14235_v1  ;;  %v4980_v39 = vpop.f32.mrf.mxu1  ;;  %6898 = vmatmul.mubr.bf16.gmra.mxu0 %v16604_v25  ;;  %v5539_v30 = vrot.slane %v5035_v16, 2  ;;  %v5036_v53 = vmax.f32 %v4973_v54, 0.0  ;;  %v4689_v46 = vadd.f32 %v16605_v35, %v12876_v61 }
 0x38d   : > { %v5038_v11 = vmax.f32 %v4977_v26, 0.0  ;;  %v4829_v15 = vpop.f32.mrf.mxu0  ;;  %6905 = vmatprep.mubr.bf16.mxu0 %v5636_v50  ;;  %v5428_v62 = vrot.slane %v5037_v33, 1  ;;  %v5540_v56 = vrot.slane %v5037_v33, 2  ;;  %v5669_v1 = vpack.c.bf16 %v5037_v33, %v5035_v16 }
 0x38e   : > { %v4830_v32 = vadd.f32 %v4829_v15, %v4677_v31  ;;  %v4982_v24 = vpop.f32.mrf.mxu1  ;;  %v5420_v40 = vrot.slane %v14220_v27, 1  ;;  %v4981_v25 = vadd.f32 %v4980_v39, %v4828_v60  ;;  %v16606_v31 = vld [vmem:[#allocation181_spill] sm:$0xff]  ;;  %v5425_v50 = vrot.slane %v5034_v63, 1 }
 0x38f   : > { %v4831_v55 = vpop.f32.mrf.mxu0  ;;  %v5670_v3 = vpack.c.bf16 %v5038_v11, %v5036_v53  ;;  %v14310_v54 = vsel %vm711_vm0, %v5427_v41, %v5428_v62  ;;  %v14313_v26 = vsel %vm1098_vm1, %v5539_v30, %v5540_v56  ;;  %v4691_v16 = vadd.f32 %v16606_v31, %v12883_v9 }
 0x390   : > { %v4832_v59 = vadd.f32 %v4831_v55, %v4679_v47  ;;  %v4983_v42 = vadd.f32 %v4982_v24, %v4830_v32  ;;  %v4984_v44 = vpop.f32.mrf.mxu1  ;;  %v5039_v33 = vmax.f32 %v4981_v25, 0.0  ;;  %v16607_v27 = vrot.slane %v14243_v49, 1 }
 0x391   : > { %v4833_v61 = vpop.f32.mrf.mxu0  ;;  %6832 = vmatprep.mubr.bf16.mxu1 %v5670_v3  ;;  %v5431_v47 = vrot.slane %v5038_v11, 1  ;;  %v5430_v32 = vrot.slane %v5036_v53, 1  ;;  %v5543_v30 = vrot.slane %v5038_v11, 2  ;;  %v5542_v9 = vrot.slane %v5036_v53, 2 }
 0x392   : > { %v5422_v60 = vsel %vm711_vm0, %v5420_v40, %v16607_v27  ;;  %v5040_v39 = vmax.f32 %v4983_v42, 0.0  ;;  %v4834_v55 = vadd.f32 %v4833_v61, %v4681_v51  ;;  %v4985_v15 = vadd.f32 %v4984_v44, %v4832_v59  ;;  %v4986_v41 = vpop.f32.mrf.mxu1  ;;  %6833 = vmatmul.mubr.bf16.gmra.mxu1 %v5669_v1 }
 0x393   : > { %v5433_v24 = vrot.slane %v5039_v33, 1  ;;  %v5545_v35 = vrot.slane %v5039_v33, 2  ;;  %v4837_v4 = vpop.f32.mrf.mxu0  ;;  %v16608_v0 = vpack.c.bf16 %v14139_v45, %v14108_v7  ;;  %v16609_v53 = vpack.c.bf16 %v14223_v29, %v14218_v37 }
 0x394   : > { %v5435_v63 = vrot.slane %v5040_v39, 1  ;;  %v5547_v25 = vrot.slane %v5040_v39, 2  ;;  %v4838_v31 = vadd.f32 %v4837_v4, %v4685_v19  ;;  %v4990_v3 = vpop.f32.mrf.mxu1  ;;  %v5041_v44 = vmax.f32 %v4985_v15, 0.0 }
 0x395   : > { %6906 = vmatmul.mubr.bf16.gmra.mxu0 %v16608_v0  ;;  %v14324_v42 = vsel %vm711_vm0, %v5428_v62, %v5433_v24  ;;  %v14327_v51 = vsel %vm1098_vm1, %v5540_v56, %v5545_v35  ;;  %v4987_v59 = vadd.f32 %v4986_v41, %v4834_v55  ;;  %v4839_v11 = vpop.f32.mrf.mxu0  ;;  %v16610_v40 = vmov %v16607_v27 }
 0x396   : > { %6913 = vmatprep.mubr.bf16.mxu0 %v16609_v53  ;;  %v4840_v1 = vadd.f32 %v4839_v11, %v4687_v21  ;;  %v4991_v4 = vadd.f32 %v4990_v3, %v4838_v31  ;;  %v4992_v19 = vpop.f32.mrf.mxu1  ;;  %v5426_v7 = vsel %vm711_vm0, %v16610_v40, %v5425_v50  ;;  %v5432_v45 = vsel %vm711_vm0, %v5430_v32, %v5431_v47 }
 0x397   : > { %v4841_v0 = vpop.f32.mrf.mxu0  ;;  %v5436_v62 = vsel %vm711_vm0, %v5431_v47, %v5435_v63  ;;  %v5671_v56 = vpack.c.bf16 %v14324_v42, %v14310_v54  ;;  %v14340_v33 = vsel %vm1098_vm1, %v5542_v9, %v5543_v30  ;;  %v14343_v37 = vsel %vm1098_vm1, %v5543_v30, %v5547_v25 }
 0x398   : > { %v5043_v29 = vmax.f32 %v4991_v4, 0.0  ;;  %v4842_v21 = vadd.f32 %v4841_v0, %v4689_v46  ;;  %v4993_v61 = vadd.f32 %v4992_v19, %v4840_v1  ;;  %v4994_v49 = vpop.f32.mrf.mxu1  ;;  %v5672_v27 = vpack.c.bf16 %v5436_v62, %v5432_v45 }
 0x399   : > { %v5437_v50 = vrot.slane %v5041_v44, 1  ;;  %v14345_v39 = vmax.f32 %v4987_v59, 0.0  ;;  %v4843_v55 = vpop.f32.mrf.mxu0  ;;  %v5674_v47 = vpack.c.bf16 %v14343_v37, %v14340_v33  ;;  %v5673_v15 = vpack.c.bf16 %v14327_v51, %v14313_v26 }
 0x39a   : > { %v5438_v41 = vrot.slane %v5043_v29, 1  ;;  %v5550_v32 = vrot.slane %v5043_v29, 2  ;;  %v5681_v24 = vpack.c.bf16 %v5043_v29, %v5041_v44  ;;  %v14351_v30 = vmax.f32 %v4993_v61, 0.0  ;;  %v4996_v35 = vpop.f32.mrf.mxu1 }
 0x39b   : > { %v5549_v46 = vrot.slane %v5041_v44, 2  ;;  %v4844_v9 = vadd.f32 %v4843_v55, %v4691_v16  ;;  %v4995_v63 = vadd.f32 %v4994_v49, %v4842_v21  ;;  %v5660_v25 = vpack.c.bf16 %v5426_v7, %v5422_v60  ;;  %v7353_v31 = vpop.f32.mrf.mxu0  ;;  %v16613_v7 = vld [vmem:[#allocation76_spill] sm:$0xff] }
 0x39c   : > { %v5682_v3 = vpack.c.bf16 %v14351_v30, %v14345_v39  ;;  %v16611_v59 = vpack.c.bf16 %v14208_v20, %v14183_v17  ;;  %v14359_v11 = vsel %vm711_vm0, %v5437_v50, %v5438_v41  ;;  %v16612_v20 = vld [vmem:[#allocation156_spill] sm:$0xff]  ;;  %v14380_v50 = vld [vmem:[%s14778_s6] ss:$0 sm:$0xff] }
 0x39d   : > { %v5045_v53 = vmax.f32 %v4995_v63, 0.0  ;;  %v14361_v1 = vadd.f32 %v4996_v35, %v4844_v9  ;;  %v7354_v4 = vpop.f32.mrf.mxu0  ;;  %v14364_v16 = vsel %vm1098_vm1, %v5549_v46, %v5550_v32  ;;  %v16614_v45 = vpack.c.bf16 %v16612_v20, %v16613_v7 }
 0x39e   : > { %6914 = vmatmul.mubr.bf16.gmra.mxu0 %v16611_v59  ;;  %6840 = vmatprep.mubr.bf16.mxu1 %v5682_v3  ;;  %v7355_v60 = vadd.f32 %v7354_v4, %v7353_v31  ;;  %v5441_v9 = vrot.slane %v14351_v30, 1  ;;  %v16616_v3 = vld [vmem:[#allocation87_spill] sm:$0xff]  ;;  %v16617_v59 = vld [vmem:[#allocation189_spill] sm:$0xff] }
 0x39f   : > { %6921 = vmatprep.mubr.bf16.mxu0 %v5660_v25  ;;  %v5443_v44 = vrot.slane %v5045_v53, 1  ;;  %v5555_v19 = vrot.slane %v5045_v53, 2  ;;  %6841 = vmatmul.mubr.bf16.gmra.mxu1 %v5681_v24  ;;  %v7356_v40 = vpop.f32.mrf.mxu0  ;;  %v5046_v17 = vmax.f32 %v14361_v1, 0.0 }
 0x3a0   : > { %6978 = vmatprep.mubr.bf16.mxu1 %v16614_v45  ;;  %v6496_v63 = vadd.f32 %v7355_v60, %v14380_v50 }
 0x3a1   : > { %v5444_v0 = vsel %vm711_vm0, %v5438_v41, %v5443_v44  ;;  %v14372_v62 = vsel %vm1098_vm1, %v5550_v32, %v5555_v19  ;;  %v7357_v29 = vpop.f32.mrf.mxu0  ;;  %v5445_v41 = vrot.slane %v5046_v17, 1  ;;  %v16615_v32 = vpack.c.bf16 %v14280_v43, %v14257_v58 }
 0x3a2   : > { %v7358_v21 = vadd.f32 %v7357_v29, %v7356_v40  ;;  %v5683_v61 = vpack.c.bf16 %v5444_v0, %v14359_v11  ;;  %v5685_v49 = vpack.c.bf16 %v14372_v62, %v14364_v16  ;;  %v16618_v11 = vpack.c.bf16 %v16616_v3, %v16617_v59 }
 0x3a3   : > { %v7417_v55 = vpop.f32.mrf.mxu1  ;;  %v7359_v24 = vpop.f32.mrf.mxu0  ;;  %v5440_v44 = vrot.slane %v14345_v39, 1  ;;  %v16619_v58 = vpack.c.bf16 %v13983_v34, %v13952_v14 }
 0x3a4   : > { %v6499_v40 = vadd.f32 %v7358_v21, %v14380_v50  ;;  %v16620_v21 = vpack.c.bf16 %v13959_v18, %v13986_v23  ;;  %v16622_v23 = vpack.c.bf16 %v14054_v36, %v14034_v57  ;;  %v16624_v57 = vpack.c.bf16 %v14142_v22, %v14111_v6 }
 0x3a5   : > { %v7418_v35 = vpop.f32.mrf.mxu1  ;;  %v7360_v46 = vpop.f32.mrf.mxu0  ;;  %v5442_v7 = vsel %vm711_vm0, %v5440_v44, %v5441_v9  ;;  %v16627_v22 = vpack.c.bf16 %v14293_v2, %v14271_v5 }
 0x3a6   : > { %6922 = vmatmul.mubr.bf16.gmra.mxu0 %v16615_v32  ;;  %v7419_v25 = vadd.f32 %v7418_v35, %v7417_v55  ;;  %v7361_v31 = vadd.f32 %v7360_v46, %v7359_v24  ;;  %v16621_v35 = vpack.c.bf16 %v14078_v13, %v14047_v8  ;;  %v16623_v13 = vpack.c.bf16 %v14160_v48, %v14123_v28 }
 0x3a7   : > { %6929 = vmatprep.mubr.bf16.mxu0 %v5672_v27  ;;  %6979 = vmatmul.mubr.bf16.vlgmr.msra.gmra.mxu1 %v16618_v11  ;;  %v7420_v53 = vpop.f32.mrf.mxu1  ;;  %v7362_v4 = vpop.f32.mrf.mxu0  ;;  %v5446_v27 = vsel %vm711_vm0, %v5441_v9, %v5445_v41  ;;  %v16625_v28 = vpack.c.bf16 %v14228_v38, %v14194_v52 }
 0x3a8   : > { %6986 = vmatprep.mubr.bf16.mxu1 %v16619_v58  ;;  %v14396_v43 = vadd.f32 %v7419_v25, %v6496_v63  ;;  %v5684_v0 = vpack.c.bf16 %v5446_v27, %v5442_v7  ;;  %v6504_v55 = vadd.f32 %v7361_v31, %v14380_v50 }
 0x3a9   : > { %v7421_v19 = vpop.f32.mrf.mxu1  ;;  %v7363_v60 = vpop.f32.mrf.mxu0 }
 0x3aa   : > { %v7422_v20 = vadd.f32 %v7421_v19, %v7420_v53  ;;  %v7364_v45 = vadd.f32 %v7363_v60, %v7362_v4 }
 0x3ab   : > { %v7423_v29 = vpop.f32.mrf.mxu1 }
 0x3ac   : > { %v14404_v14 = vadd.f32 %v7422_v20, %v6499_v40  ;;  %v6507_v9 = vadd.f32 %v7364_v45, %v14380_v50 }
 0x3ad   : > { %v7424_v34 = vpop.f32.mrf.mxu1 }
 0x3ae   : > { %6930 = vmatmul.mubr.bf16.gmra.mxu0 %v5671_v56  ;;  %v7425_v24 = vadd.f32 %v7424_v34, %v7423_v29  ;;  %v16626_v29 = vpack.c.bf16 %v14211_v10, %v14186_v12 }
 0x3af   : > { %6937 = vmatprep.mubr.bf16.mxu0 %v5684_v0  ;;  %v7365_v41 = vpop.f32.mrf.mxu0  ;;  %6987 = vmatmul.mubr.bf16.gmra.mxu1 %v16620_v21  ;;  %v7426_v32 = vpop.f32.mrf.mxu1 }
 0x3b0   : > { %6994 = vmatprep.mubr.bf16.mxu1 %v16621_v35  ;;  %v14413_v46 = vadd.f32 %v7425_v24, %v6504_v55 }
 0x3b1   : > { %v7366_v54 = vpop.f32.mrf.mxu0  ;;  %v7427_v42 = vpop.f32.mrf.mxu1 }
 0x3b2   : > { %v7367_v56 = vadd.f32 %v7366_v54, %v7365_v41  ;;  %v7428_v63 = vadd.f32 %v7427_v42, %v7426_v32  ;;  %v5557_v54 = vrot.slane %v5046_v17, 2  ;;  %v16628_v42 = vld [vmem:[#allocation165_spill] sm:$0xff] }
 0x3b3   : > { %v7368_v25 = vpop.f32.mrf.mxu0 }
 0x3b4   : > { %v14416_v31 = vadd.f32 %v7428_v63, %v6507_v9  ;;  %v6512_v11 = vadd.f32 %v7367_v56, %v14380_v50  ;;  %v16629_v56 = vld [vmem:[#allocation161_spill] sm:$0xff]  ;;  %v5553_v9 = vrot.slane %v14351_v30, 2 }
 0x3b5   : > { %v7369_v3 = vpop.f32.mrf.mxu0  ;;  %v16630_v5 = vpack.c.bf16 %v16628_v42, %v16629_v56 }
 0x3b6   : > { %6938 = vmatmul.mubr.bf16.gmra.mxu0 %v5683_v61  ;;  %v7370_v18 = vadd.f32 %v7369_v3, %v7368_v25  ;;  %v5552_v25 = vrot.slane %v14345_v39, 2  ;;  %v5558_v3 = vsel %vm1098_vm1, %v5553_v9, %v5557_v54 }
 0x3b7   : > { %6995 = vmatmul.mubr.bf16.gmra.mxu1 %v16622_v23 }
 0x3b8   : > { %v7429_v8 = vpop.f32.mrf.mxu1  ;;  %7002 = vmatprep.mubr.bf16.mxu1 %v16623_v13  ;;  %v6515_v27 = vadd.f32 %v7370_v18, %v14380_v50  ;;  %v5554_v1 = vsel %vm1098_vm1, %v5552_v25, %v5553_v9 }
 0x3b9   : > { %v5686_v23 = vpack.c.bf16 %v5558_v3, %v5554_v1 }
 0x3ba   : > { %v7430_v59 = vpop.f32.mrf.mxu1 }
 0x3bb   : > { %v7431_v53 = vadd.f32 %v7430_v59, %v7429_v8 }
 0x3bc   : > { %v7432_v4 = vpop.f32.mrf.mxu1  ;;  %v7371_v61 = vpop.f32.mrf.mxu0 }
 0x3bd   : > { %v14425_v44 = vadd.f32 %v7431_v53, %v6512_v11 }
 0x3be   : > { %v7433_v58 = vpop.f32.mrf.mxu1  ;;  %v7372_v60 = vpop.f32.mrf.mxu0 }
 0x3bf   : > { %v7434_v19 = vadd.f32 %v7433_v58, %v7432_v4  ;;  %7003 = vmatmul.mubr.bf16.gmra.mxu1 %v16624_v57  ;;  %v7373_v36 = vadd.f32 %v7372_v60, %v7371_v61 }
 0x3c0   : > { %7010 = vmatprep.mubr.bf16.mxu1 %v16625_v28  ;;  %v7374_v40 = vpop.f32.mrf.mxu0 }
 0x3c1   : > { %v14434_v48 = vadd.f32 %v7434_v19, %v6515_v27  ;;  %v6520_v34 = vadd.f32 %v7373_v36, %v14380_v50 }
 0x3c2   : > { %v7375_v20 = vpop.f32.mrf.mxu0 }
 0x3c3   : > { %v7376_v7 = vadd.f32 %v7375_v20, %v7374_v40 }
 0x3c4   : > { %v7435_v45 = vpop.f32.mrf.mxu1 }
 0x3c5   : > { %v6523_v41 = vadd.f32 %v7376_v7, %v14380_v50 }
 0x3c6   : > { %v7436_v0 = vpop.f32.mrf.mxu1 }
 0x3c7   : > { %7011 = vmatmul.mubr.bf16.gmra.mxu1 %v16626_v29  ;;  %v7437_v6 = vadd.f32 %v7436_v0, %v7435_v45 }
 0x3c8   : > { %7018 = vmatprep.mubr.bf16.mxu1 %v16627_v22  ;;  %v7438_v52 = vpop.f32.mrf.mxu1  ;;  %v7377_v55 = vpop.f32.mrf.mxu0 }
 0x3c9   : > { %v14443_v38 = vadd.f32 %v7437_v6, %v6520_v34 }
 0x3ca   : > { %v7439_v24 = vpop.f32.mrf.mxu1  ;;  %v7378_v32 = vpop.f32.mrf.mxu0 }
 0x3cb   : > { %v7440_v21 = vadd.f32 %v7439_v24, %v7438_v52  ;;  %v7379_v12 = vadd.f32 %v7378_v32, %v7377_v55 }
 0x3cc   : > { %v7380_v10 = vpop.f32.mrf.mxu0 }
 0x3cd   : > { %v14446_v35 = vadd.f32 %v7440_v21, %v6523_v41  ;;  %v6528_v8 = vadd.f32 %v7379_v12, %v14380_v50 }
 0x3ce   : > { %v7381_v2 = vpop.f32.mrf.mxu0 }
 0x3cf   : > { %7019 = vmatmul.mubr.bf16.gmra.mxu1 %v16630_v5  ;;  %v7382_v63 = vadd.f32 %v7381_v2, %v7380_v10 }
 0x3d0   : > { %7026 = vmatprep.mubr.bf16.mxu1 %v5674_v47  ;;  %v7441_v18 = vpop.f32.mrf.mxu1 }
 0x3d1   : > { %v6531_v30 = vadd.f32 %v7382_v63, %v14380_v50 }
 0x3d2   : > { %v7442_v17 = vpop.f32.mrf.mxu1 }
 0x3d3   : > { %v7443_v13 = vadd.f32 %v7442_v17, %v7441_v18 }
 0x3d4   : > { %v7444_v33 = vpop.f32.mrf.mxu1  ;;  %v7383_v47 = vpop.f32.mrf.mxu0 }
 0x3d5   : > { %v14464_v37 = vadd.f32 %v7443_v13, %v6528_v8 }
 0x3d6   : > { %v7445_v39 = vpop.f32.mrf.mxu1  ;;  %v7384_v11 = vpop.f32.mrf.mxu0 }
 0x3d7   : > { %7027 = vmatmul.mubr.bf16.gmra.mxu1 %v5673_v15  ;;  %16631 = vst [vmem:[#allocation183_spill] sm:$0xff] %v14464_v37  ;;  %v7446_v59 = vadd.f32 %v7445_v39, %v7444_v33  ;;  %v7385_v53 = vadd.f32 %v7384_v11, %v7383_v47 }
 0x3d8   : > { %7034 = vmatprep.mubr.bf16.mxu1 %v5686_v23  ;;  %v7386_v61 = vpop.f32.mrf.mxu0 }
 0x3d9   : > { %v14467_v4 = vadd.f32 %v7446_v59, %v6531_v30  ;;  %v6536_v27 = vadd.f32 %v7385_v53, %v14380_v50 }
 0x3da   : > { %v7387_v58 = vpop.f32.mrf.mxu0 }
 0x3db   : > { %16632 = vst [vmem:[#allocation187_spill] sm:$0xff] %v14467_v4  ;;  %v7388_v26 = vadd.f32 %v7387_v58, %v7386_v61  ;;  %v7447_v51 = vpop.f32.mrf.mxu1 }
 0x3dd   : > { %v7448_v15 = vpop.f32.mrf.mxu1  ;;  %v6539_v40 = vadd.f32 %v7388_v26, %v14380_v50 }
 0x3de   : > { %v7449_v19 = vadd.f32 %v7448_v15, %v7447_v51 }
 0x3df   : > { %7035 = vmatmul.mubr.bf16.gmra.mxu1 %v5685_v49  ;;  %v7450_v60 = vpop.f32.mrf.mxu1 }
 0x3e0   : > { %v14473_v57 = vadd.f32 %v7449_v19, %v6536_v27  ;;  %v7389_v36 = vpop.f32.mrf.mxu0 }
 0x3e1   : > { %v7451_v28 = vpop.f32.mrf.mxu1 }
 0x3e2   : > { %16633 = vst [vmem:[#allocation30_spill] sm:$0xff] %v14473_v57  ;;  %v7452_v20 = vadd.f32 %v7451_v28, %v7450_v60  ;;  %v7390_v7 = vpop.f32.mrf.mxu0 }
 0x3e3   : > { %v7391_v0 = vadd.f32 %v7390_v7, %v7389_v36 }
 0x3e4   : > { %v14476_v45 = vadd.f32 %v7452_v20, %v6539_v40  ;;  %v7392_v16 = vpop.f32.mrf.mxu0 }
 0x3e5   : > { %v6544_v6 = vadd.f32 %v7391_v0, %v14380_v50 }
 0x3e6   : > { %16634 = vst [vmem:[#allocation190_spill] sm:$0xff] %v14476_v45  ;;  %v7393_v62 = vpop.f32.mrf.mxu0 }
 0x3e7   : > { %v7394_v49 = vadd.f32 %v7393_v62, %v7392_v16  ;;  %v7453_v29 = vpop.f32.mrf.mxu1 }
 0x3e9   : > { %v7454_v34 = vpop.f32.mrf.mxu1  ;;  %v6547_v21 = vadd.f32 %v7394_v49, %v14380_v50 }
 0x3ea   : > { %v7455_v22 = vadd.f32 %v7454_v34, %v7453_v29 }
 0x3eb   : > { %v7456_v52 = vpop.f32.mrf.mxu1 }
 0x3ec   : > { %v14479_v55 = vadd.f32 %v7455_v22, %v6544_v6  ;;  %v7395_v24 = vpop.f32.mrf.mxu0 }
 0x3ed   : > { %v7457_v41 = vpop.f32.mrf.mxu1 }
 0x3ee   : > { %16635 = vst [vmem:[#allocation33_spill] sm:$0xff] %v14479_v55  ;;  %v7458_v32 = vadd.f32 %v7457_v41, %v7456_v52  ;;  %v7396_v12 = vpop.f32.mrf.mxu0 }
 0x3ef   : > { %v7397_v54 = vadd.f32 %v7396_v12, %v7395_v24 }
 0x3f0   : > { %v14482_v10 = vadd.f32 %v7458_v32, %v6547_v21  ;;  %v7398_v42 = vpop.f32.mrf.mxu0 }
 0x3f1   : > { %v6552_v25 = vadd.f32 %v7397_v54, %v14380_v50 }
 0x3f2   : > { %16636 = vst [vmem:[#allocation194_spill] sm:$0xff] %v14482_v10  ;;  %v7399_v56 = vpop.f32.mrf.mxu0 }
 0x3f3   : > { %v7459_v5 = vpop.f32.mrf.mxu1  ;;  %v7400_v2 = vadd.f32 %v7399_v56, %v7398_v42 }
 0x3f4   : > { %v14484_v9 = vpop.f32.mrf.mxu0 }
 0x3f5   : > { %v7460_v63 = vpop.f32.mrf.mxu1  ;;  %v6555_v13 = vadd.f32 %v7400_v2, %v14380_v50 }
 0x3f6   : > { %v7461_v3 = vadd.f32 %v7460_v63, %v7459_v5  ;;  %v14487_v18 = vpop.f32.mrf.mxu0 }
 0x3f7   : > { %v7462_v1 = vpop.f32.mrf.mxu1 }
 0x3f8   : > { %v14489_v17 = vadd.f32 %v7461_v3, %v6552_v25  ;;  %v14491_v23 = vpop.f32.mrf.mxu0 }
 0x3f9   : > { %v7463_v8 = vpop.f32.mrf.mxu1 }
 0x3fa   : > { %16637 = vst [vmem:[#allocation188_spill] sm:$0xff] %v14489_v17  ;;  %v7464_v33 = vadd.f32 %v7463_v8, %v7462_v1  ;;  %v14494_v47 = vpop.f32.mrf.mxu0 }
 0x3fc   : > { %v14496_v39 = vadd.f32 %v7464_v33, %v6555_v13 }
 0x3fe   : > { %16638 = vst [vmem:[#allocation193_spill] sm:$0xff] %v14496_v39 }
 0x400   : > { %v14498_v30 = vpop.f32.mrf.mxu0 }
 0x402   : > { %v14500_v59 = vpop.f32.mrf.mxu0 }
 0x404   : > { %v14502_v11 = vpop.f32.mrf.mxu0 }
 0x405   : > { %v14504_v53 = vpop.f32.mrf.mxu1 }
 0x406   : > { %v14506_v61 = vpop.f32.mrf.mxu0 }
 0x407   : > { %v14508_v58 = vpop.f32.mrf.mxu1 }
 0x409   : > { %v14510_v26 = vpop.f32.mrf.mxu0  ;;  %v14514_v51 = vpop.f32.mrf.mxu1 }
 0x40b   : > { %v14512_v50 = vpop.f32.mrf.mxu0  ;;  %v14520_v19 = vpop.f32.mrf.mxu1 }
 0x40d   : > { %v14516_v15 = vpop.f32.mrf.mxu0 }
 0x40f   : > { %v14518_v27 = vpop.f32.mrf.mxu0 }
 0x411   : > { %v14522_v60 = vpop.f32.mrf.mxu0  ;;  %v14524_v36 = vpop.f32.mrf.mxu1 }
 0x413   : > { %v14526_v28 = vpop.f32.mrf.mxu0  ;;  %v14528_v40 = vpop.f32.mrf.mxu1 }
 0x415   : > { %v14530_v20 = vpop.f32.mrf.mxu0  ;;  %v14534_v0 = vpop.f32.mrf.mxu1 }
 0x417   : > { %v14532_v7 = vpop.f32.mrf.mxu0  ;;  %v14540_v49 = vpop.f32.mrf.mxu1 }
 0x419   : > { %v14536_v16 = vpop.f32.mrf.mxu0 }
 0x41b   : > { %v14538_v62 = vpop.f32.mrf.mxu0 }
 0x41c   : > { %16639 = vst [vmem:[#allocation19_spill] sm:$0xff] %v14538_v62  ;;  %v14544_v34 = vpop.f32.mrf.mxu1 }
 0x41d   : > { %v14542_v29 = vpop.f32.mrf.mxu0 }
 0x41e   : > { %16640 = vst [vmem:[#allocation173_spill] sm:$0xff] %v14542_v29  ;;  %v14548_v22 = vpop.f32.mrf.mxu1 }
 0x41f   : > { %v14546_v6 = vpop.f32.mrf.mxu0 }
 0x420   : > { %16641 = vst [vmem:[#allocation175_spill] sm:$0xff] %v14546_v6  ;;  %v14554_v41 = vpop.f32.mrf.mxu1 }
 0x421   : > { %v14550_v52 = vpop.f32.mrf.mxu0 }
 0x422   : > { %16642 = vst [vmem:[#allocation179_spill] sm:$0xff] %v14550_v52  ;;  %v14560_v12 = vpop.f32.mrf.mxu1 }
 0x423   : > { %v14552_v24 = vpop.f32.mrf.mxu0 }
 0x424   : > { %16643 = vst [vmem:[#allocation180_spill] sm:$0xff] %v14552_v24 }
 0x425   : > { %v14556_v21 = vpop.f32.mrf.mxu0 }
 0x426   : > { %16644 = vst [vmem:[#allocation197_spill] sm:$0xff] %v14556_v21 }
 0x427   : > { %v14558_v32 = vpop.f32.mrf.mxu0 }
 0x428   : > { %16645 = vst [vmem:[#allocation192_spill] sm:$0xff] %v14558_v32 }
 0x429   : > { %v14562_v54 = vpop.f32.mrf.mxu0 }
 0x42a   : > { %16646 = vst [vmem:[#allocation195_spill] sm:$0xff] %v14562_v54  ;;  %v14564_v42 = vpop.f32.mrf.mxu1 }
 0x42b   : > { %v14566_v56 = vpop.f32.mrf.mxu0 }
 0x42c   : > { %16647 = vst [vmem:[#allocation198_spill] sm:$0xff] %v14566_v56  ;;  %v14568_v5 = vpop.f32.mrf.mxu1 }
 0x42d   : > { %v14570_v2 = vpop.f32.mrf.mxu0 }
 0x42e   : > { %16648 = vst [vmem:[#allocation97_spill] sm:$0xff] %v14570_v2  ;;  %v14574_v25 = vpop.f32.mrf.mxu1 }
 0x42f   : > { %v14572_v63 = vpop.f32.mrf.mxu0 }
 0x430   : > { %16649 = vst [vmem:[#allocation184_spill] sm:$0xff] %v14572_v63  ;;  %v14580_v8 = vpop.f32.mrf.mxu1 }
 0x431   : > { %v14576_v3 = vpop.f32.mrf.mxu0 }
 0x432   : > { %16650 = vst [vmem:[#allocation185_spill] sm:$0xff] %v14576_v3 }
 0x433   : > { %v14578_v1 = vpop.f32.mrf.mxu0 }
 0x434   : > { %16651 = vst [vmem:[#allocation24_spill] sm:$0xff] %v14578_v1 }
 0x435   : > { %v14582_v13 = vpop.f32.mrf.mxu0 }
 0x436   : > { %16652 = vst [vmem:[#allocation101_spill] sm:$0xff] %v14582_v13 }
 0x437   : > { %v14586_v39 = vpop.f32.mrf.mxu0 }
 0x438   : > { %v14584_v33 = vpop.f32.mrf.mxu1  ;;  %16654 = vst [vmem:[#allocation112_spill] sm:$0xff] %v14586_v39 }
 0x439   : > { %16653 = vst [vmem:[#allocation4_spill] sm:$0xff] %v14584_v33  ;;  %v7483_v33 = vadd.f32 %v14487_v18, %v14484_v9 }
 0x43a   : > { %v14588_v17 = vpop.f32.mrf.mxu1 }
 0x43b   : > { %16655 = vst [vmem:[#allocation93_spill] sm:$0xff] %v14588_v17 }
 0x43c   : > { %v7609_v10 = vpop.f32.mrf.mxu0  ;;  %v14590_v55 = vpop.f32.mrf.mxu1 }
 0x43d   : > { %16656 = vst [vmem:[#allocation199_spill] sm:$0xff] %v14590_v55 }
 0x43e   : > { %v7610_v2 = vpop.f32.mrf.mxu0  ;;  %v14592_v54 = vpop.f32.mrf.mxu1 }
 0x43f   : > { %16657 = vst [vmem:[#allocation99_spill] sm:$0xff] %v14592_v54 }
 0x440   : > { %v7612_v63 = vpop.f32.mrf.mxu0 }
 0x442   : > { %v7613_v56 = vpop.f32.mrf.mxu0 }
 0x444   : > { %v7615_v3 = vpop.f32.mrf.mxu0 }
 0x446   : > { %v14594_v1 = vpop.f32.mrf.mxu1  ;;  %v7616_v45 = vpop.f32.mrf.mxu0 }
 0x447   : > { %16658 = vst [vmem:[#allocation67_spill] sm:$0xff] %v14594_v1 }
 0x448   : > { %v14596_v32 = vpop.f32.mrf.mxu1  ;;  %v14598_v13 = vpop.f32.mrf.mxu0 }
 0x449   : > { %16659 = vst [vmem:[#allocation114_spill] sm:$0xff] %v14596_v32 }
 0x44a   : > { %v7619_v21 = vpop.f32.mrf.mxu0  ;;  %v14600_v39 = vpop.f32.mrf.mxu1 }
 0x44b   : > { %16660 = vst [vmem:[#allocation100_spill] sm:$0xff] %v14600_v39 }
 0x44c   : > { %v14602_v57 = vpop.f32.mrf.mxu0  ;;  %v14606_v52 = vpop.f32.mrf.mxu1 }
 0x44d   : > { %16661 = vst [vmem:[#allocation116_spill] sm:$0xff] %v14606_v52 }
 0x44e   : > { %v14604_v24 = vpop.f32.mrf.mxu0 }
 0x450   : > { %v14608_v4 = vpop.f32.mrf.mxu0 }
 0x452   : > { %v14610_v54 = vpop.f32.mrf.mxu1  ;;  %v14612_v1 = vpop.f32.mrf.mxu0 }
 0x453   : > { %16662 = vst [vmem:[#allocation26_spill] sm:$0xff] %v14610_v54 }
 0x454   : > { %v14616_v32 = vpop.f32.mrf.mxu1 }
 0x455   : > { %v14614_v55 = vpop.f32.mrf.mxu0  ;;  %16663 = vst [vmem:[#allocation17_spill] sm:$0xff] %v14616_v32 }
 0x456   : > { %v14620_v29 = vpop.f32.mrf.mxu1 }
 0x457   : > { %v14618_v6 = vpop.f32.mrf.mxu0  ;;  %16664 = vst [vmem:[#allocation113_spill] sm:$0xff] %v14620_v29  ;;  %v7547_v29 = vadd.f32 %v14508_v58, %v14504_v53 }
 0x458   : > { %v14624_v37 = vpop.f32.mrf.mxu1 }
 0x459   : > { %v14622_v39 = vpop.f32.mrf.mxu0  ;;  %16666 = vst [vmem:[#allocation115_spill] sm:$0xff] %v14624_v37 }
 0x45a   : > { %16665 = vst [vmem:[#allocation106_spill] sm:$0xff] %v14622_v39  ;;  %v7611_v39 = vadd.f32 %v7610_v2, %v7609_v10 }
 0x45b   : > { %v14628_v52 = vpop.f32.mrf.mxu0 }
 0x45c   : > { %16668 = vst [vmem:[#allocation52_spill] sm:$0xff] %v14628_v52  ;;  %v7486_v52 = vadd.f32 %v14494_v47, %v14491_v23 }
 0x45e   : > { %v14638_v62 = vpop.f32.mrf.mxu0  ;;  %v6693_v58 = vadd.f32 %v7486_v52, %v14404_v14 }
 0x45f   : > { %v14626_v17 = vpop.f32.mrf.mxu1  ;;  %16671 = vst [vmem:[#allocation139_spill] sm:$0xff] %v14638_v62  ;;  %v7489_v62 = vadd.f32 %v14500_v59, %v14498_v30  ;;  %v7492_v30 = vadd.f32 %v14506_v61, %v14502_v11  ;;  %v7617_v59 = vadd.f32 %v7616_v45, %v7615_v3  ;;  %v7620_v45 = vadd.f32 %v7619_v21, %v14598_v13 }
 0x460   : > { %16667 = vst [vmem:[#allocation126_spill] sm:$0xff] %v14626_v17  ;;  %v6690_v17 = vadd.f32 %v7483_v33, %v14396_v43  ;;  %v7614_v43 = vadd.f32 %v7613_v56, %v7612_v63  ;;  %v7623_v21 = vadd.f32 %v14604_v24, %v14602_v57  ;;  %v7626_v57 = vadd.f32 %v14612_v1, %v14608_v4 }
 0x461   : > { %v14632_v54 = vpop.f32.mrf.mxu1  ;;  %v6701_v61 = vadd.f32 %v7492_v30, %v14416_v31  ;;  %v7629_v4 = vadd.f32 %v14618_v6, %v14614_v55 }
 0x462   : > { %16669 = vst [vmem:[#allocation13_spill] sm:$0xff] %v14632_v54  ;;  %v14647_v54 = vpop.f32.mrf.mxu0  ;;  %v6787_v18 = vadd.f32 %v7547_v29, %v6690_v17  ;;  %v7553_v17 = vadd.f32 %v14528_v40, %v14524_v36  ;;  %v7495_v40 = vadd.f32 %v14512_v50, %v14510_v26  ;;  %v7498_v26 = vadd.f32 %v14518_v27, %v14516_v15 }
 0x463   : > { %v14636_v32 = vpop.f32.mrf.mxu1  ;;  %v7501_v15 = vadd.f32 %v14526_v28, %v14522_v60  ;;  %v7504_v60 = vadd.f32 %v14532_v7, %v14530_v20  ;;  %v16673_v20 = vld [vmem:[#allocation19_spill] sm:$0xff]  ;;  %v16675_v55 = vld [vmem:[#allocation52_spill] sm:$0xff] }
 0x464   : > { %16670 = vst [vmem:[#allocation129_spill] sm:$0xff] %v14636_v32  ;;  %v7550_v32 = vadd.f32 %v14520_v19, %v14514_v51  ;;  %v14654_v23 = vpop.f32.mrf.mxu0  ;;  %v6698_v51 = vadd.f32 %v7489_v62, %v14413_v46  ;;  %v7556_v46 = vadd.f32 %v14540_v49, %v14534_v0  ;;  %v7559_v0 = vadd.f32 %v14548_v22, %v14544_v34 }
 0x465   : > { %v14642_v37 = vpop.f32.mrf.mxu1  ;;  %v6706_v31 = vadd.f32 %v7495_v40, %v14425_v44  ;;  %v7562_v34 = vadd.f32 %v14560_v12, %v14554_v41  ;;  %v6709_v22 = vadd.f32 %v7498_v26, %v14434_v48  ;;  %v7565_v41 = vadd.f32 %v14568_v5, %v14564_v42 }
 0x466   : > { %16672 = vst [vmem:[#allocation16_spill] sm:$0xff] %v14642_v37  ;;  %v6884_v37 = vadd.f32 %v7611_v39, %v6787_v18  ;;  %v6790_v47 = vadd.f32 %v7550_v32, %v6693_v58  ;;  %v14666_v32 = vpop.f32.mrf.mxu0  ;;  %v6798_v18 = vadd.f32 %v7556_v46, %v6701_v61  ;;  %v6714_v12 = vadd.f32 %v7501_v15, %v14443_v38  ;;  %v16674_v46 = vld [vmem:[#allocation106_spill] sm:$0xff] }
 0x467   : > { %v7673_v9 = vpop.f32.mrf.mxu1  ;;  %v6806_v30 = vadd.f32 %v7562_v34, %v6709_v22  ;;  %v7568_v42 = vadd.f32 %v14580_v8, %v14574_v25  ;;  %v6717_v38 = vadd.f32 %v7504_v60, %v14446_v35  ;;  %v7507_v7 = vadd.f32 %v16673_v20, %v14536_v16  ;;  %v16677_v25 = vld [vmem:[#allocation93_spill] sm:$0xff]  ;;  %v16678_v35 = vld [vmem:[#allocation183_spill] sm:$0xff] }
 0x468   : > { %v6887_v39 = vadd.f32 %v7614_v43, %v6790_v47  ;;  %v14675_v3 = vpop.f32.mrf.mxu0  ;;  %v7632_v6 = vadd.f32 %v16675_v55, %v16674_v46  ;;  %v16680_v16 = vld [vmem:[#allocation175_spill] sm:$0xff]  ;;  %v16692_v46 = vld [vmem:[#allocation100_spill] sm:$0xff] }
 0x469   : > { %v7674_v53 = vpop.f32.mrf.mxu1  ;;  %v16684_v22 = vld [vmem:[#allocation187_spill] sm:$0xff]  ;;  %v16693_v55 = vld [vmem:[#allocation116_spill] sm:$0xff] }
 0x46a   : > { %v7675_v33 = vadd.f32 %v7674_v53, %v7673_v9  ;;  %v6895_v53 = vadd.f32 %v7620_v45, %v6798_v18  ;;  %v14685_v43 = vpop.f32.mrf.mxu0  ;;  %v16676_v45 = vld [vmem:[#allocation4_spill] sm:$0xff]  ;;  %v16687_v60 = vld [vmem:[#allocation67_spill] sm:$0xff] }
 0x46b   : > { %v7676_v10 = vpop.f32.mrf.mxu1  ;;  %v7571_v8 = vadd.f32 %v16677_v25, %v16676_v45  ;;  %v16696_v45 = vld [vmem:[#allocation198_spill] sm:$0xff] }
 0x46c   : > { %v6981_v29 = vadd.f32 %v7675_v33, %v6884_v37  ;;  %v6795_v37 = vadd.f32 %v7553_v17, %v6698_v51 }
 0x46d   : > { %v7677_v14 = vpop.f32.mrf.mxu1 }
 0x46e   : > { %v7043_v19 = vmax.f32 %v6981_v29, 0.0  ;;  %v7678_v52 = vadd.f32 %v7677_v14, %v7676_v10  ;;  %v6892_v56 = vadd.f32 %v7617_v59, %v6795_v37  ;;  %v6803_v10 = vadd.f32 %v7559_v0, %v6706_v31  ;;  %v14695_v29 = vpop.f32.mrf.mxu0  ;;  %v16681_v31 = vld [vmem:[#allocation139_spill] sm:$0xff] }
 0x46f   : > { %v7679_v36 = vpop.f32.mrf.mxu1  ;;  %v6903_v14 = vadd.f32 %v7626_v57, %v6806_v30  ;;  %v7635_v26 = vadd.f32 %v14647_v54, %v16681_v31  ;;  %v7638_v54 = vadd.f32 %v14666_v32, %v14654_v23  ;;  %v7641_v23 = vadd.f32 %v14685_v43, %v14675_v3 }
 0x470   : > { %7059 = vst [vmem:[%s14664_s10] sm:$0xff] %v7043_v19  ;;  %v6984_v11 = vadd.f32 %v7678_v52, %v6887_v39  ;;  %v6900_v47 = vadd.f32 %v7623_v21, %v6803_v10  ;;  %v7643_v59 = vpop.f32.mrf.mxu0  ;;  %v6811_v52 = vadd.f32 %v7565_v41, %v6714_v12  ;;  %v16683_v10 = vld [vmem:[#allocation99_spill] sm:$0xff] }
 0x471   : > { %v7680_v62 = vpop.f32.mrf.mxu1  ;;  %v7644_v3 = vadd.f32 %v7643_v59, %v14695_v29 }
 0x472   : > { %v7044_v2 = vmax.f32 %v6984_v11, 0.0  ;;  %v7681_v63 = vadd.f32 %v7680_v62, %v7679_v36  ;;  %v6908_v37 = vadd.f32 %v7629_v4, %v6811_v52  ;;  %v7645_v40 = vpop.f32.mrf.mxu0  ;;  %v16691_v52 = vld [vmem:[#allocation192_spill] sm:$0xff] }
 0x473   : > { %v7682_v9 = vpop.f32.mrf.mxu1 }
 0x474   : > { %7060 = vst [vmem:[%s14664_s10 + $0x8] sm:$0xff] %v7044_v2  ;;  %v6989_v49 = vadd.f32 %v7681_v63, %v6892_v56  ;;  %v6814_v56 = vadd.f32 %v7568_v42, %v6717_v38  ;;  %v6722_v63 = vadd.f32 %v7507_v7, %v16678_v35  ;;  %v7646_v21 = vpop.f32.mrf.mxu0 }
 0x475   : > { %v7683_v50 = vpop.f32.mrf.mxu1 }
 0x476   : > { %v7045_v13 = vmax.f32 %v6989_v49, 0.0  ;;  %v7684_v58 = vadd.f32 %v7683_v50, %v7682_v9  ;;  %v16679_v9 = vld [vmem:[#allocation173_spill] sm:$0xff]  ;;  %v6911_v49 = vadd.f32 %v7632_v6, %v6814_v56  ;;  %v7648_v41 = vpop.f32.mrf.mxu0  ;;  %v7580_v6 = vadd.f32 %v16693_v55, %v16692_v46  ;;  %v16695_v56 = vld [vmem:[#allocation195_spill] sm:$0xff] }
 0x477   : > { %v7685_v33 = vpop.f32.mrf.mxu1  ;;  %v7510_v18 = vadd.f32 %v16680_v16, %v16679_v9  ;;  %v7519_v25 = vadd.f32 %v16696_v45, %v16695_v56 }
 0x478   : > { %7061 = vst [vmem:[%s14664_s10 + $0x10] sm:$0xff] %v7045_v13  ;;  %v6992_v44 = vadd.f32 %v7684_v58, %v6895_v53  ;;  %v6819_v58 = vadd.f32 %v7571_v8, %v6722_v63  ;;  %v7649_v7 = vpop.f32.mrf.mxu0 }
 0x479   : > { %v7686_v27 = vpop.f32.mrf.mxu1  ;;  %v6725_v15 = vadd.f32 %v7510_v18, %v16684_v22  ;;  %v16697_v18 = vld [vmem:[#allocation26_spill] sm:$0xff] }
 0x47a   : > { %v7046_v24 = vmax.f32 %v6992_v44, 0.0  ;;  %v7687_v17 = vadd.f32 %v7686_v27, %v7685_v33  ;;  %v16682_v33 = vld [vmem:[#allocation199_spill] sm:$0xff]  ;;  %v7651_v63 = vpop.f32.mrf.mxu0 }
 0x47b   : > { %v7688_v51 = vpop.f32.mrf.mxu1  ;;  %v7574_v34 = vadd.f32 %v16683_v10, %v16682_v33  ;;  %v16685_v27 = vld [vmem:[#allocation179_spill] sm:$0xff] }
 0x47c   : > { %7062 = vst [vmem:[%s14664_s10 + $0x18] sm:$0xff] %v7046_v24  ;;  %v6997_v48 = vadd.f32 %v7687_v17, %v6900_v47  ;;  %v16686_v47 = vld [vmem:[#allocation180_spill] sm:$0xff]  ;;  %v6916_v17 = vadd.f32 %v7635_v26, %v6819_v58  ;;  %v16699_v26 = vld [vmem:[#allocation33_spill] sm:$0xff] }
 0x47d   : > { %v7689_v28 = vpop.f32.mrf.mxu1  ;;  %v7513_v57 = vadd.f32 %v16686_v47, %v16685_v27  ;;  %v6822_v12 = vadd.f32 %v7574_v34, %v6725_v15  ;;  %v7647_v34 = vadd.f32 %v7646_v21, %v7645_v40  ;;  %v16702_v27 = vld [vmem:[#allocation113_spill] sm:$0xff]  ;;  %v16703_v47 = vld [vmem:[#allocation115_spill] sm:$0xff] }
 0x47e   : > { %v7047_v1 = vmax.f32 %v6997_v48, 0.0  ;;  %v7690_v39 = vadd.f32 %v7689_v28, %v7688_v51  ;;  %v16688_v28 = vld [vmem:[#allocation114_spill] sm:$0xff] }
 0x47f   : > { %v7691_v19 = vpop.f32.mrf.mxu1  ;;  %v6919_v38 = vadd.f32 %v7638_v54, %v6822_v12 }
 0x480   : > { %7063 = vst [vmem:[%s14664_s10 + $0x20] sm:$0xff] %v7047_v1  ;;  %v7000_v5 = vadd.f32 %v7690_v39, %v6903_v14  ;;  %v7577_v14 = vadd.f32 %v16688_v28, %v16687_v60  ;;  %v16689_v1 = vld [vmem:[#allocation30_spill] sm:$0xff]  ;;  %v7650_v28 = vadd.f32 %v7649_v7, %v7648_v41 }
 0x481   : > { %v7692_v36 = vpop.f32.mrf.mxu1  ;;  %v6730_v39 = vadd.f32 %v7513_v57, %v16689_v1  ;;  %v7586_v57 = vadd.f32 %v16703_v47, %v16702_v27 }
 0x482   : > { %v7048_v11 = vmax.f32 %v7000_v5, 0.0  ;;  %v7693_v61 = vadd.f32 %v7692_v36, %v7691_v19  ;;  %v16690_v19 = vld [vmem:[#allocation197_spill] sm:$0xff] }
 0x483   : > { %v7694_v62 = vpop.f32.mrf.mxu1  ;;  %v7516_v42 = vadd.f32 %v16691_v52, %v16690_v19  ;;  %v16708_v19 = vld [vmem:[#allocation13_spill] sm:$0xff] }
 0x484   : > { %7064 = vst [vmem:[%s14664_s10 + $0x28] sm:$0xff] %v7048_v11  ;;  %v7005_v2 = vadd.f32 %v7693_v61, %v6908_v37  ;;  %v6827_v37 = vadd.f32 %v7577_v14, %v6730_v39  ;;  %v16694_v61 = vld [vmem:[#allocation190_spill] sm:$0xff] }
 0x485   : > { %v7695_v0 = vpop.f32.mrf.mxu1  ;;  %v16707_v39 = vld [vmem:[#allocation126_spill] sm:$0xff] }
 0x486   : > { %v7049_v50 = vmax.f32 %v7005_v2, 0.0  ;;  %v7696_v53 = vadd.f32 %v7695_v0, %v7694_v62  ;;  %v6733_v62 = vadd.f32 %v7516_v42, %v16694_v61  ;;  %v6924_v2 = vadd.f32 %v7641_v23, %v6827_v37  ;;  %v16698_v0 = vld [vmem:[#allocation17_spill] sm:$0xff] }
 0x487   : > { %v7697_v13 = vpop.f32.mrf.mxu1  ;;  %v7589_v52 = vadd.f32 %v16708_v19, %v16707_v39  ;;  %v16710_v23 = vld [vmem:[#allocation101_spill] sm:$0xff] }
 0x488   : > { %7065 = vst [vmem:[%s14664_s10 + $0x30] sm:$0xff] %v7049_v50  ;;  %v7008_v44 = vadd.f32 %v7696_v53, %v6911_v49  ;;  %v6830_v16 = vadd.f32 %v7580_v6, %v6733_v62  ;;  %v7583_v49 = vadd.f32 %v16698_v0, %v16697_v18  ;;  %v6738_v50 = vadd.f32 %v7519_v25, %v16699_v26  ;;  %v16700_v53 = vld [vmem:[#allocation97_spill] sm:$0xff]  ;;  %v16713_v62 = vld [vmem:[#allocation16_spill] sm:$0xff] }
 0x489   : > { %v7698_v24 = vpop.f32.mrf.mxu1  ;;  %v16712_v61 = vld [vmem:[#allocation129_spill] sm:$0xff] }
 0x48a   : > { %v7050_v51 = vmax.f32 %v7008_v44, 0.0  ;;  %v7699_v30 = vadd.f32 %v7698_v24, %v7697_v13  ;;  %v16701_v13 = vld [vmem:[#allocation184_spill] sm:$0xff]  ;;  %v6927_v10 = vadd.f32 %v7644_v3, %v6830_v16  ;;  %v7652_v44 = vpop.f32.mrf.mxu0  ;;  %v6835_v15 = vadd.f32 %v7583_v49, %v6738_v50  ;;  %v16714_v25 = vld [vmem:[#allocation193_spill] sm:$0xff] }
 0x48b   : > { %v7700_v48 = vpop.f32.mrf.mxu1  ;;  %v7522_v58 = vadd.f32 %v16701_v13, %v16700_v53  ;;  %v7653_v46 = vadd.f32 %v7652_v44, %v7651_v63  ;;  %v7592_v56 = vadd.f32 %v16713_v62, %v16712_v61 }
 0x48c   : > { %7066 = vst [vmem:[%s14664_s10 + $0x38] sm:$0xff] %v7050_v51  ;;  %v7013_v4 = vadd.f32 %v7699_v30, %v6916_v17  ;;  %v16704_v17 = vld [vmem:[#allocation194_spill] sm:$0xff]  ;;  %v16705_v51 = vld [vmem:[#allocation185_spill] sm:$0xff]  ;;  %v16706_v30 = vld [vmem:[#allocation24_spill] sm:$0xff]  ;;  %v6932_v60 = vadd.f32 %v7647_v34, %v6835_v15  ;;  %v7654_v14 = vpop.f32.mrf.mxu0 }
 0x48d   : > { %v7701_v5 = vpop.f32.mrf.mxu1  ;;  %v6741_v54 = vadd.f32 %v7522_v58, %v16704_v17 }
 0x48e   : > { %v7051_v32 = vmax.f32 %v7013_v4, 0.0  ;;  %v7702_v20 = vadd.f32 %v7701_v5, %v7700_v48  ;;  %v7525_v48 = vadd.f32 %v16706_v30, %v16705_v51  ;;  %v16709_v5 = vld [vmem:[#allocation188_spill] sm:$0xff]  ;;  %v7655_v55 = vpop.f32.mrf.mxu0 }
 0x48f   : > { %v7703_v36 = vpop.f32.mrf.mxu1  ;;  %v6838_v1 = vadd.f32 %v7586_v57, %v6741_v54 }
 0x490   : > { %7067 = vst [vmem:[%s14664_s10 + $0x40] sm:$0xff] %v7051_v32  ;;  %v7016_v11 = vadd.f32 %v7702_v20, %v6919_v38  ;;  %v6746_v38 = vadd.f32 %v7525_v48, %v16709_v5  ;;  %v16711_v32 = vld [vmem:[#allocation112_spill] sm:$0xff] }
 0x491   : > { %v7704_v8 = vpop.f32.mrf.mxu1  ;;  %v7528_v20 = vadd.f32 %v16711_v32, %v16710_v23  ;;  %v6935_v37 = vadd.f32 %v7650_v28, %v6838_v1 }
 0x492   : > { %v7052_v43 = vmax.f32 %v7016_v11, 0.0  ;;  %v7705_v35 = vadd.f32 %v7704_v8, %v7703_v36  ;;  %v6843_v11 = vadd.f32 %v7589_v52, %v6746_v38 }
 0x493   : > { %v7706_v9 = vpop.f32.mrf.mxu1  ;;  %v6749_v8 = vadd.f32 %v7528_v20, %v16714_v25 }
 0x494   : > { %7068 = vst [vmem:[%s14664_s10 + $0x48] sm:$0xff] %v7052_v43  ;;  %v7021_v31 = vadd.f32 %v7705_v35, %v6924_v2  ;;  %v6940_v3 = vadd.f32 %v7653_v46, %v6843_v11  ;;  %v7656_v43 = vadd.f32 %v7655_v55, %v7654_v14 }
 0x495   : > { %v7707_v33 = vpop.f32.mrf.mxu1  ;;  %v6846_v16 = vadd.f32 %v7592_v56, %v6749_v8 }
 0x496   : > { %v7053_v29 = vmax.f32 %v7021_v31, 0.0  ;;  %v7708_v59 = vadd.f32 %v7707_v33, %v7706_v9 }
 0x497   : > { %v7709_v22 = vpop.f32.mrf.mxu1  ;;  %v6943_v49 = vadd.f32 %v7656_v43, %v6846_v16 }
 0x498   : > { %7069 = vst [vmem:[%s14664_s10 + $0x50] sm:$0xff] %v7053_v29  ;;  %v7024_v24 = vadd.f32 %v7708_v59, %v6927_v10 }
 0x499   : > { %v7710_v12 = vpop.f32.mrf.mxu1 }
 0x49a   : > { %v7054_v40 = vmax.f32 %v7024_v24, 0.0  ;;  %v7711_v21 = vadd.f32 %v7710_v12, %v7709_v22 }
 0x49b   : > { %v7712_v4 = vpop.f32.mrf.mxu1 }
 0x49c   : > { %7070 = vst [vmem:[%s14664_s10 + $0x58] sm:$0xff] %v7054_v40  ;;  %v7029_v42 = vadd.f32 %v7711_v21, %v6932_v60 }
 0x49d   : > { %v7713_v36 = vpop.f32.mrf.mxu1 }
 0x49e   : > { %v7055_v41 = vmax.f32 %v7029_v42, 0.0  ;;  %v7714_v7 = vadd.f32 %v7713_v36, %v7712_v4 }
 0x49f   : > { %v7715_v6 = vpop.f32.mrf.mxu1 }
 0x4a0   : > { %7071 = vst [vmem:[%s14664_s10 + $0x60] sm:$0xff] %v7055_v41  ;;  %v7032_v45 = vadd.f32 %v7714_v7, %v6935_v37 }
 0x4a1   : > { %v7716_v2 = vpop.f32.mrf.mxu1 }
 0x4a2   : > { %v7056_v35 = vmax.f32 %v7032_v45, 0.0  ;;  %v7717_v63 = vadd.f32 %v7716_v2, %v7715_v6 }
 0x4a3   : > { %v7718_v9 = vpop.f32.mrf.mxu1 }
 0x4a4   : > { %7072 = vst [vmem:[%s14664_s10 + $0x68] sm:$0xff] %v7056_v35  ;;  %v7037_v18 = vadd.f32 %v7717_v63, %v6940_v3 }
 0x4a5   : > { %v7719_v0 = vpop.f32.mrf.mxu1 }
 0x4a6   : > { %v7057_v31 = vmax.f32 %v7037_v18, 0.0  ;;  %v7720_v26 = vadd.f32 %v7719_v0, %v7718_v9 }
 0x4a8   : > { %7073 = vst [vmem:[%s14664_s10 + $0x70] sm:$0xff] %v7057_v31  ;;  %v7040_v50 = vadd.f32 %v7720_v26, %v6943_v49 }
 0x4aa   : > { %v7058_v53 = vmax.f32 %v7040_v50, 0.0 }
 0x4ac   : > { %7074 = vst [vmem:[%s14664_s10 + $0x78] sm:$0xff] %v7058_v53 }
 0x4ad PF: > { %s17_s24 = sadd.s32 1, %s8076_s24  }
 0x4ae   : > { %p14_p5 = scmp.ge.s32.totalorder %s17_s24, 4  }
 0x4b0   :  { %16 = sbr.rel (!%p14_p5) target bundleno = 1 (0x1), region = 78 }

</bundles_post_ra>
